<compile_context>
chip_gen: v7x
topology: tpu7x:2x2x1
jax: 0.10.0
libtpu: 0.0.40
codegen_flags: <defaults>
</compile_context>

<pallas_src>
import functools

import jax
import jax.numpy as jnp
from jax import lax
from jax.experimental import pallas as pl
from jax.experimental.pallas import tpu as pltpu


C_IN = 5
C_OUT = 6
C_OUT_PAD = 8            # channel axis padded to one sublane group
KSZ = 7
PAD = 3
BN_EPS = 1e-5
CK2 = C_IN * KSZ * KSZ   # 245 -- (c, kh, kw) contraction depth
CK2_PAD = 256            # padded contraction depth (two full 128-lane groups)


def _round_up(x, m):
    return ((x + m - 1) // m) * m


# ---------------------------------------------------------------------------
# Pallas kernels
# ---------------------------------------------------------------------------
def _conv_kernel(xTT_ref, w_ref, b_ref, mask_ref, y_ref, s1_ref, s2_ref, *,
                 n_d, tm):
    """Direct conv (K-deep shifted matmul) + bias + ReLU + fused BN partial stats.

    xTT_ref:  (CK2_PAD, P_pad)  (c,kh,kw)-unfolded flat padded input, K-major
    w_ref:    (7, 8, CK2_PAD)   weights per kd tap, channel axis on sublanes
    b_ref:    (8, 1)            bias (padded channels zero)
    mask_ref: (1, HW128)        1.0 on valid (hy, hx) positions of a depth slice
    y_ref:    (8, MP)           relu(conv + bias), lane-dense
    s1_ref:   (8, 1)            per-channel masked sum(y)
    s2_ref:   (8, 1)            per-channel masked sum(y^2)
    """
    mask = mask_ref[...]                                    # (1, TM)
    bvec = b_ref[...]                                       # (8, 1)
    s1 = jnp.zeros((C_OUT_PAD, 1), jnp.float32)
    s2 = jnp.zeros((C_OUT_PAD, 1), jnp.float32)

    for blk in range(n_d):                                  # output depth slices
        acc = jnp.zeros((C_OUT_PAD, tm), jnp.float32)       # register accumulator
        for kd in range(KSZ):                               # statically unrolled taps
            # 128-aligned lane slice of the K-major unfolded input.
            xs = xTT_ref[:, (blk + kd) * tm:(blk + kd + 1) * tm]   # (256, TM)
            acc = acc + jnp.dot(w_ref[kd], xs,
                                preferred_element_type=jnp.float32)
        y = jnp.maximum(acc + bvec, 0.0)                    # (8, TM)
        y_ref[:, blk * tm:(blk + 1) * tm] = y               # lane-dense store

        ym = y * mask                                       # exclude garbage margins
        s1 = s1 + jnp.sum(ym, axis=1, keepdims=True)        # (8, 1)
        s2 = s2 + jnp.sum(ym * y, axis=1, keepdims=True)    # (8, 1) = sum(mask*y^2)

    s1_ref[...] = s1
    s2_ref[...] = s2


def _bn_tanh_kernel(y_ref, scale_ref, shift_ref, o_ref):
    # y_ref/o_ref: (8, MP) lane-dense; scale/shift: (8, 1) per channel.
    o_ref[...] = jnp.tanh(y_ref[...] * scale_ref[...] + shift_ref[...])


# ---------------------------------------------------------------------------
# Wrapper
# ---------------------------------------------------------------------------
@jax.jit
def model_tanh_forward(x, weight, bias):
    """x: [N, 5, D, H, W] f32.  weight: [6, 5, 7, 7, 7], bias: [6]."""
    n, c_in, d, h, w = x.shape
    assert c_in == C_IN

    dp, hp, wpp = d + 2 * PAD, h + 2 * PAD, w + 2 * PAD
    hw = hp * wpp                              # true flat stride of a depth slice
    hw128 = _round_up(hw, 128)                 # lane-aligned padded slice stride
    mp = d * hw128                             # flat output rows (incl. margins)
    p_pad = dp * hw128                         # flat input rows reachable by kd taps

    # ---- (c, kh, kw)-unfolded, K-major flat input:
    #      xTT[n, c*49 + kh*7 + kw, p] = xpad_flat[n, c, p + kh*wpp + kw]
    xp = jnp.pad(x, ((0, 0), (0, 0), (PAD, PAD), (PAD, PAD), (PAD, PAD)))
    xf = xp.reshape(n, C_IN, dp, hw)
    xf = jnp.pad(xf, ((0, 0), (0, 0), (0, 0), (0, hw128 - hw)))
    xf = xf.reshape(n, C_IN, p_pad)
    xf = jnp.pad(xf, ((0, 0), (0, 0), (0, (KSZ - 1) * wpp + KSZ)))
    shifts = [xf[:, :, kh * wpp + kw: kh * wpp + kw + p_pad]
              for kh in range(KSZ) for kw in range(KSZ)]
    xTT = jnp.stack(shifts, axis=2).reshape(n, CK2, p_pad)      # (n, 245, p_pad)
    xTT = jnp.pad(xTT, ((0, 0), (0, CK2_PAD - CK2), (0, 0)))    # (n, 256, p_pad)

    # ---- weights per kd tap, dense: w3[kd, co, c*49 + kh*7 + kw]
    w3 = jnp.transpose(weight, (2, 0, 1, 3, 4)).reshape(KSZ, C_OUT, CK2)
    w3 = jnp.pad(w3, ((0, 0), (0, C_OUT_PAD - C_OUT), (0, CK2_PAD - CK2)))
    b2 = jnp.pad(bias, (0, C_OUT_PAD - C_OUT)).reshape(C_OUT_PAD, 1)

    # ---- validity mask over one depth slice (same for every slice)
    r = jnp.arange(hw128)
    mask = (((r // wpp) < h) & ((r % wpp) < w)).astype(jnp.float32)
    mask = mask.reshape(1, hw128)

    # ---- conv + bias + relu + fused BN partial statistics ---------------------
    conv_kernel = functools.partial(_conv_kernel, n_d=d, tm=hw128)
    y, s1, s2 = pl.pallas_call(
        conv_kernel,
        out_shape=(
            jax.ShapeDtypeStruct((n, C_OUT_PAD, mp), jnp.float32),
            jax.ShapeDtypeStruct((n, C_OUT_PAD, 1), jnp.float32),
            jax.ShapeDtypeStruct((n, C_OUT_PAD, 1), jnp.float32),
        ),
        grid=(n,),
        in_specs=[
            pl.BlockSpec((None, CK2_PAD, p_pad), lambda i: (i, 0, 0)),
            pl.BlockSpec((KSZ, C_OUT_PAD, CK2_PAD), lambda i: (0, 0, 0)),
            pl.BlockSpec((C_OUT_PAD, 1), lambda i: (0, 0)),
            pl.BlockSpec((1, hw128), lambda i: (0, 0)),
        ],
        out_specs=(
            pl.BlockSpec((None, C_OUT_PAD, mp), lambda i: (i, 0, 0)),
            pl.BlockSpec((None, C_OUT_PAD, 1), lambda i: (i, 0, 0)),
            pl.BlockSpec((None, C_OUT_PAD, 1), lambda i: (i, 0, 0)),
        ),
        compiler_params=pltpu.CompilerParams(
            dimension_semantics=("parallel",)),
    )(xTT, w3, b2, mask)

    # ---- batch-norm scale/shift from fused partial sums -----------------------
    cnt = float(n * d * h * w)                  # valid positions only
    tot = jnp.sum(s1[:, :, 0], axis=0)          # (8,)
    tot2 = jnp.sum(s2[:, :, 0], axis=0)         # (8,)
    mean = tot / cnt
    var = jnp.maximum(tot2 / cnt - mean * mean, 0.0)   # biased var, as PyTorch
    inv_std = lax.rsqrt(var + BN_EPS)
    scale = inv_std.reshape(C_OUT_PAD, 1)               # gamma = 1
    shift = (-mean * inv_std).reshape(C_OUT_PAD, 1)     # beta = 0

    # ---- BN + tanh, lane-dense on [C_out_pad, M] (no relayout needed) ---------
    out_flat = pl.pallas_call(
        _bn_tanh_kernel,
        out_shape=jax.ShapeDtypeStruct((n, C_OUT_PAD, mp), jnp.float32),
        grid=(n,),
        in_specs=[
            pl.BlockSpec((None, C_OUT_PAD, mp), lambda i: (i, 0, 0)),
            pl.BlockSpec((C_OUT_PAD, 1), lambda i: (0, 0)),
            pl.BlockSpec((C_OUT_PAD, 1), lambda i: (0, 0)),
        ],
        out_specs=pl.BlockSpec((None, C_OUT_PAD, mp), lambda i: (i, 0, 0)),
        compiler_params=pltpu.CompilerParams(
            dimension_semantics=("parallel",)),
    )(y, scale, shift)

    # [N, 8, MP] -> [N, 6, D, Hp, Wp] -> trim margins: NCDHW with no transpose.
    out = out_flat.reshape(n, C_OUT_PAD, d, hw128)[:, :C_OUT, :, :hw]
    out = out.reshape(n, C_OUT, d, hp, wpp)[:, :, :, :h, :w]
    return out


# ---------------------------------------------------------------------------
# Pure-JAX reference
# ---------------------------------------------------------------------------
def reference_forward(x, weight, bias):
    y = lax.conv_general_dilated(
        x, weight,
        window_strides=(1, 1, 1),
        padding=[(PAD, PAD)] * 3,
        dimension_numbers=("NCDHW", "OIDHW", "NCDHW"),
    ) + bias.reshape(1, C_OUT, 1, 1, 1)
    y = jnp.maximum(y, 0.0)
    mean = jnp.mean(y, axis=(0, 2, 3, 4), keepdims=True)
    var = jnp.mean(jnp.square(y - mean), axis=(0, 2, 3, 4), keepdims=True)
    y = (y - mean) * lax.rsqrt(var + BN_EPS)
    return jnp.tanh(y)


if __name__ == "__main__":
    key = jax.random.PRNGKey(0)
    kx, kw_, kb = jax.random.split(key, 3)

    N, D, H, W = 2, 8, 8, 8
    x = jax.random.normal(kx, (N, C_IN, D, H, W), dtype=jnp.float32)

    fan_in = C_IN * KSZ ** 3
    bound = 1.0 / (fan_in ** 0.5)
    weight = jax.random.uniform(kw_, (C_OUT, C_IN, KSZ, KSZ, KSZ),
                                minval=-bound, maxval=bound, dtype=jnp.float32)
    bias = jax.random.uniform(kb, (C_OUT,), minval=-bound, maxval=bound,
                              dtype=jnp.float32)

    out = jax.block_until_ready(model_tanh_forward(x, weight, bias))
    ref = reference_forward(x, weight, bias)

    assert out.shape == (N, C_OUT, D, H, W), out.shape
    max_err = float(jnp.max(jnp.abs(out - ref)))
    assert jnp.allclose(out, ref, atol=1e-4, rtol=1e-4), max_err

    print("KERNEL_OK")
</pallas_src>

<mosaic_0001>
module attributes {stable_mosaic.version = 11 : i64} {
  func.func @_conv_kernel(%arg0: i32, %arg1: memref<1x256x3584xf32, #tpu.memory_space<vmem>>, %arg2: memref<7x8x256xf32, #tpu.memory_space<vmem>>, %arg3: memref<8x1xf32, #tpu.memory_space<vmem>>, %arg4: memref<1x256xf32, #tpu.memory_space<vmem>>, %arg5: memref<1x8x2048xf32, #tpu.memory_space<vmem>>, %arg6: memref<1x8x1xf32, #tpu.memory_space<vmem>>, %arg7: memref<1x8x1xf32, #tpu.memory_space<vmem>>) attributes {dimension_semantics = [#tpu.dimension_semantics<parallel>], iteration_bounds = array<i64: 2>, scalar_prefetch = 0 : i64, scratch_operands = 0 : i64, tpu.core_type = #tpu.core_type<tc>, window_params = [{transform_indices = @transform_0, window_bounds = array<i64: 1, 256, 3584>}, {pipeline_mode = #tpu.pipeline_mode<synchronous>, transform_indices = @transform_1, window_bounds = array<i64: 7, 8, 256>}, {pipeline_mode = #tpu.pipeline_mode<synchronous>, transform_indices = @transform_2, window_bounds = array<i64: 8, 1>}, {pipeline_mode = #tpu.pipeline_mode<synchronous>, transform_indices = @transform_3, window_bounds = array<i64: 1, 256>}, {transform_indices = @transform_4, window_bounds = array<i64: 1, 8, 2048>}, {transform_indices = @transform_5, window_bounds = array<i64: 1, 8, 1>}, {transform_indices = @transform_6, window_bounds = array<i64: 1, 8, 1>}]} {
    %c0 = arith.constant 0 : index
    %c0_0 = arith.constant 0 : index
    %0 = vector.load %arg4[%c0, %c0_0] : memref<1x256xf32, #tpu.memory_space<vmem>>, vector<1x256xf32>
    %c0_1 = arith.constant 0 : index
    %c0_2 = arith.constant 0 : index
    %1 = vector.load %arg3[%c0_1, %c0_2] : memref<8x1xf32, #tpu.memory_space<vmem>>, vector<8x1xf32>
    %cst = arith.constant 0.000000e+00 : f32
    %2 = vector.broadcast %cst : f32 to vector<8x1xf32>
    %cst_3 = arith.constant 0.000000e+00 : f32
    %3 = vector.broadcast %cst_3 : f32 to vector<8x1xf32>
    %cst_4 = arith.constant 0.000000e+00 : f32
    %4 = vector.broadcast %cst_4 : f32 to vector<8x256xf32>
    %c0_5 = arith.constant 0 : index
    %c0_6 = arith.constant 0 : index
    %c0_7 = arith.constant 0 : index
    %5 = vector.load %arg1[%c0_5, %c0_6, %c0_7] : memref<1x256x3584xf32, #tpu.memory_space<vmem>>, vector<1x256x256xf32>
    %6 = vector.shape_cast %5 : vector<1x256x256xf32> to vector<256x256xf32>
    %c0_8 = arith.constant 0 : index
    %c0_9 = arith.constant 0 : index
    %c0_10 = arith.constant 0 : index
    %7 = vector.load %arg2[%c0_8, %c0_9, %c0_10] : memref<7x8x256xf32, #tpu.memory_space<vmem>>, vector<1x8x256xf32>
    %8 = vector.shape_cast %7 : vector<1x8x256xf32> to vector<8x256xf32>
    %cst_11 = arith.constant dense<0.000000e+00> : vector<8x256xf32>
    %9 = tpu.matmul %8, %6, %cst_11 {dimension_numbers = #tpu.dot_dimension_numbers<[1], [0], [0], [1], [0, 0, 1, 1], [], []>} : vector<8x256xf32>, vector<256x256xf32>, vector<8x256xf32> -> vector<8x256xf32>
    %10 = arith.addf %4, %9 : vector<8x256xf32>
    %c0_12 = arith.constant 0 : index
    %c0_13 = arith.constant 0 : index
    %c256 = arith.constant 256 : index
    %11 = vector.load %arg1[%c0_12, %c0_13, %c256] : memref<1x256x3584xf32, #tpu.memory_space<vmem>>, vector<1x256x256xf32>
    %12 = vector.shape_cast %11 : vector<1x256x256xf32> to vector<256x256xf32>
    %c1 = arith.constant 1 : index
    %c0_14 = arith.constant 0 : index
    %c0_15 = arith.constant 0 : index
    %13 = vector.load %arg2[%c1, %c0_14, %c0_15] : memref<7x8x256xf32, #tpu.memory_space<vmem>>, vector<1x8x256xf32>
    %14 = vector.shape_cast %13 : vector<1x8x256xf32> to vector<8x256xf32>
    %cst_16 = arith.constant dense<0.000000e+00> : vector<8x256xf32>
    %15 = tpu.matmul %14, %12, %cst_16 {dimension_numbers = #tpu.dot_dimension_numbers<[1], [0], [0], [1], [0, 0, 1, 1], [], []>} : vector<8x256xf32>, vector<256x256xf32>, vector<8x256xf32> -> vector<8x256xf32>
    %16 = arith.addf %10, %15 : vector<8x256xf32>
    %c0_17 = arith.constant 0 : index
    %c0_18 = arith.constant 0 : index
    %c512 = arith.constant 512 : index
    %17 = vector.load %arg1[%c0_17, %c0_18, %c512] : memref<1x256x3584xf32, #tpu.memory_space<vmem>>, vector<1x256x256xf32>
    %18 = vector.shape_cast %17 : vector<1x256x256xf32> to vector<256x256xf32>
    %c2 = arith.constant 2 : index
    %c0_19 = arith.constant 0 : index
    %c0_20 = arith.constant 0 : index
    %19 = vector.load %arg2[%c2, %c0_19, %c0_20] : memref<7x8x256xf32, #tpu.memory_space<vmem>>, vector<1x8x256xf32>
    %20 = vector.shape_cast %19 : vector<1x8x256xf32> to vector<8x256xf32>
    %cst_21 = arith.constant dense<0.000000e+00> : vector<8x256xf32>
    %21 = tpu.matmul %20, %18, %cst_21 {dimension_numbers = #tpu.dot_dimension_numbers<[1], [0], [0], [1], [0, 0, 1, 1], [], []>} : vector<8x256xf32>, vector<256x256xf32>, vector<8x256xf32> -> vector<8x256xf32>
    %22 = arith.addf %16, %21 : vector<8x256xf32>
    %c0_22 = arith.constant 0 : index
    %c0_23 = arith.constant 0 : index
    %c768 = arith.constant 768 : index
    %23 = vector.load %arg1[%c0_22, %c0_23, %c768] : memref<1x256x3584xf32, #tpu.memory_space<vmem>>, vector<1x256x256xf32>
    %24 = vector.shape_cast %23 : vector<1x256x256xf32> to vector<256x256xf32>
    %c3 = arith.constant 3 : index
    %c0_24 = arith.constant 0 : index
    %c0_25 = arith.constant 0 : index
    %25 = vector.load %arg2[%c3, %c0_24, %c0_25] : memref<7x8x256xf32, #tpu.memory_space<vmem>>, vector<1x8x256xf32>
    %26 = vector.shape_cast %25 : vector<1x8x256xf32> to vector<8x256xf32>
    %cst_26 = arith.constant dense<0.000000e+00> : vector<8x256xf32>
    %27 = tpu.matmul %26, %24, %cst_26 {dimension_numbers = #tpu.dot_dimension_numbers<[1], [0], [0], [1], [0, 0, 1, 1], [], []>} : vector<8x256xf32>, vector<256x256xf32>, vector<8x256xf32> -> vector<8x256xf32>
    %28 = arith.addf %22, %27 : vector<8x256xf32>
    %c0_27 = arith.constant 0 : index
    %c0_28 = arith.constant 0 : index
    %c1024 = arith.constant 1024 : index
    %29 = vector.load %arg1[%c0_27, %c0_28, %c1024] : memref<1x256x3584xf32, #tpu.memory_space<vmem>>, vector<1x256x256xf32>
    %30 = vector.shape_cast %29 : vector<1x256x256xf32> to vector<256x256xf32>
    %c4 = arith.constant 4 : index
    %c0_29 = arith.constant 0 : index
    %c0_30 = arith.constant 0 : index
    %31 = vector.load %arg2[%c4, %c0_29, %c0_30] : memref<7x8x256xf32, #tpu.memory_space<vmem>>, vector<1x8x256xf32>
    %32 = vector.shape_cast %31 : vector<1x8x256xf32> to vector<8x256xf32>
    %cst_31 = arith.constant dense<0.000000e+00> : vector<8x256xf32>
    %33 = tpu.matmul %32, %30, %cst_31 {dimension_numbers = #tpu.dot_dimension_numbers<[1], [0], [0], [1], [0, 0, 1, 1], [], []>} : vector<8x256xf32>, vector<256x256xf32>, vector<8x256xf32> -> vector<8x256xf32>
    %34 = arith.addf %28, %33 : vector<8x256xf32>
    %c0_32 = arith.constant 0 : index
    %c0_33 = arith.constant 0 : index
    %c1280 = arith.constant 1280 : index
    %35 = vector.load %arg1[%c0_32, %c0_33, %c1280] : memref<1x256x3584xf32, #tpu.memory_space<vmem>>, vector<1x256x256xf32>
    %36 = vector.shape_cast %35 : vector<1x256x256xf32> to vector<256x256xf32>
    %c5 = arith.constant 5 : index
    %c0_34 = arith.constant 0 : index
    %c0_35 = arith.constant 0 : index
    %37 = vector.load %arg2[%c5, %c0_34, %c0_35] : memref<7x8x256xf32, #tpu.memory_space<vmem>>, vector<1x8x256xf32>
    %38 = vector.shape_cast %37 : vector<1x8x256xf32> to vector<8x256xf32>
    %cst_36 = arith.constant dense<0.000000e+00> : vector<8x256xf32>
    %39 = tpu.matmul %38, %36, %cst_36 {dimension_numbers = #tpu.dot_dimension_numbers<[1], [0], [0], [1], [0, 0, 1, 1], [], []>} : vector<8x256xf32>, vector<256x256xf32>, vector<8x256xf32> -> vector<8x256xf32>
    %40 = arith.addf %34, %39 : vector<8x256xf32>
    %c0_37 = arith.constant 0 : index
    %c0_38 = arith.constant 0 : index
    %c1536 = arith.constant 1536 : index
    %41 = vector.load %arg1[%c0_37, %c0_38, %c1536] : memref<1x256x3584xf32, #tpu.memory_space<vmem>>, vector<1x256x256xf32>
    %42 = vector.shape_cast %41 : vector<1x256x256xf32> to vector<256x256xf32>
    %c6 = arith.constant 6 : index
    %c0_39 = arith.constant 0 : index
    %c0_40 = arith.constant 0 : index
    %43 = vector.load %arg2[%c6, %c0_39, %c0_40] : memref<7x8x256xf32, #tpu.memory_space<vmem>>, vector<1x8x256xf32>
    %44 = vector.shape_cast %43 : vector<1x8x256xf32> to vector<8x256xf32>
    %cst_41 = arith.constant dense<0.000000e+00> : vector<8x256xf32>
    %45 = tpu.matmul %44, %42, %cst_41 {dimension_numbers = #tpu.dot_dimension_numbers<[1], [0], [0], [1], [0, 0, 1, 1], [], []>} : vector<8x256xf32>, vector<256x256xf32>, vector<8x256xf32> -> vector<8x256xf32>
    %46 = arith.addf %40, %45 : vector<8x256xf32>
    %47 = vector.broadcast %1 : vector<8x1xf32> to vector<8x256xf32>
    %48 = arith.addf %46, %47 : vector<8x256xf32>
    %cst_42 = arith.constant 0.000000e+00 : f32
    %49 = vector.broadcast %cst_42 : f32 to vector<8x256xf32>
    %50 = arith.maximumf %48, %49 : vector<8x256xf32>
    %c0_43 = arith.constant 0 : index
    %c0_44 = arith.constant 0 : index
    %c0_45 = arith.constant 0 : index
    %51 = vector.load %arg5[%c0_43, %c0_44, %c0_45] : memref<1x8x2048xf32, #tpu.memory_space<vmem>>, vector<1x8x256xf32>
    %52 = vector.shape_cast %51 : vector<1x8x256xf32> to vector<8x256xf32>
    %53 = vector.shape_cast %50 : vector<8x256xf32> to vector<1x8x256xf32>
    tpu.vector_store %arg5[%c0_43, %c0_44, %c0_45], %53 {strides = array<i32>} : memref<1x8x2048xf32, #tpu.memory_space<vmem>>, vector<1x8x256xf32>,
    %54 = vector.broadcast %0 : vector<1x256xf32> to vector<8x256xf32>
    %55 = arith.mulf %50, %54 : vector<8x256xf32>
    %cst_46 = arith.constant dense<0.000000e+00> : vector<8xf32>
    %56 = vector.multi_reduction <add>, %55, %cst_46 [1] : vector<8x256xf32> to vector<8xf32>
    %57 = vector.shape_cast %56 : vector<8xf32> to vector<8x1xf32>
    %58 = arith.addf %2, %57 : vector<8x1xf32>
    %59 = arith.mulf %55, %50 : vector<8x256xf32>
    %cst_47 = arith.constant dense<0.000000e+00> : vector<8xf32>
    %60 = vector.multi_reduction <add>, %59, %cst_47 [1] : vector<8x256xf32> to vector<8xf32>
    %61 = vector.shape_cast %60 : vector<8xf32> to vector<8x1xf32>
    %62 = arith.addf %3, %61 : vector<8x1xf32>
    %cst_48 = arith.constant 0.000000e+00 : f32
    %63 = vector.broadcast %cst_48 : f32 to vector<8x256xf32>
    %c0_49 = arith.constant 0 : index
    %c0_50 = arith.constant 0 : index
    %c256_51 = arith.constant 256 : index
    %64 = vector.load %arg1[%c0_49, %c0_50, %c256_51] : memref<1x256x3584xf32, #tpu.memory_space<vmem>>, vector<1x256x256xf32>
    %65 = vector.shape_cast %64 : vector<1x256x256xf32> to vector<256x256xf32>
    %c0_52 = arith.constant 0 : index
    %c0_53 = arith.constant 0 : index
    %c0_54 = arith.constant 0 : index
    %66 = vector.load %arg2[%c0_52, %c0_53, %c0_54] : memref<7x8x256xf32, #tpu.memory_space<vmem>>, vector<1x8x256xf32>
    %67 = vector.shape_cast %66 : vector<1x8x256xf32> to vector<8x256xf32>
    %cst_55 = arith.constant dense<0.000000e+00> : vector<8x256xf32>
    %68 = tpu.matmul %67, %65, %cst_55 {dimension_numbers = #tpu.dot_dimension_numbers<[1], [0], [0], [1], [0, 0, 1, 1], [], []>} : vector<8x256xf32>, vector<256x256xf32>, vector<8x256xf32> -> vector<8x256xf32>
    %69 = arith.addf %63, %68 : vector<8x256xf32>
    %c0_56 = arith.constant 0 : index
    %c0_57 = arith.constant 0 : index
    %c512_58 = arith.constant 512 : index
    %70 = vector.load %arg1[%c0_56, %c0_57, %c512_58] : memref<1x256x3584xf32, #tpu.memory_space<vmem>>, vector<1x256x256xf32>
    %71 = vector.shape_cast %70 : vector<1x256x256xf32> to vector<256x256xf32>
    %c1_59 = arith.constant 1 : index
    %c0_60 = arith.constant 0 : index
    %c0_61 = arith.constant 0 : index
    %72 = vector.load %arg2[%c1_59, %c0_60, %c0_61] : memref<7x8x256xf32, #tpu.memory_space<vmem>>, vector<1x8x256xf32>
    %73 = vector.shape_cast %72 : vector<1x8x256xf32> to vector<8x256xf32>
    %cst_62 = arith.constant dense<0.000000e+00> : vector<8x256xf32>
    %74 = tpu.matmul %73, %71, %cst_62 {dimension_numbers = #tpu.dot_dimension_numbers<[1], [0], [0], [1], [0, 0, 1, 1], [], []>} : vector<8x256xf32>, vector<256x256xf32>, vector<8x256xf32> -> vector<8x256xf32>
    %75 = arith.addf %69, %74 : vector<8x256xf32>
    %c0_63 = arith.constant 0 : index
    %c0_64 = arith.constant 0 : index
    %c768_65 = arith.constant 768 : index
    %76 = vector.load %arg1[%c0_63, %c0_64, %c768_65] : memref<1x256x3584xf32, #tpu.memory_space<vmem>>, vector<1x256x256xf32>
    %77 = vector.shape_cast %76 : vector<1x256x256xf32> to vector<256x256xf32>
    %c2_66 = arith.constant 2 : index
    %c0_67 = arith.constant 0 : index
    %c0_68 = arith.constant 0 : index
    %78 = vector.load %arg2[%c2_66, %c0_67, %c0_68] : memref<7x8x256xf32, #tpu.memory_space<vmem>>, vector<1x8x256xf32>
    %79 = vector.shape_cast %78 : vector<1x8x256xf32> to vector<8x256xf32>
    %cst_69 = arith.constant dense<0.000000e+00> : vector<8x256xf32>
    %80 = tpu.matmul %79, %77, %cst_69 {dimension_numbers = #tpu.dot_dimension_numbers<[1], [0], [0], [1], [0, 0, 1, 1], [], []>} : vector<8x256xf32>, vector<256x256xf32>, vector<8x256xf32> -> vector<8x256xf32>
    %81 = arith.addf %75, %80 : vector<8x256xf32>
    %c0_70 = arith.constant 0 : index
    %c0_71 = arith.constant 0 : index
    %c1024_72 = arith.constant 1024 : index
    %82 = vector.load %arg1[%c0_70, %c0_71, %c1024_72] : memref<1x256x3584xf32, #tpu.memory_space<vmem>>, vector<1x256x256xf32>
    %83 = vector.shape_cast %82 : vector<1x256x256xf32> to vector<256x256xf32>
    %c3_73 = arith.constant 3 : index
    %c0_74 = arith.constant 0 : index
    %c0_75 = arith.constant 0 : index
    %84 = vector.load %arg2[%c3_73, %c0_74, %c0_75] : memref<7x8x256xf32, #tpu.memory_space<vmem>>, vector<1x8x256xf32>
    %85 = vector.shape_cast %84 : vector<1x8x256xf32> to vector<8x256xf32>
    %cst_76 = arith.constant dense<0.000000e+00> : vector<8x256xf32>
    %86 = tpu.matmul %85, %83, %cst_76 {dimension_numbers = #tpu.dot_dimension_numbers<[1], [0], [0], [1], [0, 0, 1, 1], [], []>} : vector<8x256xf32>, vector<256x256xf32>, vector<8x256xf32> -> vector<8x256xf32>
    %87 = arith.addf %81, %86 : vector<8x256xf32>
    %c0_77 = arith.constant 0 : index
    %c0_78 = arith.constant 0 : index
    %c1280_79 = arith.constant 1280 : index
    %88 = vector.load %arg1[%c0_77, %c0_78, %c1280_79] : memref<1x256x3584xf32, #tpu.memory_space<vmem>>, vector<1x256x256xf32>
    %89 = vector.shape_cast %88 : vector<1x256x256xf32> to vector<256x256xf32>
    %c4_80 = arith.constant 4 : index
    %c0_81 = arith.constant 0 : index
    %c0_82 = arith.constant 0 : index
    %90 = vector.load %arg2[%c4_80, %c0_81, %c0_82] : memref<7x8x256xf32, #tpu.memory_space<vmem>>, vector<1x8x256xf32>
    %91 = vector.shape_cast %90 : vector<1x8x256xf32> to vector<8x256xf32>
    %cst_83 = arith.constant dense<0.000000e+00> : vector<8x256xf32>
    %92 = tpu.matmul %91, %89, %cst_83 {dimension_numbers = #tpu.dot_dimension_numbers<[1], [0], [0], [1], [0, 0, 1, 1], [], []>} : vector<8x256xf32>, vector<256x256xf32>, vector<8x256xf32> -> vector<8x256xf32>
    %93 = arith.addf %87, %92 : vector<8x256xf32>
    %c0_84 = arith.constant 0 : index
    %c0_85 = arith.constant 0 : index
    %c1536_86 = arith.constant 1536 : index
    %94 = vector.load %arg1[%c0_84, %c0_85, %c1536_86] : memref<1x256x3584xf32, #tpu.memory_space<vmem>>, vector<1x256x256xf32>
    %95 = vector.shape_cast %94 : vector<1x256x256xf32> to vector<256x256xf32>
    %c5_87 = arith.constant 5 : index
    %c0_88 = arith.constant 0 : index
    %c0_89 = arith.constant 0 : index
    %96 = vector.load %arg2[%c5_87, %c0_88, %c0_89] : memref<7x8x256xf32, #tpu.memory_space<vmem>>, vector<1x8x256xf32>
    %97 = vector.shape_cast %96 : vector<1x8x256xf32> to vector<8x256xf32>
    %cst_90 = arith.constant dense<0.000000e+00> : vector<8x256xf32>
    %98 = tpu.matmul %97, %95, %cst_90 {dimension_numbers = #tpu.dot_dimension_numbers<[1], [0], [0], [1], [0, 0, 1, 1], [], []>} : vector<8x256xf32>, vector<256x256xf32>, vector<8x256xf32> -> vector<8x256xf32>
    %99 = arith.addf %93, %98 : vector<8x256xf32>
    %c0_91 = arith.constant 0 : index
    %c0_92 = arith.constant 0 : index
    %c1792 = arith.constant 1792 : index
    %100 = vector.load %arg1[%c0_91, %c0_92, %c1792] : memref<1x256x3584xf32, #tpu.memory_space<vmem>>, vector<1x256x256xf32>
    %101 = vector.shape_cast %100 : vector<1x256x256xf32> to vector<256x256xf32>
    %c6_93 = arith.constant 6 : index
    %c0_94 = arith.constant 0 : index
    %c0_95 = arith.constant 0 : index
    %102 = vector.load %arg2[%c6_93, %c0_94, %c0_95] : memref<7x8x256xf32, #tpu.memory_space<vmem>>, vector<1x8x256xf32>
    %103 = vector.shape_cast %102 : vector<1x8x256xf32> to vector<8x256xf32>
    %cst_96 = arith.constant dense<0.000000e+00> : vector<8x256xf32>
    %104 = tpu.matmul %103, %101, %cst_96 {dimension_numbers = #tpu.dot_dimension_numbers<[1], [0], [0], [1], [0, 0, 1, 1], [], []>} : vector<8x256xf32>, vector<256x256xf32>, vector<8x256xf32> -> vector<8x256xf32>
    %105 = arith.addf %99, %104 : vector<8x256xf32>
    %106 = vector.broadcast %1 : vector<8x1xf32> to vector<8x256xf32>
    %107 = arith.addf %105, %106 : vector<8x256xf32>
    %cst_97 = arith.constant 0.000000e+00 : f32
    %108 = vector.broadcast %cst_97 : f32 to vector<8x256xf32>
    %109 = arith.maximumf %107, %108 : vector<8x256xf32>
    %c0_98 = arith.constant 0 : index
    %c0_99 = arith.constant 0 : index
    %c256_100 = arith.constant 256 : index
    %110 = vector.load %arg5[%c0_98, %c0_99, %c256_100] : memref<1x8x2048xf32, #tpu.memory_space<vmem>>, vector<1x8x256xf32>
    %111 = vector.shape_cast %110 : vector<1x8x256xf32> to vector<8x256xf32>
    %112 = vector.shape_cast %109 : vector<8x256xf32> to vector<1x8x256xf32>
    tpu.vector_store %arg5[%c0_98, %c0_99, %c256_100], %112 {strides = array<i32>} : memref<1x8x2048xf32, #tpu.memory_space<vmem>>, vector<1x8x256xf32>,
    %113 = vector.broadcast %0 : vector<1x256xf32> to vector<8x256xf32>
    %114 = arith.mulf %109, %113 : vector<8x256xf32>
    %cst_101 = arith.constant dense<0.000000e+00> : vector<8xf32>
    %115 = vector.multi_reduction <add>, %114, %cst_101 [1] : vector<8x256xf32> to vector<8xf32>
    %116 = vector.shape_cast %115 : vector<8xf32> to vector<8x1xf32>
    %117 = arith.addf %58, %116 : vector<8x1xf32>
    %118 = arith.mulf %114, %109 : vector<8x256xf32>
    %cst_102 = arith.constant dense<0.000000e+00> : vector<8xf32>
    %119 = vector.multi_reduction <add>, %118, %cst_102 [1] : vector<8x256xf32> to vector<8xf32>
    %120 = vector.shape_cast %119 : vector<8xf32> to vector<8x1xf32>
    %121 = arith.addf %62, %120 : vector<8x1xf32>
    %cst_103 = arith.constant 0.000000e+00 : f32
    %122 = vector.broadcast %cst_103 : f32 to vector<8x256xf32>
    %c0_104 = arith.constant 0 : index
    %c0_105 = arith.constant 0 : index
    %c512_106 = arith.constant 512 : index
    %123 = vector.load %arg1[%c0_104, %c0_105, %c512_106] : memref<1x256x3584xf32, #tpu.memory_space<vmem>>, vector<1x256x256xf32>
    %124 = vector.shape_cast %123 : vector<1x256x256xf32> to vector<256x256xf32>
    %c0_107 = arith.constant 0 : index
    %c0_108 = arith.constant 0 : index
    %c0_109 = arith.constant 0 : index
    %125 = vector.load %arg2[%c0_107, %c0_108, %c0_109] : memref<7x8x256xf32, #tpu.memory_space<vmem>>, vector<1x8x256xf32>
    %126 = vector.shape_cast %125 : vector<1x8x256xf32> to vector<8x256xf32>
    %cst_110 = arith.constant dense<0.000000e+00> : vector<8x256xf32>
    %127 = tpu.matmul %126, %124, %cst_110 {dimension_numbers = #tpu.dot_dimension_numbers<[1], [0], [0], [1], [0, 0, 1, 1], [], []>} : vector<8x256xf32>, vector<256x256xf32>, vector<8x256xf32> -> vector<8x256xf32>
    %128 = arith.addf %122, %127 : vector<8x256xf32>
    %c0_111 = arith.constant 0 : index
    %c0_112 = arith.constant 0 : index
    %c768_113 = arith.constant 768 : index
    %129 = vector.load %arg1[%c0_111, %c0_112, %c768_113] : memref<1x256x3584xf32, #tpu.memory_space<vmem>>, vector<1x256x256xf32>
    %130 = vector.shape_cast %129 : vector<1x256x256xf32> to vector<256x256xf32>
    %c1_114 = arith.constant 1 : index
    %c0_115 = arith.constant 0 : index
    %c0_116 = arith.constant 0 : index
    %131 = vector.load %arg2[%c1_114, %c0_115, %c0_116] : memref<7x8x256xf32, #tpu.memory_space<vmem>>, vector<1x8x256xf32>
    %132 = vector.shape_cast %131 : vector<1x8x256xf32> to vector<8x256xf32>
    %cst_117 = arith.constant dense<0.000000e+00> : vector<8x256xf32>
    %133 = tpu.matmul %132, %130, %cst_117 {dimension_numbers = #tpu.dot_dimension_numbers<[1], [0], [0], [1], [0, 0, 1, 1], [], []>} : vector<8x256xf32>, vector<256x256xf32>, vector<8x256xf32> -> vector<8x256xf32>
    %134 = arith.addf %128, %133 : vector<8x256xf32>
    %c0_118 = arith.constant 0 : index
    %c0_119 = arith.constant 0 : index
    %c1024_120 = arith.constant 1024 : index
    %135 = vector.load %arg1[%c0_118, %c0_119, %c1024_120] : memref<1x256x3584xf32, #tpu.memory_space<vmem>>, vector<1x256x256xf32>
    %136 = vector.shape_cast %135 : vector<1x256x256xf32> to vector<256x256xf32>
    %c2_121 = arith.constant 2 : index
    %c0_122 = arith.constant 0 : index
    %c0_123 = arith.constant 0 : index
    %137 = vector.load %arg2[%c2_121, %c0_122, %c0_123] : memref<7x8x256xf32, #tpu.memory_space<vmem>>, vector<1x8x256xf32>
    %138 = vector.shape_cast %137 : vector<1x8x256xf32> to vector<8x256xf32>
    %cst_124 = arith.constant dense<0.000000e+00> : vector<8x256xf32>
    %139 = tpu.matmul %138, %136, %cst_124 {dimension_numbers = #tpu.dot_dimension_numbers<[1], [0], [0], [1], [0, 0, 1, 1], [], []>} : vector<8x256xf32>, vector<256x256xf32>, vector<8x256xf32> -> vector<8x256xf32>
    %140 = arith.addf %134, %139 : vector<8x256xf32>
    %c0_125 = arith.constant 0 : index
    %c0_126 = arith.constant 0 : index
    %c1280_127 = arith.constant 1280 : index
    %141 = vector.load %arg1[%c0_125, %c0_126, %c1280_127] : memref<1x256x3584xf32, #tpu.memory_space<vmem>>, vector<1x256x256xf32>
    %142 = vector.shape_cast %141 : vector<1x256x256xf32> to vector<256x256xf32>
    %c3_128 = arith.constant 3 : index
    %c0_129 = arith.constant 0 : index
    %c0_130 = arith.constant 0 : index
    %143 = vector.load %arg2[%c3_128, %c0_129, %c0_130] : memref<7x8x256xf32, #tpu.memory_space<vmem>>, vector<1x8x256xf32>
    %144 = vector.shape_cast %143 : vector<1x8x256xf32> to vector<8x256xf32>
    %cst_131 = arith.constant dense<0.000000e+00> : vector<8x256xf32>
    %145 = tpu.matmul %144, %142, %cst_131 {dimension_numbers = #tpu.dot_dimension_numbers<[1], [0], [0], [1], [0, 0, 1, 1], [], []>} : vector<8x256xf32>, vector<256x256xf32>, vector<8x256xf32> -> vector<8x256xf32>
    %146 = arith.addf %140, %145 : vector<8x256xf32>
    %c0_132 = arith.constant 0 : index
    %c0_133 = arith.constant 0 : index
    %c1536_134 = arith.constant 1536 : index
    %147 = vector.load %arg1[%c0_132, %c0_133, %c1536_134] : memref<1x256x3584xf32, #tpu.memory_space<vmem>>, vector<1x256x256xf32>
    %148 = vector.shape_cast %147 : vector<1x256x256xf32> to vector<256x256xf32>
    %c4_135 = arith.constant 4 : index
    %c0_136 = arith.constant 0 : index
    %c0_137 = arith.constant 0 : index
    %149 = vector.load %arg2[%c4_135, %c0_136, %c0_137] : memref<7x8x256xf32, #tpu.memory_space<vmem>>, vector<1x8x256xf32>
    %150 = vector.shape_cast %149 : vector<1x8x256xf32> to vector<8x256xf32>
    %cst_138 = arith.constant dense<0.000000e+00> : vector<8x256xf32>
    %151 = tpu.matmul %150, %148, %cst_138 {dimension_numbers = #tpu.dot_dimension_numbers<[1], [0], [0], [1], [0, 0, 1, 1], [], []>} : vector<8x256xf32>, vector<256x256xf32>, vector<8x256xf32> -> vector<8x256xf32>
    %152 = arith.addf %146, %151 : vector<8x256xf32>
    %c0_139 = arith.constant 0 : index
    %c0_140 = arith.constant 0 : index
    %c1792_141 = arith.constant 1792 : index
    %153 = vector.load %arg1[%c0_139, %c0_140, %c1792_141] : memref<1x256x3584xf32, #tpu.memory_space<vmem>>, vector<1x256x256xf32>
    %154 = vector.shape_cast %153 : vector<1x256x256xf32> to vector<256x256xf32>
    %c5_142 = arith.constant 5 : index
    %c0_143 = arith.constant 0 : index
    %c0_144 = arith.constant 0 : index
    %155 = vector.load %arg2[%c5_142, %c0_143, %c0_144] : memref<7x8x256xf32, #tpu.memory_space<vmem>>, vector<1x8x256xf32>
    %156 = vector.shape_cast %155 : vector<1x8x256xf32> to vector<8x256xf32>
    %cst_145 = arith.constant dense<0.000000e+00> : vector<8x256xf32>
    %157 = tpu.matmul %156, %154, %cst_145 {dimension_numbers = #tpu.dot_dimension_numbers<[1], [0], [0], [1], [0, 0, 1, 1], [], []>} : vector<8x256xf32>, vector<256x256xf32>, vector<8x256xf32> -> vector<8x256xf32>
    %158 = arith.addf %152, %157 : vector<8x256xf32>
    %c0_146 = arith.constant 0 : index
    %c0_147 = arith.constant 0 : index
    %c2048 = arith.constant 2048 : index
    %159 = vector.load %arg1[%c0_146, %c0_147, %c2048] : memref<1x256x3584xf32, #tpu.memory_space<vmem>>, vector<1x256x256xf32>
    %160 = vector.shape_cast %159 : vector<1x256x256xf32> to vector<256x256xf32>
    %c6_148 = arith.constant 6 : index
    %c0_149 = arith.constant 0 : index
    %c0_150 = arith.constant 0 : index
    %161 = vector.load %arg2[%c6_148, %c0_149, %c0_150] : memref<7x8x256xf32, #tpu.memory_space<vmem>>, vector<1x8x256xf32>
    %162 = vector.shape_cast %161 : vector<1x8x256xf32> to vector<8x256xf32>
    %cst_151 = arith.constant dense<0.000000e+00> : vector<8x256xf32>
    %163 = tpu.matmul %162, %160, %cst_151 {dimension_numbers = #tpu.dot_dimension_numbers<[1], [0], [0], [1], [0, 0, 1, 1], [], []>} : vector<8x256xf32>, vector<256x256xf32>, vector<8x256xf32> -> vector<8x256xf32>
    %164 = arith.addf %158, %163 : vector<8x256xf32>
    %165 = vector.broadcast %1 : vector<8x1xf32> to vector<8x256xf32>
    %166 = arith.addf %164, %165 : vector<8x256xf32>
    %cst_152 = arith.constant 0.000000e+00 : f32
    %167 = vector.broadcast %cst_152 : f32 to vector<8x256xf32>
    %168 = arith.maximumf %166, %167 : vector<8x256xf32>
    %c0_153 = arith.constant 0 : index
    %c0_154 = arith.constant 0 : index
    %c512_155 = arith.constant 512 : index
    %169 = vector.load %arg5[%c0_153, %c0_154, %c512_155] : memref<1x8x2048xf32, #tpu.memory_space<vmem>>, vector<1x8x256xf32>
    %170 = vector.shape_cast %169 : vector<1x8x256xf32> to vector<8x256xf32>
    %171 = vector.shape_cast %168 : vector<8x256xf32> to vector<1x8x256xf32>
    tpu.vector_store %arg5[%c0_153, %c0_154, %c512_155], %171 {strides = array<i32>} : memref<1x8x2048xf32, #tpu.memory_space<vmem>>, vector<1x8x256xf32>,
    %172 = vector.broadcast %0 : vector<1x256xf32> to vector<8x256xf32>
    %173 = arith.mulf %168, %172 : vector<8x256xf32>
    %cst_156 = arith.constant dense<0.000000e+00> : vector<8xf32>
    %174 = vector.multi_reduction <add>, %173, %cst_156 [1] : vector<8x256xf32> to vector<8xf32>
    %175 = vector.shape_cast %174 : vector<8xf32> to vector<8x1xf32>
    %176 = arith.addf %117, %175 : vector<8x1xf32>
    %177 = arith.mulf %173, %168 : vector<8x256xf32>
    %cst_157 = arith.constant dense<0.000000e+00> : vector<8xf32>
    %178 = vector.multi_reduction <add>, %177, %cst_157 [1] : vector<8x256xf32> to vector<8xf32>
    %179 = vector.shape_cast %178 : vector<8xf32> to vector<8x1xf32>
    %180 = arith.addf %121, %179 : vector<8x1xf32>
    %cst_158 = arith.constant 0.000000e+00 : f32
    %181 = vector.broadcast %cst_158 : f32 to vector<8x256xf32>
    %c0_159 = arith.constant 0 : index
    %c0_160 = arith.constant 0 : index
    %c768_161 = arith.constant 768 : index
    %182 = vector.load %arg1[%c0_159, %c0_160, %c768_161] : memref<1x256x3584xf32, #tpu.memory_space<vmem>>, vector<1x256x256xf32>
    %183 = vector.shape_cast %182 : vector<1x256x256xf32> to vector<256x256xf32>
    %c0_162 = arith.constant 0 : index
    %c0_163 = arith.constant 0 : index
    %c0_164 = arith.constant 0 : index
    %184 = vector.load %arg2[%c0_162, %c0_163, %c0_164] : memref<7x8x256xf32, #tpu.memory_space<vmem>>, vector<1x8x256xf32>
    %185 = vector.shape_cast %184 : vector<1x8x256xf32> to vector<8x256xf32>
    %cst_165 = arith.constant dense<0.000000e+00> : vector<8x256xf32>
    %186 = tpu.matmul %185, %183, %cst_165 {dimension_numbers = #tpu.dot_dimension_numbers<[1], [0], [0], [1], [0, 0, 1, 1], [], []>} : vector<8x256xf32>, vector<256x256xf32>, vector<8x256xf32> -> vector<8x256xf32>
    %187 = arith.addf %181, %186 : vector<8x256xf32>
    %c0_166 = arith.constant 0 : index
    %c0_167 = arith.constant 0 : index
    %c1024_168 = arith.constant 1024 : index
    %188 = vector.load %arg1[%c0_166, %c0_167, %c1024_168] : memref<1x256x3584xf32, #tpu.memory_space<vmem>>, vector<1x256x256xf32>
    %189 = vector.shape_cast %188 : vector<1x256x256xf32> to vector<256x256xf32>
    %c1_169 = arith.constant 1 : index
    %c0_170 = arith.constant 0 : index
    %c0_171 = arith.constant 0 : index
    %190 = vector.load %arg2[%c1_169, %c0_170, %c0_171] : memref<7x8x256xf32, #tpu.memory_space<vmem>>, vector<1x8x256xf32>
    %191 = vector.shape_cast %190 : vector<1x8x256xf32> to vector<8x256xf32>
    %cst_172 = arith.constant dense<0.000000e+00> : vector<8x256xf32>
    %192 = tpu.matmul %191, %189, %cst_172 {dimension_numbers = #tpu.dot_dimension_numbers<[1], [0], [0], [1], [0, 0, 1, 1], [], []>} : vector<8x256xf32>, vector<256x256xf32>, vector<8x256xf32> -> vector<8x256xf32>
    %193 = arith.addf %187, %192 : vector<8x256xf32>
    %c0_173 = arith.constant 0 : index
    %c0_174 = arith.constant 0 : index
    %c1280_175 = arith.constant 1280 : index
    %194 = vector.load %arg1[%c0_173, %c0_174, %c1280_175] : memref<1x256x3584xf32, #tpu.memory_space<vmem>>, vector<1x256x256xf32>
    %195 = vector.shape_cast %194 : vector<1x256x256xf32> to vector<256x256xf32>
    %c2_176 = arith.constant 2 : index
    %c0_177 = arith.constant 0 : index
    %c0_178 = arith.constant 0 : index
    %196 = vector.load %arg2[%c2_176, %c0_177, %c0_178] : memref<7x8x256xf32, #tpu.memory_space<vmem>>, vector<1x8x256xf32>
    %197 = vector.shape_cast %196 : vector<1x8x256xf32> to vector<8x256xf32>
    %cst_179 = arith.constant dense<0.000000e+00> : vector<8x256xf32>
    %198 = tpu.matmul %197, %195, %cst_179 {dimension_numbers = #tpu.dot_dimension_numbers<[1], [0], [0], [1], [0, 0, 1, 1], [], []>} : vector<8x256xf32>, vector<256x256xf32>, vector<8x256xf32> -> vector<8x256xf32>
    %199 = arith.addf %193, %198 : vector<8x256xf32>
    %c0_180 = arith.constant 0 : index
    %c0_181 = arith.constant 0 : index
    %c1536_182 = arith.constant 1536 : index
    %200 = vector.load %arg1[%c0_180, %c0_181, %c1536_182] : memref<1x256x3584xf32, #tpu.memory_space<vmem>>, vector<1x256x256xf32>
    %201 = vector.shape_cast %200 : vector<1x256x256xf32> to vector<256x256xf32>
    %c3_183 = arith.constant 3 : index
    %c0_184 = arith.constant 0 : index
    %c0_185 = arith.constant 0 : index
    %202 = vector.load %arg2[%c3_183, %c0_184, %c0_185] : memref<7x8x256xf32, #tpu.memory_space<vmem>>, vector<1x8x256xf32>
    %203 = vector.shape_cast %202 : vector<1x8x256xf32> to vector<8x256xf32>
    %cst_186 = arith.constant dense<0.000000e+00> : vector<8x256xf32>
    %204 = tpu.matmul %203, %201, %cst_186 {dimension_numbers = #tpu.dot_dimension_numbers<[1], [0], [0], [1], [0, 0, 1, 1], [], []>} : vector<8x256xf32>, vector<256x256xf32>, vector<8x256xf32> -> vector<8x256xf32>
    %205 = arith.addf %199, %204 : vector<8x256xf32>
    %c0_187 = arith.constant 0 : index
    %c0_188 = arith.constant 0 : index
    %c1792_189 = arith.constant 1792 : index
    %206 = vector.load %arg1[%c0_187, %c0_188, %c1792_189] : memref<1x256x3584xf32, #tpu.memory_space<vmem>>, vector<1x256x256xf32>
    %207 = vector.shape_cast %206 : vector<1x256x256xf32> to vector<256x256xf32>
    %c4_190 = arith.constant 4 : index
    %c0_191 = arith.constant 0 : index
    %c0_192 = arith.constant 0 : index
    %208 = vector.load %arg2[%c4_190, %c0_191, %c0_192] : memref<7x8x256xf32, #tpu.memory_space<vmem>>, vector<1x8x256xf32>
    %209 = vector.shape_cast %208 : vector<1x8x256xf32> to vector<8x256xf32>
    %cst_193 = arith.constant dense<0.000000e+00> : vector<8x256xf32>
    %210 = tpu.matmul %209, %207, %cst_193 {dimension_numbers = #tpu.dot_dimension_numbers<[1], [0], [0], [1], [0, 0, 1, 1], [], []>} : vector<8x256xf32>, vector<256x256xf32>, vector<8x256xf32> -> vector<8x256xf32>
    %211 = arith.addf %205, %210 : vector<8x256xf32>
    %c0_194 = arith.constant 0 : index
    %c0_195 = arith.constant 0 : index
    %c2048_196 = arith.constant 2048 : index
    %212 = vector.load %arg1[%c0_194, %c0_195, %c2048_196] : memref<1x256x3584xf32, #tpu.memory_space<vmem>>, vector<1x256x256xf32>
    %213 = vector.shape_cast %212 : vector<1x256x256xf32> to vector<256x256xf32>
    %c5_197 = arith.constant 5 : index
    %c0_198 = arith.constant 0 : index
    %c0_199 = arith.constant 0 : index
    %214 = vector.load %arg2[%c5_197, %c0_198, %c0_199] : memref<7x8x256xf32, #tpu.memory_space<vmem>>, vector<1x8x256xf32>
    %215 = vector.shape_cast %214 : vector<1x8x256xf32> to vector<8x256xf32>
    %cst_200 = arith.constant dense<0.000000e+00> : vector<8x256xf32>
    %216 = tpu.matmul %215, %213, %cst_200 {dimension_numbers = #tpu.dot_dimension_numbers<[1], [0], [0], [1], [0, 0, 1, 1], [], []>} : vector<8x256xf32>, vector<256x256xf32>, vector<8x256xf32> -> vector<8x256xf32>
    %217 = arith.addf %211, %216 : vector<8x256xf32>
    %c0_201 = arith.constant 0 : index
    %c0_202 = arith.constant 0 : index
    %c2304 = arith.constant 2304 : index
    %218 = vector.load %arg1[%c0_201, %c0_202, %c2304] : memref<1x256x3584xf32, #tpu.memory_space<vmem>>, vector<1x256x256xf32>
    %219 = vector.shape_cast %218 : vector<1x256x256xf32> to vector<256x256xf32>
    %c6_203 = arith.constant 6 : index
    %c0_204 = arith.constant 0 : index
    %c0_205 = arith.constant 0 : index
    %220 = vector.load %arg2[%c6_203, %c0_204, %c0_205] : memref<7x8x256xf32, #tpu.memory_space<vmem>>, vector<1x8x256xf32>
    %221 = vector.shape_cast %220 : vector<1x8x256xf32> to vector<8x256xf32>
    %cst_206 = arith.constant dense<0.000000e+00> : vector<8x256xf32>
    %222 = tpu.matmul %221, %219, %cst_206 {dimension_numbers = #tpu.dot_dimension_numbers<[1], [0], [0], [1], [0, 0, 1, 1], [], []>} : vector<8x256xf32>, vector<256x256xf32>, vector<8x256xf32> -> vector<8x256xf32>
    %223 = arith.addf %217, %222 : vector<8x256xf32>
    %224 = vector.broadcast %1 : vector<8x1xf32> to vector<8x256xf32>
    %225 = arith.addf %223, %224 : vector<8x256xf32>
    %cst_207 = arith.constant 0.000000e+00 : f32
    %226 = vector.broadcast %cst_207 : f32 to vector<8x256xf32>
    %227 = arith.maximumf %225, %226 : vector<8x256xf32>
    %c0_208 = arith.constant 0 : index
    %c0_209 = arith.constant 0 : index
    %c768_210 = arith.constant 768 : index
    %228 = vector.load %arg5[%c0_208, %c0_209, %c768_210] : memref<1x8x2048xf32, #tpu.memory_space<vmem>>, vector<1x8x256xf32>
    %229 = vector.shape_cast %228 : vector<1x8x256xf32> to vector<8x256xf32>
    %230 = vector.shape_cast %227 : vector<8x256xf32> to vector<1x8x256xf32>
    tpu.vector_store %arg5[%c0_208, %c0_209, %c768_210], %230 {strides = array<i32>} : memref<1x8x2048xf32, #tpu.memory_space<vmem>>, vector<1x8x256xf32>,
    %231 = vector.broadcast %0 : vector<1x256xf32> to vector<8x256xf32>
    %232 = arith.mulf %227, %231 : vector<8x256xf32>
    %cst_211 = arith.constant dense<0.000000e+00> : vector<8xf32>
    %233 = vector.multi_reduction <add>, %232, %cst_211 [1] : vector<8x256xf32> to vector<8xf32>
    %234 = vector.shape_cast %233 : vector<8xf32> to vector<8x1xf32>
    %235 = arith.addf %176, %234 : vector<8x1xf32>
    %236 = arith.mulf %232, %227 : vector<8x256xf32>
    %cst_212 = arith.constant dense<0.000000e+00> : vector<8xf32>
    %237 = vector.multi_reduction <add>, %236, %cst_212 [1] : vector<8x256xf32> to vector<8xf32>
    %238 = vector.shape_cast %237 : vector<8xf32> to vector<8x1xf32>
    %239 = arith.addf %180, %238 : vector<8x1xf32>
    %cst_213 = arith.constant 0.000000e+00 : f32
    %240 = vector.broadcast %cst_213 : f32 to vector<8x256xf32>
    %c0_214 = arith.constant 0 : index
    %c0_215 = arith.constant 0 : index
    %c1024_216 = arith.constant 1024 : index
    %241 = vector.load %arg1[%c0_214, %c0_215, %c1024_216] : memref<1x256x3584xf32, #tpu.memory_space<vmem>>, vector<1x256x256xf32>
    %242 = vector.shape_cast %241 : vector<1x256x256xf32> to vector<256x256xf32>
    %c0_217 = arith.constant 0 : index
    %c0_218 = arith.constant 0 : index
    %c0_219 = arith.constant 0 : index
    %243 = vector.load %arg2[%c0_217, %c0_218, %c0_219] : memref<7x8x256xf32, #tpu.memory_space<vmem>>, vector<1x8x256xf32>
    %244 = vector.shape_cast %243 : vector<1x8x256xf32> to vector<8x256xf32>
    %cst_220 = arith.constant dense<0.000000e+00> : vector<8x256xf32>
    %245 = tpu.matmul %244, %242, %cst_220 {dimension_numbers = #tpu.dot_dimension_numbers<[1], [0], [0], [1], [0, 0, 1, 1], [], []>} : vector<8x256xf32>, vector<256x256xf32>, vector<8x256xf32> -> vector<8x256xf32>
    %246 = arith.addf %240, %245 : vector<8x256xf32>
    %c0_221 = arith.constant 0 : index
    %c0_222 = arith.constant 0 : index
    %c1280_223 = arith.constant 1280 : index
    %247 = vector.load %arg1[%c0_221, %c0_222, %c1280_223] : memref<1x256x3584xf32, #tpu.memory_space<vmem>>, vector<1x256x256xf32>
    %248 = vector.shape_cast %247 : vector<1x256x256xf32> to vector<256x256xf32>
    %c1_224 = arith.constant 1 : index
    %c0_225 = arith.constant 0 : index
    %c0_226 = arith.constant 0 : index
    %249 = vector.load %arg2[%c1_224, %c0_225, %c0_226] : memref<7x8x256xf32, #tpu.memory_space<vmem>>, vector<1x8x256xf32>
    %250 = vector.shape_cast %249 : vector<1x8x256xf32> to vector<8x256xf32>
    %cst_227 = arith.constant dense<0.000000e+00> : vector<8x256xf32>
    %251 = tpu.matmul %250, %248, %cst_227 {dimension_numbers = #tpu.dot_dimension_numbers<[1], [0], [0], [1], [0, 0, 1, 1], [], []>} : vector<8x256xf32>, vector<256x256xf32>, vector<8x256xf32> -> vector<8x256xf32>
    %252 = arith.addf %246, %251 : vector<8x256xf32>
    %c0_228 = arith.constant 0 : index
    %c0_229 = arith.constant 0 : index
    %c1536_230 = arith.constant 1536 : index
    %253 = vector.load %arg1[%c0_228, %c0_229, %c1536_230] : memref<1x256x3584xf32, #tpu.memory_space<vmem>>, vector<1x256x256xf32>
    %254 = vector.shape_cast %253 : vector<1x256x256xf32> to vector<256x256xf32>
    %c2_231 = arith.constant 2 : index
    %c0_232 = arith.constant 0 : index
    %c0_233 = arith.constant 0 : index
    %255 = vector.load %arg2[%c2_231, %c0_232, %c0_233] : memref<7x8x256xf32, #tpu.memory_space<vmem>>, vector<1x8x256xf32>
    %256 = vector.shape_cast %255 : vector<1x8x256xf32> to vector<8x256xf32>
    %cst_234 = arith.constant dense<0.000000e+00> : vector<8x256xf32>
    %257 = tpu.matmul %256, %254, %cst_234 {dimension_numbers = #tpu.dot_dimension_numbers<[1], [0], [0], [1], [0, 0, 1, 1], [], []>} : vector<8x256xf32>, vector<256x256xf32>, vector<8x256xf32> -> vector<8x256xf32>
    %258 = arith.addf %252, %257 : vector<8x256xf32>
    %c0_235 = arith.constant 0 : index
    %c0_236 = arith.constant 0 : index
    %c1792_237 = arith.constant 1792 : index
    %259 = vector.load %arg1[%c0_235, %c0_236, %c1792_237] : memref<1x256x3584xf32, #tpu.memory_space<vmem>>, vector<1x256x256xf32>
    %260 = vector.shape_cast %259 : vector<1x256x256xf32> to vector<256x256xf32>
    %c3_238 = arith.constant 3 : index
    %c0_239 = arith.constant 0 : index
    %c0_240 = arith.constant 0 : index
    %261 = vector.load %arg2[%c3_238, %c0_239, %c0_240] : memref<7x8x256xf32, #tpu.memory_space<vmem>>, vector<1x8x256xf32>
    %262 = vector.shape_cast %261 : vector<1x8x256xf32> to vector<8x256xf32>
    %cst_241 = arith.constant dense<0.000000e+00> : vector<8x256xf32>
    %263 = tpu.matmul %262, %260, %cst_241 {dimension_numbers = #tpu.dot_dimension_numbers<[1], [0], [0], [1], [0, 0, 1, 1], [], []>} : vector<8x256xf32>, vector<256x256xf32>, vector<8x256xf32> -> vector<8x256xf32>
    %264 = arith.addf %258, %263 : vector<8x256xf32>
    %c0_242 = arith.constant 0 : index
    %c0_243 = arith.constant 0 : index
    %c2048_244 = arith.constant 2048 : index
    %265 = vector.load %arg1[%c0_242, %c0_243, %c2048_244] : memref<1x256x3584xf32, #tpu.memory_space<vmem>>, vector<1x256x256xf32>
    %266 = vector.shape_cast %265 : vector<1x256x256xf32> to vector<256x256xf32>
    %c4_245 = arith.constant 4 : index
    %c0_246 = arith.constant 0 : index
    %c0_247 = arith.constant 0 : index
    %267 = vector.load %arg2[%c4_245, %c0_246, %c0_247] : memref<7x8x256xf32, #tpu.memory_space<vmem>>, vector<1x8x256xf32>
    %268 = vector.shape_cast %267 : vector<1x8x256xf32> to vector<8x256xf32>
    %cst_248 = arith.constant dense<0.000000e+00> : vector<8x256xf32>
    %269 = tpu.matmul %268, %266, %cst_248 {dimension_numbers = #tpu.dot_dimension_numbers<[1], [0], [0], [1], [0, 0, 1, 1], [], []>} : vector<8x256xf32>, vector<256x256xf32>, vector<8x256xf32> -> vector<8x256xf32>
    %270 = arith.addf %264, %269 : vector<8x256xf32>
    %c0_249 = arith.constant 0 : index
    %c0_250 = arith.constant 0 : index
    %c2304_251 = arith.constant 2304 : index
    %271 = vector.load %arg1[%c0_249, %c0_250, %c2304_251] : memref<1x256x3584xf32, #tpu.memory_space<vmem>>, vector<1x256x256xf32>
    %272 = vector.shape_cast %271 : vector<1x256x256xf32> to vector<256x256xf32>
    %c5_252 = arith.constant 5 : index
    %c0_253 = arith.constant 0 : index
    %c0_254 = arith.constant 0 : index
    %273 = vector.load %arg2[%c5_252, %c0_253, %c0_254] : memref<7x8x256xf32, #tpu.memory_space<vmem>>, vector<1x8x256xf32>
    %274 = vector.shape_cast %273 : vector<1x8x256xf32> to vector<8x256xf32>
    %cst_255 = arith.constant dense<0.000000e+00> : vector<8x256xf32>
    %275 = tpu.matmul %274, %272, %cst_255 {dimension_numbers = #tpu.dot_dimension_numbers<[1], [0], [0], [1], [0, 0, 1, 1], [], []>} : vector<8x256xf32>, vector<256x256xf32>, vector<8x256xf32> -> vector<8x256xf32>
    %276 = arith.addf %270, %275 : vector<8x256xf32>
    %c0_256 = arith.constant 0 : index
    %c0_257 = arith.constant 0 : index
    %c2560 = arith.constant 2560 : index
    %277 = vector.load %arg1[%c0_256, %c0_257, %c2560] : memref<1x256x3584xf32, #tpu.memory_space<vmem>>, vector<1x256x256xf32>
    %278 = vector.shape_cast %277 : vector<1x256x256xf32> to vector<256x256xf32>
    %c6_258 = arith.constant 6 : index
    %c0_259 = arith.constant 0 : index
    %c0_260 = arith.constant 0 : index
    %279 = vector.load %arg2[%c6_258, %c0_259, %c0_260] : memref<7x8x256xf32, #tpu.memory_space<vmem>>, vector<1x8x256xf32>
    %280 = vector.shape_cast %279 : vector<1x8x256xf32> to vector<8x256xf32>
    %cst_261 = arith.constant dense<0.000000e+00> : vector<8x256xf32>
    %281 = tpu.matmul %280, %278, %cst_261 {dimension_numbers = #tpu.dot_dimension_numbers<[1], [0], [0], [1], [0, 0, 1, 1], [], []>} : vector<8x256xf32>, vector<256x256xf32>, vector<8x256xf32> -> vector<8x256xf32>
    %282 = arith.addf %276, %281 : vector<8x256xf32>
    %283 = vector.broadcast %1 : vector<8x1xf32> to vector<8x256xf32>
    %284 = arith.addf %282, %283 : vector<8x256xf32>
    %cst_262 = arith.constant 0.000000e+00 : f32
    %285 = vector.broadcast %cst_262 : f32 to vector<8x256xf32>
    %286 = arith.maximumf %284, %285 : vector<8x256xf32>
    %c0_263 = arith.constant 0 : index
    %c0_264 = arith.constant 0 : index
    %c1024_265 = arith.constant 1024 : index
    %287 = vector.load %arg5[%c0_263, %c0_264, %c1024_265] : memref<1x8x2048xf32, #tpu.memory_space<vmem>>, vector<1x8x256xf32>
    %288 = vector.shape_cast %287 : vector<1x8x256xf32> to vector<8x256xf32>
    %289 = vector.shape_cast %286 : vector<8x256xf32> to vector<1x8x256xf32>
    tpu.vector_store %arg5[%c0_263, %c0_264, %c1024_265], %289 {strides = array<i32>} : memref<1x8x2048xf32, #tpu.memory_space<vmem>>, vector<1x8x256xf32>,
    %290 = vector.broadcast %0 : vector<1x256xf32> to vector<8x256xf32>
    %291 = arith.mulf %286, %290 : vector<8x256xf32>
    %cst_266 = arith.constant dense<0.000000e+00> : vector<8xf32>
    %292 = vector.multi_reduction <add>, %291, %cst_266 [1] : vector<8x256xf32> to vector<8xf32>
    %293 = vector.shape_cast %292 : vector<8xf32> to vector<8x1xf32>
    %294 = arith.addf %235, %293 : vector<8x1xf32>
    %295 = arith.mulf %291, %286 : vector<8x256xf32>
    %cst_267 = arith.constant dense<0.000000e+00> : vector<8xf32>
    %296 = vector.multi_reduction <add>, %295, %cst_267 [1] : vector<8x256xf32> to vector<8xf32>
    %297 = vector.shape_cast %296 : vector<8xf32> to vector<8x1xf32>
    %298 = arith.addf %239, %297 : vector<8x1xf32>
    %cst_268 = arith.constant 0.000000e+00 : f32
    %299 = vector.broadcast %cst_268 : f32 to vector<8x256xf32>
    %c0_269 = arith.constant 0 : index
    %c0_270 = arith.constant 0 : index
    %c1280_271 = arith.constant 1280 : index
    %300 = vector.load %arg1[%c0_269, %c0_270, %c1280_271] : memref<1x256x3584xf32, #tpu.memory_space<vmem>>, vector<1x256x256xf32>
    %301 = vector.shape_cast %300 : vector<1x256x256xf32> to vector<256x256xf32>
    %c0_272 = arith.constant 0 : index
    %c0_273 = arith.constant 0 : index
    %c0_274 = arith.constant 0 : index
    %302 = vector.load %arg2[%c0_272, %c0_273, %c0_274] : memref<7x8x256xf32, #tpu.memory_space<vmem>>, vector<1x8x256xf32>
    %303 = vector.shape_cast %302 : vector<1x8x256xf32> to vector<8x256xf32>
    %cst_275 = arith.constant dense<0.000000e+00> : vector<8x256xf32>
    %304 = tpu.matmul %303, %301, %cst_275 {dimension_numbers = #tpu.dot_dimension_numbers<[1], [0], [0], [1], [0, 0, 1, 1], [], []>} : vector<8x256xf32>, vector<256x256xf32>, vector<8x256xf32> -> vector<8x256xf32>
    %305 = arith.addf %299, %304 : vector<8x256xf32>
    %c0_276 = arith.constant 0 : index
    %c0_277 = arith.constant 0 : index
    %c1536_278 = arith.constant 1536 : index
    %306 = vector.load %arg1[%c0_276, %c0_277, %c1536_278] : memref<1x256x3584xf32, #tpu.memory_space<vmem>>, vector<1x256x256xf32>
    %307 = vector.shape_cast %306 : vector<1x256x256xf32> to vector<256x256xf32>
    %c1_279 = arith.constant 1 : index
    %c0_280 = arith.constant 0 : index
    %c0_281 = arith.constant 0 : index
    %308 = vector.load %arg2[%c1_279, %c0_280, %c0_281] : memref<7x8x256xf32, #tpu.memory_space<vmem>>, vector<1x8x256xf32>
    %309 = vector.shape_cast %308 : vector<1x8x256xf32> to vector<8x256xf32>
    %cst_282 = arith.constant dense<0.000000e+00> : vector<8x256xf32>
    %310 = tpu.matmul %309, %307, %cst_282 {dimension_numbers = #tpu.dot_dimension_numbers<[1], [0], [0], [1], [0, 0, 1, 1], [], []>} : vector<8x256xf32>, vector<256x256xf32>, vector<8x256xf32> -> vector<8x256xf32>
    %311 = arith.addf %305, %310 : vector<8x256xf32>
    %c0_283 = arith.constant 0 : index
    %c0_284 = arith.constant 0 : index
    %c1792_285 = arith.constant 1792 : index
    %312 = vector.load %arg1[%c0_283, %c0_284, %c1792_285] : memref<1x256x3584xf32, #tpu.memory_space<vmem>>, vector<1x256x256xf32>
    %313 = vector.shape_cast %312 : vector<1x256x256xf32> to vector<256x256xf32>
    %c2_286 = arith.constant 2 : index
    %c0_287 = arith.constant 0 : index
    %c0_288 = arith.constant 0 : index
    %314 = vector.load %arg2[%c2_286, %c0_287, %c0_288] : memref<7x8x256xf32, #tpu.memory_space<vmem>>, vector<1x8x256xf32>
    %315 = vector.shape_cast %314 : vector<1x8x256xf32> to vector<8x256xf32>
    %cst_289 = arith.constant dense<0.000000e+00> : vector<8x256xf32>
    %316 = tpu.matmul %315, %313, %cst_289 {dimension_numbers = #tpu.dot_dimension_numbers<[1], [0], [0], [1], [0, 0, 1, 1], [], []>} : vector<8x256xf32>, vector<256x256xf32>, vector<8x256xf32> -> vector<8x256xf32>
    %317 = arith.addf %311, %316 : vector<8x256xf32>
    %c0_290 = arith.constant 0 : index
    %c0_291 = arith.constant 0 : index
    %c2048_292 = arith.constant 2048 : index
    %318 = vector.load %arg1[%c0_290, %c0_291, %c2048_292] : memref<1x256x3584xf32, #tpu.memory_space<vmem>>, vector<1x256x256xf32>
    %319 = vector.shape_cast %318 : vector<1x256x256xf32> to vector<256x256xf32>
    %c3_293 = arith.constant 3 : index
    %c0_294 = arith.constant 0 : index
    %c0_295 = arith.constant 0 : index
    %320 = vector.load %arg2[%c3_293, %c0_294, %c0_295] : memref<7x8x256xf32, #tpu.memory_space<vmem>>, vector<1x8x256xf32>
    %321 = vector.shape_cast %320 : vector<1x8x256xf32> to vector<8x256xf32>
    %cst_296 = arith.constant dense<0.000000e+00> : vector<8x256xf32>
    %322 = tpu.matmul %321, %319, %cst_296 {dimension_numbers = #tpu.dot_dimension_numbers<[1], [0], [0], [1], [0, 0, 1, 1], [], []>} : vector<8x256xf32>, vector<256x256xf32>, vector<8x256xf32> -> vector<8x256xf32>
    %323 = arith.addf %317, %322 : vector<8x256xf32>
    %c0_297 = arith.constant 0 : index
    %c0_298 = arith.constant 0 : index
    %c2304_299 = arith.constant 2304 : index
    %324 = vector.load %arg1[%c0_297, %c0_298, %c2304_299] : memref<1x256x3584xf32, #tpu.memory_space<vmem>>, vector<1x256x256xf32>
    %325 = vector.shape_cast %324 : vector<1x256x256xf32> to vector<256x256xf32>
    %c4_300 = arith.constant 4 : index
    %c0_301 = arith.constant 0 : index
    %c0_302 = arith.constant 0 : index
    %326 = vector.load %arg2[%c4_300, %c0_301, %c0_302] : memref<7x8x256xf32, #tpu.memory_space<vmem>>, vector<1x8x256xf32>
    %327 = vector.shape_cast %326 : vector<1x8x256xf32> to vector<8x256xf32>
    %cst_303 = arith.constant dense<0.000000e+00> : vector<8x256xf32>
    %328 = tpu.matmul %327, %325, %cst_303 {dimension_numbers = #tpu.dot_dimension_numbers<[1], [0], [0], [1], [0, 0, 1, 1], [], []>} : vector<8x256xf32>, vector<256x256xf32>, vector<8x256xf32> -> vector<8x256xf32>
    %329 = arith.addf %323, %328 : vector<8x256xf32>
    %c0_304 = arith.constant 0 : index
    %c0_305 = arith.constant 0 : index
    %c2560_306 = arith.constant 2560 : index
    %330 = vector.load %arg1[%c0_304, %c0_305, %c2560_306] : memref<1x256x3584xf32, #tpu.memory_space<vmem>>, vector<1x256x256xf32>
    %331 = vector.shape_cast %330 : vector<1x256x256xf32> to vector<256x256xf32>
    %c5_307 = arith.constant 5 : index
    %c0_308 = arith.constant 0 : index
    %c0_309 = arith.constant 0 : index
    %332 = vector.load %arg2[%c5_307, %c0_308, %c0_309] : memref<7x8x256xf32, #tpu.memory_space<vmem>>, vector<1x8x256xf32>
    %333 = vector.shape_cast %332 : vector<1x8x256xf32> to vector<8x256xf32>
    %cst_310 = arith.constant dense<0.000000e+00> : vector<8x256xf32>
    %334 = tpu.matmul %333, %331, %cst_310 {dimension_numbers = #tpu.dot_dimension_numbers<[1], [0], [0], [1], [0, 0, 1, 1], [], []>} : vector<8x256xf32>, vector<256x256xf32>, vector<8x256xf32> -> vector<8x256xf32>
    %335 = arith.addf %329, %334 : vector<8x256xf32>
    %c0_311 = arith.constant 0 : index
    %c0_312 = arith.constant 0 : index
    %c2816 = arith.constant 2816 : index
    %336 = vector.load %arg1[%c0_311, %c0_312, %c2816] : memref<1x256x3584xf32, #tpu.memory_space<vmem>>, vector<1x256x256xf32>
    %337 = vector.shape_cast %336 : vector<1x256x256xf32> to vector<256x256xf32>
    %c6_313 = arith.constant 6 : index
    %c0_314 = arith.constant 0 : index
    %c0_315 = arith.constant 0 : index
    %338 = vector.load %arg2[%c6_313, %c0_314, %c0_315] : memref<7x8x256xf32, #tpu.memory_space<vmem>>, vector<1x8x256xf32>
    %339 = vector.shape_cast %338 : vector<1x8x256xf32> to vector<8x256xf32>
    %cst_316 = arith.constant dense<0.000000e+00> : vector<8x256xf32>
    %340 = tpu.matmul %339, %337, %cst_316 {dimension_numbers = #tpu.dot_dimension_numbers<[1], [0], [0], [1], [0, 0, 1, 1], [], []>} : vector<8x256xf32>, vector<256x256xf32>, vector<8x256xf32> -> vector<8x256xf32>
    %341 = arith.addf %335, %340 : vector<8x256xf32>
    %342 = vector.broadcast %1 : vector<8x1xf32> to vector<8x256xf32>
    %343 = arith.addf %341, %342 : vector<8x256xf32>
    %cst_317 = arith.constant 0.000000e+00 : f32
    %344 = vector.broadcast %cst_317 : f32 to vector<8x256xf32>
    %345 = arith.maximumf %343, %344 : vector<8x256xf32>
    %c0_318 = arith.constant 0 : index
    %c0_319 = arith.constant 0 : index
    %c1280_320 = arith.constant 1280 : index
    %346 = vector.load %arg5[%c0_318, %c0_319, %c1280_320] : memref<1x8x2048xf32, #tpu.memory_space<vmem>>, vector<1x8x256xf32>
    %347 = vector.shape_cast %346 : vector<1x8x256xf32> to vector<8x256xf32>
    %348 = vector.shape_cast %345 : vector<8x256xf32> to vector<1x8x256xf32>
    tpu.vector_store %arg5[%c0_318, %c0_319, %c1280_320], %348 {strides = array<i32>} : memref<1x8x2048xf32, #tpu.memory_space<vmem>>, vector<1x8x256xf32>,
    %349 = vector.broadcast %0 : vector<1x256xf32> to vector<8x256xf32>
    %350 = arith.mulf %345, %349 : vector<8x256xf32>
    %cst_321 = arith.constant dense<0.000000e+00> : vector<8xf32>
    %351 = vector.multi_reduction <add>, %350, %cst_321 [1] : vector<8x256xf32> to vector<8xf32>
    %352 = vector.shape_cast %351 : vector<8xf32> to vector<8x1xf32>
    %353 = arith.addf %294, %352 : vector<8x1xf32>
    %354 = arith.mulf %350, %345 : vector<8x256xf32>
    %cst_322 = arith.constant dense<0.000000e+00> : vector<8xf32>
    %355 = vector.multi_reduction <add>, %354, %cst_322 [1] : vector<8x256xf32> to vector<8xf32>
    %356 = vector.shape_cast %355 : vector<8xf32> to vector<8x1xf32>
    %357 = arith.addf %298, %356 : vector<8x1xf32>
    %cst_323 = arith.constant 0.000000e+00 : f32
    %358 = vector.broadcast %cst_323 : f32 to vector<8x256xf32>
    %c0_324 = arith.constant 0 : index
    %c0_325 = arith.constant 0 : index
    %c1536_326 = arith.constant 1536 : index
    %359 = vector.load %arg1[%c0_324, %c0_325, %c1536_326] : memref<1x256x3584xf32, #tpu.memory_space<vmem>>, vector<1x256x256xf32>
    %360 = vector.shape_cast %359 : vector<1x256x256xf32> to vector<256x256xf32>
    %c0_327 = arith.constant 0 : index
    %c0_328 = arith.constant 0 : index
    %c0_329 = arith.constant 0 : index
    %361 = vector.load %arg2[%c0_327, %c0_328, %c0_329] : memref<7x8x256xf32, #tpu.memory_space<vmem>>, vector<1x8x256xf32>
    %362 = vector.shape_cast %361 : vector<1x8x256xf32> to vector<8x256xf32>
    %cst_330 = arith.constant dense<0.000000e+00> : vector<8x256xf32>
    %363 = tpu.matmul %362, %360, %cst_330 {dimension_numbers = #tpu.dot_dimension_numbers<[1], [0], [0], [1], [0, 0, 1, 1], [], []>} : vector<8x256xf32>, vector<256x256xf32>, vector<8x256xf32> -> vector<8x256xf32>
    %364 = arith.addf %358, %363 : vector<8x256xf32>
    %c0_331 = arith.constant 0 : index
    %c0_332 = arith.constant 0 : index
    %c1792_333 = arith.constant 1792 : index
    %365 = vector.load %arg1[%c0_331, %c0_332, %c1792_333] : memref<1x256x3584xf32, #tpu.memory_space<vmem>>, vector<1x256x256xf32>
    %366 = vector.shape_cast %365 : vector<1x256x256xf32> to vector<256x256xf32>
    %c1_334 = arith.constant 1 : index
    %c0_335 = arith.constant 0 : index
    %c0_336 = arith.constant 0 : index
    %367 = vector.load %arg2[%c1_334, %c0_335, %c0_336] : memref<7x8x256xf32, #tpu.memory_space<vmem>>, vector<1x8x256xf32>
    %368 = vector.shape_cast %367 : vector<1x8x256xf32> to vector<8x256xf32>
    %cst_337 = arith.constant dense<0.000000e+00> : vector<8x256xf32>
    %369 = tpu.matmul %368, %366, %cst_337 {dimension_numbers = #tpu.dot_dimension_numbers<[1], [0], [0], [1], [0, 0, 1, 1], [], []>} : vector<8x256xf32>, vector<256x256xf32>, vector<8x256xf32> -> vector<8x256xf32>
    %370 = arith.addf %364, %369 : vector<8x256xf32>
    %c0_338 = arith.constant 0 : index
    %c0_339 = arith.constant 0 : index
    %c2048_340 = arith.constant 2048 : index
    %371 = vector.load %arg1[%c0_338, %c0_339, %c2048_340] : memref<1x256x3584xf32, #tpu.memory_space<vmem>>, vector<1x256x256xf32>
    %372 = vector.shape_cast %371 : vector<1x256x256xf32> to vector<256x256xf32>
    %c2_341 = arith.constant 2 : index
    %c0_342 = arith.constant 0 : index
    %c0_343 = arith.constant 0 : index
    %373 = vector.load %arg2[%c2_341, %c0_342, %c0_343] : memref<7x8x256xf32, #tpu.memory_space<vmem>>, vector<1x8x256xf32>
    %374 = vector.shape_cast %373 : vector<1x8x256xf32> to vector<8x256xf32>
    %cst_344 = arith.constant dense<0.000000e+00> : vector<8x256xf32>
    %375 = tpu.matmul %374, %372, %cst_344 {dimension_numbers = #tpu.dot_dimension_numbers<[1], [0], [0], [1], [0, 0, 1, 1], [], []>} : vector<8x256xf32>, vector<256x256xf32>, vector<8x256xf32> -> vector<8x256xf32>
    %376 = arith.addf %370, %375 : vector<8x256xf32>
    %c0_345 = arith.constant 0 : index
    %c0_346 = arith.constant 0 : index
    %c2304_347 = arith.constant 2304 : index
    %377 = vector.load %arg1[%c0_345, %c0_346, %c2304_347] : memref<1x256x3584xf32, #tpu.memory_space<vmem>>, vector<1x256x256xf32>
    %378 = vector.shape_cast %377 : vector<1x256x256xf32> to vector<256x256xf32>
    %c3_348 = arith.constant 3 : index
    %c0_349 = arith.constant 0 : index
    %c0_350 = arith.constant 0 : index
    %379 = vector.load %arg2[%c3_348, %c0_349, %c0_350] : memref<7x8x256xf32, #tpu.memory_space<vmem>>, vector<1x8x256xf32>
    %380 = vector.shape_cast %379 : vector<1x8x256xf32> to vector<8x256xf32>
    %cst_351 = arith.constant dense<0.000000e+00> : vector<8x256xf32>
    %381 = tpu.matmul %380, %378, %cst_351 {dimension_numbers = #tpu.dot_dimension_numbers<[1], [0], [0], [1], [0, 0, 1, 1], [], []>} : vector<8x256xf32>, vector<256x256xf32>, vector<8x256xf32> -> vector<8x256xf32>
    %382 = arith.addf %376, %381 : vector<8x256xf32>
    %c0_352 = arith.constant 0 : index
    %c0_353 = arith.constant 0 : index
    %c2560_354 = arith.constant 2560 : index
    %383 = vector.load %arg1[%c0_352, %c0_353, %c2560_354] : memref<1x256x3584xf32, #tpu.memory_space<vmem>>, vector<1x256x256xf32>
    %384 = vector.shape_cast %383 : vector<1x256x256xf32> to vector<256x256xf32>
    %c4_355 = arith.constant 4 : index
    %c0_356 = arith.constant 0 : index
    %c0_357 = arith.constant 0 : index
    %385 = vector.load %arg2[%c4_355, %c0_356, %c0_357] : memref<7x8x256xf32, #tpu.memory_space<vmem>>, vector<1x8x256xf32>
    %386 = vector.shape_cast %385 : vector<1x8x256xf32> to vector<8x256xf32>
    %cst_358 = arith.constant dense<0.000000e+00> : vector<8x256xf32>
    %387 = tpu.matmul %386, %384, %cst_358 {dimension_numbers = #tpu.dot_dimension_numbers<[1], [0], [0], [1], [0, 0, 1, 1], [], []>} : vector<8x256xf32>, vector<256x256xf32>, vector<8x256xf32> -> vector<8x256xf32>
    %388 = arith.addf %382, %387 : vector<8x256xf32>
    %c0_359 = arith.constant 0 : index
    %c0_360 = arith.constant 0 : index
    %c2816_361 = arith.constant 2816 : index
    %389 = vector.load %arg1[%c0_359, %c0_360, %c2816_361] : memref<1x256x3584xf32, #tpu.memory_space<vmem>>, vector<1x256x256xf32>
    %390 = vector.shape_cast %389 : vector<1x256x256xf32> to vector<256x256xf32>
    %c5_362 = arith.constant 5 : index
    %c0_363 = arith.constant 0 : index
    %c0_364 = arith.constant 0 : index
    %391 = vector.load %arg2[%c5_362, %c0_363, %c0_364] : memref<7x8x256xf32, #tpu.memory_space<vmem>>, vector<1x8x256xf32>
    %392 = vector.shape_cast %391 : vector<1x8x256xf32> to vector<8x256xf32>
    %cst_365 = arith.constant dense<0.000000e+00> : vector<8x256xf32>
    %393 = tpu.matmul %392, %390, %cst_365 {dimension_numbers = #tpu.dot_dimension_numbers<[1], [0], [0], [1], [0, 0, 1, 1], [], []>} : vector<8x256xf32>, vector<256x256xf32>, vector<8x256xf32> -> vector<8x256xf32>
    %394 = arith.addf %388, %393 : vector<8x256xf32>
    %c0_366 = arith.constant 0 : index
    %c0_367 = arith.constant 0 : index
    %c3072 = arith.constant 3072 : index
    %395 = vector.load %arg1[%c0_366, %c0_367, %c3072] : memref<1x256x3584xf32, #tpu.memory_space<vmem>>, vector<1x256x256xf32>
    %396 = vector.shape_cast %395 : vector<1x256x256xf32> to vector<256x256xf32>
    %c6_368 = arith.constant 6 : index
    %c0_369 = arith.constant 0 : index
    %c0_370 = arith.constant 0 : index
    %397 = vector.load %arg2[%c6_368, %c0_369, %c0_370] : memref<7x8x256xf32, #tpu.memory_space<vmem>>, vector<1x8x256xf32>
    %398 = vector.shape_cast %397 : vector<1x8x256xf32> to vector<8x256xf32>
    %cst_371 = arith.constant dense<0.000000e+00> : vector<8x256xf32>
    %399 = tpu.matmul %398, %396, %cst_371 {dimension_numbers = #tpu.dot_dimension_numbers<[1], [0], [0], [1], [0, 0, 1, 1], [], []>} : vector<8x256xf32>, vector<256x256xf32>, vector<8x256xf32> -> vector<8x256xf32>
    %400 = arith.addf %394, %399 : vector<8x256xf32>
    %401 = vector.broadcast %1 : vector<8x1xf32> to vector<8x256xf32>
    %402 = arith.addf %400, %401 : vector<8x256xf32>
    %cst_372 = arith.constant 0.000000e+00 : f32
    %403 = vector.broadcast %cst_372 : f32 to vector<8x256xf32>
    %404 = arith.maximumf %402, %403 : vector<8x256xf32>
    %c0_373 = arith.constant 0 : index
    %c0_374 = arith.constant 0 : index
    %c1536_375 = arith.constant 1536 : index
    %405 = vector.load %arg5[%c0_373, %c0_374, %c1536_375] : memref<1x8x2048xf32, #tpu.memory_space<vmem>>, vector<1x8x256xf32>
    %406 = vector.shape_cast %405 : vector<1x8x256xf32> to vector<8x256xf32>
    %407 = vector.shape_cast %404 : vector<8x256xf32> to vector<1x8x256xf32>
    tpu.vector_store %arg5[%c0_373, %c0_374, %c1536_375], %407 {strides = array<i32>} : memref<1x8x2048xf32, #tpu.memory_space<vmem>>, vector<1x8x256xf32>,
    %408 = vector.broadcast %0 : vector<1x256xf32> to vector<8x256xf32>
    %409 = arith.mulf %404, %408 : vector<8x256xf32>
    %cst_376 = arith.constant dense<0.000000e+00> : vector<8xf32>
    %410 = vector.multi_reduction <add>, %409, %cst_376 [1] : vector<8x256xf32> to vector<8xf32>
    %411 = vector.shape_cast %410 : vector<8xf32> to vector<8x1xf32>
    %412 = arith.addf %353, %411 : vector<8x1xf32>
    %413 = arith.mulf %409, %404 : vector<8x256xf32>
    %cst_377 = arith.constant dense<0.000000e+00> : vector<8xf32>
    %414 = vector.multi_reduction <add>, %413, %cst_377 [1] : vector<8x256xf32> to vector<8xf32>
    %415 = vector.shape_cast %414 : vector<8xf32> to vector<8x1xf32>
    %416 = arith.addf %357, %415 : vector<8x1xf32>
    %cst_378 = arith.constant 0.000000e+00 : f32
    %417 = vector.broadcast %cst_378 : f32 to vector<8x256xf32>
    %c0_379 = arith.constant 0 : index
    %c0_380 = arith.constant 0 : index
    %c1792_381 = arith.constant 1792 : index
    %418 = vector.load %arg1[%c0_379, %c0_380, %c1792_381] : memref<1x256x3584xf32, #tpu.memory_space<vmem>>, vector<1x256x256xf32>
    %419 = vector.shape_cast %418 : vector<1x256x256xf32> to vector<256x256xf32>
    %c0_382 = arith.constant 0 : index
    %c0_383 = arith.constant 0 : index
    %c0_384 = arith.constant 0 : index
    %420 = vector.load %arg2[%c0_382, %c0_383, %c0_384] : memref<7x8x256xf32, #tpu.memory_space<vmem>>, vector<1x8x256xf32>
    %421 = vector.shape_cast %420 : vector<1x8x256xf32> to vector<8x256xf32>
    %cst_385 = arith.constant dense<0.000000e+00> : vector<8x256xf32>
    %422 = tpu.matmul %421, %419, %cst_385 {dimension_numbers = #tpu.dot_dimension_numbers<[1], [0], [0], [1], [0, 0, 1, 1], [], []>} : vector<8x256xf32>, vector<256x256xf32>, vector<8x256xf32> -> vector<8x256xf32>
    %423 = arith.addf %417, %422 : vector<8x256xf32>
    %c0_386 = arith.constant 0 : index
    %c0_387 = arith.constant 0 : index
    %c2048_388 = arith.constant 2048 : index
    %424 = vector.load %arg1[%c0_386, %c0_387, %c2048_388] : memref<1x256x3584xf32, #tpu.memory_space<vmem>>, vector<1x256x256xf32>
    %425 = vector.shape_cast %424 : vector<1x256x256xf32> to vector<256x256xf32>
    %c1_389 = arith.constant 1 : index
    %c0_390 = arith.constant 0 : index
    %c0_391 = arith.constant 0 : index
    %426 = vector.load %arg2[%c1_389, %c0_390, %c0_391] : memref<7x8x256xf32, #tpu.memory_space<vmem>>, vector<1x8x256xf32>
    %427 = vector.shape_cast %426 : vector<1x8x256xf32> to vector<8x256xf32>
    %cst_392 = arith.constant dense<0.000000e+00> : vector<8x256xf32>
    %428 = tpu.matmul %427, %425, %cst_392 {dimension_numbers = #tpu.dot_dimension_numbers<[1], [0], [0], [1], [0, 0, 1, 1], [], []>} : vector<8x256xf32>, vector<256x256xf32>, vector<8x256xf32> -> vector<8x256xf32>
    %429 = arith.addf %423, %428 : vector<8x256xf32>
    %c0_393 = arith.constant 0 : index
    %c0_394 = arith.constant 0 : index
    %c2304_395 = arith.constant 2304 : index
    %430 = vector.load %arg1[%c0_393, %c0_394, %c2304_395] : memref<1x256x3584xf32, #tpu.memory_space<vmem>>, vector<1x256x256xf32>
    %431 = vector.shape_cast %430 : vector<1x256x256xf32> to vector<256x256xf32>
    %c2_396 = arith.constant 2 : index
    %c0_397 = arith.constant 0 : index
    %c0_398 = arith.constant 0 : index
    %432 = vector.load %arg2[%c2_396, %c0_397, %c0_398] : memref<7x8x256xf32, #tpu.memory_space<vmem>>, vector<1x8x256xf32>
    %433 = vector.shape_cast %432 : vector<1x8x256xf32> to vector<8x256xf32>
    %cst_399 = arith.constant dense<0.000000e+00> : vector<8x256xf32>
    %434 = tpu.matmul %433, %431, %cst_399 {dimension_numbers = #tpu.dot_dimension_numbers<[1], [0], [0], [1], [0, 0, 1, 1], [], []>} : vector<8x256xf32>, vector<256x256xf32>, vector<8x256xf32> -> vector<8x256xf32>
    %435 = arith.addf %429, %434 : vector<8x256xf32>
    %c0_400 = arith.constant 0 : index
    %c0_401 = arith.constant 0 : index
    %c2560_402 = arith.constant 2560 : index
    %436 = vector.load %arg1[%c0_400, %c0_401, %c2560_402] : memref<1x256x3584xf32, #tpu.memory_space<vmem>>, vector<1x256x256xf32>
    %437 = vector.shape_cast %436 : vector<1x256x256xf32> to vector<256x256xf32>
    %c3_403 = arith.constant 3 : index
    %c0_404 = arith.constant 0 : index
    %c0_405 = arith.constant 0 : index
    %438 = vector.load %arg2[%c3_403, %c0_404, %c0_405] : memref<7x8x256xf32, #tpu.memory_space<vmem>>, vector<1x8x256xf32>
    %439 = vector.shape_cast %438 : vector<1x8x256xf32> to vector<8x256xf32>
    %cst_406 = arith.constant dense<0.000000e+00> : vector<8x256xf32>
    %440 = tpu.matmul %439, %437, %cst_406 {dimension_numbers = #tpu.dot_dimension_numbers<[1], [0], [0], [1], [0, 0, 1, 1], [], []>} : vector<8x256xf32>, vector<256x256xf32>, vector<8x256xf32> -> vector<8x256xf32>
    %441 = arith.addf %435, %440 : vector<8x256xf32>
    %c0_407 = arith.constant 0 : index
    %c0_408 = arith.constant 0 : index
    %c2816_409 = arith.constant 2816 : index
    %442 = vector.load %arg1[%c0_407, %c0_408, %c2816_409] : memref<1x256x3584xf32, #tpu.memory_space<vmem>>, vector<1x256x256xf32>
    %443 = vector.shape_cast %442 : vector<1x256x256xf32> to vector<256x256xf32>
    %c4_410 = arith.constant 4 : index
    %c0_411 = arith.constant 0 : index
    %c0_412 = arith.constant 0 : index
    %444 = vector.load %arg2[%c4_410, %c0_411, %c0_412] : memref<7x8x256xf32, #tpu.memory_space<vmem>>, vector<1x8x256xf32>
    %445 = vector.shape_cast %444 : vector<1x8x256xf32> to vector<8x256xf32>
    %cst_413 = arith.constant dense<0.000000e+00> : vector<8x256xf32>
    %446 = tpu.matmul %445, %443, %cst_413 {dimension_numbers = #tpu.dot_dimension_numbers<[1], [0], [0], [1], [0, 0, 1, 1], [], []>} : vector<8x256xf32>, vector<256x256xf32>, vector<8x256xf32> -> vector<8x256xf32>
    %447 = arith.addf %441, %446 : vector<8x256xf32>
    %c0_414 = arith.constant 0 : index
    %c0_415 = arith.constant 0 : index
    %c3072_416 = arith.constant 3072 : index
    %448 = vector.load %arg1[%c0_414, %c0_415, %c3072_416] : memref<1x256x3584xf32, #tpu.memory_space<vmem>>, vector<1x256x256xf32>
    %449 = vector.shape_cast %448 : vector<1x256x256xf32> to vector<256x256xf32>
    %c5_417 = arith.constant 5 : index
    %c0_418 = arith.constant 0 : index
    %c0_419 = arith.constant 0 : index
    %450 = vector.load %arg2[%c5_417, %c0_418, %c0_419] : memref<7x8x256xf32, #tpu.memory_space<vmem>>, vector<1x8x256xf32>
    %451 = vector.shape_cast %450 : vector<1x8x256xf32> to vector<8x256xf32>
    %cst_420 = arith.constant dense<0.000000e+00> : vector<8x256xf32>
    %452 = tpu.matmul %451, %449, %cst_420 {dimension_numbers = #tpu.dot_dimension_numbers<[1], [0], [0], [1], [0, 0, 1, 1], [], []>} : vector<8x256xf32>, vector<256x256xf32>, vector<8x256xf32> -> vector<8x256xf32>
    %453 = arith.addf %447, %452 : vector<8x256xf32>
    %c0_421 = arith.constant 0 : index
    %c0_422 = arith.constant 0 : index
    %c3328 = arith.constant 3328 : index
    %454 = vector.load %arg1[%c0_421, %c0_422, %c3328] : memref<1x256x3584xf32, #tpu.memory_space<vmem>>, vector<1x256x256xf32>
    %455 = vector.shape_cast %454 : vector<1x256x256xf32> to vector<256x256xf32>
    %c6_423 = arith.constant 6 : index
    %c0_424 = arith.constant 0 : index
    %c0_425 = arith.constant 0 : index
    %456 = vector.load %arg2[%c6_423, %c0_424, %c0_425] : memref<7x8x256xf32, #tpu.memory_space<vmem>>, vector<1x8x256xf32>
    %457 = vector.shape_cast %456 : vector<1x8x256xf32> to vector<8x256xf32>
    %cst_426 = arith.constant dense<0.000000e+00> : vector<8x256xf32>
    %458 = tpu.matmul %457, %455, %cst_426 {dimension_numbers = #tpu.dot_dimension_numbers<[1], [0], [0], [1], [0, 0, 1, 1], [], []>} : vector<8x256xf32>, vector<256x256xf32>, vector<8x256xf32> -> vector<8x256xf32>
    %459 = arith.addf %453, %458 : vector<8x256xf32>
    %460 = vector.broadcast %1 : vector<8x1xf32> to vector<8x256xf32>
    %461 = arith.addf %459, %460 : vector<8x256xf32>
    %cst_427 = arith.constant 0.000000e+00 : f32
    %462 = vector.broadcast %cst_427 : f32 to vector<8x256xf32>
    %463 = arith.maximumf %461, %462 : vector<8x256xf32>
    %c0_428 = arith.constant 0 : index
    %c0_429 = arith.constant 0 : index
    %c1792_430 = arith.constant 1792 : index
    %464 = vector.load %arg5[%c0_428, %c0_429, %c1792_430] : memref<1x8x2048xf32, #tpu.memory_space<vmem>>, vector<1x8x256xf32>
    %465 = vector.shape_cast %464 : vector<1x8x256xf32> to vector<8x256xf32>
    %466 = vector.shape_cast %463 : vector<8x256xf32> to vector<1x8x256xf32>
    tpu.vector_store %arg5[%c0_428, %c0_429, %c1792_430], %466 {strides = array<i32>} : memref<1x8x2048xf32, #tpu.memory_space<vmem>>, vector<1x8x256xf32>,
    %467 = vector.broadcast %0 : vector<1x256xf32> to vector<8x256xf32>
    %468 = arith.mulf %463, %467 : vector<8x256xf32>
    %cst_431 = arith.constant dense<0.000000e+00> : vector<8xf32>
    %469 = vector.multi_reduction <add>, %468, %cst_431 [1] : vector<8x256xf32> to vector<8xf32>
    %470 = vector.shape_cast %469 : vector<8xf32> to vector<8x1xf32>
    %471 = arith.addf %412, %470 : vector<8x1xf32>
    %472 = arith.mulf %468, %463 : vector<8x256xf32>
    %cst_432 = arith.constant dense<0.000000e+00> : vector<8xf32>
    %473 = vector.multi_reduction <add>, %472, %cst_432 [1] : vector<8x256xf32> to vector<8xf32>
    %474 = vector.shape_cast %473 : vector<8xf32> to vector<8x1xf32>
    %475 = arith.addf %416, %474 : vector<8x1xf32>
    %c0_433 = arith.constant 0 : index
    %c0_434 = arith.constant 0 : index
    %c0_435 = arith.constant 0 : index
    %476 = vector.load %arg6[%c0_433, %c0_434, %c0_435] : memref<1x8x1xf32, #tpu.memory_space<vmem>>, vector<1x8x1xf32>
    %477 = vector.shape_cast %476 : vector<1x8x1xf32> to vector<8x1xf32>
    %478 = vector.shape_cast %471 : vector<8x1xf32> to vector<1x8x1xf32>
    tpu.vector_store %arg6[%c0_433, %c0_434, %c0_435], %478 {strides = array<i32>} : memref<1x8x1xf32, #tpu.memory_space<vmem>>, vector<1x8x1xf32>,
    %c0_436 = arith.constant 0 : index
    %c0_437 = arith.constant 0 : index
    %c0_438 = arith.constant 0 : index
    %479 = vector.load %arg7[%c0_436, %c0_437, %c0_438] : memref<1x8x1xf32, #tpu.memory_space<vmem>>, vector<1x8x1xf32>
    %480 = vector.shape_cast %479 : vector<1x8x1xf32> to vector<8x1xf32>
    %481 = vector.shape_cast %475 : vector<8x1xf32> to vector<1x8x1xf32>
    tpu.vector_store %arg7[%c0_436, %c0_437, %c0_438], %481 {strides = array<i32>} : memref<1x8x1xf32, #tpu.memory_space<vmem>>, vector<1x8x1xf32>,
    return
  }
  func.func @transform_0(%arg0: i32) -> (i32, i32, i32) {
    %c0_i32 = arith.constant 0 : i32
    %c0_i32_0 = arith.constant 0 : i32
    %c0_i32_1 = arith.constant 0 : i32
    return %arg0, %c0_i32, %c0_i32_0 : i32, i32, i32
  }
  func.func @transform_1(%arg0: i32) -> (i32, i32, i32) {
    %c0_i32 = arith.constant 0 : i32
    %c0_i32_0 = arith.constant 0 : i32
    %c0_i32_1 = arith.constant 0 : i32
    %c0_i32_2 = arith.constant 0 : i32
    return %c0_i32, %c0_i32_0, %c0_i32_1 : i32, i32, i32
  }
  func.func @transform_2(%arg0: i32) -> (i32, i32) {
    %c0_i32 = arith.constant 0 : i32
    %c0_i32_0 = arith.constant 0 : i32
    %c0_i32_1 = arith.constant 0 : i32
    return %c0_i32, %c0_i32_0 : i32, i32
  }
  func.func @transform_3(%arg0: i32) -> (i32, i32) {
    %c0_i32 = arith.constant 0 : i32
    %c0_i32_0 = arith.constant 0 : i32
    %c0_i32_1 = arith.constant 0 : i32
    return %c0_i32, %c0_i32_0 : i32, i32
  }
  func.func @transform_4(%arg0: i32) -> (i32, i32, i32) {
    %c0_i32 = arith.constant 0 : i32
    %c0_i32_0 = arith.constant 0 : i32
    %c0_i32_1 = arith.constant 0 : i32
    return %arg0, %c0_i32, %c0_i32_0 : i32, i32, i32
  }
  func.func @transform_5(%arg0: i32) -> (i32, i32, i32) {
    %c0_i32 = arith.constant 0 : i32
    %c0_i32_0 = arith.constant 0 : i32
    %c0_i32_1 = arith.constant 0 : i32
    return %arg0, %c0_i32, %c0_i32_0 : i32, i32, i32
  }
  func.func @transform_6(%arg0: i32) -> (i32, i32, i32) {
    %c0_i32 = arith.constant 0 : i32
    %c0_i32_0 = arith.constant 0 : i32
    %c0_i32_1 = arith.constant 0 : i32
    return %arg0, %c0_i32, %c0_i32_0 : i32, i32, i32
  }
}

module attributes {stable_mosaic.version = 11 : i64} {
  func.func @_bn_tanh_kernel(%arg0: i32, %arg1: memref<1x8x2048xf32, #tpu.memory_space<vmem>>, %arg2: memref<8x1xf32, #tpu.memory_space<vmem>>, %arg3: memref<8x1xf32, #tpu.memory_space<vmem>>, %arg4: memref<1x8x2048xf32, #tpu.memory_space<vmem>>) attributes {dimension_semantics = [#tpu.dimension_semantics<parallel>], iteration_bounds = array<i64: 2>, scalar_prefetch = 0 : i64, scratch_operands = 0 : i64, tpu.core_type = #tpu.core_type<tc>, window_params = [{transform_indices = @transform_0, window_bounds = array<i64: 1, 8, 2048>}, {pipeline_mode = #tpu.pipeline_mode<synchronous>, transform_indices = @transform_1, window_bounds = array<i64: 8, 1>}, {pipeline_mode = #tpu.pipeline_mode<synchronous>, transform_indices = @transform_2, window_bounds = array<i64: 8, 1>}, {transform_indices = @transform_3, window_bounds = array<i64: 1, 8, 2048>}]} {
    %c0 = arith.constant 0 : index
    %c0_0 = arith.constant 0 : index
    %c0_1 = arith.constant 0 : index
    %0 = vector.load %arg1[%c0, %c0_0, %c0_1] : memref<1x8x2048xf32, #tpu.memory_space<vmem>>, vector<1x8x2048xf32>
    %1 = vector.shape_cast %0 : vector<1x8x2048xf32> to vector<8x2048xf32>
    %c0_2 = arith.constant 0 : index
    %c0_3 = arith.constant 0 : index
    %2 = vector.load %arg2[%c0_2, %c0_3] : memref<8x1xf32, #tpu.memory_space<vmem>>, vector<8x1xf32>
    %3 = vector.broadcast %2 : vector<8x1xf32> to vector<8x2048xf32>
    %4 = arith.mulf %1, %3 : vector<8x2048xf32>
    %c0_4 = arith.constant 0 : index
    %c0_5 = arith.constant 0 : index
    %5 = vector.load %arg3[%c0_4, %c0_5] : memref<8x1xf32, #tpu.memory_space<vmem>>, vector<8x1xf32>
    %6 = vector.broadcast %5 : vector<8x1xf32> to vector<8x2048xf32>
    %7 = arith.addf %4, %6 : vector<8x2048xf32>
    %8 = math.tanh %7 : vector<8x2048xf32>
    %c0_6 = arith.constant 0 : index
    %c0_7 = arith.constant 0 : index
    %c0_8 = arith.constant 0 : index
    %9 = vector.load %arg4[%c0_6, %c0_7, %c0_8] : memref<1x8x2048xf32, #tpu.memory_space<vmem>>, vector<1x8x2048xf32>
    %10 = vector.shape_cast %9 : vector<1x8x2048xf32> to vector<8x2048xf32>
    %11 = vector.shape_cast %8 : vector<8x2048xf32> to vector<1x8x2048xf32>
    tpu.vector_store %arg4[%c0_6, %c0_7, %c0_8], %11 {strides = array<i32>} : memref<1x8x2048xf32, #tpu.memory_space<vmem>>, vector<1x8x2048xf32>,
    return
  }
  func.func @transform_0(%arg0: i32) -> (i32, i32, i32) {
    %c0_i32 = arith.constant 0 : i32
    %c0_i32_0 = arith.constant 0 : i32
    %c0_i32_1 = arith.constant 0 : i32
    return %arg0, %c0_i32, %c0_i32_0 : i32, i32, i32
  }
  func.func @transform_1(%arg0: i32) -> (i32, i32) {
    %c0_i32 = arith.constant 0 : i32
    %c0_i32_0 = arith.constant 0 : i32
    %c0_i32_1 = arith.constant 0 : i32
    return %c0_i32, %c0_i32_0 : i32, i32
  }
  func.func @transform_2(%arg0: i32) -> (i32, i32) {
    %c0_i32 = arith.constant 0 : i32
    %c0_i32_0 = arith.constant 0 : i32
    %c0_i32_1 = arith.constant 0 : i32
    return %c0_i32, %c0_i32_0 : i32, i32
  }
  func.func @transform_3(%arg0: i32) -> (i32, i32, i32) {
    %c0_i32 = arith.constant 0 : i32
    %c0_i32_0 = arith.constant 0 : i32
    %c0_i32_1 = arith.constant 0 : i32
    return %arg0, %c0_i32, %c0_i32_0 : i32, i32, i32
  }
}

</mosaic_0001>

<bundles_post_ra>
// kernel: mul.19
= control target key start
LH: loop header
LB: loop body
LE: loop exit
PB: predicated region body
PF: predicated region fallthrough
CT: control target
= control target key end

     0   :  { %s34_s0 = inlined_call_operand.vmem [shape: f32[8,1], index: 0, kind: input, shape index: {}]   ;;  %s35_s1 = inlined_call_operand.vmem [shape: f32[8,1], index: 1, kind: input, shape index: {}]   ;;  %s36_s2 = inlined_call_operand.vmem [shape: f32[8,1], index: 2, kind: output, shape index: {}]  }
   0x1   :  { %v3_v0 = vld [vmem:[%s34_s0] sm:$0xff] }
   0x2   :  { %v4_v1 = vld [vmem:[%s35_s1] sm:$0xff] }
   0x3   :  { %v7_v2 = vmul.f32 %v4_v1, %v3_v0 }
   0x5   :  { %9 = vst [vmem:[%s36_s2] sm:$0xff] %v7_v2 }

// kernel: model_tanh_forward.3
= control target key start
LH: loop header
LB: loop body
LE: loop exit
PB: predicated region body
PF: predicated region fallthrough
CT: control target
= control target key end

     0   :  { %s402_s12 = smov 0   ;;  %s468_s0 = inlined_call_operand.vmem [shape: f32[2,8,2048], index: 0, kind: input, shape index: {}]   ;;  %s469_s1 = inlined_call_operand.vmem [shape: f32[8,1], index: 1, kind: input, shape index: {}]   ;;  %s470_s2 = inlined_call_operand.vmem [shape: f32[8,1], index: 2, kind: input, shape index: {}]   ;;  %s471_s3 = inlined_call_operand.vmem [shape: f32[2,8,2048], index: 3, kind: output, shape index: {}]  }
   0x1 LB: > { %s318_s13 = sadd.s32 4294967295, %s379_s12   ;;  %p322_p0 = scmp.ge.s32.totalorder %s379_s12, 1  ;;  %s379_s12 = sphi %s402_s12, %s13_s12  }
   0x2   : > { %p137_p1 = scmp.lt.s32.totalorder %s379_s12, 3 }
   0x4   : > { %p138_p2 = pnand %p322_p0, %p137_p1 }
   0x5   : > { %v187_v0 = vld [vmem:[%s469_s1] sm:$0xff] (!%p138_p2)  ;;  %v381_v1 = vmov (!%p138_p2), 0   ;;  %p161_p3 = scmp.lt.s32.totalorder (!%p138_p2), %s318_s13, 1 }
   0x6   : > { %141 = sbr.rel (%p138_p2) target bundleno = 168 (0xa8), region = 32  ;;  %340 = vset.pattern.permute.xlu0 (!%p138_p2), %v381_v1  ;;  %v209_v2 = vld [vmem:[%s470_s2] sm:$0xff] (!%p138_p2) }
   0x7   : > { %190 = vperm.xlu0 (!%p138_p2), %340, %v187_v0  }
   0xb   : > { %212 = vperm.xlu0 (!%p138_p2), %340, %v209_v2  }
   0xd   : > { %s473_s13 = smov (!%p161_p3, %s318_s13), 1 }
   0xe   : > { %s329_s18 = sshll.u32 %s473_s13, 7 }
   0xf   : > { %s424_s21 = scalar_lea.vmem %s468_s0, %s329_s18  ;;  %s447_s24 = scalar_lea.vmem %s471_s3, %s329_s18 }
  0x10   : > { %v171_v4 = vld [vmem:[%s424_s21] sm:$0xff]  ;;  %v172_v5 = vld [vmem:[%s424_s21 + $0x8] sm:$0xff]  ;;  %v173_v6 = vld [vmem:[%s424_s21 + $0x10] sm:$0xff] }
  0x11   : > { %v174_v7 = vld [vmem:[%s424_s21 + $0x18] sm:$0xff]  ;;  %v175_v10 = vld [vmem:[%s424_s21 + $0x20] sm:$0xff]  ;;  %v176_v12 = vld [vmem:[%s424_s21 + $0x28] sm:$0xff] }
  0x12   : > { %v177_v15 = vld [vmem:[%s424_s21 + $0x30] sm:$0xff]  ;;  %v178_v18 = vld [vmem:[%s424_s21 + $0x38] sm:$0xff]  ;;  %v179_v21 = vld [vmem:[%s424_s21 + $0x40] sm:$0xff] }
  0x13   : > { %v180_v24 = vld [vmem:[%s424_s21 + $0x48] sm:$0xff]  ;;  %v181_v27 = vld [vmem:[%s424_s21 + $0x50] sm:$0xff]  ;;  %v182_v30 = vld [vmem:[%s424_s21 + $0x58] sm:$0xff] }
  0x14   : > { %v183_v33 = vld [vmem:[%s424_s21 + $0x60] sm:$0xff]  ;;  %v184_v36 = vld [vmem:[%s424_s21 + $0x68] sm:$0xff]  ;;  %v185_v39 = vld [vmem:[%s424_s21 + $0x70] sm:$0xff] }
  0x15   : > { %v186_v42 = vld [vmem:[%s424_s21 + $0x78] sm:$0xff] }
  0x86   : > { %v191_v3 = vpop.permute.xlu0 %190 }
  0x87   : > { %v193_v8 = vmul.f32 %v191_v3, %v171_v4  ;;  %v194_v11 = vmul.f32 %v191_v3, %v172_v5  ;;  %v195_v13 = vmul.f32 %v191_v3, %v173_v6  ;;  %v196_v16 = vmul.f32 %v191_v3, %v174_v7 }
  0x88   : > { %v197_v19 = vmul.f32 %v191_v3, %v175_v10  ;;  %v198_v22 = vmul.f32 %v191_v3, %v176_v12  ;;  %v199_v25 = vmul.f32 %v191_v3, %v177_v15  ;;  %v200_v28 = vmul.f32 %v191_v3, %v178_v18 }
  0x89   : > { %v201_v31 = vmul.f32 %v191_v3, %v179_v21  ;;  %v202_v34 = vmul.f32 %v191_v3, %v180_v24  ;;  %v203_v37 = vmul.f32 %v191_v3, %v181_v27  ;;  %v204_v40 = vmul.f32 %v191_v3, %v182_v30 }
  0x8a   : > { %v213_v9 = vpop.permute.xlu0 %212  ;;  %v205_v43 = vmul.f32 %v191_v3, %v183_v33  ;;  %v206_v45 = vmul.f32 %v191_v3, %v184_v36  ;;  %v207_v47 = vmul.f32 %v191_v3, %v185_v39  ;;  %v208_v49 = vmul.f32 %v191_v3, %v186_v42 }
  0x8b   : > { %v215_v14 = vadd.f32 %v213_v9, %v193_v8  ;;  %v216_v17 = vadd.f32 %v213_v9, %v194_v11  ;;  %v217_v20 = vadd.f32 %v213_v9, %v195_v13  ;;  %v218_v23 = vadd.f32 %v213_v9, %v196_v16 }
  0x8c   : > { %v219_v26 = vadd.f32 %v213_v9, %v197_v19  ;;  %v220_v29 = vadd.f32 %v213_v9, %v198_v22  ;;  %v221_v32 = vadd.f32 %v213_v9, %v199_v25  ;;  %v222_v35 = vadd.f32 %v213_v9, %v200_v28 }
  0x8d   : > { %341 = vtanh.f32 %v215_v14  ;;  %v223_v38 = vadd.f32 %v213_v9, %v201_v31  ;;  %v224_v41 = vadd.f32 %v213_v9, %v202_v34  ;;  %v225_v44 = vadd.f32 %v213_v9, %v203_v37 }
  0x8e   : > { %343 = vtanh.f32 %v216_v17  ;;  %v226_v46 = vadd.f32 %v213_v9, %v204_v40  ;;  %v227_v48 = vadd.f32 %v213_v9, %v205_v43  ;;  %v228_v50 = vadd.f32 %v213_v9, %v206_v45 }
  0x8f   : > { %345 = vtanh.f32 %v217_v20  ;;  %v229_v52 = vadd.f32 %v213_v9, %v207_v47  ;;  %v230_v54 = vadd.f32 %v213_v9, %v208_v49 }
  0x90   : > { %347 = vtanh.f32 %v218_v23 }
  0x91   : > { %349 = vtanh.f32 %v219_v26 }
  0x92   : > { %351 = vtanh.f32 %v220_v29 }
  0x93   : > { %353 = vtanh.f32 %v221_v32 }
  0x94   : > { %355 = vtanh.f32 %v222_v35 }
  0x95   : > { %357 = vtanh.f32 %v223_v38 }
  0x96   : > { %359 = vtanh.f32 %v224_v41 }
  0x97   : > { %v342_v51 = vpop.eup %341  ;;  %361 = vtanh.f32 %v225_v44 }
  0x98   : > { %v344_v53 = vpop.eup %343  ;;  %363 = vtanh.f32 %v226_v46  ;;  %247 = vst [vmem:[%s447_s24] sm:$0xff] %v342_v51 }
  0x99   : > { %v346_v55 = vpop.eup %345  ;;  %365 = vtanh.f32 %v227_v48  ;;  %248 = vst [vmem:[%s447_s24 + $0x8] sm:$0xff] %v344_v53 }
  0x9a   : > { %v348_v56 = vpop.eup %347  ;;  %367 = vtanh.f32 %v228_v50  ;;  %249 = vst [vmem:[%s447_s24 + $0x10] sm:$0xff] %v346_v55 }
  0x9b   : > { %v350_v57 = vpop.eup %349  ;;  %369 = vtanh.f32 %v229_v52  ;;  %250 = vst [vmem:[%s447_s24 + $0x18] sm:$0xff] %v348_v56 }
  0x9c   : > { %v352_v58 = vpop.eup %351  ;;  %371 = vtanh.f32 %v230_v54  ;;  %251 = vst [vmem:[%s447_s24 + $0x20] sm:$0xff] %v350_v57 }
  0x9d   : > { %v354_v59 = vpop.eup %353  ;;  %252 = vst [vmem:[%s447_s24 + $0x28] sm:$0xff] %v352_v58 }
  0x9e   : > { %v356_v60 = vpop.eup %355  ;;  %253 = vst [vmem:[%s447_s24 + $0x30] sm:$0xff] %v354_v59 }
  0x9f   : > { %v358_v61 = vpop.eup %357  ;;  %254 = vst [vmem:[%s447_s24 + $0x38] sm:$0xff] %v356_v60 }
  0xa0   : > { %v360_v62 = vpop.eup %359  ;;  %255 = vst [vmem:[%s447_s24 + $0x40] sm:$0xff] %v358_v61 }
  0xa1   : > { %v362_v63 = vpop.eup %361  ;;  %256 = vst [vmem:[%s447_s24 + $0x48] sm:$0xff] %v360_v62 }
  0xa2   : > { %v364_v0 = vpop.eup %363  ;;  %257 = vst [vmem:[%s447_s24 + $0x50] sm:$0xff] %v362_v63 }
  0xa3   : > { %v366_v1 = vpop.eup %365  ;;  %258 = vst [vmem:[%s447_s24 + $0x58] sm:$0xff] %v364_v0 }
  0xa4   : > { %v368_v2 = vpop.eup %367  ;;  %259 = vst [vmem:[%s447_s24 + $0x60] sm:$0xff] %v366_v1 }
  0xa5   : > { %v370_v3 = vpop.eup %369  ;;  %260 = vst [vmem:[%s447_s24 + $0x68] sm:$0xff] %v368_v2 }
  0xa6   : > { %v372_v4 = vpop.eup %371  ;;  %261 = vst [vmem:[%s447_s24 + $0x70] sm:$0xff] %v370_v3 }
  0xa7   : > { %262 = vst [vmem:[%s447_s24 + $0x78] sm:$0xff] %v372_v4 }
  0xa8 PF: > { %s13_s12 = sadd.s32 1, %s379_s12  }
  0xa9   : > { %p10_p4 = scmp.ge.s32.totalorder %s13_s12, 4  }
  0xab   :  { %12 = sbr.rel (!%p10_p4) target bundleno = 1 (0x1), region = 62 }

// kernel: model_tanh_forward.2
= control target key start
LH: loop header
LB: loop body
LE: loop exit
PB: predicated region body
PF: predicated region fallthrough
CT: control target
= control target key end

     0   :  { %s12157_s21 = smov 0   ;;  %s17281_s0 = inlined_call_operand.vmem [shape: f32[2,256,3584], index: 0, kind: input, shape index: {}]   ;;  %s17282_s1 = inlined_call_operand.vmem [shape: f32[7,8,256], index: 1, kind: input, shape index: {}]   ;;  %s17283_s2 = inlined_call_operand.vmem [shape: f32[8,1], index: 2, kind: input, shape index: {}]   ;;  %s17284_s3 = inlined_call_operand.vmem [shape: f32[1,256], index: 3, kind: input, shape index: {}]   ;;  %s17285_s4 = inlined_call_operand.vmem [shape: f32[2,8,2048], index: 4, kind: output, shape index: {0}]   ;;  %s17286_s5 = inlined_call_operand.vmem [shape: f32[2,8,1], index: 5, kind: output, shape index: {1}]   ;;  %s17287_s6 = inlined_call_operand.vmem [shape: f32[2,8,1], index: 6, kind: output, shape index: {2}]  }
   0x1 LB: > { %s8313_s22 = sadd.s32 4294967295, %s12119_s21   ;;  %p8317_p0 = scmp.ge.s32.totalorder %s12119_s21, 1  ;;  %s12119_s21 = sphi %s12157_s21, %s17_s21  }
   0x2   : > { %p217_p1 = scmp.lt.s32.totalorder %s12119_s21, 3 }
   0x4   : > { %p218_p2 = pnand %p8317_p0, %p217_p1 }
   0x5   : > { %p255_p3 = scmp.lt.s32.totalorder (!%p218_p2), %s8313_s22, 1  ;;  %v8324_v0 = vld [vmem:[%s17282_s1 + $0x18] sm:$0xff] (!%p218_p2)  ;;  %vm8193_vm0 = vcmask (!%p218_p2), 7168  }
   0x6   : > { %221 = sbr.rel (%p218_p2) target bundleno = 2185 (0x889), region = 36  ;;  %472 = vmatprep.mubr.f32.mxu0 (!%p218_p2), %v8324_v0  ;;  %1480 = vmatprep.mubr.f32.mxu1 (!%p218_p2), %v8324_v0 }
   0xd   : > { %s17289_s22 = smov (!%p255_p3, %s8313_s22), 1 }
   0xe   : > { %s12102_s25 = smul.u32 7168, %s17289_s22  ;;  %s8421_s7 = sshll.u32 %s17289_s22, 7 }
   0xf   : > { %s14089_s10 = scalar_lea.vmem %s17285_s4, %s8421_s7 }
  0x10   : > { %s12174_s28 = scalar_lea.vmem %s17281_s0, %s12102_s25 }
  0x11   : > { %v342_v1 = vld [vmem:[%s12174_s28 + $0x18] sm:$0xff]  ;;  %v1351_v3 = vld [vmem:[%s12174_s28 + $0x28] sm:$0xff]  ;;  %v341_v6 = vld [vmem:[%s12174_s28 + $0x10] sm:$0xff] }
  0x12   : > { %v344_v2 = vld [vmem:[%s12174_s28 + $0xf8] sm:$0xff]  ;;  %v1353_v5 = vld [vmem:[%s12174_s28 + $0x108] sm:$0xff]  ;;  %v343_v7 = vld [vmem:[%s12174_s28 + $0xf0] sm:$0xff] }
  0x13   : > { %v12179_v4 = vpack.c.bf16 %v344_v2, %v342_v1  ;;  %v8870_v8 = vpack.c.bf16 %v1353_v5, %v1351_v3  ;;  %v12184_v9 = vpack.c.bf16 %v343_v7, %v341_v6  ;;  %v1350_v10 = vld [vmem:[%s12174_s28 + $0x20] sm:$0xff]  ;;  %v346_v12 = vld [vmem:[%s12174_s28 + $0x1d8] sm:$0xff]  ;;  %v1355_v15 = vld [vmem:[%s12174_s28 + $0x1e8] sm:$0xff] }
  0x14   : > { %v1352_v11 = vld [vmem:[%s12174_s28 + $0x100] sm:$0xff]  ;;  %v348_v14 = vld [vmem:[%s12174_s28 + $0x2b8] sm:$0xff]  ;;  %v1357_v16 = vld [vmem:[%s12174_s28 + $0x2c8] sm:$0xff] }
  0x15   : > { %8423 = vmatprep.subr.bf16.mxu0 %v12179_v4  ;;  %v8872_v13 = vpack.c.bf16 %v1352_v11, %v1350_v10  ;;  %8871 = vmatprep.subr.bf16.mxu1 %v8870_v8  ;;  %v12194_v17 = vpack.c.bf16 %v348_v14, %v346_v12  ;;  %v8874_v18 = vpack.c.bf16 %v1357_v16, %v1355_v15  ;;  %v345_v19 = vld [vmem:[%s12174_s28 + $0x1d0] sm:$0xff]  ;;  %v1354_v21 = vld [vmem:[%s12174_s28 + $0x1e0] sm:$0xff]  ;;  %v350_v24 = vld [vmem:[%s12174_s28 + $0x398] sm:$0xff] }
  0x16   : > { %8425 = vmatpush1.bf16.msra.mxu0 %v12184_v9  ;;  %v347_v20 = vld [vmem:[%s12174_s28 + $0x2b0] sm:$0xff]  ;;  %v1356_v23 = vld [vmem:[%s12174_s28 + $0x2c0] sm:$0xff]  ;;  %v352_v25 = vld [vmem:[%s12174_s28 + $0x478] sm:$0xff] }
  0x17   : > { %8873 = vmatpush1.bf16.msra.mxu1 %v8872_v13  ;;  %v12199_v22 = vpack.c.bf16 %v347_v20, %v345_v19  ;;  %8427 = vmatprep.subr.bf16.mxu0 %v12194_v17  ;;  %v8876_v26 = vpack.c.bf16 %v1356_v23, %v1354_v21  ;;  %v12205_v27 = vpack.c.bf16 %v352_v25, %v350_v24  ;;  %v1359_v28 = vld [vmem:[%s12174_s28 + $0x3a8] sm:$0xff]  ;;  %v349_v30 = vld [vmem:[%s12174_s28 + $0x390] sm:$0xff]  ;;  %v1358_v33 = vld [vmem:[%s12174_s28 + $0x3a0] sm:$0xff] }
  0x18   : > { %8875 = vmatprep.subr.bf16.mxu1 %v8874_v18  ;;  %v1361_v29 = vld [vmem:[%s12174_s28 + $0x488] sm:$0xff]  ;;  %v351_v32 = vld [vmem:[%s12174_s28 + $0x470] sm:$0xff]  ;;  %v1360_v34 = vld [vmem:[%s12174_s28 + $0x480] sm:$0xff] }
  0x19   : > { %v8878_v31 = vpack.c.bf16 %v1361_v29, %v1359_v28  ;;  %v12214_v35 = vpack.c.bf16 %v351_v32, %v349_v30  ;;  %v354_v36 = vld [vmem:[%s12174_s28 + $0x558] sm:$0xff]  ;;  %v1363_v38 = vld [vmem:[%s12174_s28 + $0x568] sm:$0xff]  ;;  %v8880_v39 = vpack.c.bf16 %v1360_v34, %v1358_v33  ;;  %v353_v42 = vld [vmem:[%s12174_s28 + $0x550] sm:$0xff] }
  0x1a   : > { %8429 = vmatpush1.bf16.msra.mxu0 %v12199_v22  ;;  %v356_v37 = vld [vmem:[%s12174_s28 + $0x638] sm:$0xff]  ;;  %v1365_v41 = vld [vmem:[%s12174_s28 + $0x648] sm:$0xff]  ;;  %v355_v43 = vld [vmem:[%s12174_s28 + $0x630] sm:$0xff] }
  0x1b   : > { %8877 = vmatpush1.bf16.msra.mxu1 %v8876_v26  ;;  %8431 = vmatprep.subr.bf16.mxu0 %v12205_v27  ;;  %v12220_v40 = vpack.c.bf16 %v356_v37, %v354_v36  ;;  %v8882_v44 = vpack.c.bf16 %v1365_v41, %v1363_v38  ;;  %v1362_v45 = vld [vmem:[%s12174_s28 + $0x560] sm:$0xff]  ;;  %v358_v47 = vld [vmem:[%s12174_s28 + $0x718] sm:$0xff]  ;;  %v1367_v49 = vld [vmem:[%s12174_s28 + $0x728] sm:$0xff]  ;;  %v12232_v51 = vpack.c.bf16 %v355_v43, %v353_v42 }
  0x1c   : > { %8879 = vmatprep.subr.bf16.mxu1 %v8878_v31  ;;  %v1364_v46 = vld [vmem:[%s12174_s28 + $0x640] sm:$0xff]  ;;  %v360_v48 = vld [vmem:[%s12174_s28 + $0x7f8] sm:$0xff]  ;;  %v1369_v50 = vld [vmem:[%s12174_s28 + $0x808] sm:$0xff] }
  0x1d   : > { %v8884_v52 = vpack.c.bf16 %v1364_v46, %v1362_v45  ;;  %v12235_v53 = vpack.c.bf16 %v360_v48, %v358_v47  ;;  %v357_v54 = vld [vmem:[%s12174_s28 + $0x710] sm:$0xff]  ;;  %v1366_v56 = vld [vmem:[%s12174_s28 + $0x720] sm:$0xff]  ;;  %v8886_v57 = vpack.c.bf16 %v1369_v50, %v1367_v49  ;;  %v362_v59 = vld [vmem:[%s12174_s28 + $0x8d8] sm:$0xff] }
  0x1e   : > { %8433 = vmatpush1.bf16.msra.mxu0 %v12214_v35  ;;  %v359_v55 = vld [vmem:[%s12174_s28 + $0x7f0] sm:$0xff]  ;;  %v1368_v58 = vld [vmem:[%s12174_s28 + $0x800] sm:$0xff]  ;;  %v364_v60 = vld [vmem:[%s12174_s28 + $0x9b8] sm:$0xff] }
  0x1f   : > { %8881 = vmatpush1.bf16.msra.mxu1 %v8880_v39  ;;  %8435 = vmatprep.subr.bf16.mxu0 %v12220_v40  ;;  %v1371_v61 = vld [vmem:[%s12174_s28 + $0x8e8] sm:$0xff]  ;;  %v12246_v63 = vpack.c.bf16 %v359_v55, %v357_v54  ;;  %v8888_v0 = vpack.c.bf16 %v1368_v58, %v1366_v56  ;;  %v12249_v1 = vpack.c.bf16 %v364_v60, %v362_v59  ;;  %v361_v2 = vld [vmem:[%s12174_s28 + $0x8d0] sm:$0xff]  ;;  %v1370_v5 = vld [vmem:[%s12174_s28 + $0x8e0] sm:$0xff] }
  0x20   : > { %8883 = vmatprep.subr.bf16.mxu1 %v8882_v44  ;;  %v1373_v62 = vld [vmem:[%s12174_s28 + $0x9c8] sm:$0xff]  ;;  %v363_v3 = vld [vmem:[%s12174_s28 + $0x9b0] sm:$0xff]  ;;  %v1372_v7 = vld [vmem:[%s12174_s28 + $0x9c0] sm:$0xff] }
  0x21   : > { %v8890_v6 = vpack.c.bf16 %v1373_v62, %v1371_v61  ;;  %v366_v8 = vld [vmem:[%s12174_s28 + $0xa98] sm:$0xff]  ;;  %v1375_v11 = vld [vmem:[%s12174_s28 + $0xaa8] sm:$0xff]  ;;  %v12260_v13 = vpack.c.bf16 %v363_v3, %v361_v2  ;;  %v8892_v14 = vpack.c.bf16 %v1372_v7, %v1370_v5  ;;  %v365_v16 = vld [vmem:[%s12174_s28 + $0xa90] sm:$0xff] }
  0x22   : > { %8437 = vmatpush1.bf16.msra.mxu0 %v12232_v51  ;;  %v368_v10 = vld [vmem:[%s12174_s28 + $0xb78] sm:$0xff]  ;;  %v1377_v12 = vld [vmem:[%s12174_s28 + $0xb88] sm:$0xff]  ;;  %v367_v18 = vld [vmem:[%s12174_s28 + $0xb70] sm:$0xff] }
  0x23   : > { %8885 = vmatpush1.bf16.msra.mxu1 %v8884_v52  ;;  %8439 = vmatprep.subr.bf16.mxu0 %v12235_v53  ;;  %v12263_v15 = vpack.c.bf16 %v368_v10, %v366_v8  ;;  %v1374_v19 = vld [vmem:[%s12174_s28 + $0xaa0] sm:$0xff]  ;;  %v8894_v20 = vpack.c.bf16 %v1377_v12, %v1375_v11  ;;  %v370_v23 = vld [vmem:[%s12174_s28 + $0xc58] sm:$0xff]  ;;  %v1379_v25 = vld [vmem:[%s12174_s28 + $0xc68] sm:$0xff]  ;;  %v12274_v28 = vpack.c.bf16 %v367_v18, %v365_v16 }
  0x24   : > { %8887 = vmatprep.subr.bf16.mxu1 %v8886_v57  ;;  %v1376_v21 = vld [vmem:[%s12174_s28 + $0xb80] sm:$0xff]  ;;  %v372_v24 = vld [vmem:[%s12174_s28 + $0xd38] sm:$0xff]  ;;  %v1381_v26 = vld [vmem:[%s12174_s28 + $0xd48] sm:$0xff] }
  0x25   : > { %v8896_v29 = vpack.c.bf16 %v1376_v21, %v1374_v19  ;;  %v12277_v30 = vpack.c.bf16 %v372_v24, %v370_v23  ;;  %v369_v31 = vld [vmem:[%s12174_s28 + $0xc50] sm:$0xff]  ;;  %v1378_v33 = vld [vmem:[%s12174_s28 + $0xc60] sm:$0xff]  ;;  %v8898_v34 = vpack.c.bf16 %v1381_v26, %v1379_v25  ;;  %v374_v37 = vld [vmem:[%s12174_s28 + $0xe18] sm:$0xff] }
  0x26   : > { %8441 = vmatpush1.bf16.msra.mxu0 %v12246_v63  ;;  %v371_v32 = vld [vmem:[%s12174_s28 + $0xd30] sm:$0xff]  ;;  %v1380_v36 = vld [vmem:[%s12174_s28 + $0xd40] sm:$0xff]  ;;  %v376_v38 = vld [vmem:[%s12174_s28 + $0xef8] sm:$0xff] }
  0x27   : > { %8889 = vmatpush1.bf16.msra.mxu1 %v8888_v0  ;;  %8443 = vmatprep.subr.bf16.mxu0 %v12249_v1  ;;  %v1383_v39 = vld [vmem:[%s12174_s28 + $0xe28] sm:$0xff]  ;;  %v12288_v42 = vpack.c.bf16 %v371_v32, %v369_v31  ;;  %v8900_v43 = vpack.c.bf16 %v1380_v36, %v1378_v33  ;;  %v12291_v44 = vpack.c.bf16 %v376_v38, %v374_v37  ;;  %v373_v45 = vld [vmem:[%s12174_s28 + $0xe10] sm:$0xff]  ;;  %v1382_v47 = vld [vmem:[%s12174_s28 + $0xe20] sm:$0xff] }
  0x28   : > { %8891 = vmatprep.subr.bf16.mxu1 %v8890_v6  ;;  %v1385_v41 = vld [vmem:[%s12174_s28 + $0xf08] sm:$0xff]  ;;  %v375_v46 = vld [vmem:[%s12174_s28 + $0xef0] sm:$0xff]  ;;  %v1384_v49 = vld [vmem:[%s12174_s28 + $0xf00] sm:$0xff] }
  0x29   : > { %v8902_v48 = vpack.c.bf16 %v1385_v41, %v1383_v39  ;;  %v378_v50 = vld [vmem:[%s12174_s28 + $0xfd8] sm:$0xff]  ;;  %v1387_v54 = vld [vmem:[%s12174_s28 + $0xfe8] sm:$0xff]  ;;  %v12302_v56 = vpack.c.bf16 %v375_v46, %v373_v45  ;;  %v8904_v57 = vpack.c.bf16 %v1384_v49, %v1382_v47  ;;  %v377_v59 = vld [vmem:[%s12174_s28 + $0xfd0] sm:$0xff] }
  0x2a   : > { %8445 = vmatpush1.bf16.msra.mxu0 %v12260_v13  ;;  %v380_v52 = vld [vmem:[%s12174_s28 + $0x10b8] sm:$0xff]  ;;  %v1389_v55 = vld [vmem:[%s12174_s28 + $0x10c8] sm:$0xff]  ;;  %v379_v60 = vld [vmem:[%s12174_s28 + $0x10b0] sm:$0xff] }
  0x2b   : > { %8893 = vmatpush1.bf16.msra.mxu1 %v8892_v14  ;;  %8447 = vmatprep.subr.bf16.mxu0 %v12263_v15  ;;  %v12305_v58 = vpack.c.bf16 %v380_v52, %v378_v50  ;;  %v1386_v61 = vld [vmem:[%s12174_s28 + $0xfe0] sm:$0xff]  ;;  %v8906_v62 = vpack.c.bf16 %v1389_v55, %v1387_v54  ;;  %v382_v2 = vld [vmem:[%s12174_s28 + $0x1198] sm:$0xff]  ;;  %v1391_v5 = vld [vmem:[%s12174_s28 + $0x11a8] sm:$0xff]  ;;  %v12316_v7 = vpack.c.bf16 %v379_v60, %v377_v59 }
  0x2c   : > { %8895 = vmatprep.subr.bf16.mxu1 %v8894_v20  ;;  %v1388_v0 = vld [vmem:[%s12174_s28 + $0x10c0] sm:$0xff]  ;;  %v384_v3 = vld [vmem:[%s12174_s28 + $0x1278] sm:$0xff]  ;;  %v1393_v6 = vld [vmem:[%s12174_s28 + $0x1288] sm:$0xff] }
  0x2d   : > { %v8908_v8 = vpack.c.bf16 %v1388_v0, %v1386_v61  ;;  %v12319_v10 = vpack.c.bf16 %v384_v3, %v382_v2  ;;  %v381_v11 = vld [vmem:[%s12174_s28 + $0x1190] sm:$0xff]  ;;  %v1390_v14 = vld [vmem:[%s12174_s28 + $0x11a0] sm:$0xff]  ;;  %v8910_v16 = vpack.c.bf16 %v1393_v6, %v1391_v5  ;;  %v386_v19 = vld [vmem:[%s12174_s28 + $0x1358] sm:$0xff] }
  0x2e   : > { %8449 = vmatpush1.bf16.msra.mxu0 %v12274_v28  ;;  %v383_v12 = vld [vmem:[%s12174_s28 + $0x1270] sm:$0xff]  ;;  %v1392_v18 = vld [vmem:[%s12174_s28 + $0x1280] sm:$0xff]  ;;  %v388_v20 = vld [vmem:[%s12174_s28 + $0x1438] sm:$0xff] }
  0x2f   : > { %8897 = vmatpush1.bf16.msra.mxu1 %v8896_v29  ;;  %8451 = vmatprep.subr.bf16.mxu0 %v12277_v30  ;;  %v1395_v21 = vld [vmem:[%s12174_s28 + $0x1368] sm:$0xff]  ;;  %v12330_v24 = vpack.c.bf16 %v383_v12, %v381_v11  ;;  %v8912_v25 = vpack.c.bf16 %v1392_v18, %v1390_v14  ;;  %v12333_v26 = vpack.c.bf16 %v388_v20, %v386_v19  ;;  %v385_v29 = vld [vmem:[%s12174_s28 + $0x1350] sm:$0xff]  ;;  %v1394_v32 = vld [vmem:[%s12174_s28 + $0x1360] sm:$0xff] }
  0x30   : > { %8899 = vmatprep.subr.bf16.mxu1 %v8898_v34  ;;  %v1397_v23 = vld [vmem:[%s12174_s28 + $0x1448] sm:$0xff]  ;;  %v387_v31 = vld [vmem:[%s12174_s28 + $0x1430] sm:$0xff]  ;;  %v1396_v34 = vld [vmem:[%s12174_s28 + $0x1440] sm:$0xff] }
  0x31   : > { %v8914_v33 = vpack.c.bf16 %v1397_v23, %v1395_v21  ;;  %v390_v36 = vld [vmem:[%s12174_s28 + $0x1518] sm:$0xff]  ;;  %v1399_v38 = vld [vmem:[%s12174_s28 + $0x1528] sm:$0xff]  ;;  %v12344_v41 = vpack.c.bf16 %v387_v31, %v385_v29  ;;  %v389_v46 = vld [vmem:[%s12174_s28 + $0x1510] sm:$0xff] }
  0x32   : > { %8453 = vmatpush1.bf16.msra.mxu0 %v12288_v42  ;;  %v392_v37 = vld [vmem:[%s12174_s28 + $0x15f8] sm:$0xff]  ;;  %v1401_v39 = vld [vmem:[%s12174_s28 + $0x1608] sm:$0xff]  ;;  %v391_v47 = vld [vmem:[%s12174_s28 + $0x15f0] sm:$0xff] }
  0x33   : > { %8901 = vmatpush1.bf16.msra.mxu1 %v8900_v43  ;;  %8455 = vmatprep.subr.bf16.mxu0 %v12291_v44  ;;  %v8916_v43 = vpack.c.bf16 %v1396_v34, %v1394_v32  ;;  %v12347_v45 = vpack.c.bf16 %v392_v37, %v390_v36  ;;  %v8918_v49 = vpack.c.bf16 %v1401_v39, %v1399_v38  ;;  %v1400_v50 = vld [vmem:[%s12174_s28 + $0x1600] sm:$0xff]  ;;  %v394_v52 = vld [vmem:[%s12174_s28 + $0x16d8] sm:$0xff]  ;;  %v1403_v55 = vld [vmem:[%s12174_s28 + $0x16e8] sm:$0xff] }
  0x34   : > { %8903 = vmatprep.subr.bf16.mxu1 %v8902_v48  ;;  %v1398_v48 = vld [vmem:[%s12174_s28 + $0x1520] sm:$0xff]  ;;  %v396_v54 = vld [vmem:[%s12174_s28 + $0x17b8] sm:$0xff]  ;;  %v12358_v59 = vpack.c.bf16 %v391_v47, %v389_v46  ;;  %v395_v0 = vld [vmem:[%s12174_s28 + $0x17b0] sm:$0xff] }
  0x35   : > { %v8920_v60 = vpack.c.bf16 %v1400_v50, %v1398_v48  ;;  %v12361_v61 = vpack.c.bf16 %v396_v54, %v394_v52  ;;  %v1402_v2 = vld [vmem:[%s12174_s28 + $0x16e0] sm:$0xff]  ;;  %v398_v6 = vld [vmem:[%s12174_s28 + $0x1898] sm:$0xff]  ;;  %v1407_v11 = vld [vmem:[%s12174_s28 + $0x18a8] sm:$0xff] }
  0x36   : > { %8457 = vmatpush1.bf16.msra.mxu0 %v12302_v56  ;;  %v1404_v5 = vld [vmem:[%s12174_s28 + $0x17c0] sm:$0xff]  ;;  %v1409_v12 = vld [vmem:[%s12174_s28 + $0x1988] sm:$0xff]  ;;  %v397_v19 = vld [vmem:[%s12174_s28 + $0x1890] sm:$0xff] }
  0x37   : > { %8905 = vmatpush1.bf16.msra.mxu1 %v8904_v57  ;;  %8459 = vmatprep.subr.bf16.mxu0 %v12305_v58  ;;  %v1405_v57 = vld [vmem:[%s12174_s28 + $0x17c8] sm:$0xff]  ;;  %v399_v20 = vld [vmem:[%s12174_s28 + $0x1970] sm:$0xff]  ;;  %v1406_v21 = vld [vmem:[%s12174_s28 + $0x18a0] sm:$0xff]  ;;  %v8926_v23 = vpack.c.bf16 %v1409_v12, %v1407_v11 }
  0x38   : > { %8907 = vmatprep.subr.bf16.mxu1 %v8906_v62  ;;  %v393_v62 = vld [vmem:[%s12174_s28 + $0x16d0] sm:$0xff]  ;;  %v8922_v3 = vpack.c.bf16 %v1405_v57, %v1403_v55  ;;  %v402_v29 = vld [vmem:[%s12174_s28 + $0x1a58] sm:$0xff]  ;;  %v1411_v32 = vld [vmem:[%s12174_s28 + $0x1a68] sm:$0xff]  ;;  %v12386_v34 = vpack.c.bf16 %v399_v20, %v397_v19 }
  0x39   : > { %v12372_v14 = vpack.c.bf16 %v395_v0, %v393_v62  ;;  %v404_v31 = vld [vmem:[%s12174_s28 + $0x1b38] sm:$0xff]  ;;  %v401_v38 = vld [vmem:[%s12174_s28 + $0x1a50] sm:$0xff]  ;;  %v1412_v47 = vld [vmem:[%s12174_s28 + $0x1b40] sm:$0xff] }
  0x3a   : > { %8461 = vmatpush1.bf16.msra.mxu0 %v12316_v7  ;;  %v12389_v37 = vpack.c.bf16 %v404_v31, %v402_v29  ;;  %v403_v39 = vld [vmem:[%s12174_s28 + $0x1b30] sm:$0xff]  ;;  %v276_v48 = vld [vmem:[%s12174_s28 + $0x8] sm:$0xff]  ;;  %v275_v55 = vld [vmem:[%s12174_s28] sm:$0xff] }
  0x3b   : > { %8909 = vmatpush1.bf16.msra.mxu1 %v8908_v8  ;;  %8463 = vmatprep.subr.bf16.mxu0 %v12319_v10  ;;  %v400_v8 = vld [vmem:[%s12174_s28 + $0x1978] sm:$0xff]  ;;  %v12398_v50 = vpack.c.bf16 %v403_v39, %v401_v38  ;;  %v277_v57 = vld [vmem:[%s12174_s28 + $0xe0] sm:$0xff]  ;;  %v282_v62 = vld [vmem:[%s12174_s28 + $0x2a8] sm:$0xff] }
  0x3c   : > { %8911 = vmatprep.subr.bf16.mxu1 %v8910_v16  ;;  %v8924_v16 = vpack.c.bf16 %v1404_v5, %v1402_v2  ;;  %v12375_v18 = vpack.c.bf16 %v400_v8, %v398_v6  ;;  %v8323_v0 = vld [vmem:[%s17282_s1 + $0x10] sm:$0xff]  ;;  %v8488_v2 = vpack.c.bf16 %v277_v57, %v275_v55  ;;  %v279_v5 = vld [vmem:[%s12174_s28 + $0x1c0] sm:$0xff]  ;;  %v284_v8 = vld [vmem:[%s12174_s28 + $0x388] sm:$0xff] }
  0x3d   : > { %v281_v6 = vld [vmem:[%s12174_s28 + $0x2a0] sm:$0xff]  ;;  %v286_v11 = vld [vmem:[%s12174_s28 + $0x468] sm:$0xff] }
  0x3e   : > { %8465 = vmatpush1.bf16.msra.mxu0 %v12330_v24  ;;  %v340_v12 = vld [vmem:[%s17282_s1 + $0x8] sm:$0xff]  ;;  %v8494_v19 = vpack.c.bf16 %v286_v11, %v284_v8  ;;  %v283_v20 = vld [vmem:[%s12174_s28 + $0x380] sm:$0xff] }
  0x3f   : > { %8913 = vmatpush1.bf16.msra.mxu1 %v8912_v25  ;;  %8467 = vmatprep.subr.bf16.mxu0 %v12333_v26  ;;  %v1408_v25 = vld [vmem:[%s12174_s28 + $0x1980] sm:$0xff]  ;;  %v296_v39 = vld [vmem:[%s12174_s28 + $0x8c8] sm:$0xff] }
  0x40   : > { %8915 = vmatprep.subr.bf16.mxu1 %v8914_v33  ;;  %v1413_v33 = vld [vmem:[%s12174_s28 + $0x1b48] sm:$0xff]  ;;  %v8928_v36 = vpack.c.bf16 %v1408_v25, %v1406_v21  ;;  %v287_v29 = vld [vmem:[%s12174_s28 + $0x540] sm:$0xff] }
  0x41   : > { %v8930_v46 = vpack.c.bf16 %v1413_v33, %v1411_v32  ;;  %v288_v21 = vld [vmem:[%s12174_s28 + $0x548] sm:$0xff]  ;;  %v289_v31 = vld [vmem:[%s12174_s28 + $0x620] sm:$0xff] }
  0x42   : > { %8469 = vmatpush1.bf16.msra.mxu0 %v12344_v41  ;;  %v292_v32 = vld [vmem:[%s12174_s28 + $0x708] sm:$0xff]  ;;  %v8500_v33 = vpack.c.bf16 %v289_v31, %v287_v29  ;;  %v293_v38 = vld [vmem:[%s12174_s28 + $0x7e0] sm:$0xff] }
  0x43   : > { %8917 = vmatpush1.bf16.msra.mxu1 %v8916_v43  ;;  %8471 = vmatprep.subr.bf16.mxu0 %v12347_v45  ;;  %v1410_v43 = vld [vmem:[%s12174_s28 + $0x1a60] sm:$0xff]  ;;  %v304_v55 = vld [vmem:[%s12174_s28 + $0xc48] sm:$0xff] }
  0x44   : > { %8919 = vmatprep.subr.bf16.mxu1 %v8918_v49  ;;  %v278_v49 = vld [vmem:[%s12174_s28 + $0xe8] sm:$0xff]  ;;  %v8932_v52 = vpack.c.bf16 %v1412_v47, %v1410_v43  ;;  %v297_v47 = vld [vmem:[%s12174_s28 + $0x9a0] sm:$0xff] }
  0x45   : > { %v8486_v54 = vpack.c.bf16 %v278_v49, %v276_v48  ;;  %v298_v43 = vld [vmem:[%s12174_s28 + $0x9a8] sm:$0xff]  ;;  %v311_v11 = vld [vmem:[%s12174_s28 + $0xfc0] sm:$0xff] }
  0x46   : > { %8473 = vmatpush1.bf16.msra.mxu0 %v12358_v59  ;;  %v300_v48 = vld [vmem:[%s12174_s28 + $0xa88] sm:$0xff] }
  0x47   : > { %8921 = vmatpush1.bf16.msra.mxu1 %v8920_v60  ;;  %8475 = vmatprep.subr.bf16.mxu0 %v12361_v61  ;;  %v280_v60 = vld [vmem:[%s12174_s28 + $0x1c8] sm:$0xff] }
  0x48   : > { %8923 = vmatprep.subr.bf16.mxu1 %v8922_v3  ;;  %v8490_v3 = vpack.c.bf16 %v282_v62, %v280_v60  ;;  %v302_v49 = vld [vmem:[%s12174_s28 + $0xb68] sm:$0xff]  ;;  %v303_v60 = vld [vmem:[%s12174_s28 + $0xc40] sm:$0xff] }
  0x49   : > { %v306_v57 = vld [vmem:[%s12174_s28 + $0xd28] sm:$0xff]  ;;  %v305_v62 = vld [vmem:[%s12174_s28 + $0xd20] sm:$0xff] }
  0x4a   : > { %8477 = vmatpush1.bf16.msra.mxu0 %v12372_v14  ;;  %v314_v8 = vld [vmem:[%s12174_s28 + $0x10a8] sm:$0xff] }
  0x4b   : > { %8925 = vmatpush1.bf16.msra.mxu1 %v8924_v16  ;;  %8479 = vmatprep.subr.bf16.mxu0 %v12375_v18  ;;  %v8492_v16 = vpack.c.bf16 %v281_v6, %v279_v5  ;;  %v309_v5 = vld [vmem:[%s12174_s28 + $0xee0] sm:$0xff]  ;;  %v312_v6 = vld [vmem:[%s12174_s28 + $0xfc8] sm:$0xff] }
  0x4c   : > { %8927 = vmatprep.subr.bf16.mxu1 %v8926_v23  ;;  %v290_v23 = vld [vmem:[%s12174_s28 + $0x628] sm:$0xff] }
  0x4d   : > { %v324_v29 = vld [vmem:[%s12174_s28 + $0x1508] sm:$0xff] }
  0x4e   : > { %8481 = vmatpush1.bf16.msra.mxu0 %v12386_v34  ;;  %v326_v31 = vld [vmem:[%s12174_s28 + $0x15e8] sm:$0xff] }
  0x4f   : > { %8929 = vmatpush1.bf16.msra.mxu1 %v8928_v36  ;;  %8483 = vmatprep.subr.bf16.mxu0 %v12389_v37  ;;  %v291_v36 = vld [vmem:[%s12174_s28 + $0x700] sm:$0xff] }
  0x50   : > { %8931 = vmatprep.subr.bf16.mxu1 %v8930_v46  ;;  %v295_v46 = vld [vmem:[%s12174_s28 + $0x8c0] sm:$0xff] }
  0x52   : > { %8485 = vmatpush1.bf16.msra.mxu0 %v12398_v50 }
  0x53   : > { %8933 = vmatpush1.bf16.msra.mxu1 %v8932_v52  ;;  %8487 = vmatprep.subr.bf16.mxu0 %v8486_v54  ;;  %v299_v52 = vld [vmem:[%s12174_s28 + $0xa80] sm:$0xff] }
  0x54   : > { %8935 = vmatprep.subr.bf16.mxu1 %v12179_v4  ;;  %v285_v4 = vld [vmem:[%s12174_s28 + $0x460] sm:$0xff] }
  0x55   : > { %473 = vmatmul.mubr.f32.vlgmr.msra.gmra.mrb[0].mxu0 %v8323_v0  ;;  %v8496_v25 = vpack.c.bf16 %v285_v4, %v283_v20  ;;  %v301_v54 = vld [vmem:[%s12174_s28 + $0xb60] sm:$0xff] }
  0x56   : > { %8489 = vmatpush1.bf16.msra.mxu0 %v8488_v2  ;;  %1481 = vmatmul.mubr.f32.vlgmr.msra.gmra.mrb[0].mxu1 %v8323_v0  ;;  %v308_v0 = vld [vmem:[%s12174_s28 + $0xe08] sm:$0xff]  ;;  %v315_v20 = vld [vmem:[%s12174_s28 + $0x1180] sm:$0xff] }
  0x57   : > { %8937 = vmatpush1.bf16.msra.mxu1 %v12184_v9  ;;  %8491 = vmatprep.subr.bf16.mxu0 %v8490_v3  ;;  %v8498_v9 = vpack.c.bf16 %v290_v23, %v288_v21  ;;  %v310_v2 = vld [vmem:[%s12174_s28 + $0xee8] sm:$0xff]  ;;  %v307_v3 = vld [vmem:[%s12174_s28 + $0xe00] sm:$0xff] }
  0x58   : > { %8939 = vmatprep.subr.bf16.mxu1 %v12194_v17  ;;  %543 = vmatprep.mubr.f32.mxu0 %v340_v12  ;;  %v294_v17 = vld [vmem:[%s12174_s28 + $0x7e8] sm:$0xff]  ;;  %v317_v4 = vld [vmem:[%s12174_s28 + $0x1260] sm:$0xff] }
  0x59   : > { %1551 = vmatprep.mubr.f32.mxu1 %v340_v12  ;;  %v313_v12 = vld [vmem:[%s12174_s28 + $0x10a0] sm:$0xff]  ;;  %v320_v21 = vld [vmem:[%s12174_s28 + $0x1348] sm:$0xff] }
  0x5a   : > { %8493 = vmatpush1.bf16.msra.mxu0 %v8492_v16  ;;  %v316_v16 = vld [vmem:[%s12174_s28 + $0x1188] sm:$0xff] }
  0x5b   : > { %8941 = vmatpush1.bf16.msra.mxu1 %v12199_v22  ;;  %8495 = vmatprep.subr.bf16.mxu0 %v8494_v19  ;;  %v8502_v22 = vpack.c.bf16 %v294_v17, %v292_v32  ;;  %v318_v19 = vld [vmem:[%s12174_s28 + $0x1268] sm:$0xff]  ;;  %v323_v32 = vld [vmem:[%s12174_s28 + $0x1500] sm:$0xff] }
  0x5c   : > { %8943 = vmatprep.subr.bf16.mxu1 %v12205_v27  ;;  %v8504_v27 = vpack.c.bf16 %v293_v38, %v291_v36  ;;  %v322_v23 = vld [vmem:[%s12174_s28 + $0x1428] sm:$0xff]  ;;  %v325_v17 = vld [vmem:[%s12174_s28 + $0x15e0] sm:$0xff] }
  0x5d   : > { %v327_v36 = vld [vmem:[%s12174_s28 + $0x16c0] sm:$0xff] }
  0x5e   : > { %8497 = vmatpush1.bf16.msra.mxu0 %v8496_v25  ;;  %v319_v25 = vld [vmem:[%s12174_s28 + $0x1340] sm:$0xff] }
  0x5f   : > { %8945 = vmatpush1.bf16.msra.mxu1 %v12214_v35  ;;  %8499 = vmatprep.subr.bf16.mxu0 %v8498_v9  ;;  %v8506_v35 = vpack.c.bf16 %v298_v43, %v296_v39  ;;  %v321_v9 = vld [vmem:[%s12174_s28 + $0x1420] sm:$0xff]  ;;  %v332_v39 = vld [vmem:[%s12174_s28 + $0x1888] sm:$0xff] }
  0x60   : > { %8947 = vmatprep.subr.bf16.mxu1 %v12220_v40  ;;  %v8508_v40 = vpack.c.bf16 %v297_v47, %v295_v46  ;;  %v329_v38 = vld [vmem:[%s12174_s28 + $0x17a0] sm:$0xff]  ;;  %v334_v43 = vld [vmem:[%s12174_s28 + $0x1968] sm:$0xff] }
  0x61   : > { %v336_v46 = vld [vmem:[%s12174_s28 + $0x1a48] sm:$0xff] }
  0x62   : > { %8501 = vmatpush1.bf16.msra.mxu0 %v8500_v33  ;;  %v328_v33 = vld [vmem:[%s12174_s28 + $0x16c8] sm:$0xff] }
  0x63   : > { %8949 = vmatpush1.bf16.msra.mxu1 %v12232_v51  ;;  %8503 = vmatprep.subr.bf16.mxu0 %v8502_v22  ;;  %v8510_v51 = vpack.c.bf16 %v302_v49, %v300_v48  ;;  %v330_v22 = vld [vmem:[%s12174_s28 + $0x17a8] sm:$0xff]  ;;  %v335_v48 = vld [vmem:[%s12174_s28 + $0x1a40] sm:$0xff] }
  0x64   : > { %8951 = vmatprep.subr.bf16.mxu1 %v12235_v53  ;;  %v8512_v53 = vpack.c.bf16 %v301_v54, %v299_v52  ;;  %v337_v49 = vld [vmem:[%s12174_s28 + $0x1b20] sm:$0xff]  ;;  %v1561_v52 = vld [vmem:[%s12174_s28 + $0x118] sm:$0xff] }
  0x65   : > { %v8548_v54 = vpack.c.bf16 %v337_v49, %v335_v48  ;;  %v573_v48 = vld [vmem:[%s12174_s28 + $0x9c8] sm:$0xff]  ;;  %v1579_v49 = vld [vmem:[%s12174_s28 + $0x8f8] sm:$0xff] }
  0x66   : > { %8505 = vmatpush1.bf16.msra.mxu0 %v8504_v27  ;;  %v331_v27 = vld [vmem:[%s12174_s28 + $0x1880] sm:$0xff] }
  0x67   : > { %8953 = vmatpush1.bf16.msra.mxu1 %v12246_v63  ;;  %8507 = vmatprep.subr.bf16.mxu0 %v8506_v35  ;;  %v8514_v63 = vpack.c.bf16 %v306_v57, %v304_v55  ;;  %v333_v35 = vld [vmem:[%s12174_s28 + $0x1960] sm:$0xff] }
  0x68   : > { %8955 = vmatprep.subr.bf16.mxu1 %v12249_v1  ;;  %v8516_v1 = vpack.c.bf16 %v305_v62, %v303_v60  ;;  %v8544_v47 = vpack.c.bf16 %v333_v35, %v331_v27  ;;  %v550_v55 = vld [vmem:[%s12174_s28 + $0x20] sm:$0xff]  ;;  %v555_v60 = vld [vmem:[%s12174_s28 + $0x1e8] sm:$0xff] }
  0x69   : > { %v552_v57 = vld [vmem:[%s12174_s28 + $0x100] sm:$0xff]  ;;  %v557_v62 = vld [vmem:[%s12174_s28 + $0x2c8] sm:$0xff] }
  0x6a   : > { %8509 = vmatpush1.bf16.msra.mxu0 %v8508_v40  ;;  %v551_v40 = vld [vmem:[%s12174_s28 + $0x28] sm:$0xff]  ;;  %v566_v27 = vld [vmem:[%s12174_s28 + $0x720] sm:$0xff] }
  0x6b   : > { %8957 = vmatpush1.bf16.msra.mxu1 %v12260_v13  ;;  %8511 = vmatprep.subr.bf16.mxu0 %v8510_v51  ;;  %v8518_v13 = vpack.c.bf16 %v310_v2, %v308_v0  ;;  %v1559_v51 = vld [vmem:[%s12174_s28 + $0x38] sm:$0xff]  ;;  %v339_v2 = vld [vmem:[%s17282_s1] sm:$0xff] }
  0x6c   : > { %8959 = vmatprep.subr.bf16.mxu1 %v12263_v15  ;;  %v8520_v15 = vpack.c.bf16 %v309_v5, %v307_v3  ;;  %v1563_v0 = vld [vmem:[%s12174_s28 + $0x1f8] sm:$0xff]  ;;  %v554_v3 = vld [vmem:[%s12174_s28 + $0x1e0] sm:$0xff] }
  0x6d   : > { %v556_v5 = vld [vmem:[%s12174_s28 + $0x2c0] sm:$0xff] }
  0x6e   : > { %8513 = vmatpush1.bf16.msra.mxu0 %v8512_v53  ;;  %v1558_v53 = vld [vmem:[%s12174_s28 + $0x30] sm:$0xff]  ;;  %v568_v35 = vld [vmem:[%s12174_s28 + $0x800] sm:$0xff] }
  0x6f   : > { %8961 = vmatpush1.bf16.msra.mxu1 %v12274_v28  ;;  %8515 = vmatprep.subr.bf16.mxu0 %v8514_v63  ;;  %v8522_v28 = vpack.c.bf16 %v314_v8, %v312_v6  ;;  %v1560_v63 = vld [vmem:[%s12174_s28 + $0x110] sm:$0xff] }
  0x70   : > { %8963 = vmatprep.subr.bf16.mxu1 %v12277_v30  ;;  %v8524_v30 = vpack.c.bf16 %v313_v12, %v311_v11  ;;  %v1562_v6 = vld [vmem:[%s12174_s28 + $0x1f0] sm:$0xff]  ;;  %v561_v11 = vld [vmem:[%s12174_s28 + $0x488] sm:$0xff]  ;;  %v1569_v12 = vld [vmem:[%s12174_s28 + $0x498] sm:$0xff] }
  0x72   : > { %8517 = vmatpush1.bf16.msra.mxu0 %v8516_v1  ;;  %v8552_v1 = vpack.c.bf16 %v552_v57, %v550_v55  ;;  %v1578_v55 = vld [vmem:[%s12174_s28 + $0x8f0] sm:$0xff] }
  0x73   : > { %8965 = vmatpush1.bf16.msra.mxu1 %v12288_v42  ;;  %8519 = vmatprep.subr.bf16.mxu0 %v8518_v13  ;;  %v8526_v42 = vpack.c.bf16 %v318_v19, %v316_v16  ;;  %v8554_v13 = vpack.c.bf16 %v557_v62, %v555_v60  ;;  %v8326_v16 = vld [vmem:[%s17282_s1 + $0x28] sm:$0xff]  ;;  %v8556_v19 = vpack.c.bf16 %v556_v5, %v554_v3  ;;  %v1583_v62 = vld [vmem:[%s12174_s28 + $0xab8] sm:$0xff]  ;;  %v576_v3 = vld [vmem:[%s12174_s28 + $0xb80] sm:$0xff] }
  0x74   : > { %8967 = vmatprep.subr.bf16.mxu1 %v12291_v44  ;;  %v8528_v44 = vpack.c.bf16 %v317_v4, %v315_v20  ;;  %v558_v20 = vld [vmem:[%s12174_s28 + $0x3a0] sm:$0xff]  ;;  %v577_v60 = vld [vmem:[%s12174_s28 + $0xb88] sm:$0xff]  ;;  %v1582_v5 = vld [vmem:[%s12174_s28 + $0xab0] sm:$0xff] }
  0x75   : > { %v560_v4 = vld [vmem:[%s12174_s28 + $0x480] sm:$0xff] }
  0x76   : > { %8521 = vmatpush1.bf16.msra.mxu0 %v8520_v15  ;;  %v1564_v15 = vld [vmem:[%s12174_s28 + $0x2d0] sm:$0xff] }
  0x77   : > { %8969 = vmatpush1.bf16.msra.mxu1 %v12302_v56  ;;  %8523 = vmatprep.subr.bf16.mxu0 %v8522_v28  ;;  %v8530_v56 = vpack.c.bf16 %v322_v23, %v320_v21  ;;  %v559_v28 = vld [vmem:[%s12174_s28 + $0x3a8] sm:$0xff]  ;;  %v1566_v21 = vld [vmem:[%s12174_s28 + $0x3b0] sm:$0xff] }
  0x78   : > { %8971 = vmatprep.subr.bf16.mxu1 %v12305_v58  ;;  %v8532_v58 = vpack.c.bf16 %v321_v9, %v319_v25  ;;  %v565_v25 = vld [vmem:[%s12174_s28 + $0x648] sm:$0xff]  ;;  %v1571_v9 = vld [vmem:[%s12174_s28 + $0x578] sm:$0xff] }
  0x7a   : > { %8525 = vmatpush1.bf16.msra.mxu0 %v8524_v30  ;;  %v12536_v30 = vpack.c.bf16 %v1564_v15, %v1562_v6  ;;  %v1584_v15 = vld [vmem:[%s12174_s28 + $0xb90] sm:$0xff] }
  0x7b   : > { %8973 = vmatpush1.bf16.msra.mxu1 %v12316_v7  ;;  %8527 = vmatprep.subr.bf16.mxu0 %v8526_v42  ;;  %v8534_v7 = vpack.c.bf16 %v326_v31, %v324_v29  ;;  %v8558_v42 = vpack.c.bf16 %v561_v11, %v559_v28  ;;  %v1573_v29 = vld [vmem:[%s12174_s28 + $0x658] sm:$0xff]  ;;  %v8560_v31 = vpack.c.bf16 %v560_v4, %v558_v20  ;;  %v579_v28 = vld [vmem:[%s12174_s28 + $0xc68] sm:$0xff]  ;;  %v578_v20 = vld [vmem:[%s12174_s28 + $0xc60] sm:$0xff] }
  0x7c   : > { %8975 = vmatprep.subr.bf16.mxu1 %v12319_v10  ;;  %v8536_v10 = vpack.c.bf16 %v325_v17, %v323_v32  ;;  %v562_v32 = vld [vmem:[%s12174_s28 + $0x560] sm:$0xff]  ;;  %v581_v11 = vld [vmem:[%s12174_s28 + $0xd48] sm:$0xff] }
  0x7d   : > { %v564_v17 = vld [vmem:[%s12174_s28 + $0x640] sm:$0xff] }
  0x7e   : > { %8529 = vmatpush1.bf16.msra.mxu0 %v8528_v44  ;;  %v1568_v44 = vld [vmem:[%s12174_s28 + $0x490] sm:$0xff]  ;;  %v580_v4 = vld [vmem:[%s12174_s28 + $0xd40] sm:$0xff] }
  0x7f   : > { %8977 = vmatpush1.bf16.msra.mxu1 %v12330_v24  ;;  %8531 = vmatprep.subr.bf16.mxu0 %v8530_v56  ;;  %v8538_v24 = vpack.c.bf16 %v330_v22, %v328_v33  ;;  %v563_v56 = vld [vmem:[%s12174_s28 + $0x568] sm:$0xff]  ;;  %v1570_v33 = vld [vmem:[%s12174_s28 + $0x570] sm:$0xff]  ;;  %v12556_v22 = vpack.c.bf16 %v1573_v29, %v1571_v9  ;;  %v1591_v29 = vld [vmem:[%s12174_s28 + $0xe38] sm:$0xff] }
  0x80   : > { %8979 = vmatprep.subr.bf16.mxu1 %v12333_v26  ;;  %v8540_v26 = vpack.c.bf16 %v329_v38, %v327_v36  ;;  %v569_v36 = vld [vmem:[%s12174_s28 + $0x808] sm:$0xff]  ;;  %v1575_v38 = vld [vmem:[%s12174_s28 + $0x738] sm:$0xff] }
  0x81   : > { %v585_v9 = vld [vmem:[%s12174_s28 + $0xf08] sm:$0xff] }
  0x82   : > { %8533 = vmatpush1.bf16.msra.mxu0 %v8532_v58  ;;  %v12550_v58 = vpack.c.bf16 %v1568_v44, %v1566_v21  ;;  %v1586_v21 = vld [vmem:[%s12174_s28 + $0xc70] sm:$0xff] }
  0x83   : > { %8981 = vmatpush1.bf16.msra.mxu1 %v12344_v41  ;;  %8535 = vmatprep.subr.bf16.mxu0 %v8534_v7  ;;  %v8542_v41 = vpack.c.bf16 %v334_v43, %v332_v39  ;;  %v8562_v7 = vpack.c.bf16 %v565_v25, %v563_v56  ;;  %v1577_v39 = vld [vmem:[%s12174_s28 + $0x818] sm:$0xff]  ;;  %v8564_v43 = vpack.c.bf16 %v564_v17, %v562_v32  ;;  %v1588_v56 = vld [vmem:[%s12174_s28 + $0xd50] sm:$0xff]  ;;  %v583_v25 = vld [vmem:[%s12174_s28 + $0xe28] sm:$0xff] }
  0x84   : > { %8983 = vmatprep.subr.bf16.mxu1 %v12347_v45  ;;  %v338_v45 = vld [vmem:[%s12174_s28 + $0x1b28] sm:$0xff]  ;;  %v12620_v32 = vpack.c.bf16 %v1588_v56, %v1586_v21  ;;  %v8582_v17 = vpack.c.bf16 %v585_v9, %v583_v25  ;;  %v1604_v21 = vld [vmem:[%s12174_s28 + $0x1450] sm:$0xff]  ;;  %v1607_v9 = vld [vmem:[%s12174_s28 + $0x1538] sm:$0xff] }
  0x85   : > { %v599_v56 = vld [vmem:[%s12174_s28 + $0x1528] sm:$0xff] }
  0x86   : > { %8537 = vmatpush1.bf16.msra.mxu0 %v8536_v10  ;;  %v1572_v10 = vld [vmem:[%s12174_s28 + $0x650] sm:$0xff]  ;;  %v601_v25 = vld [vmem:[%s12174_s28 + $0x1608] sm:$0xff] }
  0x87   : > { %8985 = vmatpush1.bf16.msra.mxu1 %v12358_v59  ;;  %8539 = vmatprep.subr.bf16.mxu0 %v8538_v24  ;;  %v8546_v59 = vpack.c.bf16 %v338_v45, %v336_v46  ;;  %v567_v24 = vld [vmem:[%s12174_s28 + $0x728] sm:$0xff]  ;;  %v1574_v46 = vld [vmem:[%s12174_s28 + $0x730] sm:$0xff]  ;;  %v12570_v45 = vpack.c.bf16 %v1577_v39, %v1575_v38 }
  0x88   : > { %8987 = vmatprep.subr.bf16.mxu1 %v12361_v61  ;;  %v553_v61 = vld [vmem:[%s12174_s28 + $0x108] sm:$0xff]  ;;  %v1592_v38 = vld [vmem:[%s12174_s28 + $0xf10] sm:$0xff] }
  0x89   : > { %v587_v39 = vld [vmem:[%s12174_s28 + $0xfe8] sm:$0xff] }
  0x8a   : > { %8541 = vmatpush1.bf16.msra.mxu0 %v8540_v26  ;;  %v12564_v26 = vpack.c.bf16 %v1572_v10, %v1570_v33  ;;  %v582_v33 = vld [vmem:[%s12174_s28 + $0xe20] sm:$0xff] }
  0x8b   : > { %8989 = vmatpush1.bf16.msra.mxu1 %v12372_v14  ;;  %8543 = vmatprep.subr.bf16.mxu0 %v8542_v41  ;;  %v8550_v14 = vpack.c.bf16 %v553_v61, %v551_v40  ;;  %v8566_v41 = vpack.c.bf16 %v569_v36, %v567_v24  ;;  %v1581_v40 = vld [vmem:[%s12174_s28 + $0x9d8] sm:$0xff]  ;;  %v8568_v61 = vpack.c.bf16 %v568_v35, %v566_v27  ;;  %v584_v10 = vld [vmem:[%s12174_s28 + $0xf00] sm:$0xff]  ;;  %v1590_v24 = vld [vmem:[%s12174_s28 + $0xe30] sm:$0xff] }
  0x8c   : > { %8991 = vmatprep.subr.bf16.mxu1 %v12375_v18  ;;  %v12508_v18 = vpack.c.bf16 %v1561_v52, %v1559_v51  ;;  %v12584_v57 = vpack.c.bf16 %v1581_v40, %v1579_v49  ;;  %v1597_v27 = vld [vmem:[%s12174_s28 + $0x10d8] sm:$0xff]  ;;  %v8584_v35 = vpack.c.bf16 %v584_v10, %v582_v33  ;;  %v1594_v49 = vld [vmem:[%s12174_s28 + $0xff0] sm:$0xff]  ;;  %v598_v33 = vld [vmem:[%s12174_s28 + $0x1520] sm:$0xff] }
  0x8d   : > { %v600_v10 = vld [vmem:[%s12174_s28 + $0x1600] sm:$0xff] }
  0x8e   : > { %8545 = vmatpush1.bf16.msra.mxu0 %v8544_v47  ;;  %v1576_v47 = vld [vmem:[%s12174_s28 + $0x810] sm:$0xff] }
  0x8f   : > { %8993 = vmatpush1.bf16.msra.mxu1 %v12386_v34  ;;  %8547 = vmatprep.subr.bf16.mxu0 %v8546_v59  ;;  %v1565_v34 = vld [vmem:[%s12174_s28 + $0x2d8] sm:$0xff]  ;;  %v571_v59 = vld [vmem:[%s12174_s28 + $0x8e8] sm:$0xff]  ;;  %v12578_v51 = vpack.c.bf16 %v1576_v47, %v1574_v46  ;;  %v12634_v46 = vpack.c.bf16 %v1592_v38, %v1590_v24  ;;  %v1606_v24 = vld [vmem:[%s12174_s28 + $0x1530] sm:$0xff] }
  0x90   : > { %8995 = vmatprep.subr.bf16.mxu1 %v12389_v37  ;;  %v12519_v37 = vpack.c.bf16 %v1560_v63, %v1558_v53  ;;  %v12525_v8 = vpack.c.bf16 %v1565_v34, %v1563_v0  ;;  %v8570_v52 = vpack.c.bf16 %v573_v48, %v571_v59  ;;  %v1580_v53 = vld [vmem:[%s12174_s28 + $0x9d0] sm:$0xff]  ;;  %v575_v63 = vld [vmem:[%s12174_s28 + $0xaa8] sm:$0xff]  ;;  %v1585_v0 = vld [vmem:[%s12174_s28 + $0xb98] sm:$0xff] }
  0x91   : > { %v12598_v6 = vpack.c.bf16 %v1585_v0, %v1583_v62  ;;  %v586_v59 = vld [vmem:[%s12174_s28 + $0xfe0] sm:$0xff] }
  0x92   : > { %8549 = vmatpush1.bf16.msra.mxu0 %v8548_v54  ;;  %v570_v54 = vld [vmem:[%s12174_s28 + $0x8e0] sm:$0xff] }
  0x93   : > { %8997 = vmatpush1.bf16.msra.mxu1 %v12398_v50  ;;  %8551 = vmatprep.subr.bf16.mxu0 %v8550_v14  ;;  %v1567_v50 = vld [vmem:[%s12174_s28 + $0x3b8] sm:$0xff]  ;;  %v572_v14 = vld [vmem:[%s12174_s28 + $0x9c0] sm:$0xff] }
  0x94   : > { %8999 = vmatprep.subr.bf16.mxu1 %v12508_v18  ;;  %v12542_v23 = vpack.c.bf16 %v1569_v12, %v1567_v50  ;;  %v8572_v34 = vpack.c.bf16 %v572_v14, %v570_v54  ;;  %v1587_v50 = vld [vmem:[%s12174_s28 + $0xc78] sm:$0xff]  ;;  %v588_v48 = vld [vmem:[%s12174_s28 + $0x10c0] sm:$0xff]  ;;  %v593_v54 = vld [vmem:[%s12174_s28 + $0x1288] sm:$0xff] }
  0x95   : > { %544 = vmatmul.mubr.f32.vlgmr.msra.gmra.mrb[0].mxu0 %v339_v2  ;;  %v1589_v12 = vld [vmem:[%s12174_s28 + $0xd58] sm:$0xff]  ;;  %v590_v62 = vld [vmem:[%s12174_s28 + $0x11a0] sm:$0xff] }
  0x96   : > { %8553 = vmatpush1.bf16.msra.mxu0 %v8552_v1  ;;  %1552 = vmatmul.mubr.f32.vlgmr.msra.gmra.mrb[0].mxu1 %v339_v2  ;;  %v12592_v2 = vpack.c.bf16 %v1580_v53, %v1578_v55  ;;  %v8574_v1 = vpack.c.bf16 %v577_v60, %v575_v63  ;;  %v12612_v44 = vpack.c.bf16 %v1589_v12, %v1587_v50  ;;  %v1599_v14 = vld [vmem:[%s12174_s28 + $0x11b8] sm:$0xff]  ;;  %v592_v0 = vld [vmem:[%s12174_s28 + $0x1280] sm:$0xff] }
  0x97   : > { %9001 = vmatpush1.bf16.msra.mxu1 %v12519_v37  ;;  %8555 = vmatprep.subr.bf16.mxu0 %v8554_v13  ;;  %v574_v13 = vld [vmem:[%s12174_s28 + $0xaa0] sm:$0xff]  ;;  %v1601_v55 = vld [vmem:[%s12174_s28 + $0x1298] sm:$0xff]  ;;  %v8588_v53 = vpack.c.bf16 %v588_v48, %v586_v59 }
  0x98   : > { %9003 = vmatprep.subr.bf16.mxu1 %v12525_v8  ;;  %681 = vmatprep.mubr.f32.mxu0 %v8326_v16 }
  0x99   : > { %1688 = vmatprep.mubr.f32.mxu1 %v8326_v16  ;;  %v8576_v16 = vpack.c.bf16 %v576_v3, %v574_v13  ;;  %v1600_v13 = vld [vmem:[%s12174_s28 + $0x1290] sm:$0xff]  ;;  %v595_v3 = vld [vmem:[%s12174_s28 + $0x1368] sm:$0xff] }
  0x9a   : > { %8557 = vmatpush1.bf16.msra.mxu0 %v8556_v19  ;;  %v12606_v19 = vpack.c.bf16 %v1584_v15, %v1582_v5  ;;  %v597_v5 = vld [vmem:[%s12174_s28 + $0x1448] sm:$0xff]  ;;  %v1603_v15 = vld [vmem:[%s12174_s28 + $0x1378] sm:$0xff] }
  0x9b   : > { %9005 = vmatpush1.bf16.msra.mxu1 %v12536_v30  ;;  %8559 = vmatprep.subr.bf16.mxu0 %v8558_v42  ;;  %v8578_v42 = vpack.c.bf16 %v581_v11, %v579_v28  ;;  %v1605_v28 = vld [vmem:[%s12174_s28 + $0x1458] sm:$0xff]  ;;  %v8592_v11 = vpack.c.bf16 %v592_v0, %v590_v62  ;;  %v8594_v12 = vpack.c.bf16 %v597_v5, %v595_v3  ;;  %v606_v3 = vld [vmem:[%s12174_s28 + $0x18a0] sm:$0xff] }
  0x9c   : > { %9007 = vmatprep.subr.bf16.mxu1 %v12542_v23  ;;  %v1617_v62 = vld [vmem:[%s12174_s28 + $0x1998] sm:$0xff]  ;;  %v608_v5 = vld [vmem:[%s12174_s28 + $0x1980] sm:$0xff] }
  0x9e   : > { %8561 = vmatpush1.bf16.msra.mxu0 %v8560_v31  ;;  %v1593_v31 = vld [vmem:[%s12174_s28 + $0xf18] sm:$0xff] }
  0x9f   : > { %9009 = vmatpush1.bf16.msra.mxu1 %v12550_v58  ;;  %8563 = vmatprep.subr.bf16.mxu0 %v8562_v7  ;;  %v8580_v7 = vpack.c.bf16 %v580_v4, %v578_v20  ;;  %v12626_v36 = vpack.c.bf16 %v1593_v31, %v1591_v29  ;;  %v1602_v20 = vld [vmem:[%s12174_s28 + $0x1370] sm:$0xff]  ;;  %v12668_v4 = vpack.c.bf16 %v1605_v28, %v1603_v15  ;;  %v1609_v29 = vld [vmem:[%s12174_s28 + $0x1618] sm:$0xff] }
  0xa0   : > { %9011 = vmatprep.subr.bf16.mxu1 %v12556_v22  ;;  %v12682_v38 = vpack.c.bf16 %v1609_v29, %v1607_v9  ;;  %v1614_v15 = vld [vmem:[%s12174_s28 + $0x18b0] sm:$0xff]  ;;  %v610_v9 = vld [vmem:[%s12174_s28 + $0x1a60] sm:$0xff] }
  0xa1   : > { %v612_v29 = vld [vmem:[%s12174_s28 + $0x1b40] sm:$0xff] }
  0xa2   : > { %8565 = vmatpush1.bf16.msra.mxu0 %v8564_v43  ;;  %v589_v43 = vld [vmem:[%s12174_s28 + $0x10c8] sm:$0xff] }
  0xa3   : > { %9013 = vmatpush1.bf16.msra.mxu1 %v12564_v26  ;;  %8567 = vmatprep.subr.bf16.mxu0 %v8566_v41  ;;  %v1595_v41 = vld [vmem:[%s12174_s28 + $0xff8] sm:$0xff]  ;;  %v8586_v47 = vpack.c.bf16 %v589_v43, %v587_v39  ;;  %v1608_v39 = vld [vmem:[%s12174_s28 + $0x1610] sm:$0xff]  ;;  %v603_v43 = vld [vmem:[%s12174_s28 + $0x16e8] sm:$0xff] }
  0xa4   : > { %9015 = vmatprep.subr.bf16.mxu1 %v12570_v45  ;;  %v12640_v40 = vpack.c.bf16 %v1597_v27, %v1595_v41  ;;  %v605_v41 = vld [vmem:[%s12174_s28 + $0x17c8] sm:$0xff]  ;;  %v1611_v27 = vld [vmem:[%s12174_s28 + $0x16f8] sm:$0xff]  ;;  %v12690_v59 = vpack.c.bf16 %v1608_v39, %v1606_v24  ;;  %v8612_v39 = vpack.c.bf16 %v612_v29, %v610_v9  ;;  %v1717_v29 = vld [vmem:[%s12174_s28 + $0x900] sm:$0xff] }
  0xa5   : > { %v8602_v48 = vpack.c.bf16 %v605_v41, %v603_v43  ;;  %v1700_v24 = vld [vmem:[%s12174_s28 + $0x128] sm:$0xff] }
  0xa6   : > { %8569 = vmatpush1.bf16.msra.mxu0 %v8568_v61  ;;  %v1596_v61 = vld [vmem:[%s12174_s28 + $0x10d0] sm:$0xff]  ;;  %v1720_v9 = vld [vmem:[%s12174_s28 + $0x9e8] sm:$0xff] }
  0xa7   : > { %9017 = vmatpush1.bf16.msra.mxu1 %v12578_v51  ;;  %8571 = vmatprep.subr.bf16.mxu0 %v8570_v52  ;;  %v591_v52 = vld [vmem:[%s12174_s28 + $0x11a8] sm:$0xff]  ;;  %v12648_v63 = vpack.c.bf16 %v1596_v61, %v1594_v49  ;;  %v602_v49 = vld [vmem:[%s12174_s28 + $0x16e0] sm:$0xff] }
  0xa8   : > { %9019 = vmatprep.subr.bf16.mxu1 %v12584_v57  ;;  %v8590_v60 = vpack.c.bf16 %v593_v54, %v591_v52  ;;  %v604_v61 = vld [vmem:[%s12174_s28 + $0x17c0] sm:$0xff]  ;;  %v1610_v52 = vld [vmem:[%s12174_s28 + $0x16f0] sm:$0xff] }
  0xa9   : > { %v8604_v0 = vpack.c.bf16 %v604_v61, %v602_v49  ;;  %v8325_v49 = vld [vmem:[%s17282_s1 + $0x20] sm:$0xff] }
  0xaa   : > { %8573 = vmatpush1.bf16.msra.mxu0 %v8572_v34  ;;  %v1598_v34 = vld [vmem:[%s12174_s28 + $0x11b0] sm:$0xff] }
  0xab   : > { %9021 = vmatpush1.bf16.msra.mxu1 %v12592_v2  ;;  %8575 = vmatprep.subr.bf16.mxu0 %v8574_v1  ;;  %v12654_v1 = vpack.c.bf16 %v1601_v55, %v1599_v14  ;;  %v12662_v50 = vpack.c.bf16 %v1600_v13, %v1598_v34  ;;  %v1612_v14 = vld [vmem:[%s12174_s28 + $0x17d0] sm:$0xff]  ;;  %v607_v55 = vld [vmem:[%s12174_s28 + $0x18a8] sm:$0xff] }
  0xac   : > { %9023 = vmatprep.subr.bf16.mxu1 %v12598_v6  ;;  %v12704_v34 = vpack.c.bf16 %v1612_v14, %v1610_v52  ;;  %v1701_v14 = vld [vmem:[%s12174_s28 + $0x200] sm:$0xff] }
  0xae   : > { %8577 = vmatpush1.bf16.msra.mxu0 %v8576_v16  ;;  %v594_v16 = vld [vmem:[%s12174_s28 + $0x1360] sm:$0xff] }
  0xaf   : > { %9025 = vmatpush1.bf16.msra.mxu1 %v12606_v19  ;;  %8579 = vmatprep.subr.bf16.mxu0 %v8578_v42  ;;  %v596_v42 = vld [vmem:[%s12174_s28 + $0x1440] sm:$0xff] }
  0xb0   : > { %9027 = vmatprep.subr.bf16.mxu1 %v12612_v44  ;;  %v8596_v31 = vpack.c.bf16 %v596_v42, %v594_v16  ;;  %v613_v16 = vld [vmem:[%s12174_s28 + $0x1b48] sm:$0xff]  ;;  %v1619_v42 = vld [vmem:[%s12174_s28 + $0x1a78] sm:$0xff] }
  0xb2   : > { %8581 = vmatpush1.bf16.msra.mxu0 %v8580_v7  ;;  %v12676_v7 = vpack.c.bf16 %v1604_v21, %v1602_v20  ;;  %v1621_v20 = vld [vmem:[%s12174_s28 + $0x1b58] sm:$0xff]  ;;  %v8608_v21 = vpack.c.bf16 %v608_v5, %v606_v3  ;;  %v1707_v3 = vld [vmem:[%s12174_s28 + $0x4a0] sm:$0xff]  ;;  %v1710_v5 = vld [vmem:[%s12174_s28 + $0x588] sm:$0xff] }
  0xb3   : > { %9029 = vmatpush1.bf16.msra.mxu1 %v12620_v32  ;;  %8583 = vmatprep.subr.bf16.mxu0 %v8582_v17  ;;  %v8598_v17 = vpack.c.bf16 %v601_v25, %v599_v56 }
  0xb4   : > { %9031 = vmatprep.subr.bf16.mxu1 %v12626_v36 }
  0xb6   : > { %8585 = vmatpush1.bf16.msra.mxu0 %v8584_v35  ;;  %v1613_v35 = vld [vmem:[%s12174_s28 + $0x17d8] sm:$0xff] }
  0xb7   : > { %9033 = vmatpush1.bf16.msra.mxu1 %v12634_v46  ;;  %8587 = vmatprep.subr.bf16.mxu0 %v8586_v47  ;;  %v8600_v47 = vpack.c.bf16 %v600_v10, %v598_v33  ;;  %v12696_v54 = vpack.c.bf16 %v1613_v35, %v1611_v27  ;;  %v1620_v33 = vld [vmem:[%s12174_s28 + $0x1b50] sm:$0xff]  ;;  %v1698_v10 = vld [vmem:[%s12174_s28 + $0x48] sm:$0xff]  ;;  %v1697_v27 = vld [vmem:[%s12174_s28 + $0x40] sm:$0xff] }
  0xb8   : > { %9035 = vmatprep.subr.bf16.mxu1 %v12640_v40  ;;  %v12733_v41 = vpack.c.bf16 %v1700_v24, %v1698_v10  ;;  %v1699_v35 = vld [vmem:[%s12174_s28 + $0x120] sm:$0xff]  ;;  %v1724_v10 = vld [vmem:[%s12174_s28 + $0xba8] sm:$0xff] }
  0xb9   : > { %v12744_v61 = vpack.c.bf16 %v1699_v35, %v1697_v27  ;;  %v1721_v24 = vld [vmem:[%s12174_s28 + $0xac0] sm:$0xff]  ;;  %v1726_v27 = vld [vmem:[%s12174_s28 + $0xc88] sm:$0xff] }
  0xba   : > { %8589 = vmatpush1.bf16.msra.mxu0 %v8588_v53  ;;  %v609_v53 = vld [vmem:[%s12174_s28 + $0x1988] sm:$0xff] }
  0xbb   : > { %9037 = vmatpush1.bf16.msra.mxu1 %v12648_v63  ;;  %8591 = vmatprep.subr.bf16.mxu0 %v8590_v60  ;;  %v1615_v60 = vld [vmem:[%s12174_s28 + $0x18b8] sm:$0xff]  ;;  %v8606_v13 = vpack.c.bf16 %v609_v53, %v607_v55  ;;  %v1703_v55 = vld [vmem:[%s12174_s28 + $0x2e0] sm:$0xff]  ;;  %v1706_v53 = vld [vmem:[%s12174_s28 + $0x3c8] sm:$0xff] }
  0xbc   : > { %9039 = vmatprep.subr.bf16.mxu1 %v12654_v1  ;;  %v12710_v28 = vpack.c.bf16 %v1617_v62, %v1615_v60  ;;  %v1708_v60 = vld [vmem:[%s12174_s28 + $0x4a8] sm:$0xff]  ;;  %v8328_v62 = vld [vmem:[%s17282_s1 + $0x38] sm:$0xff] }
  0xbd   : > { %v1728_v35 = vld [vmem:[%s12174_s28 + $0xd68] sm:$0xff] }
  0xbe   : > { %8593 = vmatpush1.bf16.msra.mxu0 %v8592_v11  ;;  %v1616_v11 = vld [vmem:[%s12174_s28 + $0x1990] sm:$0xff] }
  0xbf   : > { %9041 = vmatpush1.bf16.msra.mxu1 %v12662_v50  ;;  %8595 = vmatprep.subr.bf16.mxu0 %v8594_v12  ;;  %v611_v12 = vld [vmem:[%s12174_s28 + $0x1a68] sm:$0xff]  ;;  %v12718_v56 = vpack.c.bf16 %v1616_v11, %v1614_v15  ;;  %v1709_v11 = vld [vmem:[%s12174_s28 + $0x580] sm:$0xff] }
  0xc0   : > { %9043 = vmatprep.subr.bf16.mxu1 %v12668_v4  ;;  %v8610_v25 = vpack.c.bf16 %v613_v16, %v611_v12  ;;  %v1711_v12 = vld [vmem:[%s12174_s28 + $0x660] sm:$0xff]  ;;  %v1714_v16 = vld [vmem:[%s12174_s28 + $0x748] sm:$0xff] }
  0xc2   : > { %8597 = vmatpush1.bf16.msra.mxu0 %v8596_v31  ;;  %v12723_v31 = vpack.c.bf16 %v1621_v20, %v1619_v42  ;;  %v1716_v42 = vld [vmem:[%s12174_s28 + $0x828] sm:$0xff]  ;;  %v1713_v20 = vld [vmem:[%s12174_s28 + $0x740] sm:$0xff] }
  0xc3   : > { %9045 = vmatpush1.bf16.msra.mxu1 %v12676_v7  ;;  %8599 = vmatprep.subr.bf16.mxu0 %v8598_v17  ;;  %v1618_v17 = vld [vmem:[%s12174_s28 + $0x1a70] sm:$0xff] }
  0xc4   : > { %9047 = vmatprep.subr.bf16.mxu1 %v12682_v38  ;;  %v12730_v43 = vpack.c.bf16 %v1620_v33, %v1618_v17  ;;  %v1719_v17 = vld [vmem:[%s12174_s28 + $0x9e0] sm:$0xff]  ;;  %v1722_v33 = vld [vmem:[%s12174_s28 + $0xac8] sm:$0xff] }
  0xc6   : > { %8601 = vmatpush1.bf16.msra.mxu0 %v8600_v47  ;;  %v1702_v47 = vld [vmem:[%s12174_s28 + $0x208] sm:$0xff] }
  0xc7   : > { %9049 = vmatpush1.bf16.msra.mxu1 %v12690_v59  ;;  %8603 = vmatprep.subr.bf16.mxu0 %v8602_v48  ;;  %v1704_v48 = vld [vmem:[%s12174_s28 + $0x2e8] sm:$0xff] }
  0xc8   : > { %9051 = vmatprep.subr.bf16.mxu1 %v12696_v54  ;;  %v12747_v52 = vpack.c.bf16 %v1704_v48, %v1702_v47  ;;  %v1725_v47 = vld [vmem:[%s12174_s28 + $0xc80] sm:$0xff] }
  0xc9   : > { %v1727_v48 = vld [vmem:[%s12174_s28 + $0xd60] sm:$0xff] }
  0xca   : > { %8605 = vmatpush1.bf16.msra.mxu0 %v8604_v0  ;;  %v12762_v0 = vpack.c.bf16 %v1708_v60, %v1706_v53  ;;  %v1731_v53 = vld [vmem:[%s12174_s28 + $0xf20] sm:$0xff]  ;;  %v1734_v60 = vld [vmem:[%s12174_s28 + $0x1008] sm:$0xff] }
  0xcb   : > { %9053 = vmatpush1.bf16.msra.mxu1 %v12704_v34  ;;  %8607 = vmatprep.subr.bf16.mxu0 %v8606_v13  ;;  %v1705_v13 = vld [vmem:[%s12174_s28 + $0x3c0] sm:$0xff] }
  0xcc   : > { %9055 = vmatprep.subr.bf16.mxu1 %v12710_v28 }
  0xce   : > { %8609 = vmatpush1.bf16.msra.mxu0 %v8608_v21  ;;  %v1715_v21 = vld [vmem:[%s12174_s28 + $0x820] sm:$0xff] }
  0xcf   : > { %9057 = vmatpush1.bf16.msra.mxu1 %v12718_v56  ;;  %8611 = vmatprep.subr.bf16.mxu0 %v8610_v25  ;;  %v1718_v25 = vld [vmem:[%s12174_s28 + $0x908] sm:$0xff] }
  0xd0   : > { %9059 = vmatprep.subr.bf16.mxu1 %v12723_v31 }
  0xd2   : > { %8613 = vmatpush1.bf16.msra.mxu0 %v8612_v39  ;;  %v1723_v39 = vld [vmem:[%s12174_s28 + $0xba0] sm:$0xff] }
  0xd3   : > { %9061 = vmatpush1.bf16.msra.mxu1 %v12730_v43  ;;  %8615 = vmatprep.subr.bf16.mxu0 %v12508_v18  ;;  %v12759_v18 = vpack.c.bf16 %v1703_v55, %v1701_v14  ;;  %v1732_v14 = vld [vmem:[%s12174_s28 + $0xf28] sm:$0xff]  ;;  %v1729_v55 = vld [vmem:[%s12174_s28 + $0xe40] sm:$0xff] }
  0xd4   : > { %9063 = vmatprep.subr.bf16.mxu1 %v12733_v41 }
  0xd5   : > { %682 = vmatmul.mubr.f32.vlgmr.msra.gmra.mrb[0].mxu0 %v8325_v49 }
  0xd6   : > { %8617 = vmatpush1.bf16.msra.mxu0 %v12519_v37  ;;  %1689 = vmatmul.mubr.f32.vlgmr.msra.gmra.mrb[0].mxu1 %v8325_v49  ;;  %v1712_v37 = vld [vmem:[%s12174_s28 + $0x668] sm:$0xff] }
  0xd7   : > { %9065 = vmatpush1.bf16.msra.mxu1 %v12744_v61  ;;  %8619 = vmatprep.subr.bf16.mxu0 %v12525_v8  ;;  %v12771_v8 = vpack.c.bf16 %v1707_v3, %v1705_v13  ;;  %v12774_v15 = vpack.c.bf16 %v1712_v37, %v1710_v5  ;;  %v1730_v49 = vld [vmem:[%s12174_s28 + $0xe48] sm:$0xff]  ;;  %v1733_v13 = vld [vmem:[%s12174_s28 + $0x1000] sm:$0xff] }
  0xd8   : > { %9067 = vmatprep.subr.bf16.mxu1 %v12747_v52  ;;  %821 = vmatprep.mubr.f32.mxu0 %v8328_v62  ;;  %v1735_v3 = vld [vmem:[%s12174_s28 + $0x10e0] sm:$0xff]  ;;  %v1738_v5 = vld [vmem:[%s12174_s28 + $0x11c8] sm:$0xff] }
  0xd9   : > { %1827 = vmatprep.mubr.f32.mxu1 %v8328_v62  ;;  %v1736_v62 = vld [vmem:[%s12174_s28 + $0x10e8] sm:$0xff] }
  0xda   : > { %8621 = vmatpush1.bf16.msra.mxu0 %v12536_v30  ;;  %v12783_v30 = vpack.c.bf16 %v1711_v12, %v1709_v11  ;;  %v1740_v37 = vld [vmem:[%s12174_s28 + $0x12a8] sm:$0xff]  ;;  %v1737_v11 = vld [vmem:[%s12174_s28 + $0x11c0] sm:$0xff] }
  0xdb   : > { %9069 = vmatpush1.bf16.msra.mxu1 %v12759_v18  ;;  %8623 = vmatprep.subr.bf16.mxu0 %v12542_v23  ;;  %v12786_v23 = vpack.c.bf16 %v1716_v42, %v1714_v16  ;;  %v1739_v12 = vld [vmem:[%s12174_s28 + $0x12a0] sm:$0xff]  ;;  %v1742_v16 = vld [vmem:[%s12174_s28 + $0x1388] sm:$0xff] }
  0xdc   : > { %9071 = vmatprep.subr.bf16.mxu1 %v12762_v0  ;;  %v1744_v42 = vld [vmem:[%s12174_s28 + $0x1468] sm:$0xff] }
  0xde   : > { %8625 = vmatpush1.bf16.msra.mxu0 %v12550_v58  ;;  %v12795_v58 = vpack.c.bf16 %v1715_v21, %v1713_v20  ;;  %v1741_v20 = vld [vmem:[%s12174_s28 + $0x1380] sm:$0xff] }
  0xdf   : > { %9073 = vmatpush1.bf16.msra.mxu1 %v12771_v8  ;;  %8627 = vmatprep.subr.bf16.mxu0 %v12556_v22  ;;  %v12798_v22 = vpack.c.bf16 %v1720_v9, %v1718_v25  ;;  %v1743_v21 = vld [vmem:[%s12174_s28 + $0x1460] sm:$0xff]  ;;  %v1746_v25 = vld [vmem:[%s12174_s28 + $0x1548] sm:$0xff] }
  0xe0   : > { %9075 = vmatprep.subr.bf16.mxu1 %v12774_v15  ;;  %v1748_v9 = vld [vmem:[%s12174_s28 + $0x1628] sm:$0xff] }
  0xe2   : > { %8629 = vmatpush1.bf16.msra.mxu0 %v12564_v26  ;;  %v12807_v26 = vpack.c.bf16 %v1719_v17, %v1717_v29  ;;  %v1745_v29 = vld [vmem:[%s12174_s28 + $0x1540] sm:$0xff] }
  0xe3   : > { %9077 = vmatpush1.bf16.msra.mxu1 %v12783_v30  ;;  %8631 = vmatprep.subr.bf16.mxu0 %v12570_v45  ;;  %v12810_v45 = vpack.c.bf16 %v1724_v10, %v1722_v33  ;;  %v1747_v17 = vld [vmem:[%s12174_s28 + $0x1620] sm:$0xff]  ;;  %v1750_v33 = vld [vmem:[%s12174_s28 + $0x1708] sm:$0xff] }
  0xe4   : > { %9079 = vmatprep.subr.bf16.mxu1 %v12786_v23  ;;  %v1752_v10 = vld [vmem:[%s12174_s28 + $0x17e8] sm:$0xff] }
  0xe6   : > { %8633 = vmatpush1.bf16.msra.mxu0 %v12578_v51  ;;  %v12819_v51 = vpack.c.bf16 %v1723_v39, %v1721_v24  ;;  %v1749_v24 = vld [vmem:[%s12174_s28 + $0x1700] sm:$0xff] }
  0xe7   : > { %9081 = vmatpush1.bf16.msra.mxu1 %v12795_v58  ;;  %8635 = vmatprep.subr.bf16.mxu0 %v12584_v57  ;;  %v12822_v57 = vpack.c.bf16 %v1728_v35, %v1726_v27  ;;  %v1751_v39 = vld [vmem:[%s12174_s28 + $0x17e0] sm:$0xff]  ;;  %v1754_v27 = vld [vmem:[%s12174_s28 + $0x18c8] sm:$0xff] }
  0xe8   : > { %9083 = vmatprep.subr.bf16.mxu1 %v12798_v22  ;;  %v1756_v35 = vld [vmem:[%s12174_s28 + $0x19a8] sm:$0xff] }
  0xea   : > { %8637 = vmatpush1.bf16.msra.mxu0 %v12592_v2  ;;  %v12831_v2 = vpack.c.bf16 %v1727_v48, %v1725_v47  ;;  %v1753_v47 = vld [vmem:[%s12174_s28 + $0x18c0] sm:$0xff] }
  0xeb   : > { %9085 = vmatpush1.bf16.msra.mxu1 %v12807_v26  ;;  %8639 = vmatprep.subr.bf16.mxu0 %v12598_v6  ;;  %v12834_v6 = vpack.c.bf16 %v1732_v14, %v1730_v49  ;;  %v1755_v48 = vld [vmem:[%s12174_s28 + $0x19a0] sm:$0xff]  ;;  %v1758_v49 = vld [vmem:[%s12174_s28 + $0x1a88] sm:$0xff] }
  0xec   : > { %9087 = vmatprep.subr.bf16.mxu1 %v12810_v45  ;;  %v1760_v14 = vld [vmem:[%s12174_s28 + $0x1b68] sm:$0xff] }
  0xee   : > { %8641 = vmatpush1.bf16.msra.mxu0 %v12606_v19  ;;  %v12843_v19 = vpack.c.bf16 %v1731_v53, %v1729_v55  ;;  %v1757_v55 = vld [vmem:[%s12174_s28 + $0x1a80] sm:$0xff] }
  0xef   : > { %9089 = vmatpush1.bf16.msra.mxu1 %v12819_v51  ;;  %8643 = vmatprep.subr.bf16.mxu0 %v12612_v44  ;;  %v12846_v44 = vpack.c.bf16 %v1736_v62, %v1734_v60  ;;  %v1759_v53 = vld [vmem:[%s12174_s28 + $0x1b60] sm:$0xff]  ;;  %v1837_v60 = vld [vmem:[%s12174_s28 + $0x58] sm:$0xff] }
  0xf0   : > { %9091 = vmatprep.subr.bf16.mxu1 %v12822_v57  ;;  %v1839_v62 = vld [vmem:[%s12174_s28 + $0x138] sm:$0xff] }
  0xf2   : > { %8645 = vmatpush1.bf16.msra.mxu0 %v12620_v32  ;;  %v12855_v32 = vpack.c.bf16 %v1735_v3, %v1733_v13  ;;  %v1836_v13 = vld [vmem:[%s12174_s28 + $0x50] sm:$0xff] }
  0xf3   : > { %9093 = vmatpush1.bf16.msra.mxu1 %v12831_v2  ;;  %8647 = vmatprep.subr.bf16.mxu0 %v12626_v36  ;;  %v12858_v36 = vpack.c.bf16 %v1740_v37, %v1738_v5  ;;  %v1838_v3 = vld [vmem:[%s12174_s28 + $0x130] sm:$0xff]  ;;  %v1841_v5 = vld [vmem:[%s12174_s28 + $0x218] sm:$0xff] }
  0xf4   : > { %9095 = vmatprep.subr.bf16.mxu1 %v12834_v6  ;;  %v1843_v37 = vld [vmem:[%s12174_s28 + $0x2f8] sm:$0xff] }
  0xf6   : > { %8649 = vmatpush1.bf16.msra.mxu0 %v12634_v46  ;;  %v12867_v46 = vpack.c.bf16 %v1739_v12, %v1737_v11  ;;  %v12945_v11 = vpack.c.bf16 %v1843_v37, %v1841_v5  ;;  %v1840_v12 = vld [vmem:[%s12174_s28 + $0x210] sm:$0xff] }
  0xf7   : > { %9097 = vmatpush1.bf16.msra.mxu1 %v12843_v19  ;;  %8651 = vmatprep.subr.bf16.mxu0 %v12640_v40  ;;  %v12870_v40 = vpack.c.bf16 %v1744_v42, %v1742_v16  ;;  %v1842_v16 = vld [vmem:[%s12174_s28 + $0x2f0] sm:$0xff]  ;;  %v1847_v42 = vld [vmem:[%s12174_s28 + $0x4b8] sm:$0xff] }
  0xf8   : > { %9099 = vmatprep.subr.bf16.mxu1 %v12846_v44  ;;  %v1864_v5 = vld [vmem:[%s12174_s28 + $0xc90] sm:$0xff] }
  0xf9   : > { %v1866_v37 = vld [vmem:[%s12174_s28 + $0xd70] sm:$0xff] }
  0xfa   : > { %8653 = vmatpush1.bf16.msra.mxu0 %v12648_v63  ;;  %v12879_v63 = vpack.c.bf16 %v1743_v21, %v1741_v20  ;;  %v8330_v20 = vld [vmem:[%s17282_s1 + $0x48] sm:$0xff] }
  0xfb   : > { %9101 = vmatpush1.bf16.msra.mxu1 %v12855_v32  ;;  %8655 = vmatprep.subr.bf16.mxu0 %v12654_v1  ;;  %v12882_v1 = vpack.c.bf16 %v1748_v9, %v1746_v25  ;;  %v1844_v25 = vld [vmem:[%s12174_s28 + $0x3d0] sm:$0xff] }
  0xfc   : > { %9103 = vmatprep.subr.bf16.mxu1 %v12858_v36  ;;  %v1846_v9 = vld [vmem:[%s12174_s28 + $0x4b0] sm:$0xff] }
  0xfe   : > { %8657 = vmatpush1.bf16.msra.mxu0 %v12662_v50  ;;  %v12891_v50 = vpack.c.bf16 %v1747_v17, %v1745_v29  ;;  %v1849_v29 = vld [vmem:[%s12174_s28 + $0x598] sm:$0xff] }
  0xff   : > { %9105 = vmatpush1.bf16.msra.mxu1 %v12867_v46  ;;  %8659 = vmatprep.subr.bf16.mxu0 %v12668_v4  ;;  %v12894_v4 = vpack.c.bf16 %v1752_v10, %v1750_v33  ;;  %v1848_v33 = vld [vmem:[%s12174_s28 + $0x590] sm:$0xff] }
 0x100   : > { %9107 = vmatprep.subr.bf16.mxu1 %v12870_v40  ;;  %v1850_v10 = vld [vmem:[%s12174_s28 + $0x670] sm:$0xff] }
 0x102   : > { %8661 = vmatpush1.bf16.msra.mxu0 %v12676_v7  ;;  %v12903_v7 = vpack.c.bf16 %v1751_v39, %v1749_v24  ;;  %v1853_v24 = vld [vmem:[%s12174_s28 + $0x758] sm:$0xff] }
 0x103   : > { %9109 = vmatpush1.bf16.msra.mxu1 %v12879_v63  ;;  %8663 = vmatprep.subr.bf16.mxu0 %v12682_v38  ;;  %v12906_v38 = vpack.c.bf16 %v1756_v35, %v1754_v27  ;;  %v1855_v39 = vld [vmem:[%s12174_s28 + $0x838] sm:$0xff]  ;;  %v1852_v27 = vld [vmem:[%s12174_s28 + $0x750] sm:$0xff] }
 0x104   : > { %9111 = vmatprep.subr.bf16.mxu1 %v12882_v1  ;;  %v1854_v35 = vld [vmem:[%s12174_s28 + $0x830] sm:$0xff] }
 0x106   : > { %8665 = vmatpush1.bf16.msra.mxu0 %v12690_v59  ;;  %v12915_v59 = vpack.c.bf16 %v1755_v48, %v1753_v47  ;;  %v1857_v47 = vld [vmem:[%s12174_s28 + $0x918] sm:$0xff] }
 0x107   : > { %9113 = vmatpush1.bf16.msra.mxu1 %v12891_v50  ;;  %8667 = vmatprep.subr.bf16.mxu0 %v12696_v54  ;;  %v12918_v54 = vpack.c.bf16 %v1760_v14, %v1758_v49  ;;  %v1859_v48 = vld [vmem:[%s12174_s28 + $0x9f8] sm:$0xff]  ;;  %v1856_v49 = vld [vmem:[%s12174_s28 + $0x910] sm:$0xff] }
 0x108   : > { %9115 = vmatprep.subr.bf16.mxu1 %v12894_v4  ;;  %v1858_v14 = vld [vmem:[%s12174_s28 + $0x9f0] sm:$0xff] }
 0x10a   : > { %8669 = vmatpush1.bf16.msra.mxu0 %v12704_v34  ;;  %v12927_v34 = vpack.c.bf16 %v1759_v53, %v1757_v55  ;;  %v1861_v55 = vld [vmem:[%s12174_s28 + $0xad8] sm:$0xff] }
 0x10b   : > { %9117 = vmatpush1.bf16.msra.mxu1 %v12903_v7  ;;  %8671 = vmatprep.subr.bf16.mxu0 %v12710_v28  ;;  %v12930_v28 = vpack.c.bf16 %v1839_v62, %v1837_v60  ;;  %v1863_v53 = vld [vmem:[%s12174_s28 + $0xbb8] sm:$0xff]  ;;  %v1860_v60 = vld [vmem:[%s12174_s28 + $0xad0] sm:$0xff] }
 0x10c   : > { %9119 = vmatprep.subr.bf16.mxu1 %v12906_v38  ;;  %v1862_v62 = vld [vmem:[%s12174_s28 + $0xbb0] sm:$0xff] }
 0x10e   : > { %8673 = vmatpush1.bf16.msra.mxu0 %v12718_v56  ;;  %v8327_v56 = vld [vmem:[%s17282_s1 + $0x30] sm:$0xff] }
 0x10f   : > { %9121 = vmatpush1.bf16.msra.mxu1 %v12915_v59  ;;  %8675 = vmatprep.subr.bf16.mxu0 %v12723_v31  ;;  %v12942_v31 = vpack.c.bf16 %v1838_v3, %v1836_v13  ;;  %v1865_v13 = vld [vmem:[%s12174_s28 + $0xc98] sm:$0xff] }
 0x110   : > { %9123 = vmatprep.subr.bf16.mxu1 %v12918_v54  ;;  %v1867_v3 = vld [vmem:[%s12174_s28 + $0xd78] sm:$0xff] }
 0x112   : > { %8677 = vmatpush1.bf16.msra.mxu0 %v12730_v43  ;;  %v1845_v43 = vld [vmem:[%s12174_s28 + $0x3d8] sm:$0xff] }
 0x113   : > { %9125 = vmatpush1.bf16.msra.mxu1 %v12927_v34  ;;  %8679 = vmatprep.subr.bf16.mxu0 %v12733_v41  ;;  %v12957_v41 = vpack.c.bf16 %v1842_v16, %v1840_v12  ;;  %v12960_v21 = vpack.c.bf16 %v1847_v42, %v1845_v43  ;;  %v1871_v12 = vld [vmem:[%s12174_s28 + $0xf38] sm:$0xff]  ;;  %v1868_v16 = vld [vmem:[%s12174_s28 + $0xe50] sm:$0xff] }
 0x114   : > { %9127 = vmatprep.subr.bf16.mxu1 %v12930_v28  ;;  %v1870_v43 = vld [vmem:[%s12174_s28 + $0xf30] sm:$0xff]  ;;  %v1873_v42 = vld [vmem:[%s12174_s28 + $0x1018] sm:$0xff] }
 0x115   : > { %822 = vmatmul.mubr.f32.vlgmr.msra.gmra.mrb[0].mxu0 %v8327_v56 }
 0x116   : > { %8681 = vmatpush1.bf16.msra.mxu0 %v12744_v61  ;;  %1828 = vmatmul.mubr.f32.vlgmr.msra.gmra.mrb[0].mxu1 %v8327_v56  ;;  %v1851_v61 = vld [vmem:[%s12174_s28 + $0x678] sm:$0xff] }
 0x117   : > { %9129 = vmatpush1.bf16.msra.mxu1 %v12942_v31  ;;  %8683 = vmatprep.subr.bf16.mxu0 %v12747_v52  ;;  %v12969_v52 = vpack.c.bf16 %v1846_v9, %v1844_v25  ;;  %v12972_v17 = vpack.c.bf16 %v1851_v61, %v1849_v29  ;;  %v1869_v56 = vld [vmem:[%s12174_s28 + $0xe58] sm:$0xff]  ;;  %v1872_v25 = vld [vmem:[%s12174_s28 + $0x1010] sm:$0xff] }
 0x118   : > { %9131 = vmatprep.subr.bf16.mxu1 %v12945_v11  ;;  %961 = vmatprep.mubr.f32.mxu0 %v8330_v20  ;;  %v1874_v9 = vld [vmem:[%s12174_s28 + $0x10f0] sm:$0xff]  ;;  %v1877_v29 = vld [vmem:[%s12174_s28 + $0x11d8] sm:$0xff] }
 0x119   : > { %1966 = vmatprep.mubr.f32.mxu1 %v8330_v20  ;;  %v1875_v20 = vld [vmem:[%s12174_s28 + $0x10f8] sm:$0xff] }
 0x11a   : > { %8685 = vmatpush1.bf16.msra.mxu0 %v12759_v18  ;;  %v12981_v18 = vpack.c.bf16 %v1850_v10, %v1848_v33  ;;  %v1879_v61 = vld [vmem:[%s12174_s28 + $0x12b8] sm:$0xff]  ;;  %v1876_v33 = vld [vmem:[%s12174_s28 + $0x11d0] sm:$0xff] }
 0x11b   : > { %9133 = vmatpush1.bf16.msra.mxu1 %v12957_v41  ;;  %8687 = vmatprep.subr.bf16.mxu0 %v12762_v0  ;;  %v12984_v0 = vpack.c.bf16 %v1855_v39, %v1853_v24  ;;  %v1878_v10 = vld [vmem:[%s12174_s28 + $0x12b0] sm:$0xff]  ;;  %v1881_v24 = vld [vmem:[%s12174_s28 + $0x1398] sm:$0xff] }
 0x11c   : > { %9135 = vmatprep.subr.bf16.mxu1 %v12960_v21  ;;  %v1883_v39 = vld [vmem:[%s12174_s28 + $0x1478] sm:$0xff] }
 0x11e   : > { %8689 = vmatpush1.bf16.msra.mxu0 %v12771_v8  ;;  %v12993_v8 = vpack.c.bf16 %v1854_v35, %v1852_v27  ;;  %v1880_v27 = vld [vmem:[%s12174_s28 + $0x1390] sm:$0xff] }
 0x11f   : > { %9137 = vmatpush1.bf16.msra.mxu1 %v12969_v52  ;;  %8691 = vmatprep.subr.bf16.mxu0 %v12774_v15  ;;  %v12996_v15 = vpack.c.bf16 %v1859_v48, %v1857_v47  ;;  %v1882_v35 = vld [vmem:[%s12174_s28 + $0x1470] sm:$0xff]  ;;  %v1885_v47 = vld [vmem:[%s12174_s28 + $0x1558] sm:$0xff] }
 0x120   : > { %9139 = vmatprep.subr.bf16.mxu1 %v12972_v17  ;;  %v1887_v48 = vld [vmem:[%s12174_s28 + $0x1638] sm:$0xff] }
 0x122   : > { %8693 = vmatpush1.bf16.msra.mxu0 %v12783_v30  ;;  %v13005_v30 = vpack.c.bf16 %v1858_v14, %v1856_v49  ;;  %v1884_v49 = vld [vmem:[%s12174_s28 + $0x1550] sm:$0xff] }
 0x123   : > { %9141 = vmatpush1.bf16.msra.mxu1 %v12981_v18  ;;  %8695 = vmatprep.subr.bf16.mxu0 %v12786_v23  ;;  %v13008_v23 = vpack.c.bf16 %v1863_v53, %v1861_v55  ;;  %v1886_v14 = vld [vmem:[%s12174_s28 + $0x1630] sm:$0xff]  ;;  %v1889_v55 = vld [vmem:[%s12174_s28 + $0x1718] sm:$0xff] }
 0x124   : > { %9143 = vmatprep.subr.bf16.mxu1 %v12984_v0  ;;  %v1891_v53 = vld [vmem:[%s12174_s28 + $0x17f8] sm:$0xff] }
 0x126   : > { %8697 = vmatpush1.bf16.msra.mxu0 %v12795_v58  ;;  %v13017_v58 = vpack.c.bf16 %v1862_v62, %v1860_v60  ;;  %v1888_v60 = vld [vmem:[%s12174_s28 + $0x1710] sm:$0xff] }
 0x127   : > { %9145 = vmatpush1.bf16.msra.mxu1 %v12993_v8  ;;  %8699 = vmatprep.subr.bf16.mxu0 %v12798_v22  ;;  %v13020_v22 = vpack.c.bf16 %v1867_v3, %v1865_v13  ;;  %v1890_v62 = vld [vmem:[%s12174_s28 + $0x17f0] sm:$0xff]  ;;  %v1893_v13 = vld [vmem:[%s12174_s28 + $0x18d8] sm:$0xff] }
 0x128   : > { %9147 = vmatprep.subr.bf16.mxu1 %v12996_v15  ;;  %v1895_v3 = vld [vmem:[%s12174_s28 + $0x19b8] sm:$0xff] }
 0x12a   : > { %8701 = vmatpush1.bf16.msra.mxu0 %v12807_v26  ;;  %v13029_v26 = vpack.c.bf16 %v1866_v37, %v1864_v5  ;;  %v1892_v5 = vld [vmem:[%s12174_s28 + $0x18d0] sm:$0xff] }
 0x12b   : > { %9149 = vmatpush1.bf16.msra.mxu1 %v13005_v30  ;;  %8703 = vmatprep.subr.bf16.mxu0 %v12810_v45  ;;  %v13032_v45 = vpack.c.bf16 %v1871_v12, %v1869_v56  ;;  %v1894_v37 = vld [vmem:[%s12174_s28 + $0x19b0] sm:$0xff]  ;;  %v1897_v56 = vld [vmem:[%s12174_s28 + $0x1a98] sm:$0xff] }
 0x12c   : > { %9151 = vmatprep.subr.bf16.mxu1 %v13008_v23  ;;  %v1899_v12 = vld [vmem:[%s12174_s28 + $0x1b78] sm:$0xff] }
 0x12e   : > { %8705 = vmatpush1.bf16.msra.mxu0 %v12819_v51  ;;  %v13041_v51 = vpack.c.bf16 %v1870_v43, %v1868_v16  ;;  %v1896_v16 = vld [vmem:[%s12174_s28 + $0x1a90] sm:$0xff] }
 0x12f   : > { %9153 = vmatpush1.bf16.msra.mxu1 %v13017_v58  ;;  %8707 = vmatprep.subr.bf16.mxu0 %v12822_v57  ;;  %v13044_v57 = vpack.c.bf16 %v1875_v20, %v1873_v42  ;;  %v1898_v43 = vld [vmem:[%s12174_s28 + $0x1b70] sm:$0xff]  ;;  %v1976_v42 = vld [vmem:[%s12174_s28 + $0x68] sm:$0xff] }
 0x130   : > { %9155 = vmatprep.subr.bf16.mxu1 %v13020_v22  ;;  %v1978_v20 = vld [vmem:[%s12174_s28 + $0x148] sm:$0xff] }
 0x132   : > { %8709 = vmatpush1.bf16.msra.mxu0 %v12831_v2  ;;  %v13053_v2 = vpack.c.bf16 %v1874_v9, %v1872_v25  ;;  %v1975_v25 = vld [vmem:[%s12174_s28 + $0x60] sm:$0xff] }
 0x133   : > { %9157 = vmatpush1.bf16.msra.mxu1 %v13029_v26  ;;  %8711 = vmatprep.subr.bf16.mxu0 %v12834_v6  ;;  %v13056_v6 = vpack.c.bf16 %v1879_v61, %v1877_v29  ;;  %v1977_v9 = vld [vmem:[%s12174_s28 + $0x140] sm:$0xff]  ;;  %v1980_v29 = vld [vmem:[%s12174_s28 + $0x228] sm:$0xff] }
 0x134   : > { %9159 = vmatprep.subr.bf16.mxu1 %v13032_v45  ;;  %v1982_v61 = vld [vmem:[%s12174_s28 + $0x308] sm:$0xff] }
 0x136   : > { %8713 = vmatpush1.bf16.msra.mxu0 %v12843_v19  ;;  %v13065_v19 = vpack.c.bf16 %v1878_v10, %v1876_v33  ;;  %v13143_v33 = vpack.c.bf16 %v1982_v61, %v1980_v29  ;;  %v1979_v10 = vld [vmem:[%s12174_s28 + $0x220] sm:$0xff] }
 0x137   : > { %9161 = vmatpush1.bf16.msra.mxu1 %v13041_v51  ;;  %8715 = vmatprep.subr.bf16.mxu0 %v12846_v44  ;;  %v13068_v44 = vpack.c.bf16 %v1883_v39, %v1881_v24  ;;  %v1981_v24 = vld [vmem:[%s12174_s28 + $0x300] sm:$0xff]  ;;  %v1986_v39 = vld [vmem:[%s12174_s28 + $0x4c8] sm:$0xff] }
 0x138   : > { %9163 = vmatprep.subr.bf16.mxu1 %v13044_v57  ;;  %v2003_v29 = vld [vmem:[%s12174_s28 + $0xca0] sm:$0xff] }
 0x139   : > { %v2005_v61 = vld [vmem:[%s12174_s28 + $0xd80] sm:$0xff] }
 0x13a   : > { %8717 = vmatpush1.bf16.msra.mxu0 %v12855_v32  ;;  %v13077_v32 = vpack.c.bf16 %v1882_v35, %v1880_v27  ;;  %v8332_v27 = vld [vmem:[%s17282_s1 + $0x58] sm:$0xff] }
 0x13b   : > { %9165 = vmatpush1.bf16.msra.mxu1 %v13053_v2  ;;  %8719 = vmatprep.subr.bf16.mxu0 %v12858_v36  ;;  %v13080_v36 = vpack.c.bf16 %v1887_v48, %v1885_v47  ;;  %v1983_v47 = vld [vmem:[%s12174_s28 + $0x3e0] sm:$0xff] }
 0x13c   : > { %9167 = vmatprep.subr.bf16.mxu1 %v13056_v6  ;;  %v1985_v48 = vld [vmem:[%s12174_s28 + $0x4c0] sm:$0xff] }
 0x13e   : > { %8721 = vmatpush1.bf16.msra.mxu0 %v12867_v46  ;;  %v13089_v46 = vpack.c.bf16 %v1886_v14, %v1884_v49  ;;  %v1988_v49 = vld [vmem:[%s12174_s28 + $0x5a8] sm:$0xff] }
 0x13f   : > { %9169 = vmatpush1.bf16.msra.mxu1 %v13065_v19  ;;  %8723 = vmatprep.subr.bf16.mxu0 %v12870_v40  ;;  %v13092_v40 = vpack.c.bf16 %v1891_v53, %v1889_v55  ;;  %v1987_v55 = vld [vmem:[%s12174_s28 + $0x5a0] sm:$0xff] }
 0x140   : > { %9171 = vmatprep.subr.bf16.mxu1 %v13068_v44  ;;  %v1989_v53 = vld [vmem:[%s12174_s28 + $0x680] sm:$0xff] }
 0x142   : > { %8725 = vmatpush1.bf16.msra.mxu0 %v12879_v63  ;;  %v13101_v63 = vpack.c.bf16 %v1890_v62, %v1888_v60  ;;  %v1992_v60 = vld [vmem:[%s12174_s28 + $0x768] sm:$0xff] }
 0x143   : > { %9173 = vmatpush1.bf16.msra.mxu1 %v13077_v32  ;;  %8727 = vmatprep.subr.bf16.mxu0 %v12882_v1  ;;  %v13104_v1 = vpack.c.bf16 %v1895_v3, %v1893_v13  ;;  %v1994_v62 = vld [vmem:[%s12174_s28 + $0x848] sm:$0xff]  ;;  %v1991_v13 = vld [vmem:[%s12174_s28 + $0x760] sm:$0xff] }
 0x144   : > { %9175 = vmatprep.subr.bf16.mxu1 %v13080_v36  ;;  %v1993_v3 = vld [vmem:[%s12174_s28 + $0x840] sm:$0xff] }
 0x146   : > { %8729 = vmatpush1.bf16.msra.mxu0 %v12891_v50  ;;  %v13113_v50 = vpack.c.bf16 %v1894_v37, %v1892_v5  ;;  %v1996_v5 = vld [vmem:[%s12174_s28 + $0x928] sm:$0xff] }
 0x147   : > { %9177 = vmatpush1.bf16.msra.mxu1 %v13089_v46  ;;  %8731 = vmatprep.subr.bf16.mxu0 %v12894_v4  ;;  %v13116_v4 = vpack.c.bf16 %v1899_v12, %v1897_v56  ;;  %v1998_v37 = vld [vmem:[%s12174_s28 + $0xa08] sm:$0xff]  ;;  %v1995_v56 = vld [vmem:[%s12174_s28 + $0x920] sm:$0xff] }
 0x148   : > { %9179 = vmatprep.subr.bf16.mxu1 %v13092_v40  ;;  %v1997_v12 = vld [vmem:[%s12174_s28 + $0xa00] sm:$0xff] }
 0x14a   : > { %8733 = vmatpush1.bf16.msra.mxu0 %v12903_v7  ;;  %v13125_v7 = vpack.c.bf16 %v1898_v43, %v1896_v16  ;;  %v2000_v16 = vld [vmem:[%s12174_s28 + $0xae8] sm:$0xff] }
 0x14b   : > { %9181 = vmatpush1.bf16.msra.mxu1 %v13101_v63  ;;  %8735 = vmatprep.subr.bf16.mxu0 %v12906_v38  ;;  %v13128_v38 = vpack.c.bf16 %v1978_v20, %v1976_v42  ;;  %v2002_v43 = vld [vmem:[%s12174_s28 + $0xbc8] sm:$0xff]  ;;  %v1999_v42 = vld [vmem:[%s12174_s28 + $0xae0] sm:$0xff] }
 0x14c   : > { %9183 = vmatprep.subr.bf16.mxu1 %v13104_v1  ;;  %v2001_v20 = vld [vmem:[%s12174_s28 + $0xbc0] sm:$0xff] }
 0x14e   : > { %8737 = vmatpush1.bf16.msra.mxu0 %v12915_v59  ;;  %v8329_v59 = vld [vmem:[%s17282_s1 + $0x40] sm:$0xff] }
 0x14f   : > { %9185 = vmatpush1.bf16.msra.mxu1 %v13113_v50  ;;  %8739 = vmatprep.subr.bf16.mxu0 %v12918_v54  ;;  %v13140_v54 = vpack.c.bf16 %v1977_v9, %v1975_v25  ;;  %v2004_v25 = vld [vmem:[%s12174_s28 + $0xca8] sm:$0xff] }
 0x150   : > { %9187 = vmatprep.subr.bf16.mxu1 %v13116_v4  ;;  %v2006_v9 = vld [vmem:[%s12174_s28 + $0xd88] sm:$0xff] }
 0x152   : > { %8741 = vmatpush1.bf16.msra.mxu0 %v12927_v34  ;;  %v1984_v34 = vld [vmem:[%s12174_s28 + $0x3e8] sm:$0xff] }
 0x153   : > { %9189 = vmatpush1.bf16.msra.mxu1 %v13125_v7  ;;  %8743 = vmatprep.subr.bf16.mxu0 %v12930_v28  ;;  %v13155_v28 = vpack.c.bf16 %v1981_v24, %v1979_v10  ;;  %v13158_v35 = vpack.c.bf16 %v1986_v39, %v1984_v34  ;;  %v2010_v10 = vld [vmem:[%s12174_s28 + $0xf48] sm:$0xff]  ;;  %v2007_v24 = vld [vmem:[%s12174_s28 + $0xe60] sm:$0xff] }
 0x154   : > { %9191 = vmatprep.subr.bf16.mxu1 %v13128_v38  ;;  %v2009_v34 = vld [vmem:[%s12174_s28 + $0xf40] sm:$0xff]  ;;  %v2012_v39 = vld [vmem:[%s12174_s28 + $0x1028] sm:$0xff] }
 0x155   : > { %962 = vmatmul.mubr.f32.vlgmr.msra.gmra.mrb[0].mxu0 %v8329_v59 }
 0x156   : > { %8745 = vmatpush1.bf16.msra.mxu0 %v12942_v31  ;;  %1967 = vmatmul.mubr.f32.vlgmr.msra.gmra.mrb[0].mxu1 %v8329_v59  ;;  %v1990_v31 = vld [vmem:[%s12174_s28 + $0x688] sm:$0xff] }
 0x157   : > { %9193 = vmatpush1.bf16.msra.mxu1 %v13140_v54  ;;  %8747 = vmatprep.subr.bf16.mxu0 %v12945_v11  ;;  %v13167_v11 = vpack.c.bf16 %v1985_v48, %v1983_v47  ;;  %v13170_v14 = vpack.c.bf16 %v1990_v31, %v1988_v49  ;;  %v2008_v59 = vld [vmem:[%s12174_s28 + $0xe68] sm:$0xff]  ;;  %v2011_v47 = vld [vmem:[%s12174_s28 + $0x1020] sm:$0xff] }
 0x158   : > { %9195 = vmatprep.subr.bf16.mxu1 %v13143_v33  ;;  %1101 = vmatprep.mubr.f32.mxu0 %v8332_v27  ;;  %v2013_v48 = vld [vmem:[%s12174_s28 + $0x1100] sm:$0xff]  ;;  %v2016_v49 = vld [vmem:[%s12174_s28 + $0x11e8] sm:$0xff] }
 0x159   : > { %2105 = vmatprep.mubr.f32.mxu1 %v8332_v27  ;;  %v2014_v27 = vld [vmem:[%s12174_s28 + $0x1108] sm:$0xff] }
 0x15a   : > { %8749 = vmatpush1.bf16.msra.mxu0 %v12957_v41  ;;  %v13179_v41 = vpack.c.bf16 %v1989_v53, %v1987_v55  ;;  %v2018_v31 = vld [vmem:[%s12174_s28 + $0x12c8] sm:$0xff]  ;;  %v2015_v55 = vld [vmem:[%s12174_s28 + $0x11e0] sm:$0xff] }
 0x15b   : > { %9197 = vmatpush1.bf16.msra.mxu1 %v13155_v28  ;;  %8751 = vmatprep.subr.bf16.mxu0 %v12960_v21  ;;  %v13182_v21 = vpack.c.bf16 %v1994_v62, %v1992_v60  ;;  %v2017_v53 = vld [vmem:[%s12174_s28 + $0x12c0] sm:$0xff]  ;;  %v2020_v60 = vld [vmem:[%s12174_s28 + $0x13a8] sm:$0xff] }
 0x15c   : > { %9199 = vmatprep.subr.bf16.mxu1 %v13158_v35  ;;  %v2022_v62 = vld [vmem:[%s12174_s28 + $0x1488] sm:$0xff] }
 0x15e   : > { %8753 = vmatpush1.bf16.msra.mxu0 %v12969_v52  ;;  %v13191_v52 = vpack.c.bf16 %v1993_v3, %v1991_v13  ;;  %v2019_v13 = vld [vmem:[%s12174_s28 + $0x13a0] sm:$0xff] }
 0x15f   : > { %9201 = vmatpush1.bf16.msra.mxu1 %v13167_v11  ;;  %8755 = vmatprep.subr.bf16.mxu0 %v12972_v17  ;;  %v13194_v17 = vpack.c.bf16 %v1998_v37, %v1996_v5  ;;  %v2021_v3 = vld [vmem:[%s12174_s28 + $0x1480] sm:$0xff]  ;;  %v2024_v5 = vld [vmem:[%s12174_s28 + $0x1568] sm:$0xff] }
 0x160   : > { %9203 = vmatprep.subr.bf16.mxu1 %v13170_v14  ;;  %v2026_v37 = vld [vmem:[%s12174_s28 + $0x1648] sm:$0xff] }
 0x162   : > { %8757 = vmatpush1.bf16.msra.mxu0 %v12981_v18  ;;  %v13203_v18 = vpack.c.bf16 %v1997_v12, %v1995_v56  ;;  %v2023_v56 = vld [vmem:[%s12174_s28 + $0x1560] sm:$0xff] }
 0x163   : > { %9205 = vmatpush1.bf16.msra.mxu1 %v13179_v41  ;;  %8759 = vmatprep.subr.bf16.mxu0 %v12984_v0  ;;  %v13206_v0 = vpack.c.bf16 %v2002_v43, %v2000_v16  ;;  %v2025_v12 = vld [vmem:[%s12174_s28 + $0x1640] sm:$0xff]  ;;  %v2028_v16 = vld [vmem:[%s12174_s28 + $0x1728] sm:$0xff] }
 0x164   : > { %9207 = vmatprep.subr.bf16.mxu1 %v13182_v21  ;;  %v2030_v43 = vld [vmem:[%s12174_s28 + $0x1808] sm:$0xff] }
 0x166   : > { %8761 = vmatpush1.bf16.msra.mxu0 %v12993_v8  ;;  %v13215_v8 = vpack.c.bf16 %v2001_v20, %v1999_v42  ;;  %v2027_v42 = vld [vmem:[%s12174_s28 + $0x1720] sm:$0xff] }
 0x167   : > { %9209 = vmatpush1.bf16.msra.mxu1 %v13191_v52  ;;  %8763 = vmatprep.subr.bf16.mxu0 %v12996_v15  ;;  %v13218_v15 = vpack.c.bf16 %v2006_v9, %v2004_v25  ;;  %v2029_v20 = vld [vmem:[%s12174_s28 + $0x1800] sm:$0xff]  ;;  %v2032_v25 = vld [vmem:[%s12174_s28 + $0x18e8] sm:$0xff] }
 0x168   : > { %9211 = vmatprep.subr.bf16.mxu1 %v13194_v17  ;;  %v2034_v9 = vld [vmem:[%s12174_s28 + $0x19c8] sm:$0xff] }
 0x16a   : > { %8765 = vmatpush1.bf16.msra.mxu0 %v13005_v30  ;;  %v13227_v30 = vpack.c.bf16 %v2005_v61, %v2003_v29  ;;  %v2031_v29 = vld [vmem:[%s12174_s28 + $0x18e0] sm:$0xff] }
 0x16b   : > { %9213 = vmatpush1.bf16.msra.mxu1 %v13203_v18  ;;  %8767 = vmatprep.subr.bf16.mxu0 %v13008_v23  ;;  %v13230_v23 = vpack.c.bf16 %v2010_v10, %v2008_v59  ;;  %v2033_v61 = vld [vmem:[%s12174_s28 + $0x19c0] sm:$0xff]  ;;  %v2036_v59 = vld [vmem:[%s12174_s28 + $0x1aa8] sm:$0xff] }
 0x16c   : > { %9215 = vmatprep.subr.bf16.mxu1 %v13206_v0  ;;  %v2038_v10 = vld [vmem:[%s12174_s28 + $0x1b88] sm:$0xff] }
 0x16e   : > { %8769 = vmatpush1.bf16.msra.mxu0 %v13017_v58  ;;  %v13239_v58 = vpack.c.bf16 %v2009_v34, %v2007_v24  ;;  %v2035_v24 = vld [vmem:[%s12174_s28 + $0x1aa0] sm:$0xff] }
 0x16f   : > { %9217 = vmatpush1.bf16.msra.mxu1 %v13215_v8  ;;  %8771 = vmatprep.subr.bf16.mxu0 %v13020_v22  ;;  %v13242_v22 = vpack.c.bf16 %v2014_v27, %v2012_v39  ;;  %v2037_v34 = vld [vmem:[%s12174_s28 + $0x1b80] sm:$0xff]  ;;  %v2115_v39 = vld [vmem:[%s12174_s28 + $0x78] sm:$0xff] }
 0x170   : > { %9219 = vmatprep.subr.bf16.mxu1 %v13218_v15  ;;  %v2117_v27 = vld [vmem:[%s12174_s28 + $0x158] sm:$0xff] }
 0x172   : > { %8773 = vmatpush1.bf16.msra.mxu0 %v13029_v26  ;;  %v13251_v26 = vpack.c.bf16 %v2013_v48, %v2011_v47  ;;  %v2114_v47 = vld [vmem:[%s12174_s28 + $0x70] sm:$0xff] }
 0x173   : > { %9221 = vmatpush1.bf16.msra.mxu1 %v13227_v30  ;;  %8775 = vmatprep.subr.bf16.mxu0 %v13032_v45  ;;  %v13254_v45 = vpack.c.bf16 %v2018_v31, %v2016_v49  ;;  %v2116_v48 = vld [vmem:[%s12174_s28 + $0x150] sm:$0xff]  ;;  %v2119_v49 = vld [vmem:[%s12174_s28 + $0x238] sm:$0xff] }
 0x174   : > { %9223 = vmatprep.subr.bf16.mxu1 %v13230_v23  ;;  %v2121_v31 = vld [vmem:[%s12174_s28 + $0x318] sm:$0xff] }
 0x176   : > { %8777 = vmatpush1.bf16.msra.mxu0 %v13041_v51  ;;  %v13263_v51 = vpack.c.bf16 %v2017_v53, %v2015_v55  ;;  %v9258_v55 = vpack.c.bf16 %v2121_v31, %v2119_v49  ;;  %v2118_v53 = vld [vmem:[%s12174_s28 + $0x230] sm:$0xff] }
 0x177   : > { %9225 = vmatpush1.bf16.msra.mxu1 %v13239_v58  ;;  %8779 = vmatprep.subr.bf16.mxu0 %v13044_v57  ;;  %v13266_v57 = vpack.c.bf16 %v2022_v62, %v2020_v60  ;;  %v2120_v60 = vld [vmem:[%s12174_s28 + $0x310] sm:$0xff]  ;;  %v2123_v62 = vld [vmem:[%s12174_s28 + $0x3f8] sm:$0xff] }
 0x178   : > { %9227 = vmatprep.subr.bf16.mxu1 %v13242_v22  ;;  %v2142_v31 = vld [vmem:[%s12174_s28 + $0xcb0] sm:$0xff] }
 0x17a   : > { %8781 = vmatpush1.bf16.msra.mxu0 %v13053_v2  ;;  %v13275_v2 = vpack.c.bf16 %v2021_v3, %v2019_v13  ;;  %v8334_v13 = vld [vmem:[%s17282_s1 + $0x68] sm:$0xff] }
 0x17b   : > { %9229 = vmatpush1.bf16.msra.mxu1 %v13251_v26  ;;  %8783 = vmatprep.subr.bf16.mxu0 %v13056_v6  ;;  %v13278_v6 = vpack.c.bf16 %v2026_v37, %v2024_v5  ;;  %v2122_v5 = vld [vmem:[%s12174_s28 + $0x3f0] sm:$0xff] }
 0x17c   : > { %9231 = vmatprep.subr.bf16.mxu1 %v13254_v45  ;;  %v2124_v37 = vld [vmem:[%s12174_s28 + $0x4d0] sm:$0xff] }
 0x17e   : > { %8785 = vmatpush1.bf16.msra.mxu0 %v13065_v19  ;;  %v13287_v19 = vpack.c.bf16 %v2025_v12, %v2023_v56  ;;  %v2127_v56 = vld [vmem:[%s12174_s28 + $0x5b8] sm:$0xff] }
 0x17f   : > { %9233 = vmatpush1.bf16.msra.mxu1 %v13263_v51  ;;  %8787 = vmatprep.subr.bf16.mxu0 %v13068_v44  ;;  %v13290_v44 = vpack.c.bf16 %v2030_v43, %v2028_v16  ;;  %v2129_v12 = vld [vmem:[%s12174_s28 + $0x698] sm:$0xff]  ;;  %v2126_v16 = vld [vmem:[%s12174_s28 + $0x5b0] sm:$0xff] }
 0x180   : > { %9235 = vmatprep.subr.bf16.mxu1 %v13266_v57  ;;  %v2128_v43 = vld [vmem:[%s12174_s28 + $0x690] sm:$0xff] }
 0x182   : > { %8789 = vmatpush1.bf16.msra.mxu0 %v13077_v32  ;;  %v13299_v32 = vpack.c.bf16 %v2029_v20, %v2027_v42  ;;  %v2131_v42 = vld [vmem:[%s12174_s28 + $0x778] sm:$0xff] }
 0x183   : > { %9237 = vmatpush1.bf16.msra.mxu1 %v13275_v2  ;;  %8791 = vmatprep.subr.bf16.mxu0 %v13080_v36  ;;  %v13302_v36 = vpack.c.bf16 %v2034_v9, %v2032_v25  ;;  %v2133_v20 = vld [vmem:[%s12174_s28 + $0x858] sm:$0xff]  ;;  %v2130_v25 = vld [vmem:[%s12174_s28 + $0x770] sm:$0xff] }
 0x184   : > { %9239 = vmatprep.subr.bf16.mxu1 %v13278_v6  ;;  %v2132_v9 = vld [vmem:[%s12174_s28 + $0x850] sm:$0xff] }
 0x186   : > { %8793 = vmatpush1.bf16.msra.mxu0 %v13089_v46  ;;  %v13311_v46 = vpack.c.bf16 %v2033_v61, %v2031_v29  ;;  %v2135_v29 = vld [vmem:[%s12174_s28 + $0x938] sm:$0xff] }
 0x187   : > { %9241 = vmatpush1.bf16.msra.mxu1 %v13287_v19  ;;  %8795 = vmatprep.subr.bf16.mxu0 %v13092_v40  ;;  %v13314_v40 = vpack.c.bf16 %v2038_v10, %v2036_v59  ;;  %v2137_v61 = vld [vmem:[%s12174_s28 + $0xa18] sm:$0xff]  ;;  %v2136_v10 = vld [vmem:[%s12174_s28 + $0xa10] sm:$0xff] }
 0x188   : > { %9243 = vmatprep.subr.bf16.mxu1 %v13290_v44  ;;  %v9274_v59 = vpack.c.bf16 %v2137_v61, %v2135_v29  ;;  %v2168_v29 = vld [vmem:[%s12174_s28 + $0x1810] sm:$0xff]  ;;  %v2171_v61 = vld [vmem:[%s12174_s28 + $0x18f8] sm:$0xff] }
 0x18a   : > { %8797 = vmatpush1.bf16.msra.mxu0 %v13101_v63  ;;  %v13323_v63 = vpack.c.bf16 %v2037_v34, %v2035_v24  ;;  %v2139_v24 = vld [vmem:[%s12174_s28 + $0xaf8] sm:$0xff] }
 0x18b   : > { %9245 = vmatpush1.bf16.msra.mxu1 %v13299_v32  ;;  %8799 = vmatprep.subr.bf16.mxu0 %v13104_v1  ;;  %v9254_v1 = vpack.c.bf16 %v2117_v27, %v2115_v39  ;;  %v2141_v34 = vld [vmem:[%s12174_s28 + $0xbd8] sm:$0xff]  ;;  %v2138_v27 = vld [vmem:[%s12174_s28 + $0xaf0] sm:$0xff] }
 0x18c   : > { %9247 = vmatprep.subr.bf16.mxu1 %v13302_v36  ;;  %v9278_v39 = vpack.c.bf16 %v2141_v34, %v2139_v24  ;;  %v2177_v24 = vld [vmem:[%s12174_s28 + $0x1b98] sm:$0xff] }
 0x18e   : > { %8801 = vmatpush1.bf16.msra.mxu0 %v13113_v50  ;;  %v8331_v50 = vld [vmem:[%s17282_s1 + $0x50] sm:$0xff] }
 0x18f   : > { %9249 = vmatpush1.bf16.msra.mxu1 %v13311_v46  ;;  %8803 = vmatprep.subr.bf16.mxu0 %v13116_v4  ;;  %v9256_v4 = vpack.c.bf16 %v2116_v48, %v2114_v47  ;;  %v12121_v47 = vmov 0   ;;  %v2143_v48 = vld [vmem:[%s12174_s28 + $0xcb8] sm:$0xff] }
 0x190   : > { %9251 = vmatprep.subr.bf16.mxu1 %v13314_v40  ;;  %12112 = vset.pattern.permute.xlu0 %v12121_v47  ;;  %v2337_v47 = vld [vmem:[%s12174_s28 + $0x30] sm:$0xff] }
 0x192   : > { %8805 = vmatpush1.bf16.msra.mxu0 %v13125_v7  ;;  %v2125_v7 = vld [vmem:[%s12174_s28 + $0x4d8] sm:$0xff] }
 0x193   : > { %9253 = vmatpush1.bf16.msra.mxu1 %v13323_v63  ;;  %8807 = vmatprep.subr.bf16.mxu0 %v13128_v38  ;;  %v9260_v38 = vpack.c.bf16 %v2120_v60, %v2118_v53  ;;  %v9262_v3 = vpack.c.bf16 %v2125_v7, %v2123_v62  ;;  %v2146_v53 = vld [vmem:[%s12174_s28 + $0xe70] sm:$0xff]  ;;  %v2151_v62 = vld [vmem:[%s12174_s28 + $0x1038] sm:$0xff] }
 0x194   : > { %9255 = vmatprep.subr.bf16.mxu1 %v9254_v1  ;;  %v2140_v1 = vld [vmem:[%s12174_s28 + $0xbd0] sm:$0xff]  ;;  %v2153_v7 = vld [vmem:[%s12174_s28 + $0x1118] sm:$0xff] }
 0x195   : > { %1102 = vmatmul.mubr.f32.vlgmr.msra.gmra.mrb[0].mxu0 %v8331_v50  ;;  %v2148_v60 = vld [vmem:[%s12174_s28 + $0xf50] sm:$0xff] }
 0x196   : > { %8809 = vmatpush1.bf16.msra.mxu0 %v13140_v54  ;;  %2106 = vmatmul.mubr.f32.vlgmr.msra.gmra.mrb[0].mxu1 %v8331_v50  ;;  %v9264_v54 = vpack.c.bf16 %v2124_v37, %v2122_v5  ;;  %v2144_v50 = vld [vmem:[%s12174_s28 + $0xd90] sm:$0xff]  ;;  %v2157_v5 = vld [vmem:[%s12174_s28 + $0x12d8] sm:$0xff] }
 0x197   : > { %9257 = vmatpush1.bf16.msra.mxu1 %v9256_v4  ;;  %8811 = vmatprep.subr.bf16.mxu0 %v13143_v33  ;;  %v9266_v33 = vpack.c.bf16 %v2129_v12, %v2127_v56  ;;  %v2147_v4 = vld [vmem:[%s12174_s28 + $0xe78] sm:$0xff]  ;;  %v2154_v37 = vld [vmem:[%s12174_s28 + $0x11f0] sm:$0xff] }
 0x198   : > { %9259 = vmatprep.subr.bf16.mxu1 %v9258_v55  ;;  %1241 = vmatprep.mubr.f32.mxu0 %v8334_v13  ;;  %v2149_v55 = vld [vmem:[%s12174_s28 + $0xf58] sm:$0xff]  ;;  %v2156_v56 = vld [vmem:[%s12174_s28 + $0x12d0] sm:$0xff] }
 0x199   : > { %2244 = vmatprep.mubr.f32.mxu1 %v8334_v13  ;;  %v2150_v13 = vld [vmem:[%s12174_s28 + $0x1030] sm:$0xff]  ;;  %v2159_v12 = vld [vmem:[%s12174_s28 + $0x13b8] sm:$0xff] }
 0x19a   : > { %8813 = vmatpush1.bf16.msra.mxu0 %v13155_v28  ;;  %v9268_v28 = vpack.c.bf16 %v2128_v43, %v2126_v16  ;;  %v2160_v16 = vld [vmem:[%s12174_s28 + $0x1490] sm:$0xff]  ;;  %v2163_v43 = vld [vmem:[%s12174_s28 + $0x1578] sm:$0xff] }
 0x19b   : > { %9261 = vmatpush1.bf16.msra.mxu1 %v9260_v38  ;;  %8815 = vmatprep.subr.bf16.mxu0 %v13158_v35  ;;  %v9270_v35 = vpack.c.bf16 %v2133_v20, %v2131_v42  ;;  %v2152_v38 = vld [vmem:[%s12174_s28 + $0x1110] sm:$0xff]  ;;  %v2165_v42 = vld [vmem:[%s12174_s28 + $0x1658] sm:$0xff] }
 0x19c   : > { %9263 = vmatprep.subr.bf16.mxu1 %v9262_v3  ;;  %v2155_v3 = vld [vmem:[%s12174_s28 + $0x11f8] sm:$0xff]  ;;  %v2162_v20 = vld [vmem:[%s12174_s28 + $0x1570] sm:$0xff] }
 0x19e   : > { %8817 = vmatpush1.bf16.msra.mxu0 %v13167_v11  ;;  %v9272_v11 = vpack.c.bf16 %v2132_v9, %v2130_v25  ;;  %v2169_v25 = vld [vmem:[%s12174_s28 + $0x1818] sm:$0xff]  ;;  %v2166_v9 = vld [vmem:[%s12174_s28 + $0x1730] sm:$0xff] }
 0x19f   : > { %9265 = vmatpush1.bf16.msra.mxu1 %v9264_v54  ;;  %8819 = vmatprep.subr.bf16.mxu0 %v13170_v14  ;;  %v2134_v14 = vld [vmem:[%s12174_s28 + $0x930] sm:$0xff]  ;;  %v2161_v54 = vld [vmem:[%s12174_s28 + $0x1498] sm:$0xff] }
 0x1a0   : > { %9267 = vmatprep.subr.bf16.mxu1 %v9266_v33  ;;  %v2158_v33 = vld [vmem:[%s12174_s28 + $0x13b0] sm:$0xff] }
 0x1a2   : > { %8821 = vmatpush1.bf16.msra.mxu0 %v13179_v41  ;;  %v9276_v41 = vpack.c.bf16 %v2136_v10, %v2134_v14  ;;  %v2172_v14 = vld [vmem:[%s12174_s28 + $0x19d0] sm:$0xff]  ;;  %v2175_v10 = vld [vmem:[%s12174_s28 + $0x1ab8] sm:$0xff] }
 0x1a3   : > { %9269 = vmatpush1.bf16.msra.mxu1 %v9268_v28  ;;  %8823 = vmatprep.subr.bf16.mxu0 %v13182_v21  ;;  %v274_v21 = vld [vmem:[%s17283_s2] sm:$0xff]  ;;  %v2164_v28 = vld [vmem:[%s12174_s28 + $0x1650] sm:$0xff]  ;;  %v9314_v34 = vpack.c.bf16 %v2177_v24, %v2175_v10 }
 0x1a4   : > { %9271 = vmatprep.subr.bf16.mxu1 %v9270_v35  ;;  %1252 = vperm.xlu0 %12112, %v274_v21   ;;  %v2167_v35 = vld [vmem:[%s12174_s28 + $0x1738] sm:$0xff]  ;;  %v3340_v10 = vld [vmem:[%s12174_s28 + $0x740] sm:$0xff] }
 0x1a5   : > { %v2338_v21 = vld [vmem:[%s12174_s28 + $0x38] sm:$0xff] }
 0x1a6   : > { %8825 = vmatpush1.bf16.msra.mxu0 %v13191_v52  ;;  %v2145_v52 = vld [vmem:[%s12174_s28 + $0xd98] sm:$0xff] }
 0x1a7   : > { %9273 = vmatpush1.bf16.msra.mxu1 %v9272_v11  ;;  %8827 = vmatprep.subr.bf16.mxu0 %v13194_v17  ;;  %v9280_v17 = vpack.c.bf16 %v2140_v1, %v2138_v27  ;;  %v9282_v49 = vpack.c.bf16 %v2145_v52, %v2143_v48  ;;  %v2173_v11 = vld [vmem:[%s12174_s28 + $0x19d8] sm:$0xff]  ;;  %v3325_v27 = vld [vmem:[%s12174_s28 + $0x48] sm:$0xff]  ;;  %v2339_v48 = vld [vmem:[%s12174_s28 + $0x110] sm:$0xff] }
 0x1a8   : > { %9275 = vmatprep.subr.bf16.mxu1 %v9274_v59  ;;  %v2170_v59 = vld [vmem:[%s12174_s28 + $0x18f0] sm:$0xff]  ;;  %v3324_v52 = vld [vmem:[%s12174_s28 + $0x40] sm:$0xff] }
 0x1aa   : > { %8829 = vmatpush1.bf16.msra.mxu0 %v13203_v18  ;;  %v9284_v18 = vpack.c.bf16 %v2144_v50, %v2142_v31  ;;  %v2342_v31 = vld [vmem:[%s12174_s28 + $0x1f8] sm:$0xff] }
 0x1ab   : > { %9277 = vmatpush1.bf16.msra.mxu1 %v9276_v41  ;;  %8831 = vmatprep.subr.bf16.mxu0 %v13206_v0  ;;  %v9286_v0 = vpack.c.bf16 %v2149_v55, %v2147_v4  ;;  %v2176_v41 = vld [vmem:[%s12174_s28 + $0x1b90] sm:$0xff]  ;;  %v2344_v50 = vld [vmem:[%s12174_s28 + $0x2d8] sm:$0xff]  ;;  %v3331_v4 = vld [vmem:[%s12174_s28 + $0x2e8] sm:$0xff]  ;;  %v13448_v55 = vpack.c.bf16 %v2339_v48, %v2337_v47 }
 0x1ac   : > { %9279 = vmatprep.subr.bf16.mxu1 %v9278_v39  ;;  %v2340_v39 = vld [vmem:[%s12174_s28 + $0x118] sm:$0xff]  ;;  %v2359_v47 = vld [vmem:[%s12174_s28 + $0x9d0] sm:$0xff]  ;;  %v3344_v48 = vld [vmem:[%s12174_s28 + $0x900] sm:$0xff] }
 0x1ad   : > { %v13434_v1 = vpack.c.bf16 %v2340_v39, %v2338_v21  ;;  %v3347_v21 = vld [vmem:[%s12174_s28 + $0x9e8] sm:$0xff] }
 0x1ae   : > { %8833 = vmatpush1.bf16.msra.mxu0 %v13215_v8  ;;  %v9288_v8 = vpack.c.bf16 %v2148_v60, %v2146_v53  ;;  %v2341_v53 = vld [vmem:[%s12174_s28 + $0x1f0] sm:$0xff] }
 0x1af   : > { %9281 = vmatpush1.bf16.msra.mxu1 %v9280_v17  ;;  %8835 = vmatprep.subr.bf16.mxu0 %v13218_v15  ;;  %v9290_v15 = vpack.c.bf16 %v2153_v7, %v2151_v62  ;;  %v2343_v60 = vld [vmem:[%s12174_s28 + $0x2d0] sm:$0xff]  ;;  %v3328_v62 = vld [vmem:[%s12174_s28 + $0x200] sm:$0xff] }
 0x1b0   : > { %9283 = vmatprep.subr.bf16.mxu1 %v9282_v49  ;;  %v3326_v49 = vld [vmem:[%s12174_s28 + $0x120] sm:$0xff] }
 0x1b1   : > { %v3330_v7 = vld [vmem:[%s12174_s28 + $0x2e0] sm:$0xff] }
 0x1b2   : > { %8837 = vmatpush1.bf16.msra.mxu0 %v13227_v30  ;;  %v9292_v30 = vpack.c.bf16 %v2152_v38, %v2150_v13  ;;  %v3333_v13 = vld [vmem:[%s12174_s28 + $0x3c8] sm:$0xff] }
 0x1b3   : > { %9285 = vmatpush1.bf16.msra.mxu1 %v9284_v18  ;;  %8839 = vmatprep.subr.bf16.mxu0 %v13230_v23  ;;  %v9294_v23 = vpack.c.bf16 %v2157_v5, %v2155_v3  ;;  %v9768_v18 = vpack.c.bf16 %v3326_v49, %v3324_v52  ;;  %v3335_v38 = vld [vmem:[%s12174_s28 + $0x4a8] sm:$0xff]  ;;  %v8348_v3 = vld [vmem:[%s17282_s1 + $0x18] sm:$0xff]  ;;  %v13465_v5 = vpack.c.bf16 %v2343_v60, %v2341_v53  ;;  %v2361_v53 = vld [vmem:[%s12174_s28 + $0xab0] sm:$0xff] }
 0x1b4   : > { %9287 = vmatprep.subr.bf16.mxu1 %v9286_v0  ;;  %v13451_v0 = vpack.c.bf16 %v2344_v50, %v2342_v31  ;;  %v2362_v49 = vld [vmem:[%s12174_s28 + $0xab8] sm:$0xff]  ;;  %v3349_v50 = vld [vmem:[%s12174_s28 + $0xac8] sm:$0xff]  ;;  %v2363_v60 = vld [vmem:[%s12174_s28 + $0xb90] sm:$0xff] }
 0x1b5   : > { %v2364_v31 = vld [vmem:[%s12174_s28 + $0xb98] sm:$0xff] }
 0x1b6   : > { %8841 = vmatpush1.bf16.msra.mxu0 %v13239_v58  ;;  %v9296_v58 = vpack.c.bf16 %v2156_v56, %v2154_v37  ;;  %v2345_v37 = vld [vmem:[%s12174_s28 + $0x3b0] sm:$0xff] }
 0x1b7   : > { %9289 = vmatpush1.bf16.msra.mxu1 %v9288_v8  ;;  %8843 = vmatprep.subr.bf16.mxu0 %v13242_v22  ;;  %v9298_v22 = vpack.c.bf16 %v2161_v54, %v2159_v12  ;;  %v2346_v8 = vld [vmem:[%s12174_s28 + $0x3b8] sm:$0xff]  ;;  %v2347_v56 = vld [vmem:[%s12174_s28 + $0x490] sm:$0xff]  ;;  %v3332_v12 = vld [vmem:[%s12174_s28 + $0x3c0] sm:$0xff]  ;;  %v9774_v54 = vpack.c.bf16 %v3335_v38, %v3333_v13 }
 0x1b8   : > { %9291 = vmatprep.subr.bf16.mxu1 %v9290_v15  ;;  %v2348_v15 = vld [vmem:[%s12174_s28 + $0x498] sm:$0xff]  ;;  %v3353_v13 = vld [vmem:[%s12174_s28 + $0xc88] sm:$0xff] }
 0x1b9   : > { %v3355_v38 = vld [vmem:[%s12174_s28 + $0xd68] sm:$0xff] }
 0x1ba   : > { %8845 = vmatpush1.bf16.msra.mxu0 %v13251_v26  ;;  %v9300_v26 = vpack.c.bf16 %v2160_v16, %v2158_v33  ;;  %v2352_v33 = vld [vmem:[%s12174_s28 + $0x658] sm:$0xff]  ;;  %v3337_v16 = vld [vmem:[%s12174_s28 + $0x588] sm:$0xff] }
 0x1bb   : > { %9293 = vmatpush1.bf16.msra.mxu1 %v9292_v30  ;;  %8847 = vmatprep.subr.bf16.mxu0 %v13254_v45  ;;  %v9302_v45 = vpack.c.bf16 %v2165_v42, %v2163_v43  ;;  %v9772_v30 = vpack.c.bf16 %v3330_v7, %v3328_v62  ;;  %v3339_v43 = vld [vmem:[%s12174_s28 + $0x668] sm:$0xff]  ;;  %v13479_v42 = vpack.c.bf16 %v2347_v56, %v2345_v37  ;;  %v3348_v62 = vld [vmem:[%s12174_s28 + $0xac0] sm:$0xff]  ;;  %v2365_v56 = vld [vmem:[%s12174_s28 + $0xc70] sm:$0xff] }
 0x1bc   : > { %9295 = vmatprep.subr.bf16.mxu1 %v9294_v23  ;;  %v13468_v23 = vpack.c.bf16 %v2348_v15, %v2346_v8  ;;  %v3350_v7 = vld [vmem:[%s12174_s28 + $0xba0] sm:$0xff]  ;;  %v2366_v8 = vld [vmem:[%s12174_s28 + $0xc78] sm:$0xff] }
 0x1bd   : > { %v2368_v15 = vld [vmem:[%s12174_s28 + $0xd58] sm:$0xff] }
 0x1be   : > { %8849 = vmatpush1.bf16.msra.mxu0 %v13263_v51  ;;  %v9304_v51 = vpack.c.bf16 %v2164_v28, %v2162_v20  ;;  %v2349_v20 = vld [vmem:[%s12174_s28 + $0x570] sm:$0xff]  ;;  %v13538_v37 = vpack.c.bf16 %v2368_v15, %v2366_v8  ;;  %v3371_v8 = vld [vmem:[%s12174_s28 + $0x1468] sm:$0xff] }
 0x1bf   : > { %9297 = vmatpush1.bf16.msra.mxu1 %v9296_v58  ;;  %8851 = vmatprep.subr.bf16.mxu0 %v13266_v57  ;;  %v9306_v57 = vpack.c.bf16 %v2169_v25, %v2167_v35  ;;  %v3334_v58 = vld [vmem:[%s12174_s28 + $0x4a0] sm:$0xff]  ;;  %v2351_v28 = vld [vmem:[%s12174_s28 + $0x650] sm:$0xff]  ;;  %v9778_v25 = vpack.c.bf16 %v3339_v43, %v3337_v16  ;;  %v2372_v16 = vld [vmem:[%s12174_s28 + $0xf18] sm:$0xff] }
 0x1c0   : > { %9299 = vmatprep.subr.bf16.mxu1 %v9298_v22  ;;  %v2350_v22 = vld [vmem:[%s12174_s28 + $0x578] sm:$0xff]  ;;  %v3336_v35 = vld [vmem:[%s12174_s28 + $0x580] sm:$0xff]  ;;  %v3357_v43 = vld [vmem:[%s12174_s28 + $0xe48] sm:$0xff] }
 0x1c2   : > { %8853 = vmatpush1.bf16.msra.mxu0 %v13275_v2  ;;  %v9308_v2 = vpack.c.bf16 %v2168_v29, %v2166_v9  ;;  %v2356_v9 = vld [vmem:[%s12174_s28 + $0x818] sm:$0xff]  ;;  %v3341_v29 = vld [vmem:[%s12174_s28 + $0x748] sm:$0xff] }
 0x1c3   : > { %9301 = vmatpush1.bf16.msra.mxu1 %v9300_v26  ;;  %8855 = vmatprep.subr.bf16.mxu0 %v13278_v6  ;;  %v9310_v6 = vpack.c.bf16 %v2173_v11, %v2171_v61  ;;  %v9776_v26 = vpack.c.bf16 %v3334_v58, %v3332_v12  ;;  %v3343_v61 = vld [vmem:[%s12174_s28 + $0x828] sm:$0xff]  ;;  %v13493_v11 = vpack.c.bf16 %v2351_v28, %v2349_v20  ;;  %v2367_v12 = vld [vmem:[%s12174_s28 + $0xd50] sm:$0xff] }
 0x1c4   : > { %9303 = vmatprep.subr.bf16.mxu1 %v9302_v45  ;;  %v13482_v45 = vpack.c.bf16 %v2352_v33, %v2350_v22  ;;  %v9782_v24 = vpack.c.bf16 %v3343_v61, %v3341_v29  ;;  %v9794_v58 = vpack.c.bf16 %v3355_v38, %v3353_v13  ;;  %v3354_v22 = vld [vmem:[%s12174_s28 + $0xd60] sm:$0xff]  ;;  %v2370_v33 = vld [vmem:[%s12174_s28 + $0xe38] sm:$0xff]  ;;  %v13549_v20 = vpack.c.bf16 %v2367_v12, %v2365_v56  ;;  %v2383_v56 = vld [vmem:[%s12174_s28 + $0x1450] sm:$0xff] }
 0x1c5   : > { %v3358_v29 = vld [vmem:[%s12174_s28 + $0xf20] sm:$0xff]  ;;  %v2374_v61 = vld [vmem:[%s12174_s28 + $0xff8] sm:$0xff] }
 0x1c6   : > { %8857 = vmatpush1.bf16.msra.mxu0 %v13287_v19  ;;  %v9312_v19 = vpack.c.bf16 %v2172_v14, %v2170_v59  ;;  %v2353_v59 = vld [vmem:[%s12174_s28 + $0x730] sm:$0xff]  ;;  %v3368_v12 = vld [vmem:[%s12174_s28 + $0x1380] sm:$0xff] }
 0x1c7   : > { %9305 = vmatpush1.bf16.msra.mxu1 %v9304_v51  ;;  %8859 = vmatprep.subr.bf16.mxu0 %v13290_v44  ;;  %v2174_v44 = vld [vmem:[%s12174_s28 + $0x1ab0] sm:$0xff]  ;;  %v3338_v51 = vld [vmem:[%s12174_s28 + $0x660] sm:$0xff] }
 0x1c8   : > { %9307 = vmatprep.subr.bf16.mxu1 %v9306_v57  ;;  %v2354_v57 = vld [vmem:[%s12174_s28 + $0x738] sm:$0xff]  ;;  %v2355_v14 = vld [vmem:[%s12174_s28 + $0x810] sm:$0xff] }
 0x1c9   : > { %v13507_v39 = vpack.c.bf16 %v2355_v14, %v2353_v59  ;;  %v3361_v59 = vld [vmem:[%s12174_s28 + $0x1008] sm:$0xff] }
 0x1ca   : > { %8861 = vmatpush1.bf16.msra.mxu0 %v13299_v32  ;;  %v3327_v32 = vld [vmem:[%s12174_s28 + $0x128] sm:$0xff] }
 0x1cb   : > { %9309 = vmatpush1.bf16.msra.mxu1 %v9308_v2  ;;  %8863 = vmatprep.subr.bf16.mxu0 %v13302_v36  ;;  %v9316_v36 = vpack.c.bf16 %v2176_v41, %v2174_v44  ;;  %v9766_v17 = vpack.c.bf16 %v3327_v32, %v3325_v27  ;;  %v9780_v2 = vpack.c.bf16 %v3338_v51, %v3336_v35  ;;  %v2358_v44 = vld [vmem:[%s12174_s28 + $0x8f8] sm:$0xff]  ;;  %v3345_v41 = vld [vmem:[%s12174_s28 + $0x908] sm:$0xff]  ;;  %v2371_v51 = vld [vmem:[%s12174_s28 + $0xf10] sm:$0xff] }
 0x1cc   : > { %9311 = vmatprep.subr.bf16.mxu1 %v9310_v6  ;;  %v13496_v6 = vpack.c.bf16 %v2356_v9, %v2354_v57  ;;  %v9786_v52 = vpack.c.bf16 %v3347_v21, %v3345_v41  ;;  %v13552_v35 = vpack.c.bf16 %v2372_v16, %v2370_v33  ;;  %v3356_v57 = vld [vmem:[%s12174_s28 + $0xe40] sm:$0xff]  ;;  %v3363_v14 = vld [vmem:[%s12174_s28 + $0x10e8] sm:$0xff]  ;;  %v2388_v33 = vld [vmem:[%s12174_s28 + $0x1618] sm:$0xff] }
 0x1cd   : > { %v3360_v41 = vld [vmem:[%s12174_s28 + $0x1000] sm:$0xff]  ;;  %v9802_v21 = vpack.c.bf16 %v3363_v14, %v3361_v59  ;;  %v3373_v16 = vld [vmem:[%s12174_s28 + $0x1548] sm:$0xff]  ;;  %v2392_v59 = vld [vmem:[%s12174_s28 + $0x17d8] sm:$0xff] }
 0x1ce   : > { %8865 = vmatpush1.bf16.msra.mxu0 %v13311_v46  ;;  %v3329_v46 = vld [vmem:[%s12174_s28 + $0x208] sm:$0xff] }
 0x1cf   : > { %9313 = vmatpush1.bf16.msra.mxu1 %v9312_v19  ;;  %8867 = vmatprep.subr.bf16.mxu0 %v13314_v40  ;;  %v8333_v40 = vld [vmem:[%s17282_s1 + $0x60] sm:$0xff]  ;;  %v3377_v14 = vld [vmem:[%s12174_s28 + $0x1708] sm:$0xff] }
 0x1d0   : > { %9315 = vmatprep.subr.bf16.mxu1 %v9314_v34  ;;  %v3342_v19 = vld [vmem:[%s12174_s28 + $0x820] sm:$0xff]  ;;  %v2360_v34 = vld [vmem:[%s12174_s28 + $0x9d8] sm:$0xff] }
 0x1d1   : > { %v9784_v27 = vpack.c.bf16 %v3342_v19, %v3340_v10  ;;  %v13510_v32 = vpack.c.bf16 %v2360_v34, %v2358_v44  ;;  %v2373_v44 = vld [vmem:[%s12174_s28 + $0xff0] sm:$0xff] }
 0x1d2   : > { %8869 = vmatpush1.bf16.msra.mxu0 %v13323_v63  ;;  %v9770_v63 = vpack.c.bf16 %v3331_v4, %v3329_v46  ;;  %v3351_v46 = vld [vmem:[%s12174_s28 + $0xba8] sm:$0xff]  ;;  %v2375_v34 = vld [vmem:[%s12174_s28 + $0x10d0] sm:$0xff] }
 0x1d3   : > { %9317 = vmatpush1.bf16.msra.mxu1 %v9316_v36  ;;  %9319 = vmatprep.subr.bf16.mxu0 %v13434_v1  ;;  %v2357_v36 = vld [vmem:[%s12174_s28 + $0x8f0] sm:$0xff] }
 0x1d4   : > { %9767 = vmatprep.subr.bf16.mxu1 %v9766_v17  ;;  %v3346_v17 = vld [vmem:[%s12174_s28 + $0x9e0] sm:$0xff]  ;;  %v13521_v4 = vpack.c.bf16 %v2359_v47, %v2357_v36  ;;  %v2378_v36 = vld [vmem:[%s12174_s28 + $0x11b8] sm:$0xff] }
 0x1d5   : > { %1242 = vmatmul.mubr.f32.vlgmr.msra.gmra.mrb[0].mxu0 %v8333_v40  ;;  %v2380_v47 = vld [vmem:[%s12174_s28 + $0x1298] sm:$0xff] }
 0x1d6   : > { %2245 = vmatmul.mubr.f32.vlgmr.msra.gmra.mrb[0].mxu1 %v8333_v40  ;;  %9321 = vmatpush1.bf16.msra.mxu0 %v13448_v55  ;;  %v9788_v40 = vpack.c.bf16 %v3346_v17, %v3344_v48  ;;  %v3365_v48 = vld [vmem:[%s12174_s28 + $0x11c8] sm:$0xff]  ;;  %v13577_v17 = vpack.c.bf16 %v2375_v34, %v2373_v44 }
 0x1d7   : > { %9769 = vmatpush1.bf16.msra.mxu1 %v9768_v18  ;;  %9323 = vmatprep.subr.bf16.mxu0 %v13451_v0  ;;  %v13524_v18 = vpack.c.bf16 %v2364_v31, %v2362_v49  ;;  %v13580_v31 = vpack.c.bf16 %v2380_v47, %v2378_v36  ;;  %v3376_v36 = vld [vmem:[%s12174_s28 + $0x1700] sm:$0xff] }
 0x1d8   : > { %9771 = vmatprep.subr.bf16.mxu1 %v9770_v63  ;;  %2467 = vmatprep.mubr.f32.mxu0 %v8348_v3  ;;  %v9790_v63 = vpack.c.bf16 %v3351_v46, %v3349_v50  ;;  %v2377_v50 = vld [vmem:[%s12174_s28 + $0x11b0] sm:$0xff] }
 0x1d9   : > { %3454 = vmatprep.mubr.f32.mxu1 %v8348_v3  ;;  %v13535_v3 = vpack.c.bf16 %v2363_v60, %v2361_v53  ;;  %v2379_v46 = vld [vmem:[%s12174_s28 + $0x1290] sm:$0xff]  ;;  %v3366_v60 = vld [vmem:[%s12174_s28 + $0x12a0] sm:$0xff] }
 0x1da   : > { %9325 = vmatpush1.bf16.msra.mxu0 %v13465_v5  ;;  %v13591_v15 = vpack.c.bf16 %v2379_v46, %v2377_v50  ;;  %v3381_v50 = vld [vmem:[%s12174_s28 + $0x18c8] sm:$0xff] }
 0x1db   : > { %9773 = vmatpush1.bf16.msra.mxu1 %v9772_v30  ;;  %9327 = vmatprep.subr.bf16.mxu0 %v13468_v23  ;;  %v9792_v30 = vpack.c.bf16 %v3350_v7, %v3348_v62  ;;  %v2382_v62 = vld [vmem:[%s12174_s28 + $0x1378] sm:$0xff]  ;;  %v3369_v7 = vld [vmem:[%s12174_s28 + $0x1388] sm:$0xff] }
 0x1dc   : > { %9775 = vmatprep.subr.bf16.mxu1 %v9774_v54  ;;  %v3352_v54 = vld [vmem:[%s12174_s28 + $0xc80] sm:$0xff]  ;;  %v3383_v46 = vld [vmem:[%s12174_s28 + $0x19a8] sm:$0xff] }
 0x1dd   : > { %v9796_v28 = vpack.c.bf16 %v3354_v22, %v3352_v54  ;;  %v9810_v54 = vpack.c.bf16 %v3371_v8, %v3369_v7  ;;  %v2386_v22 = vld [vmem:[%s12174_s28 + $0x1538] sm:$0xff]  ;;  %v3380_v7 = vld [vmem:[%s12174_s28 + $0x18c0] sm:$0xff]  ;;  %v9822_v8 = vpack.c.bf16 %v3383_v46, %v3381_v50  ;;  %v2282_v50 = vld [vmem:[%s12174_s28 + $0x488] sm:$0xff] }
 0x1de   : > { %9329 = vmatpush1.bf16.msra.mxu0 %v13479_v42  ;;  %v2336_v46 = vld [vmem:[%s17282_s1 + $0x8] sm:$0xff] }
 0x1df   : > { %9777 = vmatpush1.bf16.msra.mxu1 %v9776_v26  ;;  %9331 = vmatprep.subr.bf16.mxu0 %v13482_v45  ;;  %v3359_v26 = vld [vmem:[%s12174_s28 + $0xf28] sm:$0xff] }
 0x1e0   : > { %9779 = vmatprep.subr.bf16.mxu1 %v9778_v25  ;;  %v2369_v25 = vld [vmem:[%s12174_s28 + $0xe30] sm:$0xff]  ;;  %v9798_v9 = vpack.c.bf16 %v3359_v26, %v3357_v43  ;;  %v3375_v43 = vld [vmem:[%s12174_s28 + $0x1628] sm:$0xff] }
 0x1e1   : > { %v13563_v10 = vpack.c.bf16 %v2371_v51, %v2369_v25  ;;  %v13608_v25 = vpack.c.bf16 %v2388_v33, %v2386_v22  ;;  %v2385_v51 = vld [vmem:[%s12174_s28 + $0x1530] sm:$0xff] }
 0x1e2   : > { %9333 = vmatpush1.bf16.msra.mxu0 %v13493_v11 }
 0x1e3   : > { %9781 = vmatpush1.bf16.msra.mxu1 %v9780_v2  ;;  %9335 = vmatprep.subr.bf16.mxu0 %v13496_v6  ;;  %v2376_v2 = vld [vmem:[%s12174_s28 + $0x10d8] sm:$0xff] }
 0x1e4   : > { %9783 = vmatprep.subr.bf16.mxu1 %v9782_v24  ;;  %v9800_v24 = vpack.c.bf16 %v3358_v29, %v3356_v57  ;;  %v13566_v19 = vpack.c.bf16 %v2376_v2, %v2374_v61  ;;  %v2387_v57 = vld [vmem:[%s12174_s28 + $0x1610] sm:$0xff]  ;;  %v9814_v29 = vpack.c.bf16 %v3375_v43, %v3373_v16  ;;  %v3374_v61 = vld [vmem:[%s12174_s28 + $0x1620] sm:$0xff]  ;;  %v2390_v2 = vld [vmem:[%s12174_s28 + $0x16f8] sm:$0xff] }
 0x1e5   : > { %v13619_v44 = vpack.c.bf16 %v2387_v57, %v2385_v51  ;;  %v2397_v16 = vld [vmem:[%s12174_s28 + $0x1a70] sm:$0xff]  ;;  %v3386_v57 = vld [vmem:[%s12174_s28 + $0x1b60] sm:$0xff] }
 0x1e6   : > { %9337 = vmatpush1.bf16.msra.mxu0 %v13507_v39  ;;  %v2399_v43 = vld [vmem:[%s12174_s28 + $0x1b50] sm:$0xff] }
 0x1e7   : > { %9785 = vmatpush1.bf16.msra.mxu1 %v9784_v27  ;;  %9339 = vmatprep.subr.bf16.mxu0 %v13510_v32  ;;  %v3362_v27 = vld [vmem:[%s12174_s28 + $0x10e0] sm:$0xff] }
 0x1e8   : > { %9787 = vmatprep.subr.bf16.mxu1 %v9786_v52  ;;  %v3367_v52 = vld [vmem:[%s12174_s28 + $0x12a8] sm:$0xff]  ;;  %v9804_v49 = vpack.c.bf16 %v3362_v27, %v3360_v41  ;;  %v13622_v41 = vpack.c.bf16 %v2392_v59, %v2390_v2  ;;  %v2391_v27 = vld [vmem:[%s12174_s28 + $0x17d0] sm:$0xff] }
 0x1e9   : > { %v9806_v53 = vpack.c.bf16 %v3367_v52, %v3365_v48  ;;  %v3378_v48 = vld [vmem:[%s12174_s28 + $0x17e0] sm:$0xff]  ;;  %v2394_v52 = vld [vmem:[%s12174_s28 + $0x18b8] sm:$0xff] }
 0x1ea   : > { %9341 = vmatpush1.bf16.msra.mxu0 %v13521_v4 }
 0x1eb   : > { %9789 = vmatpush1.bf16.msra.mxu1 %v9788_v40  ;;  %9343 = vmatprep.subr.bf16.mxu0 %v13524_v18  ;;  %v3364_v40 = vld [vmem:[%s12174_s28 + $0x11c0] sm:$0xff] }
 0x1ec   : > { %9791 = vmatprep.subr.bf16.mxu1 %v9790_v63  ;;  %v2384_v63 = vld [vmem:[%s12174_s28 + $0x1458] sm:$0xff]  ;;  %v9808_v13 = vpack.c.bf16 %v3366_v60, %v3364_v40 }
 0x1ed   : > { %v13594_v38 = vpack.c.bf16 %v2384_v63, %v2382_v62  ;;  %v2393_v62 = vld [vmem:[%s12174_s28 + $0x18b0] sm:$0xff] }
 0x1ee   : > { %9345 = vmatpush1.bf16.msra.mxu0 %v13535_v3  ;;  %v2395_v63 = vld [vmem:[%s12174_s28 + $0x1990] sm:$0xff] }
 0x1ef   : > { %9793 = vmatpush1.bf16.msra.mxu1 %v9792_v30  ;;  %9347 = vmatprep.subr.bf16.mxu0 %v13538_v37  ;;  %v2381_v30 = vld [vmem:[%s12174_s28 + $0x1370] sm:$0xff] }
 0x1f0   : > { %9795 = vmatprep.subr.bf16.mxu1 %v9794_v58  ;;  %v3370_v58 = vld [vmem:[%s12174_s28 + $0x1460] sm:$0xff]  ;;  %v13605_v26 = vpack.c.bf16 %v2383_v56, %v2381_v30  ;;  %v2398_v30 = vld [vmem:[%s12174_s28 + $0x1a78] sm:$0xff] }
 0x1f1   : > { %v2400_v56 = vld [vmem:[%s12174_s28 + $0x1b58] sm:$0xff] }
 0x1f2   : > { %9349 = vmatpush1.bf16.msra.mxu0 %v13549_v20  ;;  %v13650_v33 = vpack.c.bf16 %v2400_v56, %v2398_v30  ;;  %v2283_v30 = vld [vmem:[%s12174_s28 + $0x560] sm:$0xff] }
 0x1f3   : > { %9797 = vmatpush1.bf16.msra.mxu1 %v9796_v28  ;;  %9351 = vmatprep.subr.bf16.mxu0 %v13552_v35  ;;  %v9812_v28 = vpack.c.bf16 %v3370_v58, %v3368_v12  ;;  %v3385_v12 = vld [vmem:[%s12174_s28 + $0x1a88] sm:$0xff]  ;;  %v13647_v58 = vpack.c.bf16 %v2395_v63, %v2393_v62  ;;  %v2279_v63 = vld [vmem:[%s12174_s28 + $0x3a0] sm:$0xff] }
 0x1f4   : > { %9799 = vmatprep.subr.bf16.mxu1 %v9798_v9  ;;  %v3372_v9 = vld [vmem:[%s12174_s28 + $0x1540] sm:$0xff] }
 0x1f5   : > { %v9816_v34 = vpack.c.bf16 %v3374_v61, %v3372_v9  ;;  %v2272_v9 = vld [vmem:[%s12174_s28 + $0x28] sm:$0xff]  ;;  %v13659_v61 = vpack.c.bf16 %v2399_v43, %v2397_v16  ;;  %v2285_v56 = vld [vmem:[%s12174_s28 + $0x640] sm:$0xff] }
 0x1f6   : > { %9353 = vmatpush1.bf16.msra.mxu0 %v13563_v10  ;;  %v2289_v16 = vld [vmem:[%s12174_s28 + $0x800] sm:$0xff]  ;;  %v2292_v43 = vld [vmem:[%s12174_s28 + $0x8e8] sm:$0xff] }
 0x1f7   : > { %9801 = vmatpush1.bf16.msra.mxu1 %v9800_v24  ;;  %9355 = vmatprep.subr.bf16.mxu0 %v13566_v19  ;;  %v3379_v24 = vld [vmem:[%s12174_s28 + $0x17e8] sm:$0xff] }
 0x1f8   : > { %9803 = vmatprep.subr.bf16.mxu1 %v9802_v21  ;;  %v2389_v21 = vld [vmem:[%s12174_s28 + $0x16f0] sm:$0xff]  ;;  %v9818_v47 = vpack.c.bf16 %v3379_v24, %v3377_v14  ;;  %v2271_v14 = vld [vmem:[%s12174_s28 + $0x20] sm:$0xff] }
 0x1f9   : > { %v13633_v40 = vpack.c.bf16 %v2391_v27, %v2389_v21  ;;  %v2273_v24 = vld [vmem:[%s12174_s28 + $0x100] sm:$0xff]  ;;  %v2278_v21 = vld [vmem:[%s12174_s28 + $0x2c8] sm:$0xff]  ;;  %v8347_v27 = vld [vmem:[%s17282_s1 + $0x10] sm:$0xff] }
 0x1fa   : > { %9357 = vmatpush1.bf16.msra.mxu0 %v13577_v17 }
 0x1fb   : > { %9805 = vmatpush1.bf16.msra.mxu1 %v9804_v49  ;;  %9359 = vmatprep.subr.bf16.mxu0 %v13580_v31  ;;  %v2396_v49 = vld [vmem:[%s12174_s28 + $0x1998] sm:$0xff] }
 0x1fc   : > { %9807 = vmatprep.subr.bf16.mxu1 %v9806_v53  ;;  %v9820_v53 = vpack.c.bf16 %v3378_v48, %v3376_v36  ;;  %v13636_v60 = vpack.c.bf16 %v2396_v49, %v2394_v52  ;;  %v9384_v36 = vpack.c.bf16 %v2273_v24, %v2271_v14  ;;  %v2275_v48 = vld [vmem:[%s12174_s28 + $0x1e0] sm:$0xff]  ;;  %v2280_v49 = vld [vmem:[%s12174_s28 + $0x3a8] sm:$0xff] }
 0x1fd   : > { %v2277_v52 = vld [vmem:[%s12174_s28 + $0x2c0] sm:$0xff]  ;;  %v9390_v62 = vpack.c.bf16 %v2282_v50, %v2280_v49  ;;  %v2300_v14 = vld [vmem:[%s12174_s28 + $0xc68] sm:$0xff] }
 0x1fe   : > { %9361 = vmatpush1.bf16.msra.mxu0 %v13591_v15  ;;  %v2302_v24 = vld [vmem:[%s12174_s28 + $0xd48] sm:$0xff]  ;;  %v2307_v50 = vld [vmem:[%s12174_s28 + $0xfe0] sm:$0xff] }
 0x1ff   : > { %9809 = vmatpush1.bf16.msra.mxu1 %v9808_v13  ;;  %9363 = vmatprep.subr.bf16.mxu0 %v13594_v38  ;;  %v3382_v13 = vld [vmem:[%s12174_s28 + $0x19a0] sm:$0xff]  ;;  %v2310_v49 = vld [vmem:[%s12174_s28 + $0x10c8] sm:$0xff] }
 0x200   : > { %9811 = vmatprep.subr.bf16.mxu1 %v9810_v54  ;;  %v3387_v54 = vld [vmem:[%s12174_s28 + $0x1b68] sm:$0xff]  ;;  %v9824_v22 = vpack.c.bf16 %v3382_v13, %v3380_v7 }
 0x201   : > { %v9826_v51 = vpack.c.bf16 %v3387_v54, %v3385_v12  ;;  %v2284_v7 = vld [vmem:[%s12174_s28 + $0x568] sm:$0xff]  ;;  %v9396_v54 = vpack.c.bf16 %v2285_v56, %v2283_v30 }
 0x202   : > { %9365 = vmatpush1.bf16.msra.mxu0 %v13605_v26  ;;  %v2288_v12 = vld [vmem:[%s12174_s28 + $0x728] sm:$0xff] }
 0x203   : > { %9813 = vmatpush1.bf16.msra.mxu1 %v9812_v28  ;;  %9367 = vmatprep.subr.bf16.mxu0 %v13608_v25  ;;  %v3384_v28 = vld [vmem:[%s12174_s28 + $0x1a80] sm:$0xff]  ;;  %v2320_v30 = vld [vmem:[%s12174_s28 + $0x1528] sm:$0xff] }
 0x204   : > { %9815 = vmatprep.subr.bf16.mxu1 %v9814_v29  ;;  %v2274_v29 = vld [vmem:[%s12174_s28 + $0x108] sm:$0xff]  ;;  %v9828_v2 = vpack.c.bf16 %v3386_v57, %v3384_v28  ;;  %v2293_v57 = vld [vmem:[%s12174_s28 + $0x9c0] sm:$0xff] }
 0x205   : > { %v9382_v59 = vpack.c.bf16 %v2274_v29, %v2272_v9  ;;  %v2294_v28 = vld [vmem:[%s12174_s28 + $0x9c8] sm:$0xff] }
 0x206   : > { %9369 = vmatpush1.bf16.msra.mxu0 %v13619_v44  ;;  %v2296_v9 = vld [vmem:[%s12174_s28 + $0xaa8] sm:$0xff] }
 0x207   : > { %9817 = vmatpush1.bf16.msra.mxu1 %v9816_v34  ;;  %9371 = vmatprep.subr.bf16.mxu0 %v13622_v41  ;;  %v2276_v34 = vld [vmem:[%s12174_s28 + $0x1e8] sm:$0xff] }
 0x208   : > { %9819 = vmatprep.subr.bf16.mxu1 %v9818_v47  ;;  %v9386_v47 = vpack.c.bf16 %v2278_v21, %v2276_v34  ;;  %v2298_v29 = vld [vmem:[%s12174_s28 + $0xb88] sm:$0xff]  ;;  %v2299_v34 = vld [vmem:[%s12174_s28 + $0xc60] sm:$0xff] }
 0x209   : > { %v2301_v21 = vld [vmem:[%s12174_s28 + $0xd40] sm:$0xff]  ;;  %v2322_v56 = vld [vmem:[%s12174_s28 + $0x1608] sm:$0xff] }
 0x20a   : > { %9373 = vmatpush1.bf16.msra.mxu0 %v13633_v40 }
 0x20b   : > { %9821 = vmatpush1.bf16.msra.mxu1 %v9820_v53  ;;  %9375 = vmatprep.subr.bf16.mxu0 %v13636_v60  ;;  %v9388_v53 = vpack.c.bf16 %v2277_v52, %v2275_v48  ;;  %v2305_v48 = vld [vmem:[%s12174_s28 + $0xf00] sm:$0xff]  ;;  %v2308_v52 = vld [vmem:[%s12174_s28 + $0xfe8] sm:$0xff] }
 0x20c   : > { %9823 = vmatprep.subr.bf16.mxu1 %v9822_v8  ;;  %v2286_v8 = vld [vmem:[%s12174_s28 + $0x648] sm:$0xff] }
 0x20e   : > { %9377 = vmatpush1.bf16.msra.mxu0 %v13647_v58 }
 0x20f   : > { %9825 = vmatpush1.bf16.msra.mxu1 %v9824_v22  ;;  %9379 = vmatprep.subr.bf16.mxu0 %v13650_v33  ;;  %v2287_v22 = vld [vmem:[%s12174_s28 + $0x720] sm:$0xff] }
 0x210   : > { %9827 = vmatprep.subr.bf16.mxu1 %v9826_v51  ;;  %v2291_v51 = vld [vmem:[%s12174_s28 + $0x8e0] sm:$0xff] }
 0x212   : > { %9381 = vmatpush1.bf16.msra.mxu0 %v13659_v61 }
 0x213   : > { %9829 = vmatpush1.bf16.msra.mxu1 %v9828_v2  ;;  %9383 = vmatprep.subr.bf16.mxu0 %v9382_v59  ;;  %v2295_v2 = vld [vmem:[%s12174_s28 + $0xaa0] sm:$0xff] }
 0x214   : > { %9831 = vmatprep.subr.bf16.mxu1 %v13434_v1  ;;  %v2281_v1 = vld [vmem:[%s12174_s28 + $0x480] sm:$0xff] }
 0x215   : > { %2468 = vmatmul.mubr.f32.vlgmr.msra.gmra.mrb[2].mxu0 %v8347_v27  ;;  %v9392_v13 = vpack.c.bf16 %v2281_v1, %v2279_v63  ;;  %v2297_v59 = vld [vmem:[%s12174_s28 + $0xb80] sm:$0xff] }
 0x216   : > { %9385 = vmatpush1.bf16.msra.mxu0 %v9384_v36  ;;  %3455 = vmatmul.mubr.f32.vlgmr.msra.gmra.mrb[2].mxu1 %v8347_v27  ;;  %v2304_v27 = vld [vmem:[%s12174_s28 + $0xe28] sm:$0xff]  ;;  %v2311_v63 = vld [vmem:[%s12174_s28 + $0x11a0] sm:$0xff] }
 0x217   : > { %9833 = vmatpush1.bf16.msra.mxu1 %v13448_v55  ;;  %9387 = vmatprep.subr.bf16.mxu0 %v9386_v47  ;;  %v9394_v55 = vpack.c.bf16 %v2286_v8, %v2284_v7  ;;  %v2306_v36 = vld [vmem:[%s12174_s28 + $0xf08] sm:$0xff]  ;;  %v2303_v47 = vld [vmem:[%s12174_s28 + $0xe20] sm:$0xff] }
 0x218   : > { %9835 = vmatprep.subr.bf16.mxu1 %v13451_v0  ;;  %2538 = vmatprep.mubr.f32.mxu0 %v2336_v46  ;;  %v2290_v0 = vld [vmem:[%s12174_s28 + $0x808] sm:$0xff]  ;;  %v2313_v1 = vld [vmem:[%s12174_s28 + $0x1280] sm:$0xff] }
 0x219   : > { %3525 = vmatprep.mubr.f32.mxu1 %v2336_v46  ;;  %v2309_v46 = vld [vmem:[%s12174_s28 + $0x10c0] sm:$0xff]  ;;  %v2316_v7 = vld [vmem:[%s12174_s28 + $0x1368] sm:$0xff] }
 0x21a   : > { %9389 = vmatpush1.bf16.msra.mxu0 %v9388_v53  ;;  %v2312_v53 = vld [vmem:[%s12174_s28 + $0x11a8] sm:$0xff] }
 0x21b   : > { %9837 = vmatpush1.bf16.msra.mxu1 %v13465_v5  ;;  %9391 = vmatprep.subr.bf16.mxu0 %v9390_v62  ;;  %v9398_v5 = vpack.c.bf16 %v2290_v0, %v2288_v12  ;;  %v2314_v62 = vld [vmem:[%s12174_s28 + $0x1288] sm:$0xff]  ;;  %v2319_v12 = vld [vmem:[%s12174_s28 + $0x1520] sm:$0xff] }
 0x21c   : > { %9839 = vmatprep.subr.bf16.mxu1 %v13468_v23  ;;  %v9400_v23 = vpack.c.bf16 %v2289_v16, %v2287_v22  ;;  %v2318_v8 = vld [vmem:[%s12174_s28 + $0x1448] sm:$0xff]  ;;  %v2321_v0 = vld [vmem:[%s12174_s28 + $0x1600] sm:$0xff] }
 0x21d   : > { %v2323_v22 = vld [vmem:[%s12174_s28 + $0x16e0] sm:$0xff] }
 0x21e   : > { %9393 = vmatpush1.bf16.msra.mxu0 %v9392_v13  ;;  %v2315_v13 = vld [vmem:[%s12174_s28 + $0x1360] sm:$0xff] }
 0x21f   : > { %9841 = vmatpush1.bf16.msra.mxu1 %v13479_v42  ;;  %9395 = vmatprep.subr.bf16.mxu0 %v9394_v55  ;;  %v9402_v42 = vpack.c.bf16 %v2294_v28, %v2292_v43  ;;  %v2317_v55 = vld [vmem:[%s12174_s28 + $0x1440] sm:$0xff]  ;;  %v2328_v43 = vld [vmem:[%s12174_s28 + $0x18a8] sm:$0xff] }
 0x220   : > { %9843 = vmatprep.subr.bf16.mxu1 %v13482_v45  ;;  %v9404_v45 = vpack.c.bf16 %v2293_v57, %v2291_v51  ;;  %v2325_v16 = vld [vmem:[%s12174_s28 + $0x17c0] sm:$0xff]  ;;  %v2330_v28 = vld [vmem:[%s12174_s28 + $0x1988] sm:$0xff] }
 0x221   : > { %v2332_v51 = vld [vmem:[%s12174_s28 + $0x1a68] sm:$0xff] }
 0x222   : > { %9397 = vmatpush1.bf16.msra.mxu0 %v9396_v54  ;;  %v2324_v54 = vld [vmem:[%s12174_s28 + $0x16e8] sm:$0xff] }
 0x223   : > { %9845 = vmatpush1.bf16.msra.mxu1 %v13493_v11  ;;  %9399 = vmatprep.subr.bf16.mxu0 %v9398_v5  ;;  %v9406_v11 = vpack.c.bf16 %v2298_v29, %v2296_v9  ;;  %v2326_v5 = vld [vmem:[%s12174_s28 + $0x17c8] sm:$0xff]  ;;  %v2331_v9 = vld [vmem:[%s12174_s28 + $0x1a60] sm:$0xff] }
 0x224   : > { %9847 = vmatprep.subr.bf16.mxu1 %v13496_v6  ;;  %v9408_v6 = vpack.c.bf16 %v2297_v59, %v2295_v2  ;;  %v2333_v29 = vld [vmem:[%s12174_s28 + $0x1b40] sm:$0xff]  ;;  %v3535_v2 = vld [vmem:[%s12174_s28 + $0x138] sm:$0xff] }
 0x225   : > { %v9444_v59 = vpack.c.bf16 %v2333_v29, %v2331_v9  ;;  %v2568_v9 = vld [vmem:[%s12174_s28 + $0x9e8] sm:$0xff]  ;;  %v3553_v29 = vld [vmem:[%s12174_s28 + $0x918] sm:$0xff] }
 0x226   : > { %9401 = vmatpush1.bf16.msra.mxu0 %v9400_v23  ;;  %v2327_v23 = vld [vmem:[%s12174_s28 + $0x18a0] sm:$0xff] }
 0x227   : > { %9849 = vmatpush1.bf16.msra.mxu1 %v13507_v39  ;;  %9403 = vmatprep.subr.bf16.mxu0 %v9402_v42  ;;  %v9410_v39 = vpack.c.bf16 %v2302_v24, %v2300_v14  ;;  %v2329_v42 = vld [vmem:[%s12174_s28 + $0x1980] sm:$0xff] }
 0x228   : > { %9851 = vmatprep.subr.bf16.mxu1 %v13510_v32  ;;  %v9412_v32 = vpack.c.bf16 %v2301_v21, %v2299_v34  ;;  %v9440_v57 = vpack.c.bf16 %v2329_v42, %v2327_v23  ;;  %v2545_v14 = vld [vmem:[%s12174_s28 + $0x40] sm:$0xff]  ;;  %v2550_v34 = vld [vmem:[%s12174_s28 + $0x208] sm:$0xff] }
 0x229   : > { %v2547_v24 = vld [vmem:[%s12174_s28 + $0x120] sm:$0xff]  ;;  %v2552_v21 = vld [vmem:[%s12174_s28 + $0x2e8] sm:$0xff] }
 0x22a   : > { %9405 = vmatpush1.bf16.msra.mxu0 %v9404_v45  ;;  %v2546_v45 = vld [vmem:[%s12174_s28 + $0x48] sm:$0xff]  ;;  %v2561_v23 = vld [vmem:[%s12174_s28 + $0x740] sm:$0xff] }
 0x22b   : > { %9853 = vmatpush1.bf16.msra.mxu1 %v13521_v4  ;;  %9407 = vmatprep.subr.bf16.mxu0 %v9406_v11  ;;  %v9414_v4 = vpack.c.bf16 %v2306_v36, %v2304_v27  ;;  %v3533_v11 = vld [vmem:[%s12174_s28 + $0x58] sm:$0xff]  ;;  %v2335_v36 = vld [vmem:[%s17282_s1] sm:$0xff] }
 0x22c   : > { %9855 = vmatprep.subr.bf16.mxu1 %v13524_v18  ;;  %v9416_v18 = vpack.c.bf16 %v2305_v48, %v2303_v47  ;;  %v3537_v27 = vld [vmem:[%s12174_s28 + $0x218] sm:$0xff]  ;;  %v2549_v47 = vld [vmem:[%s12174_s28 + $0x200] sm:$0xff] }
 0x22d   : > { %v2551_v48 = vld [vmem:[%s12174_s28 + $0x2e0] sm:$0xff] }
 0x22e   : > { %9409 = vmatpush1.bf16.msra.mxu0 %v9408_v6  ;;  %v3532_v6 = vld [vmem:[%s12174_s28 + $0x50] sm:$0xff]  ;;  %v2563_v42 = vld [vmem:[%s12174_s28 + $0x820] sm:$0xff] }
 0x22f   : > { %9857 = vmatpush1.bf16.msra.mxu1 %v13535_v3  ;;  %9411 = vmatprep.subr.bf16.mxu0 %v9410_v39  ;;  %v9418_v3 = vpack.c.bf16 %v2310_v49, %v2308_v52  ;;  %v3534_v39 = vld [vmem:[%s12174_s28 + $0x130] sm:$0xff] }
 0x230   : > { %9859 = vmatprep.subr.bf16.mxu1 %v13538_v37  ;;  %v9420_v37 = vpack.c.bf16 %v2309_v46, %v2307_v50  ;;  %v3536_v52 = vld [vmem:[%s12174_s28 + $0x210] sm:$0xff]  ;;  %v2556_v50 = vld [vmem:[%s12174_s28 + $0x4a8] sm:$0xff]  ;;  %v3543_v46 = vld [vmem:[%s12174_s28 + $0x4b8] sm:$0xff] }
 0x232   : > { %9413 = vmatpush1.bf16.msra.mxu0 %v9412_v32  ;;  %v9448_v32 = vpack.c.bf16 %v2547_v24, %v2545_v14  ;;  %v3552_v14 = vld [vmem:[%s12174_s28 + $0x910] sm:$0xff] }
 0x233   : > { %9861 = vmatpush1.bf16.msra.mxu1 %v13549_v20  ;;  %9415 = vmatprep.subr.bf16.mxu0 %v9414_v4  ;;  %v9422_v20 = vpack.c.bf16 %v2314_v62, %v2312_v53  ;;  %v9450_v4 = vpack.c.bf16 %v2552_v21, %v2550_v34  ;;  %v8350_v53 = vld [vmem:[%s17282_s1 + $0x28] sm:$0xff]  ;;  %v9452_v62 = vpack.c.bf16 %v2551_v48, %v2549_v47  ;;  %v3557_v21 = vld [vmem:[%s12174_s28 + $0xad8] sm:$0xff]  ;;  %v2571_v47 = vld [vmem:[%s12174_s28 + $0xba0] sm:$0xff] }
 0x234   : > { %9863 = vmatprep.subr.bf16.mxu1 %v13552_v35  ;;  %v9424_v35 = vpack.c.bf16 %v2313_v1, %v2311_v63  ;;  %v2553_v63 = vld [vmem:[%s12174_s28 + $0x3c0] sm:$0xff]  ;;  %v2572_v34 = vld [vmem:[%s12174_s28 + $0xba8] sm:$0xff]  ;;  %v3556_v48 = vld [vmem:[%s12174_s28 + $0xad0] sm:$0xff] }
 0x235   : > { %v2555_v1 = vld [vmem:[%s12174_s28 + $0x4a0] sm:$0xff] }
 0x236   : > { %9417 = vmatpush1.bf16.msra.mxu0 %v9416_v18  ;;  %v3538_v18 = vld [vmem:[%s12174_s28 + $0x2f0] sm:$0xff] }
 0x237   : > { %9865 = vmatpush1.bf16.msra.mxu1 %v13563_v10  ;;  %9419 = vmatprep.subr.bf16.mxu0 %v9418_v3  ;;  %v9426_v10 = vpack.c.bf16 %v2318_v8, %v2316_v7  ;;  %v2554_v3 = vld [vmem:[%s12174_s28 + $0x3c8] sm:$0xff]  ;;  %v3540_v7 = vld [vmem:[%s12174_s28 + $0x3d0] sm:$0xff] }
 0x238   : > { %9867 = vmatprep.subr.bf16.mxu1 %v13566_v19  ;;  %v9428_v19 = vpack.c.bf16 %v2317_v55, %v2315_v13  ;;  %v2560_v13 = vld [vmem:[%s12174_s28 + $0x668] sm:$0xff]  ;;  %v3545_v55 = vld [vmem:[%s12174_s28 + $0x598] sm:$0xff] }
 0x23a   : > { %9421 = vmatpush1.bf16.msra.mxu0 %v9420_v37  ;;  %v13797_v37 = vpack.c.bf16 %v3538_v18, %v3536_v52  ;;  %v3558_v18 = vld [vmem:[%s12174_s28 + $0xbb0] sm:$0xff] }
 0x23b   : > { %9869 = vmatpush1.bf16.msra.mxu1 %v13577_v17  ;;  %9423 = vmatprep.subr.bf16.mxu0 %v9422_v20  ;;  %v9430_v17 = vpack.c.bf16 %v2322_v56, %v2320_v30  ;;  %v9454_v20 = vpack.c.bf16 %v2556_v50, %v2554_v3  ;;  %v3547_v30 = vld [vmem:[%s12174_s28 + $0x678] sm:$0xff]  ;;  %v9456_v56 = vpack.c.bf16 %v2555_v1, %v2553_v63  ;;  %v2574_v3 = vld [vmem:[%s12174_s28 + $0xc88] sm:$0xff]  ;;  %v2573_v63 = vld [vmem:[%s12174_s28 + $0xc80] sm:$0xff] }
 0x23c   : > { %9871 = vmatprep.subr.bf16.mxu1 %v13580_v31  ;;  %v9432_v31 = vpack.c.bf16 %v2321_v0, %v2319_v12  ;;  %v2557_v12 = vld [vmem:[%s12174_s28 + $0x580] sm:$0xff]  ;;  %v2576_v50 = vld [vmem:[%s12174_s28 + $0xd68] sm:$0xff] }
 0x23d   : > { %v2559_v0 = vld [vmem:[%s12174_s28 + $0x660] sm:$0xff] }
 0x23e   : > { %9425 = vmatpush1.bf16.msra.mxu0 %v9424_v35  ;;  %v3542_v35 = vld [vmem:[%s12174_s28 + $0x4b0] sm:$0xff]  ;;  %v2575_v1 = vld [vmem:[%s12174_s28 + $0xd60] sm:$0xff] }
 0x23f   : > { %9873 = vmatpush1.bf16.msra.mxu1 %v13591_v15  ;;  %9427 = vmatprep.subr.bf16.mxu0 %v9426_v10  ;;  %v9434_v15 = vpack.c.bf16 %v2326_v5, %v2324_v54  ;;  %v2558_v10 = vld [vmem:[%s12174_s28 + $0x588] sm:$0xff]  ;;  %v3544_v54 = vld [vmem:[%s12174_s28 + $0x590] sm:$0xff]  ;;  %v13817_v5 = vpack.c.bf16 %v3547_v30, %v3545_v55  ;;  %v3565_v30 = vld [vmem:[%s12174_s28 + $0xe58] sm:$0xff] }
 0x240   : > { %9875 = vmatprep.subr.bf16.mxu1 %v13594_v38  ;;  %v9436_v38 = vpack.c.bf16 %v2325_v16, %v2323_v22  ;;  %v2564_v22 = vld [vmem:[%s12174_s28 + $0x828] sm:$0xff]  ;;  %v3549_v16 = vld [vmem:[%s12174_s28 + $0x758] sm:$0xff] }
 0x241   : > { %v2580_v55 = vld [vmem:[%s12174_s28 + $0xf28] sm:$0xff] }
 0x242   : > { %9429 = vmatpush1.bf16.msra.mxu0 %v9428_v19  ;;  %v13811_v19 = vpack.c.bf16 %v3542_v35, %v3540_v7  ;;  %v3560_v7 = vld [vmem:[%s12174_s28 + $0xc90] sm:$0xff] }
 0x243   : > { %9877 = vmatpush1.bf16.msra.mxu1 %v13605_v26  ;;  %9431 = vmatprep.subr.bf16.mxu0 %v9430_v17  ;;  %v9438_v26 = vpack.c.bf16 %v2330_v28, %v2328_v43  ;;  %v9458_v17 = vpack.c.bf16 %v2560_v13, %v2558_v10  ;;  %v3551_v43 = vld [vmem:[%s12174_s28 + $0x838] sm:$0xff]  ;;  %v9460_v28 = vpack.c.bf16 %v2559_v0, %v2557_v12  ;;  %v3562_v10 = vld [vmem:[%s12174_s28 + $0xd70] sm:$0xff]  ;;  %v2578_v13 = vld [vmem:[%s12174_s28 + $0xe48] sm:$0xff] }
 0x244   : > { %9879 = vmatprep.subr.bf16.mxu1 %v13608_v25  ;;  %v2334_v25 = vld [vmem:[%s12174_s28 + $0x1b48] sm:$0xff]  ;;  %v13881_v12 = vpack.c.bf16 %v3562_v10, %v3560_v7  ;;  %v9478_v0 = vpack.c.bf16 %v2580_v55, %v2578_v13  ;;  %v3578_v7 = vld [vmem:[%s12174_s28 + $0x1470] sm:$0xff]  ;;  %v3581_v55 = vld [vmem:[%s12174_s28 + $0x1558] sm:$0xff] }
 0x245   : > { %v2594_v10 = vld [vmem:[%s12174_s28 + $0x1548] sm:$0xff] }
 0x246   : > { %9433 = vmatpush1.bf16.msra.mxu0 %v9432_v31  ;;  %v3546_v31 = vld [vmem:[%s12174_s28 + $0x670] sm:$0xff]  ;;  %v2596_v13 = vld [vmem:[%s12174_s28 + $0x1628] sm:$0xff] }
 0x247   : > { %9881 = vmatpush1.bf16.msra.mxu1 %v13619_v44  ;;  %9435 = vmatprep.subr.bf16.mxu0 %v9434_v15  ;;  %v9442_v44 = vpack.c.bf16 %v2334_v25, %v2332_v51  ;;  %v2562_v15 = vld [vmem:[%s12174_s28 + $0x748] sm:$0xff]  ;;  %v3548_v51 = vld [vmem:[%s12174_s28 + $0x750] sm:$0xff]  ;;  %v13831_v25 = vpack.c.bf16 %v3551_v43, %v3549_v16 }
 0x248   : > { %9883 = vmatprep.subr.bf16.mxu1 %v13622_v41  ;;  %v2548_v41 = vld [vmem:[%s12174_s28 + $0x128] sm:$0xff]  ;;  %v3566_v16 = vld [vmem:[%s12174_s28 + $0xf30] sm:$0xff] }
 0x249   : > { %v2582_v43 = vld [vmem:[%s12174_s28 + $0x1008] sm:$0xff] }
 0x24a   : > { %9437 = vmatpush1.bf16.msra.mxu0 %v9436_v38  ;;  %v13825_v38 = vpack.c.bf16 %v3546_v31, %v3544_v54  ;;  %v2577_v54 = vld [vmem:[%s12174_s28 + $0xe40] sm:$0xff] }
 0x24b   : > { %9885 = vmatpush1.bf16.msra.mxu1 %v13633_v40  ;;  %9439 = vmatprep.subr.bf16.mxu0 %v9438_v26  ;;  %v9446_v40 = vpack.c.bf16 %v2548_v41, %v2546_v45  ;;  %v9462_v26 = vpack.c.bf16 %v2564_v22, %v2562_v15  ;;  %v3555_v45 = vld [vmem:[%s12174_s28 + $0x9f8] sm:$0xff]  ;;  %v9464_v41 = vpack.c.bf16 %v2563_v42, %v2561_v23  ;;  %v2579_v31 = vld [vmem:[%s12174_s28 + $0xf20] sm:$0xff]  ;;  %v3564_v15 = vld [vmem:[%s12174_s28 + $0xe50] sm:$0xff] }
 0x24c   : > { %9887 = vmatprep.subr.bf16.mxu1 %v13636_v60  ;;  %v13769_v60 = vpack.c.bf16 %v3535_v2, %v3533_v11  ;;  %v13845_v24 = vpack.c.bf16 %v3555_v45, %v3553_v29  ;;  %v3571_v23 = vld [vmem:[%s12174_s28 + $0x10f8] sm:$0xff]  ;;  %v9480_v42 = vpack.c.bf16 %v2579_v31, %v2577_v54  ;;  %v3568_v29 = vld [vmem:[%s12174_s28 + $0x1010] sm:$0xff]  ;;  %v2593_v54 = vld [vmem:[%s12174_s28 + $0x1540] sm:$0xff] }
 0x24d   : > { %v2595_v31 = vld [vmem:[%s12174_s28 + $0x1620] sm:$0xff] }
 0x24e   : > { %9441 = vmatpush1.bf16.msra.mxu0 %v9440_v57  ;;  %v3550_v57 = vld [vmem:[%s12174_s28 + $0x830] sm:$0xff] }
 0x24f   : > { %9889 = vmatpush1.bf16.msra.mxu1 %v13647_v58  ;;  %9443 = vmatprep.subr.bf16.mxu0 %v9442_v44  ;;  %v3539_v58 = vld [vmem:[%s12174_s28 + $0x2f8] sm:$0xff]  ;;  %v2566_v44 = vld [vmem:[%s12174_s28 + $0x908] sm:$0xff]  ;;  %v13839_v11 = vpack.c.bf16 %v3550_v57, %v3548_v51  ;;  %v13895_v51 = vpack.c.bf16 %v3566_v16, %v3564_v15  ;;  %v3580_v15 = vld [vmem:[%s12174_s28 + $0x1550] sm:$0xff] }
 0x250   : > { %9891 = vmatprep.subr.bf16.mxu1 %v13650_v33  ;;  %v13780_v33 = vpack.c.bf16 %v3534_v39, %v3532_v6  ;;  %v13786_v49 = vpack.c.bf16 %v3539_v58, %v3537_v27  ;;  %v9466_v2 = vpack.c.bf16 %v2568_v9, %v2566_v44  ;;  %v3554_v6 = vld [vmem:[%s12174_s28 + $0x9f0] sm:$0xff]  ;;  %v2570_v39 = vld [vmem:[%s12174_s28 + $0xac8] sm:$0xff]  ;;  %v3559_v27 = vld [vmem:[%s12174_s28 + $0xbb8] sm:$0xff] }
 0x251   : > { %v13859_v52 = vpack.c.bf16 %v3559_v27, %v3557_v21  ;;  %v2581_v44 = vld [vmem:[%s12174_s28 + $0x1000] sm:$0xff] }
 0x252   : > { %9445 = vmatpush1.bf16.msra.mxu0 %v9444_v59  ;;  %v2565_v59 = vld [vmem:[%s12174_s28 + $0x900] sm:$0xff] }
 0x253   : > { %9893 = vmatpush1.bf16.msra.mxu1 %v13659_v61  ;;  %9447 = vmatprep.subr.bf16.mxu0 %v9446_v40  ;;  %v3541_v61 = vld [vmem:[%s12174_s28 + $0x3d8] sm:$0xff]  ;;  %v2567_v40 = vld [vmem:[%s12174_s28 + $0x9e0] sm:$0xff] }
 0x254   : > { %9895 = vmatprep.subr.bf16.mxu1 %v13769_v60  ;;  %v13803_v8 = vpack.c.bf16 %v3543_v46, %v3541_v61  ;;  %v9468_v58 = vpack.c.bf16 %v2567_v40, %v2565_v59  ;;  %v3561_v61 = vld [vmem:[%s12174_s28 + $0xc98] sm:$0xff]  ;;  %v2583_v9 = vld [vmem:[%s12174_s28 + $0x10e0] sm:$0xff]  ;;  %v2588_v59 = vld [vmem:[%s12174_s28 + $0x12a8] sm:$0xff] }
 0x255   : > { %2539 = vmatmul.mubr.f32.vlgmr.msra.gmra.mrb[2].mxu0 %v2335_v36  ;;  %v3563_v46 = vld [vmem:[%s12174_s28 + $0xd78] sm:$0xff]  ;;  %v2585_v21 = vld [vmem:[%s12174_s28 + $0x11c0] sm:$0xff] }
 0x256   : > { %9449 = vmatpush1.bf16.msra.mxu0 %v9448_v32  ;;  %3526 = vmatmul.mubr.f32.vlgmr.msra.gmra.mrb[2].mxu1 %v2335_v36  ;;  %v13853_v36 = vpack.c.bf16 %v3554_v6, %v3552_v14  ;;  %v9470_v32 = vpack.c.bf16 %v2572_v34, %v2570_v39  ;;  %v13873_v35 = vpack.c.bf16 %v3563_v46, %v3561_v61  ;;  %v3573_v40 = vld [vmem:[%s12174_s28 + $0x11d8] sm:$0xff]  ;;  %v2587_v27 = vld [vmem:[%s12174_s28 + $0x12a0] sm:$0xff] }
 0x257   : > { %9897 = vmatpush1.bf16.msra.mxu1 %v13780_v33  ;;  %9451 = vmatprep.subr.bf16.mxu0 %v9450_v4  ;;  %v2569_v4 = vld [vmem:[%s12174_s28 + $0xac0] sm:$0xff]  ;;  %v3575_v14 = vld [vmem:[%s12174_s28 + $0x12b8] sm:$0xff]  ;;  %v9484_v6 = vpack.c.bf16 %v2583_v9, %v2581_v44 }
 0x258   : > { %9899 = vmatprep.subr.bf16.mxu1 %v13786_v49  ;;  %2675 = vmatprep.mubr.f32.mxu0 %v8350_v53 }
 0x259   : > { %3662 = vmatprep.mubr.f32.mxu1 %v8350_v53  ;;  %v9472_v53 = vpack.c.bf16 %v2571_v47, %v2569_v4  ;;  %v3574_v4 = vld [vmem:[%s12174_s28 + $0x12b0] sm:$0xff]  ;;  %v2590_v47 = vld [vmem:[%s12174_s28 + $0x1388] sm:$0xff] }
 0x25a   : > { %9453 = vmatpush1.bf16.msra.mxu0 %v9452_v62  ;;  %v13867_v62 = vpack.c.bf16 %v3558_v18, %v3556_v48  ;;  %v2592_v48 = vld [vmem:[%s12174_s28 + $0x1468] sm:$0xff]  ;;  %v3577_v18 = vld [vmem:[%s12174_s28 + $0x1398] sm:$0xff] }
 0x25b   : > { %9901 = vmatpush1.bf16.msra.mxu1 %v13797_v37  ;;  %9455 = vmatprep.subr.bf16.mxu0 %v9454_v20  ;;  %v9474_v20 = vpack.c.bf16 %v2576_v50, %v2574_v3  ;;  %v3579_v3 = vld [vmem:[%s12174_s28 + $0x1478] sm:$0xff]  ;;  %v9488_v50 = vpack.c.bf16 %v2587_v27, %v2585_v21  ;;  %v9490_v46 = vpack.c.bf16 %v2592_v48, %v2590_v47  ;;  %v2601_v47 = vld [vmem:[%s12174_s28 + $0x18c0] sm:$0xff] }
 0x25c   : > { %9903 = vmatprep.subr.bf16.mxu1 %v13803_v8  ;;  %v3591_v21 = vld [vmem:[%s12174_s28 + $0x19b8] sm:$0xff]  ;;  %v2603_v48 = vld [vmem:[%s12174_s28 + $0x19a0] sm:$0xff] }
 0x25e   : > { %9457 = vmatpush1.bf16.msra.mxu0 %v9456_v56  ;;  %v3567_v56 = vld [vmem:[%s12174_s28 + $0xf38] sm:$0xff] }
 0x25f   : > { %9905 = vmatpush1.bf16.msra.mxu1 %v13811_v19  ;;  %9459 = vmatprep.subr.bf16.mxu0 %v9458_v17  ;;  %v9476_v17 = vpack.c.bf16 %v2575_v1, %v2573_v63  ;;  %v13887_v22 = vpack.c.bf16 %v3567_v56, %v3565_v30  ;;  %v3576_v63 = vld [vmem:[%s12174_s28 + $0x1390] sm:$0xff]  ;;  %v13929_v1 = vpack.c.bf16 %v3579_v3, %v3577_v18  ;;  %v3583_v30 = vld [vmem:[%s12174_s28 + $0x1638] sm:$0xff] }
 0x260   : > { %9907 = vmatprep.subr.bf16.mxu1 %v13817_v5  ;;  %v13943_v16 = vpack.c.bf16 %v3583_v30, %v3581_v55  ;;  %v3588_v18 = vld [vmem:[%s12174_s28 + $0x18d0] sm:$0xff]  ;;  %v2605_v55 = vld [vmem:[%s12174_s28 + $0x1a80] sm:$0xff] }
 0x261   : > { %v2607_v30 = vld [vmem:[%s12174_s28 + $0x1b60] sm:$0xff] }
 0x262   : > { %9461 = vmatpush1.bf16.msra.mxu0 %v9460_v28  ;;  %v2584_v28 = vld [vmem:[%s12174_s28 + $0x10e8] sm:$0xff] }
 0x263   : > { %9909 = vmatpush1.bf16.msra.mxu1 %v13825_v38  ;;  %9463 = vmatprep.subr.bf16.mxu0 %v9462_v26  ;;  %v3569_v26 = vld [vmem:[%s12174_s28 + $0x1018] sm:$0xff]  ;;  %v9482_v57 = vpack.c.bf16 %v2584_v28, %v2582_v43  ;;  %v3582_v43 = vld [vmem:[%s12174_s28 + $0x1630] sm:$0xff]  ;;  %v2598_v28 = vld [vmem:[%s12174_s28 + $0x1708] sm:$0xff] }
 0x264   : > { %9911 = vmatprep.subr.bf16.mxu1 %v13831_v25  ;;  %v13901_v45 = vpack.c.bf16 %v3571_v23, %v3569_v26  ;;  %v2600_v26 = vld [vmem:[%s12174_s28 + $0x17e8] sm:$0xff]  ;;  %v3585_v23 = vld [vmem:[%s12174_s28 + $0x1718] sm:$0xff]  ;;  %v13951_v44 = vpack.c.bf16 %v3582_v43, %v3580_v15  ;;  %v9508_v43 = vpack.c.bf16 %v2607_v30, %v2605_v55 }
 0x265   : > { %v9498_v9 = vpack.c.bf16 %v2600_v26, %v2598_v28  ;;  %v3674_v15 = vld [vmem:[%s12174_s28 + $0x148] sm:$0xff] }
 0x266   : > { %9465 = vmatpush1.bf16.msra.mxu0 %v9464_v41  ;;  %v3570_v41 = vld [vmem:[%s12174_s28 + $0x10f0] sm:$0xff]  ;;  %v3692_v55 = vld [vmem:[%s12174_s28 + $0x928] sm:$0xff] }
 0x267   : > { %9913 = vmatpush1.bf16.msra.mxu1 %v13839_v11  ;;  %9467 = vmatprep.subr.bf16.mxu0 %v9466_v2  ;;  %v2586_v2 = vld [vmem:[%s12174_s28 + $0x11c8] sm:$0xff]  ;;  %v13909_v39 = vpack.c.bf16 %v3570_v41, %v3568_v29  ;;  %v2597_v29 = vld [vmem:[%s12174_s28 + $0x1700] sm:$0xff] }
 0x268   : > { %9915 = vmatprep.subr.bf16.mxu1 %v13845_v24  ;;  %v9486_v34 = vpack.c.bf16 %v2588_v59, %v2586_v2  ;;  %v2599_v41 = vld [vmem:[%s12174_s28 + $0x17e0] sm:$0xff]  ;;  %v3584_v2 = vld [vmem:[%s12174_s28 + $0x1710] sm:$0xff]  ;;  %v3694_v30 = vld [vmem:[%s12174_s28 + $0xa08] sm:$0xff] }
 0x269   : > { %v9500_v27 = vpack.c.bf16 %v2599_v41, %v2597_v29  ;;  %v8349_v29 = vld [vmem:[%s17282_s1 + $0x20] sm:$0xff] }
 0x26a   : > { %9469 = vmatpush1.bf16.msra.mxu0 %v9468_v58  ;;  %v3572_v58 = vld [vmem:[%s12174_s28 + $0x11d0] sm:$0xff] }
 0x26b   : > { %9917 = vmatpush1.bf16.msra.mxu1 %v13853_v36  ;;  %9471 = vmatprep.subr.bf16.mxu0 %v9470_v32  ;;  %v13915_v32 = vpack.c.bf16 %v3575_v14, %v3573_v40  ;;  %v13923_v61 = vpack.c.bf16 %v3574_v4, %v3572_v58  ;;  %v3586_v40 = vld [vmem:[%s12174_s28 + $0x17f0] sm:$0xff]  ;;  %v2602_v14 = vld [vmem:[%s12174_s28 + $0x18c8] sm:$0xff] }
 0x26c   : > { %9919 = vmatprep.subr.bf16.mxu1 %v13859_v52  ;;  %v13965_v58 = vpack.c.bf16 %v3586_v40, %v3584_v2  ;;  %v3675_v40 = vld [vmem:[%s12174_s28 + $0x220] sm:$0xff] }
 0x26e   : > { %9473 = vmatpush1.bf16.msra.mxu0 %v9472_v53  ;;  %v2589_v53 = vld [vmem:[%s12174_s28 + $0x1380] sm:$0xff] }
 0x26f   : > { %9921 = vmatpush1.bf16.msra.mxu1 %v13867_v62  ;;  %9475 = vmatprep.subr.bf16.mxu0 %v9474_v20  ;;  %v2591_v20 = vld [vmem:[%s12174_s28 + $0x1460] sm:$0xff] }
 0x270   : > { %9923 = vmatprep.subr.bf16.mxu1 %v13873_v35  ;;  %v9492_v56 = vpack.c.bf16 %v2591_v20, %v2589_v53  ;;  %v2608_v53 = vld [vmem:[%s12174_s28 + $0x1b68] sm:$0xff]  ;;  %v3593_v20 = vld [vmem:[%s12174_s28 + $0x1a98] sm:$0xff] }
 0x272   : > { %9477 = vmatpush1.bf16.msra.mxu0 %v9476_v17  ;;  %v13937_v17 = vpack.c.bf16 %v3578_v7, %v3576_v63  ;;  %v3595_v63 = vld [vmem:[%s12174_s28 + $0x1b78] sm:$0xff]  ;;  %v9504_v7 = vpack.c.bf16 %v2603_v48, %v2601_v47  ;;  %v3681_v47 = vld [vmem:[%s12174_s28 + $0x4c0] sm:$0xff]  ;;  %v3684_v48 = vld [vmem:[%s12174_s28 + $0x5a8] sm:$0xff] }
 0x273   : > { %9925 = vmatpush1.bf16.msra.mxu1 %v13881_v12  ;;  %9479 = vmatprep.subr.bf16.mxu0 %v9478_v0  ;;  %v9494_v0 = vpack.c.bf16 %v2596_v13, %v2594_v10 }
 0x274   : > { %9927 = vmatprep.subr.bf16.mxu1 %v13887_v22 }
 0x276   : > { %9481 = vmatpush1.bf16.msra.mxu0 %v9480_v42  ;;  %v3587_v42 = vld [vmem:[%s12174_s28 + $0x17f8] sm:$0xff] }
 0x277   : > { %9929 = vmatpush1.bf16.msra.mxu1 %v13895_v51  ;;  %9483 = vmatprep.subr.bf16.mxu0 %v9482_v57  ;;  %v9496_v57 = vpack.c.bf16 %v2595_v31, %v2593_v54  ;;  %v13957_v59 = vpack.c.bf16 %v3587_v42, %v3585_v23  ;;  %v3594_v54 = vld [vmem:[%s12174_s28 + $0x1b70] sm:$0xff]  ;;  %v3672_v31 = vld [vmem:[%s12174_s28 + $0x68] sm:$0xff]  ;;  %v3671_v23 = vld [vmem:[%s12174_s28 + $0x60] sm:$0xff] }
 0x278   : > { %9931 = vmatprep.subr.bf16.mxu1 %v13901_v45  ;;  %v13994_v26 = vpack.c.bf16 %v3674_v15, %v3672_v31  ;;  %v3673_v42 = vld [vmem:[%s12174_s28 + $0x140] sm:$0xff]  ;;  %v3696_v15 = vld [vmem:[%s12174_s28 + $0xae8] sm:$0xff] }
 0x279   : > { %v14005_v41 = vpack.c.bf16 %v3673_v42, %v3671_v23  ;;  %v3693_v31 = vld [vmem:[%s12174_s28 + $0xa00] sm:$0xff] }
 0x27a   : > { %9485 = vmatpush1.bf16.msra.mxu0 %v9484_v6  ;;  %v2604_v6 = vld [vmem:[%s12174_s28 + $0x19a8] sm:$0xff] }
 0x27b   : > { %9933 = vmatpush1.bf16.msra.mxu1 %v13909_v39  ;;  %9487 = vmatprep.subr.bf16.mxu0 %v9486_v34  ;;  %v3589_v34 = vld [vmem:[%s12174_s28 + $0x18d8] sm:$0xff]  ;;  %v9502_v4 = vpack.c.bf16 %v2604_v6, %v2602_v14  ;;  %v3677_v14 = vld [vmem:[%s12174_s28 + $0x300] sm:$0xff]  ;;  %v3680_v6 = vld [vmem:[%s12174_s28 + $0x3e8] sm:$0xff] }
 0x27c   : > { %9935 = vmatprep.subr.bf16.mxu1 %v13915_v32  ;;  %v13971_v3 = vpack.c.bf16 %v3591_v21, %v3589_v34  ;;  %v3682_v34 = vld [vmem:[%s12174_s28 + $0x4c8] sm:$0xff]  ;;  %v8352_v21 = vld [vmem:[%s17282_s1 + $0x38] sm:$0xff] }
 0x27e   : > { %9489 = vmatpush1.bf16.msra.mxu0 %v9488_v50  ;;  %v3590_v50 = vld [vmem:[%s12174_s28 + $0x19b0] sm:$0xff] }
 0x27f   : > { %9937 = vmatpush1.bf16.msra.mxu1 %v13923_v61  ;;  %9491 = vmatprep.subr.bf16.mxu0 %v9490_v46  ;;  %v2606_v46 = vld [vmem:[%s12174_s28 + $0x1a88] sm:$0xff]  ;;  %v13979_v10 = vpack.c.bf16 %v3590_v50, %v3588_v18  ;;  %v3683_v50 = vld [vmem:[%s12174_s28 + $0x5a0] sm:$0xff] }
 0x280   : > { %9939 = vmatprep.subr.bf16.mxu1 %v13929_v1  ;;  %v9506_v13 = vpack.c.bf16 %v2608_v53, %v2606_v46  ;;  %v3685_v46 = vld [vmem:[%s12174_s28 + $0x680] sm:$0xff]  ;;  %v3688_v53 = vld [vmem:[%s12174_s28 + $0x768] sm:$0xff] }
 0x282   : > { %9493 = vmatpush1.bf16.msra.mxu0 %v9492_v56  ;;  %v13984_v56 = vpack.c.bf16 %v3595_v63, %v3593_v20  ;;  %v3690_v20 = vld [vmem:[%s12174_s28 + $0x848] sm:$0xff]  ;;  %v1262_v63 = vlaneseq }
 0x283   : > { %9941 = vmatpush1.bf16.msra.mxu1 %v13937_v17  ;;  %9495 = vmatprep.subr.bf16.mxu0 %v9494_v0  ;;  %v3592_v0 = vld [vmem:[%s12174_s28 + $0x1a90] sm:$0xff] }
 0x284   : > { %9943 = vmatprep.subr.bf16.mxu1 %v13943_v16  ;;  %v13991_v28 = vpack.c.bf16 %v3594_v54, %v3592_v0  ;;  %v1263_v0 = vshrl.u32 %v1262_v63, 7  ;;  %v3691_v54 = vld [vmem:[%s12174_s28 + $0x920] sm:$0xff] }
 0x286   : > { %9497 = vmatpush1.bf16.msra.mxu0 %v9496_v57  ;;  %v3676_v57 = vld [vmem:[%s12174_s28 + $0x228] sm:$0xff]  ;;  %v1264_v23 = vsub.s32 0, %v1263_v0  ;;  %v1268_v42 = vsub.s32 1, %v1263_v0 }
 0x287   : > { %9945 = vmatpush1.bf16.msra.mxu1 %v13951_v44  ;;  %9499 = vmatprep.subr.bf16.mxu0 %v9498_v9  ;;  %v3678_v9 = vld [vmem:[%s12174_s28 + $0x308] sm:$0xff] }
 0x288   : > { %9947 = vmatprep.subr.bf16.mxu1 %v13957_v59  ;;  %v14008_v2 = vpack.c.bf16 %v3678_v9, %v3676_v57  ;;  %v14074_v57 = vpack.c.bf16 %v3693_v31, %v3691_v54  ;;  %v3704_v54 = vld [vmem:[%s12174_s28 + $0xe68] sm:$0xff] }
 0x289   : > { %v3706_v31 = vld [vmem:[%s12174_s28 + $0xf48] sm:$0xff] }
 0x28a   : > { %9501 = vmatpush1.bf16.msra.mxu0 %v9500_v27  ;;  %v14023_v27 = vpack.c.bf16 %v3682_v34, %v3680_v6 }
 0x28b   : > { %9949 = vmatpush1.bf16.msra.mxu1 %v13965_v58  ;;  %9503 = vmatprep.subr.bf16.mxu0 %v9502_v4  ;;  %v3679_v4 = vld [vmem:[%s12174_s28 + $0x3e0] sm:$0xff] }
 0x28c   : > { %9951 = vmatprep.subr.bf16.mxu1 %v13971_v3 }
 0x28e   : > { %9505 = vmatpush1.bf16.msra.mxu0 %v9504_v7  ;;  %v3687_v7 = vld [vmem:[%s12174_s28 + $0x760] sm:$0xff] }
 0x28f   : > { %9953 = vmatpush1.bf16.msra.mxu1 %v13979_v10  ;;  %9507 = vmatprep.subr.bf16.mxu0 %v9506_v13  ;;  %v3689_v13 = vld [vmem:[%s12174_s28 + $0x840] sm:$0xff] }
 0x290   : > { %9955 = vmatprep.subr.bf16.mxu1 %v13984_v56 }
 0x292   : > { %9509 = vmatpush1.bf16.msra.mxu0 %v9508_v43  ;;  %v3698_v43 = vld [vmem:[%s12174_s28 + $0xbc8] sm:$0xff] }
 0x293   : > { %9957 = vmatpush1.bf16.msra.mxu1 %v13991_v28  ;;  %9511 = vmatprep.subr.bf16.mxu0 %v13769_v60  ;;  %v14020_v60 = vpack.c.bf16 %v3677_v14, %v3675_v40  ;;  %v3697_v40 = vld [vmem:[%s12174_s28 + $0xbc0] sm:$0xff] }
 0x294   : > { %9959 = vmatprep.subr.bf16.mxu1 %v13994_v26 }
 0x295   : > { %2676 = vmatmul.mubr.f32.vlgmr.msra.gmra.mrb[2].mxu0 %v8349_v29 }
 0x296   : > { %9513 = vmatpush1.bf16.msra.mxu0 %v13780_v33  ;;  %3663 = vmatmul.mubr.f32.vlgmr.msra.gmra.mrb[2].mxu1 %v8349_v29  ;;  %v3686_v33 = vld [vmem:[%s12174_s28 + $0x688] sm:$0xff]  ;;  %v3695_v29 = vld [vmem:[%s12174_s28 + $0xae0] sm:$0xff] }
 0x297   : > { %9961 = vmatpush1.bf16.msra.mxu1 %v14005_v41  ;;  %9515 = vmatprep.subr.bf16.mxu0 %v13786_v49  ;;  %v14032_v49 = vpack.c.bf16 %v3681_v47, %v3679_v4  ;;  %v14035_v18 = vpack.c.bf16 %v3686_v33, %v3684_v48  ;;  %v3702_v4 = vld [vmem:[%s12174_s28 + $0xd88] sm:$0xff] }
 0x298   : > { %9963 = vmatprep.subr.bf16.mxu1 %v14008_v2  ;;  %2814 = vmatprep.mubr.f32.mxu0 %v8352_v21 }
 0x299   : > { %3801 = vmatprep.mubr.f32.mxu1 %v8352_v21  ;;  %v3700_v21 = vld [vmem:[%s12174_s28 + $0xca8] sm:$0xff] }
 0x29a   : > { %9517 = vmatpush1.bf16.msra.mxu0 %v13797_v37  ;;  %v14044_v37 = vpack.c.bf16 %v3685_v46, %v3683_v50 }
 0x29b   : > { %9965 = vmatpush1.bf16.msra.mxu1 %v14020_v60  ;;  %9519 = vmatprep.subr.bf16.mxu0 %v13803_v8  ;;  %v14047_v8 = vpack.c.bf16 %v3690_v20, %v3688_v53  ;;  %v14099_v20 = vpack.c.bf16 %v3697_v40, %v3695_v29  ;;  %v3705_v29 = vld [vmem:[%s12174_s28 + $0xf40] sm:$0xff] }
 0x29c   : > { %9967 = vmatprep.subr.bf16.mxu1 %v14023_v27 }
 0x29e   : > { %9521 = vmatpush1.bf16.msra.mxu0 %v13811_v19  ;;  %v14056_v19 = vpack.c.bf16 %v3689_v13, %v3687_v7  ;;  %v3699_v13 = vld [vmem:[%s12174_s28 + $0xca0] sm:$0xff] }
 0x29f   : > { %9969 = vmatpush1.bf16.msra.mxu1 %v14032_v49  ;;  %9523 = vmatprep.subr.bf16.mxu0 %v13817_v5  ;;  %v14059_v5 = vpack.c.bf16 %v3694_v30, %v3692_v55  ;;  %v3701_v55 = vld [vmem:[%s12174_s28 + $0xd80] sm:$0xff] }
 0x2a0   : > { %9971 = vmatprep.subr.bf16.mxu1 %v14035_v18 }
 0x2a2   : > { %9525 = vmatpush1.bf16.msra.mxu0 %v13825_v38  ;;  %v14066_v38 = vpop.permute.xlu0 %1252 }
 0x2a3   : > { %9973 = vmatpush1.bf16.msra.mxu1 %v14044_v37  ;;  %9527 = vmatprep.subr.bf16.mxu0 %v13831_v25  ;;  %v273_v25 = vld [vmem:[%s17284_s3] sm:$0x3] }
 0x2a4   : > { %9975 = vmatprep.subr.bf16.mxu1 %v14047_v8  ;;  %v14084_v47 = vrot.slane %v273_v25, %v1264_v23  ;;  %v14094_v50 = vrot.slane %v273_v25, %v1268_v42 }
 0x2a6   : > { %9529 = vmatpush1.bf16.msra.mxu0 %v13839_v11  ;;  %v14077_v11 = vpack.c.bf16 %v3698_v43, %v3696_v15  ;;  %v14118_v43 = vpack.c.bf16 %v3701_v55, %v3699_v13  ;;  %v3711_v13 = vld [vmem:[%s12174_s28 + $0x11e0] sm:$0xff] }
 0x2a7   : > { %9977 = vmatpush1.bf16.msra.mxu1 %v14056_v19  ;;  %9531 = vmatprep.subr.bf16.mxu0 %v13845_v24  ;;  %v3713_v55 = vld [vmem:[%s12174_s28 + $0x12c0] sm:$0xff] }
 0x2a8   : > { %v1243_v9 = vpop.f32.mrb[0].mxu0  ;;  %9979 = vmatprep.subr.bf16.mxu1 %v14059_v5 }
 0x2a9   : > { %v1255_v14 = vadd.f32 %v14066_v38, %v1243_v9  ;;  %v2246_v6 = vpop.f32.mrb[0].mxu1  ;;  %v1245_v34 = vpop.f32.mrb[1].mxu0  ;;  %v3703_v9 = vld [vmem:[%s12174_s28 + $0xe60] sm:$0xff] }
 0x2aa   : > { %v2253_v24 = vadd.f32 %v2246_v6, %v14066_v38  ;;  %v1256_v48 = vadd.f32 %v14066_v38, %v1245_v34  ;;  %v2248_v33 = vpop.f32.mrb[1].mxu1  ;;  %9533 = vmatpush1.bf16.msra.mxu0 %v13853_v36  ;;  %v14102_v36 = vpack.c.bf16 %v3702_v4, %v3700_v21  ;;  %v3708_v34 = vld [vmem:[%s12174_s28 + $0x1028] sm:$0xff] }
 0x2ab   : > { %v1257_v46 = vmax.f32 %v1255_v14, 0.0  ;;  %v2254_v53 = vadd.f32 %v2248_v33, %v14066_v38  ;;  %9981 = vmatpush1.bf16.msra.mxu1 %v14074_v57  ;;  %9535 = vmatprep.subr.bf16.mxu0 %v13859_v52 }
 0x2ac   : > { %v2255_v63 = vmax.f32 %v2253_v24, 0.0  ;;  %v1258_v7 = vmax.f32 %v1256_v48, 0.0  ;;  %9983 = vmatprep.subr.bf16.mxu1 %v14077_v11  ;;  %v14130_v24 = vpack.c.bf16 %v3705_v29, %v3703_v9  ;;  %v3726_v9 = vld [vmem:[%s12174_s28 + $0x1808] sm:$0xff]  ;;  %v3723_v29 = vld [vmem:[%s12174_s28 + $0x1720] sm:$0xff] }
 0x2ad   : > { %1259 = vst [vmem:[%s14089_s10] sm:$0xff] %v1257_v46  ;;  %v2256_v30 = vmax.f32 %v2254_v53, 0.0  ;;  %v1272_v0 = vmul.f32 %v14084_v47, %v1257_v46  ;;  %v3712_v53 = vld [vmem:[%s12174_s28 + $0x11e8] sm:$0xff] }
 0x2ae   : > { %2257 = vst [vmem:[%s14089_s10 + $0x10] sm:$0xff] %v2255_v63  ;;  %1260 = vst [vmem:[%s14089_s10 + $0x8] sm:$0xff] %v1258_v7  ;;  %9537 = vmatpush1.bf16.msra.mxu0 %v13867_v62  ;;  %v2259_v52 = vmul.f32 %v2255_v63, %v14084_v47  ;;  %v1273_v15 = vmul.f32 %v14094_v50, %v1258_v7  ;;  %v14122_v62 = vpack.c.bf16 %v3706_v31, %v3704_v54  ;;  %v3715_v54 = vld [vmem:[%s12174_s28 + $0x13a0] sm:$0xff] }
 0x2af   : > { %2258 = vst [vmem:[%s14089_s10 + $0x18] sm:$0xff] %v2256_v30  ;;  %9985 = vmatpush1.bf16.msra.mxu1 %v14099_v20  ;;  %9539 = vmatprep.subr.bf16.mxu0 %v13873_v35  ;;  %v2260_v23 = vmul.f32 %v2256_v30, %v14094_v50  ;;  %v1278_v25 = vmul.f32 %v1272_v0, %v1257_v46  ;;  %v3710_v35 = vld [vmem:[%s12174_s28 + $0x1108] sm:$0xff]  ;;  %v3707_v46 = vld [vmem:[%s12174_s28 + $0x1020] sm:$0xff] }
 0x2b0   : > { %9987 = vmatprep.subr.bf16.mxu1 %v14102_v36  ;;  %v1274_v42 = vadd.f32 %v1273_v15, %v1272_v0  ;;  %v1279_v40 = vmul.f32 %v1273_v15, %v1258_v7  ;;  %v2265_v14 = vmul.f32 %v2259_v52, %v2255_v63  ;;  %v14134_v33 = vpack.c.bf16 %v3710_v35, %v3708_v34  ;;  %v3714_v63 = vld [vmem:[%s12174_s28 + $0x12c8] sm:$0xff]  ;;  %v3717_v31 = vld [vmem:[%s12174_s28 + $0x1480] sm:$0xff] }
 0x2b1   : > { %v2261_v6 = vadd.f32 %v2260_v23, %v2259_v52  ;;  %v2266_v21 = vmul.f32 %v2260_v23, %v2256_v30  ;;  %v3716_v30 = vld [vmem:[%s12174_s28 + $0x13a8] sm:$0xff]  ;;  %v3719_v23 = vld [vmem:[%s12174_s28 + $0x1560] sm:$0xff] }
 0x2b2   : > { %9541 = vmatpush1.bf16.msra.mxu0 %v13881_v12  ;;  %1275 = vadd.xlane.f32.xlu0 %v1274_v42  ;;  %v1280_v4 = vadd.f32 %v1279_v40, %v1278_v25  ;;  %v3709_v12 = vld [vmem:[%s12174_s28 + $0x1100] sm:$0xff]  ;;  %v3718_v0 = vld [vmem:[%s12174_s28 + $0x1488] sm:$0xff] }
 0x2b3   : > { %9989 = vmatpush1.bf16.msra.mxu1 %v14118_v43  ;;  %2262 = vadd.xlane.f32.xlu1 %v2261_v6  ;;  %v2267_v48 = vadd.f32 %v2266_v21, %v2265_v14  ;;  %v14142_v7 = vpack.c.bf16 %v3709_v12, %v3707_v46  ;;  %v3720_v52 = vld [vmem:[%s12174_s28 + $0x1568] sm:$0xff]  ;;  %v3721_v25 = vld [vmem:[%s12174_s28 + $0x1640] sm:$0xff]  ;;  %v3811_v12 = vld [vmem:[%s12174_s28 + $0x78] sm:$0xff] }
 0x2b4   : > { %9543 = vmatprep.subr.bf16.mxu0 %v13887_v22  ;;  %9991 = vmatprep.subr.bf16.mxu1 %v14122_v62  ;;  %v14146_v22 = vpack.c.bf16 %v3714_v63, %v3712_v53  ;;  %v3722_v15 = vld [vmem:[%s12174_s28 + $0x1648] sm:$0xff]  ;;  %v3725_v40 = vld [vmem:[%s12174_s28 + $0x1800] sm:$0xff]  ;;  %v3813_v53 = vld [vmem:[%s12174_s28 + $0x158] sm:$0xff] }
 0x2b5   : > { %v3724_v42 = vld [vmem:[%s12174_s28 + $0x1728] sm:$0xff]  ;;  %v3727_v34 = vld [vmem:[%s12174_s28 + $0x18e0] sm:$0xff]  ;;  %v3810_v63 = vld [vmem:[%s12174_s28 + $0x70] sm:$0xff] }
 0x2b6   : > { %9545 = vmatpush1.bf16.msra.mxu0 %v13895_v51  ;;  %v14154_v51 = vpack.c.bf16 %v3713_v55, %v3711_v13  ;;  %v3728_v14 = vld [vmem:[%s12174_s28 + $0x18e8] sm:$0xff]  ;;  %v3729_v35 = vld [vmem:[%s12174_s28 + $0x19c0] sm:$0xff]  ;;  %v3812_v13 = vld [vmem:[%s12174_s28 + $0x150] sm:$0xff] }
 0x2b7   : > { %9993 = vmatpush1.bf16.msra.mxu1 %v14130_v24  ;;  %1281 = vadd.xlane.f32.xlu1 %v1280_v4  ;;  %v3730_v6 = vld [vmem:[%s12174_s28 + $0x19c8] sm:$0xff]  ;;  %v3733_v46 = vld [vmem:[%s12174_s28 + $0x1b80] sm:$0xff]  ;;  %v3815_v55 = vld [vmem:[%s12174_s28 + $0x238] sm:$0xff] }
 0x2b8   : > { %9547 = vmatprep.subr.bf16.mxu0 %v13901_v45  ;;  %9995 = vmatprep.subr.bf16.mxu1 %v14134_v33  ;;  %v14158_v45 = vpack.c.bf16 %v3718_v0, %v3716_v30  ;;  %v3732_v21 = vld [vmem:[%s12174_s28 + $0x1aa8] sm:$0xff]  ;;  %v3817_v30 = vld [vmem:[%s12174_s28 + $0x318] sm:$0xff] }
 0x2b9   : > { %v3734_v4 = vld [vmem:[%s12174_s28 + $0x1b88] sm:$0xff]  ;;  %v14233_v0 = vpack.c.bf16 %v3817_v30, %v3815_v55  ;;  %v3836_v55 = vld [vmem:[%s12174_s28 + $0xbd0] sm:$0xff]  ;;  %v3839_v30 = vld [vmem:[%s12174_s28 + $0xcb8] sm:$0xff] }
 0x2ba   : > { %9549 = vmatpush1.bf16.msra.mxu0 %v13909_v39  ;;  %v14167_v39 = vpack.c.bf16 %v3717_v31, %v3715_v54  ;;  %v3814_v54 = vld [vmem:[%s12174_s28 + $0x230] sm:$0xff] }
 0x2bb   : > { %9997 = vmatpush1.bf16.msra.mxu1 %v14142_v7  ;;  %2268 = vadd.xlane.f32.xlu1 %v2267_v48  ;;  %v3731_v48 = vld [vmem:[%s12174_s28 + $0x1aa0] sm:$0xff]  ;;  %v3816_v31 = vld [vmem:[%s12174_s28 + $0x310] sm:$0xff] }
 0x2bc   : > { %9551 = vmatprep.subr.bf16.mxu0 %v13915_v32  ;;  %9999 = vmatprep.subr.bf16.mxu1 %v14146_v22  ;;  %v14170_v32 = vpack.c.bf16 %v3722_v15, %v3720_v52  ;;  %v3821_v52 = vld [vmem:[%s12174_s28 + $0x4d8] sm:$0xff]  ;;  %v8354_v15 = vld [vmem:[%s17282_s1 + $0x48] sm:$0xff] }
 0x2be   : > { %9553 = vmatpush1.bf16.msra.mxu0 %v13923_v61  ;;  %v14179_v61 = vpack.c.bf16 %v3721_v25, %v3719_v23  ;;  %v3818_v25 = vld [vmem:[%s12174_s28 + $0x3f0] sm:$0xff] }
 0x2bf   : > { %10001 = vmatpush1.bf16.msra.mxu1 %v14154_v51  ;;  %9555 = vmatprep.subr.bf16.mxu0 %v13929_v1  ;;  %v14182_v1 = vpack.c.bf16 %v3726_v9, %v3724_v42  ;;  %v3820_v42 = vld [vmem:[%s12174_s28 + $0x4d0] sm:$0xff]  ;;  %v3823_v9 = vld [vmem:[%s12174_s28 + $0x5b8] sm:$0xff] }
 0x2c0   : > { %10003 = vmatprep.subr.bf16.mxu1 %v14158_v45 }
 0x2c2   : > { %9557 = vmatpush1.bf16.msra.mxu0 %v13937_v17  ;;  %v14191_v17 = vpack.c.bf16 %v3725_v40, %v3723_v29  ;;  %v3822_v40 = vld [vmem:[%s12174_s28 + $0x5b0] sm:$0xff] }
 0x2c3   : > { %10005 = vmatpush1.bf16.msra.mxu1 %v14167_v39  ;;  %9559 = vmatprep.subr.bf16.mxu0 %v13943_v16  ;;  %v14194_v16 = vpack.c.bf16 %v3730_v6, %v3728_v14  ;;  %v3824_v14 = vld [vmem:[%s12174_s28 + $0x690] sm:$0xff]  ;;  %v3827_v6 = vld [vmem:[%s12174_s28 + $0x778] sm:$0xff] }
 0x2c4   : > { %10007 = vmatprep.subr.bf16.mxu1 %v14170_v32 }
 0x2c6   : > { %9561 = vmatpush1.bf16.msra.mxu0 %v13951_v44  ;;  %v14203_v44 = vpack.c.bf16 %v3729_v35, %v3727_v34  ;;  %v3829_v34 = vld [vmem:[%s12174_s28 + $0x858] sm:$0xff]  ;;  %v3826_v35 = vld [vmem:[%s12174_s28 + $0x770] sm:$0xff] }
 0x2c7   : > { %10009 = vmatpush1.bf16.msra.mxu1 %v14179_v61  ;;  %9563 = vmatprep.subr.bf16.mxu0 %v13957_v59  ;;  %v14206_v59 = vpack.c.bf16 %v3734_v4, %v3732_v21  ;;  %v3828_v21 = vld [vmem:[%s12174_s28 + $0x850] sm:$0xff]  ;;  %v3831_v4 = vld [vmem:[%s12174_s28 + $0x938] sm:$0xff] }
 0x2c8   : > { %10011 = vmatprep.subr.bf16.mxu1 %v14182_v1 }
 0x2ca   : > { %9565 = vmatpush1.bf16.msra.mxu0 %v13965_v58  ;;  %v14215_v58 = vpack.c.bf16 %v3733_v46, %v3731_v48  ;;  %v3833_v48 = vld [vmem:[%s12174_s28 + $0xa18] sm:$0xff]  ;;  %v3830_v46 = vld [vmem:[%s12174_s28 + $0x930] sm:$0xff] }
 0x2cb   : > { %10013 = vmatpush1.bf16.msra.mxu1 %v14191_v17  ;;  %9567 = vmatprep.subr.bf16.mxu0 %v13971_v3  ;;  %v14218_v3 = vpack.c.bf16 %v3813_v53, %v3811_v12  ;;  %v3832_v12 = vld [vmem:[%s12174_s28 + $0xa10] sm:$0xff]  ;;  %v3835_v53 = vld [vmem:[%s12174_s28 + $0xaf8] sm:$0xff] }
 0x2cc   : > { %10015 = vmatprep.subr.bf16.mxu1 %v14194_v16 }
 0x2ce   : > { %9569 = vmatpush1.bf16.msra.mxu0 %v13979_v10  ;;  %v8351_v10 = vld [vmem:[%s17282_s1 + $0x30] sm:$0xff] }
 0x2cf   : > { %10017 = vmatpush1.bf16.msra.mxu1 %v14203_v44  ;;  %9571 = vmatprep.subr.bf16.mxu0 %v13984_v56  ;;  %v14230_v56 = vpack.c.bf16 %v3812_v13, %v3810_v63  ;;  %v3837_v63 = vld [vmem:[%s12174_s28 + $0xbd8] sm:$0xff]  ;;  %v3834_v13 = vld [vmem:[%s12174_s28 + $0xaf0] sm:$0xff] }
 0x2d0   : > { %10019 = vmatprep.subr.bf16.mxu1 %v14206_v59 }
 0x2d2   : > { %9573 = vmatpush1.bf16.msra.mxu0 %v13991_v28  ;;  %v3819_v28 = vld [vmem:[%s12174_s28 + $0x3f8] sm:$0xff] }
 0x2d3   : > { %10021 = vmatpush1.bf16.msra.mxu1 %v14215_v58  ;;  %9575 = vmatprep.subr.bf16.mxu0 %v13994_v26  ;;  %v14245_v26 = vpack.c.bf16 %v3816_v31, %v3814_v54  ;;  %v14248_v23 = vpack.c.bf16 %v3821_v52, %v3819_v28  ;;  %v3838_v54 = vld [vmem:[%s12174_s28 + $0xcb0] sm:$0xff]  ;;  %v3843_v28 = vld [vmem:[%s12174_s28 + $0xe78] sm:$0xff] }
 0x2d4   : > { %10023 = vmatprep.subr.bf16.mxu1 %v14218_v3  ;;  %v3840_v31 = vld [vmem:[%s12174_s28 + $0xd90] sm:$0xff]  ;;  %v3845_v52 = vld [vmem:[%s12174_s28 + $0xf58] sm:$0xff] }
 0x2d5   : > { %2815 = vmatmul.mubr.f32.vlgmr.msra.gmra.mrb[2].mxu0 %v8351_v10 }
 0x2d6   : > { %9577 = vmatpush1.bf16.msra.mxu0 %v14005_v41  ;;  %3802 = vmatmul.mubr.f32.vlgmr.msra.gmra.mrb[2].mxu1 %v8351_v10  ;;  %v3825_v41 = vld [vmem:[%s12174_s28 + $0x698] sm:$0xff] }
 0x2d7   : > { %10025 = vmatpush1.bf16.msra.mxu1 %v14230_v56  ;;  %9579 = vmatprep.subr.bf16.mxu0 %v14008_v2  ;;  %v14257_v2 = vpack.c.bf16 %v3820_v42, %v3818_v25  ;;  %v14260_v29 = vpack.c.bf16 %v3825_v41, %v3823_v9  ;;  %v3841_v10 = vld [vmem:[%s12174_s28 + $0xd98] sm:$0xff]  ;;  %v3844_v25 = vld [vmem:[%s12174_s28 + $0xf50] sm:$0xff] }
 0x2d8   : > { %10027 = vmatprep.subr.bf16.mxu1 %v14233_v0  ;;  %2953 = vmatprep.mubr.f32.mxu0 %v8354_v15  ;;  %v3847_v42 = vld [vmem:[%s12174_s28 + $0x1038] sm:$0xff]  ;;  %v3846_v41 = vld [vmem:[%s12174_s28 + $0x1030] sm:$0xff] }
 0x2d9   : > { %3940 = vmatprep.mubr.f32.mxu1 %v8354_v15  ;;  %v3842_v15 = vld [vmem:[%s12174_s28 + $0xe70] sm:$0xff]  ;;  %v3849_v9 = vld [vmem:[%s12174_s28 + $0x1118] sm:$0xff] }
 0x2da   : > { %9581 = vmatpush1.bf16.msra.mxu0 %v14020_v60  ;;  %v14269_v60 = vpack.c.bf16 %v3824_v14, %v3822_v40  ;;  %v3848_v40 = vld [vmem:[%s12174_s28 + $0x1110] sm:$0xff]  ;;  %v3851_v14 = vld [vmem:[%s12174_s28 + $0x11f8] sm:$0xff] }
 0x2db   : > { %10029 = vmatpush1.bf16.msra.mxu1 %v14245_v26  ;;  %9583 = vmatprep.subr.bf16.mxu0 %v14023_v27  ;;  %v14272_v27 = vpack.c.bf16 %v3829_v34, %v3827_v6  ;;  %v3853_v6 = vld [vmem:[%s12174_s28 + $0x12d8] sm:$0xff]  ;;  %v3850_v34 = vld [vmem:[%s12174_s28 + $0x11f0] sm:$0xff] }
 0x2dc   : > { %10031 = vmatprep.subr.bf16.mxu1 %v14248_v23 }
 0x2de   : > { %9585 = vmatpush1.bf16.msra.mxu0 %v14032_v49  ;;  %v14281_v49 = vpack.c.bf16 %v3828_v21, %v3826_v35  ;;  %v3852_v35 = vld [vmem:[%s12174_s28 + $0x12d0] sm:$0xff]  ;;  %v3855_v21 = vld [vmem:[%s12174_s28 + $0x13b8] sm:$0xff] }
 0x2df   : > { %10033 = vmatpush1.bf16.msra.mxu1 %v14257_v2  ;;  %9587 = vmatprep.subr.bf16.mxu0 %v14035_v18  ;;  %v14284_v18 = vpack.c.bf16 %v3833_v48, %v3831_v4  ;;  %v3857_v4 = vld [vmem:[%s12174_s28 + $0x1498] sm:$0xff]  ;;  %v3854_v48 = vld [vmem:[%s12174_s28 + $0x13b0] sm:$0xff] }
 0x2e0   : > { %10035 = vmatprep.subr.bf16.mxu1 %v14260_v29 }
 0x2e2   : > { %9589 = vmatpush1.bf16.msra.mxu0 %v14044_v37  ;;  %v14293_v37 = vpack.c.bf16 %v3832_v12, %v3830_v46  ;;  %v3856_v46 = vld [vmem:[%s12174_s28 + $0x1490] sm:$0xff]  ;;  %v3859_v12 = vld [vmem:[%s12174_s28 + $0x1578] sm:$0xff] }
 0x2e3   : > { %10037 = vmatpush1.bf16.msra.mxu1 %v14269_v60  ;;  %9591 = vmatprep.subr.bf16.mxu0 %v14047_v8  ;;  %v14296_v8 = vpack.c.bf16 %v3837_v63, %v3835_v53  ;;  %v3861_v53 = vld [vmem:[%s12174_s28 + $0x1658] sm:$0xff]  ;;  %v3858_v63 = vld [vmem:[%s12174_s28 + $0x1570] sm:$0xff] }
 0x2e4   : > { %10039 = vmatprep.subr.bf16.mxu1 %v14272_v27 }
 0x2e6   : > { %9593 = vmatpush1.bf16.msra.mxu0 %v14056_v19  ;;  %v14305_v19 = vpack.c.bf16 %v3836_v55, %v3834_v13  ;;  %v3860_v13 = vld [vmem:[%s12174_s28 + $0x1650] sm:$0xff]  ;;  %v3863_v55 = vld [vmem:[%s12174_s28 + $0x1738] sm:$0xff] }
 0x2e7   : > { %10041 = vmatpush1.bf16.msra.mxu1 %v14281_v49  ;;  %9595 = vmatprep.subr.bf16.mxu0 %v14059_v5  ;;  %v14308_v5 = vpack.c.bf16 %v3841_v10, %v3839_v30  ;;  %v3865_v30 = vld [vmem:[%s12174_s28 + $0x1818] sm:$0xff]  ;;  %v3862_v10 = vld [vmem:[%s12174_s28 + $0x1730] sm:$0xff] }
 0x2e8   : > { %10043 = vmatprep.subr.bf16.mxu1 %v14284_v18 }
 0x2ea   : > { %9597 = vmatpush1.bf16.msra.mxu0 %v14074_v57  ;;  %v14317_v57 = vpack.c.bf16 %v3840_v31, %v3838_v54  ;;  %v3864_v54 = vld [vmem:[%s12174_s28 + $0x1810] sm:$0xff]  ;;  %v3867_v31 = vld [vmem:[%s12174_s28 + $0x18f8] sm:$0xff] }
 0x2eb   : > { %10045 = vmatpush1.bf16.msra.mxu1 %v14293_v37  ;;  %9599 = vmatprep.subr.bf16.mxu0 %v14077_v11  ;;  %v14320_v11 = vpack.c.bf16 %v3845_v52, %v3843_v28  ;;  %v3869_v28 = vld [vmem:[%s12174_s28 + $0x19d8] sm:$0xff]  ;;  %v3866_v52 = vld [vmem:[%s12174_s28 + $0x18f0] sm:$0xff] }
 0x2ec   : > { %10047 = vmatprep.subr.bf16.mxu1 %v14296_v8 }
 0x2ee   : > { %9601 = vmatpush1.bf16.msra.mxu0 %v14099_v20  ;;  %v14329_v20 = vpack.c.bf16 %v3844_v25, %v3842_v15  ;;  %v3868_v15 = vld [vmem:[%s12174_s28 + $0x19d0] sm:$0xff]  ;;  %v3871_v25 = vld [vmem:[%s12174_s28 + $0x1ab8] sm:$0xff] }
 0x2ef   : > { %10049 = vmatpush1.bf16.msra.mxu1 %v14305_v19  ;;  %9603 = vmatprep.subr.bf16.mxu0 %v14102_v36  ;;  %v14332_v36 = vpack.c.bf16 %v3849_v9, %v3847_v42  ;;  %v3873_v42 = vld [vmem:[%s12174_s28 + $0x1b98] sm:$0xff]  ;;  %v3870_v9 = vld [vmem:[%s12174_s28 + $0x1ab0] sm:$0xff] }
 0x2f0   : > { %10051 = vmatprep.subr.bf16.mxu1 %v14308_v5 }
 0x2f2   : > { %9605 = vmatpush1.bf16.msra.mxu0 %v14118_v43  ;;  %v14341_v43 = vpack.c.bf16 %v3848_v40, %v3846_v41  ;;  %v3872_v41 = vld [vmem:[%s12174_s28 + $0x1b90] sm:$0xff]  ;;  %v3950_v40 = vld [vmem:[%s12174_s28 + $0x88] sm:$0xff] }
 0x2f3   : > { %10053 = vmatpush1.bf16.msra.mxu1 %v14317_v57  ;;  %9607 = vmatprep.subr.bf16.mxu0 %v14122_v62  ;;  %v14344_v62 = vpack.c.bf16 %v3853_v6, %v3851_v14  ;;  %v3952_v14 = vld [vmem:[%s12174_s28 + $0x168] sm:$0xff]  ;;  %v3949_v6 = vld [vmem:[%s12174_s28 + $0x80] sm:$0xff] }
 0x2f4   : > { %10055 = vmatprep.subr.bf16.mxu1 %v14320_v11 }
 0x2f6   : > { %9609 = vmatpush1.bf16.msra.mxu0 %v14130_v24  ;;  %v14353_v24 = vpack.c.bf16 %v3852_v35, %v3850_v34  ;;  %v3951_v34 = vld [vmem:[%s12174_s28 + $0x160] sm:$0xff]  ;;  %v3954_v35 = vld [vmem:[%s12174_s28 + $0x248] sm:$0xff] }
 0x2f7   : > { %10057 = vmatpush1.bf16.msra.mxu1 %v14329_v20  ;;  %9611 = vmatprep.subr.bf16.mxu0 %v14134_v33  ;;  %v14356_v33 = vpack.c.bf16 %v3857_v4, %v3855_v21  ;;  %v3956_v21 = vld [vmem:[%s12174_s28 + $0x328] sm:$0xff] }
 0x2f8   : > { %10059 = vmatprep.subr.bf16.mxu1 %v14332_v36  ;;  %v14431_v4 = vpack.c.bf16 %v3956_v21, %v3954_v35  ;;  %v3975_v35 = vld [vmem:[%s12174_s28 + $0xbe0] sm:$0xff]  ;;  %v3978_v21 = vld [vmem:[%s12174_s28 + $0xcc8] sm:$0xff] }
 0x2fa   : > { %9613 = vmatpush1.bf16.msra.mxu0 %v14142_v7  ;;  %v14365_v7 = vpack.c.bf16 %v3856_v46, %v3854_v48  ;;  %v3953_v48 = vld [vmem:[%s12174_s28 + $0x240] sm:$0xff] }
 0x2fb   : > { %10061 = vmatpush1.bf16.msra.mxu1 %v14341_v43  ;;  %9615 = vmatprep.subr.bf16.mxu0 %v14146_v22  ;;  %v14368_v22 = vpack.c.bf16 %v3861_v53, %v3859_v12  ;;  %v3955_v46 = vld [vmem:[%s12174_s28 + $0x320] sm:$0xff]  ;;  %v3960_v12 = vld [vmem:[%s12174_s28 + $0x4e8] sm:$0xff]  ;;  %v8356_v53 = vld [vmem:[%s17282_s1 + $0x58] sm:$0xff] }
 0x2fc   : > { %10063 = vmatprep.subr.bf16.mxu1 %v14344_v62 }
 0x2fe   : > { %9617 = vmatpush1.bf16.msra.mxu0 %v14154_v51  ;;  %v14377_v51 = vpack.c.bf16 %v3860_v13, %v3858_v63  ;;  %v3957_v13 = vld [vmem:[%s12174_s28 + $0x400] sm:$0xff] }
 0x2ff   : > { %10065 = vmatpush1.bf16.msra.mxu1 %v14353_v24  ;;  %9619 = vmatprep.subr.bf16.mxu0 %v14158_v45  ;;  %v14380_v45 = vpack.c.bf16 %v3865_v30, %v3863_v55  ;;  %v3959_v55 = vld [vmem:[%s12174_s28 + $0x4e0] sm:$0xff]  ;;  %v3962_v30 = vld [vmem:[%s12174_s28 + $0x5c8] sm:$0xff] }
 0x300   : > { %10067 = vmatprep.subr.bf16.mxu1 %v14356_v33 }
 0x302   : > { %9621 = vmatpush1.bf16.msra.mxu0 %v14167_v39  ;;  %v14389_v39 = vpack.c.bf16 %v3864_v54, %v3862_v10  ;;  %v3961_v54 = vld [vmem:[%s12174_s28 + $0x5c0] sm:$0xff] }
 0x303   : > { %10069 = vmatpush1.bf16.msra.mxu1 %v14365_v7  ;;  %9623 = vmatprep.subr.bf16.mxu0 %v14170_v32  ;;  %v14392_v32 = vpack.c.bf16 %v3869_v28, %v3867_v31  ;;  %v3963_v31 = vld [vmem:[%s12174_s28 + $0x6a0] sm:$0xff]  ;;  %v3966_v28 = vld [vmem:[%s12174_s28 + $0x788] sm:$0xff] }
 0x304   : > { %10071 = vmatprep.subr.bf16.mxu1 %v14368_v22 }
 0x306   : > { %9625 = vmatpush1.bf16.msra.mxu0 %v14179_v61  ;;  %v14401_v61 = vpack.c.bf16 %v3868_v15, %v3866_v52  ;;  %v3968_v52 = vld [vmem:[%s12174_s28 + $0x868] sm:$0xff]  ;;  %v3965_v15 = vld [vmem:[%s12174_s28 + $0x780] sm:$0xff] }
 0x307   : > { %10073 = vmatpush1.bf16.msra.mxu1 %v14377_v51  ;;  %9627 = vmatprep.subr.bf16.mxu0 %v14182_v1  ;;  %v14404_v1 = vpack.c.bf16 %v3873_v42, %v3871_v25  ;;  %v3967_v25 = vld [vmem:[%s12174_s28 + $0x860] sm:$0xff]  ;;  %v3970_v42 = vld [vmem:[%s12174_s28 + $0x948] sm:$0xff] }
 0x308   : > { %10075 = vmatprep.subr.bf16.mxu1 %v14380_v45 }
 0x30a   : > { %9629 = vmatpush1.bf16.msra.mxu0 %v14191_v17  ;;  %v14413_v17 = vpack.c.bf16 %v3872_v41, %v3870_v9  ;;  %v3972_v9 = vld [vmem:[%s12174_s28 + $0xa28] sm:$0xff]  ;;  %v3969_v41 = vld [vmem:[%s12174_s28 + $0x940] sm:$0xff] }
 0x30b   : > { %10077 = vmatpush1.bf16.msra.mxu1 %v14389_v39  ;;  %9631 = vmatprep.subr.bf16.mxu0 %v14194_v16  ;;  %v14416_v16 = vpack.c.bf16 %v3952_v14, %v3950_v40  ;;  %v3971_v40 = vld [vmem:[%s12174_s28 + $0xa20] sm:$0xff]  ;;  %v3974_v14 = vld [vmem:[%s12174_s28 + $0xb08] sm:$0xff] }
 0x30c   : > { %10079 = vmatprep.subr.bf16.mxu1 %v14392_v32 }
 0x30e   : > { %9633 = vmatpush1.bf16.msra.mxu0 %v14203_v44  ;;  %v8353_v44 = vld [vmem:[%s17282_s1 + $0x40] sm:$0xff] }
 0x30f   : > { %10081 = vmatpush1.bf16.msra.mxu1 %v14401_v61  ;;  %9635 = vmatprep.subr.bf16.mxu0 %v14206_v59  ;;  %v14428_v59 = vpack.c.bf16 %v3951_v34, %v3949_v6  ;;  %v3976_v6 = vld [vmem:[%s12174_s28 + $0xbe8] sm:$0xff]  ;;  %v3973_v34 = vld [vmem:[%s12174_s28 + $0xb00] sm:$0xff] }
 0x310   : > { %10083 = vmatprep.subr.bf16.mxu1 %v14404_v1 }
 0x312   : > { %9637 = vmatpush1.bf16.msra.mxu0 %v14215_v58  ;;  %v3958_v58 = vld [vmem:[%s12174_s28 + $0x408] sm:$0xff] }
 0x313   : > { %10085 = vmatpush1.bf16.msra.mxu1 %v14413_v17  ;;  %9639 = vmatprep.subr.bf16.mxu0 %v14218_v3  ;;  %v14443_v3 = vpack.c.bf16 %v3955_v46, %v3953_v48  ;;  %v14446_v63 = vpack.c.bf16 %v3960_v12, %v3958_v58  ;;  %v3977_v48 = vld [vmem:[%s12174_s28 + $0xcc0] sm:$0xff]  ;;  %v3982_v58 = vld [vmem:[%s12174_s28 + $0xe88] sm:$0xff] }
 0x314   : > { %10087 = vmatprep.subr.bf16.mxu1 %v14416_v16  ;;  %v3979_v46 = vld [vmem:[%s12174_s28 + $0xda0] sm:$0xff]  ;;  %v3984_v12 = vld [vmem:[%s12174_s28 + $0xf68] sm:$0xff] }
 0x315   : > { %2954 = vmatmul.mubr.f32.vlgmr.msra.gmra.mrb[2].mxu0 %v8353_v44 }
 0x316   : > { %9641 = vmatpush1.bf16.msra.mxu0 %v14230_v56  ;;  %3941 = vmatmul.mubr.f32.vlgmr.msra.gmra.mrb[2].mxu1 %v8353_v44  ;;  %v3964_v56 = vld [vmem:[%s12174_s28 + $0x6a8] sm:$0xff] }
 0x317   : > { %10089 = vmatpush1.bf16.msra.mxu1 %v14428_v59  ;;  %9643 = vmatprep.subr.bf16.mxu0 %v14233_v0  ;;  %v14455_v0 = vpack.c.bf16 %v3959_v55, %v3957_v13  ;;  %v14458_v10 = vpack.c.bf16 %v3964_v56, %v3962_v30  ;;  %v3980_v44 = vld [vmem:[%s12174_s28 + $0xda8] sm:$0xff]  ;;  %v3983_v13 = vld [vmem:[%s12174_s28 + $0xf60] sm:$0xff] }
 0x318   : > { %10091 = vmatprep.subr.bf16.mxu1 %v14431_v4  ;;  %3092 = vmatprep.mubr.f32.mxu0 %v8356_v53  ;;  %v3986_v55 = vld [vmem:[%s12174_s28 + $0x1048] sm:$0xff]  ;;  %v3985_v56 = vld [vmem:[%s12174_s28 + $0x1040] sm:$0xff] }
 0x319   : > { %4079 = vmatprep.mubr.f32.mxu1 %v8356_v53  ;;  %v3981_v53 = vld [vmem:[%s12174_s28 + $0xe80] sm:$0xff]  ;;  %v3988_v30 = vld [vmem:[%s12174_s28 + $0x1128] sm:$0xff] }
 0x31a   : > { %9645 = vmatpush1.bf16.msra.mxu0 %v14245_v26  ;;  %v14467_v26 = vpack.c.bf16 %v3963_v31, %v3961_v54  ;;  %v3987_v54 = vld [vmem:[%s12174_s28 + $0x1120] sm:$0xff]  ;;  %v3990_v31 = vld [vmem:[%s12174_s28 + $0x1208] sm:$0xff] }
 0x31b   : > { %10093 = vmatpush1.bf16.msra.mxu1 %v14443_v3  ;;  %9647 = vmatprep.subr.bf16.mxu0 %v14248_v23  ;;  %v14470_v23 = vpack.c.bf16 %v3968_v52, %v3966_v28  ;;  %v3992_v28 = vld [vmem:[%s12174_s28 + $0x12e8] sm:$0xff]  ;;  %v3989_v52 = vld [vmem:[%s12174_s28 + $0x1200] sm:$0xff] }
 0x31c   : > { %10095 = vmatprep.subr.bf16.mxu1 %v14446_v63 }
 0x31e   : > { %9649 = vmatpush1.bf16.msra.mxu0 %v14257_v2  ;;  %v14479_v2 = vpack.c.bf16 %v3967_v25, %v3965_v15  ;;  %v3991_v15 = vld [vmem:[%s12174_s28 + $0x12e0] sm:$0xff]  ;;  %v3994_v25 = vld [vmem:[%s12174_s28 + $0x13c8] sm:$0xff] }
 0x31f   : > { %10097 = vmatpush1.bf16.msra.mxu1 %v14455_v0  ;;  %9651 = vmatprep.subr.bf16.mxu0 %v14260_v29  ;;  %v14482_v29 = vpack.c.bf16 %v3972_v9, %v3970_v42  ;;  %v3996_v42 = vld [vmem:[%s12174_s28 + $0x14a8] sm:$0xff]  ;;  %v3993_v9 = vld [vmem:[%s12174_s28 + $0x13c0] sm:$0xff] }
 0x320   : > { %10099 = vmatprep.subr.bf16.mxu1 %v14458_v10 }
 0x322   : > { %9653 = vmatpush1.bf16.msra.mxu0 %v14269_v60  ;;  %v14491_v60 = vpack.c.bf16 %v3971_v40, %v3969_v41  ;;  %v3995_v41 = vld [vmem:[%s12174_s28 + $0x14a0] sm:$0xff]  ;;  %v3998_v40 = vld [vmem:[%s12174_s28 + $0x1588] sm:$0xff] }
 0x323   : > { %10101 = vmatpush1.bf16.msra.mxu1 %v14467_v26  ;;  %9655 = vmatprep.subr.bf16.mxu0 %v14272_v27  ;;  %v14494_v27 = vpack.c.bf16 %v3976_v6, %v3974_v14  ;;  %v4000_v14 = vld [vmem:[%s12174_s28 + $0x1668] sm:$0xff]  ;;  %v3997_v6 = vld [vmem:[%s12174_s28 + $0x1580] sm:$0xff] }
 0x324   : > { %10103 = vmatprep.subr.bf16.mxu1 %v14470_v23 }
 0x326   : > { %9657 = vmatpush1.bf16.msra.mxu0 %v14281_v49  ;;  %v14503_v49 = vpack.c.bf16 %v3975_v35, %v3973_v34  ;;  %v3999_v34 = vld [vmem:[%s12174_s28 + $0x1660] sm:$0xff]  ;;  %v4002_v35 = vld [vmem:[%s12174_s28 + $0x1748] sm:$0xff] }
 0x327   : > { %10105 = vmatpush1.bf16.msra.mxu1 %v14479_v2  ;;  %9659 = vmatprep.subr.bf16.mxu0 %v14284_v18  ;;  %v14506_v18 = vpack.c.bf16 %v3980_v44, %v3978_v21  ;;  %v4004_v21 = vld [vmem:[%s12174_s28 + $0x1828] sm:$0xff]  ;;  %v4001_v44 = vld [vmem:[%s12174_s28 + $0x1740] sm:$0xff] }
 0x328   : > { %10107 = vmatprep.subr.bf16.mxu1 %v14482_v29 }
 0x32a   : > { %9661 = vmatpush1.bf16.msra.mxu0 %v14293_v37  ;;  %v14515_v37 = vpack.c.bf16 %v3979_v46, %v3977_v48  ;;  %v4003_v48 = vld [vmem:[%s12174_s28 + $0x1820] sm:$0xff]  ;;  %v4006_v46 = vld [vmem:[%s12174_s28 + $0x1908] sm:$0xff] }
 0x32b   : > { %10109 = vmatpush1.bf16.msra.mxu1 %v14491_v60  ;;  %9663 = vmatprep.subr.bf16.mxu0 %v14296_v8  ;;  %v14518_v8 = vpack.c.bf16 %v3984_v12, %v3982_v58  ;;  %v4008_v58 = vld [vmem:[%s12174_s28 + $0x19e8] sm:$0xff]  ;;  %v4005_v12 = vld [vmem:[%s12174_s28 + $0x1900] sm:$0xff] }
 0x32c   : > { %10111 = vmatprep.subr.bf16.mxu1 %v14494_v27 }
 0x32e   : > { %9665 = vmatpush1.bf16.msra.mxu0 %v14305_v19  ;;  %v14527_v19 = vpack.c.bf16 %v3983_v13, %v3981_v53  ;;  %v4007_v53 = vld [vmem:[%s12174_s28 + $0x19e0] sm:$0xff]  ;;  %v4010_v13 = vld [vmem:[%s12174_s28 + $0x1ac8] sm:$0xff] }
 0x32f   : > { %10113 = vmatpush1.bf16.msra.mxu1 %v14503_v49  ;;  %9667 = vmatprep.subr.bf16.mxu0 %v14308_v5  ;;  %v14530_v5 = vpack.c.bf16 %v3988_v30, %v3986_v55  ;;  %v4012_v55 = vld [vmem:[%s12174_s28 + $0x1ba8] sm:$0xff]  ;;  %v4009_v30 = vld [vmem:[%s12174_s28 + $0x1ac0] sm:$0xff] }
 0x330   : > { %10115 = vmatprep.subr.bf16.mxu1 %v14506_v18 }
 0x332   : > { %9669 = vmatpush1.bf16.msra.mxu0 %v14317_v57  ;;  %v14539_v57 = vpack.c.bf16 %v3987_v54, %v3985_v56  ;;  %v4011_v56 = vld [vmem:[%s12174_s28 + $0x1ba0] sm:$0xff]  ;;  %v4089_v54 = vld [vmem:[%s12174_s28 + $0x98] sm:$0xff] }
 0x333   : > { %10117 = vmatpush1.bf16.msra.mxu1 %v14515_v37  ;;  %9671 = vmatprep.subr.bf16.mxu0 %v14320_v11  ;;  %v14542_v11 = vpack.c.bf16 %v3992_v28, %v3990_v31  ;;  %v4091_v31 = vld [vmem:[%s12174_s28 + $0x178] sm:$0xff]  ;;  %v4088_v28 = vld [vmem:[%s12174_s28 + $0x90] sm:$0xff] }
 0x334   : > { %10119 = vmatprep.subr.bf16.mxu1 %v14518_v8 }
 0x336   : > { %9673 = vmatpush1.bf16.msra.mxu0 %v14329_v20  ;;  %v14551_v20 = vpack.c.bf16 %v3991_v15, %v3989_v52  ;;  %v4090_v52 = vld [vmem:[%s12174_s28 + $0x170] sm:$0xff]  ;;  %v4093_v15 = vld [vmem:[%s12174_s28 + $0x258] sm:$0xff] }
 0x337   : > { %10121 = vmatpush1.bf16.msra.mxu1 %v14527_v19  ;;  %9675 = vmatprep.subr.bf16.mxu0 %v14332_v36  ;;  %v14554_v36 = vpack.c.bf16 %v3996_v42, %v3994_v25  ;;  %v4095_v25 = vld [vmem:[%s12174_s28 + $0x338] sm:$0xff] }
 0x338   : > { %10123 = vmatprep.subr.bf16.mxu1 %v14530_v5  ;;  %v10154_v42 = vpack.c.bf16 %v4095_v25, %v4093_v15  ;;  %v4117_v15 = vld [vmem:[%s12174_s28 + $0xcd8] sm:$0xff] }
 0x339   : > { %v4119_v25 = vld [vmem:[%s12174_s28 + $0xdb8] sm:$0xff] }
 0x33a   : > { %9677 = vmatpush1.bf16.msra.mxu0 %v14341_v43  ;;  %v14563_v43 = vpack.c.bf16 %v3995_v41, %v3993_v9  ;;  %v4092_v9 = vld [vmem:[%s12174_s28 + $0x250] sm:$0xff] }
 0x33b   : > { %10125 = vmatpush1.bf16.msra.mxu1 %v14539_v57  ;;  %9679 = vmatprep.subr.bf16.mxu0 %v14344_v62  ;;  %v14566_v62 = vpack.c.bf16 %v4000_v14, %v3998_v40  ;;  %v4094_v41 = vld [vmem:[%s12174_s28 + $0x330] sm:$0xff]  ;;  %v4097_v40 = vld [vmem:[%s12174_s28 + $0x418] sm:$0xff]  ;;  %v8358_v14 = vld [vmem:[%s17282_s1 + $0x68] sm:$0xff] }
 0x33c   : > { %10127 = vmatprep.subr.bf16.mxu1 %v14542_v11 }
 0x33e   : > { %9681 = vmatpush1.bf16.msra.mxu0 %v14353_v24  ;;  %v14575_v24 = vpack.c.bf16 %v3999_v34, %v3997_v6  ;;  %v4096_v34 = vld [vmem:[%s12174_s28 + $0x410] sm:$0xff] }
 0x33f   : > { %10129 = vmatpush1.bf16.msra.mxu1 %v14551_v20  ;;  %9683 = vmatprep.subr.bf16.mxu0 %v14356_v33  ;;  %v14578_v33 = vpack.c.bf16 %v4004_v21, %v4002_v35  ;;  %v4098_v35 = vld [vmem:[%s12174_s28 + $0x4f0] sm:$0xff]  ;;  %v4101_v21 = vld [vmem:[%s12174_s28 + $0x5d8] sm:$0xff] }
 0x340   : > { %10131 = vmatprep.subr.bf16.mxu1 %v14554_v36 }
 0x342   : > { %9685 = vmatpush1.bf16.msra.mxu0 %v14365_v7  ;;  %v14587_v7 = vpack.c.bf16 %v4003_v48, %v4001_v44  ;;  %v4103_v44 = vld [vmem:[%s12174_s28 + $0x6b8] sm:$0xff]  ;;  %v4100_v48 = vld [vmem:[%s12174_s28 + $0x5d0] sm:$0xff] }
 0x343   : > { %10133 = vmatpush1.bf16.msra.mxu1 %v14563_v43  ;;  %9687 = vmatprep.subr.bf16.mxu0 %v14368_v22  ;;  %v14590_v22 = vpack.c.bf16 %v4008_v58, %v4006_v46  ;;  %v4102_v46 = vld [vmem:[%s12174_s28 + $0x6b0] sm:$0xff]  ;;  %v4105_v58 = vld [vmem:[%s12174_s28 + $0x798] sm:$0xff] }
 0x344   : > { %10135 = vmatprep.subr.bf16.mxu1 %v14566_v62 }
 0x346   : > { %9689 = vmatpush1.bf16.msra.mxu0 %v14377_v51  ;;  %v14599_v51 = vpack.c.bf16 %v4007_v53, %v4005_v12  ;;  %v4107_v12 = vld [vmem:[%s12174_s28 + $0x878] sm:$0xff]  ;;  %v4104_v53 = vld [vmem:[%s12174_s28 + $0x790] sm:$0xff] }
 0x347   : > { %10137 = vmatpush1.bf16.msra.mxu1 %v14575_v24  ;;  %9691 = vmatprep.subr.bf16.mxu0 %v14380_v45  ;;  %v14602_v45 = vpack.c.bf16 %v4012_v55, %v4010_v13  ;;  %v4106_v13 = vld [vmem:[%s12174_s28 + $0x870] sm:$0xff]  ;;  %v4109_v55 = vld [vmem:[%s12174_s28 + $0x958] sm:$0xff] }
 0x348   : > { %10139 = vmatprep.subr.bf16.mxu1 %v14578_v33 }
 0x34a   : > { %9693 = vmatpush1.bf16.msra.mxu0 %v14389_v39  ;;  %v14611_v39 = vpack.c.bf16 %v4011_v56, %v4009_v30  ;;  %v4111_v30 = vld [vmem:[%s12174_s28 + $0xa38] sm:$0xff]  ;;  %v4108_v56 = vld [vmem:[%s12174_s28 + $0x950] sm:$0xff] }
 0x34b   : > { %10141 = vmatpush1.bf16.msra.mxu1 %v14587_v7  ;;  %9695 = vmatprep.subr.bf16.mxu0 %v14392_v32  ;;  %v10150_v32 = vpack.c.bf16 %v4091_v31, %v4089_v54  ;;  %v4110_v54 = vld [vmem:[%s12174_s28 + $0xa30] sm:$0xff]  ;;  %v4113_v31 = vld [vmem:[%s12174_s28 + $0xb18] sm:$0xff] }
 0x34c   : > { %10143 = vmatprep.subr.bf16.mxu1 %v14590_v22 }
 0x34e   : > { %9697 = vmatpush1.bf16.msra.mxu0 %v14401_v61  ;;  %v8355_v61 = vld [vmem:[%s17282_s1 + $0x50] sm:$0xff] }
 0x34f   : > { %10145 = vmatpush1.bf16.msra.mxu1 %v14599_v51  ;;  %9699 = vmatprep.subr.bf16.mxu0 %v14404_v1  ;;  %v10152_v1 = vpack.c.bf16 %v4090_v52, %v4088_v28  ;;  %v4112_v28 = vld [vmem:[%s12174_s28 + $0xb10] sm:$0xff] }
 0x350   : > { %10147 = vmatprep.subr.bf16.mxu1 %v14602_v45  ;;  %v4114_v52 = vld [vmem:[%s12174_s28 + $0xbf0] sm:$0xff] }
 0x352   : > { %9701 = vmatpush1.bf16.msra.mxu0 %v14413_v17  ;;  %v4099_v17 = vld [vmem:[%s12174_s28 + $0x4f8] sm:$0xff] }
 0x353   : > { %10149 = vmatpush1.bf16.msra.mxu1 %v14611_v39  ;;  %9703 = vmatprep.subr.bf16.mxu0 %v14416_v16  ;;  %v10156_v16 = vpack.c.bf16 %v4094_v41, %v4092_v9  ;;  %v10158_v6 = vpack.c.bf16 %v4099_v17, %v4097_v40  ;;  %v4123_v9 = vld [vmem:[%s12174_s28 + $0xf78] sm:$0xff]  ;;  %v4120_v41 = vld [vmem:[%s12174_s28 + $0xe90] sm:$0xff] }
 0x354   : > { %10151 = vmatprep.subr.bf16.mxu1 %v10150_v32  ;;  %v4115_v32 = vld [vmem:[%s12174_s28 + $0xbf8] sm:$0xff]  ;;  %v4122_v40 = vld [vmem:[%s12174_s28 + $0xf70] sm:$0xff] }
 0x355   : > { %3093 = vmatmul.mubr.f32.vlgmr.msra.gmra.mrb[2].mxu0 %v8355_v61  ;;  %v4125_v17 = vld [vmem:[%s12174_s28 + $0x1058] sm:$0xff] }
 0x356   : > { %9705 = vmatpush1.bf16.msra.mxu0 %v14428_v59  ;;  %4080 = vmatmul.mubr.f32.vlgmr.msra.gmra.mrb[2].mxu1 %v8355_v61  ;;  %v10160_v59 = vpack.c.bf16 %v4098_v35, %v4096_v34  ;;  %v4116_v61 = vld [vmem:[%s12174_s28 + $0xcd0] sm:$0xff]  ;;  %v4129_v34 = vld [vmem:[%s12174_s28 + $0x1218] sm:$0xff] }
 0x357   : > { %10153 = vmatpush1.bf16.msra.mxu1 %v10152_v1  ;;  %9707 = vmatprep.subr.bf16.mxu0 %v14431_v4  ;;  %v10162_v4 = vpack.c.bf16 %v4103_v44, %v4101_v21  ;;  %v4118_v1 = vld [vmem:[%s12174_s28 + $0xdb0] sm:$0xff]  ;;  %v4131_v35 = vld [vmem:[%s12174_s28 + $0x12f8] sm:$0xff] }
 0x358   : > { %10155 = vmatprep.subr.bf16.mxu1 %v10154_v42  ;;  %3231 = vmatprep.mubr.f32.mxu0 %v8358_v14  ;;  %v4121_v42 = vld [vmem:[%s12174_s28 + $0xe98] sm:$0xff]  ;;  %v4128_v21 = vld [vmem:[%s12174_s28 + $0x1210] sm:$0xff] }
 0x359   : > { %4218 = vmatprep.mubr.f32.mxu1 %v8358_v14  ;;  %v4127_v14 = vld [vmem:[%s12174_s28 + $0x1138] sm:$0xff]  ;;  %v4130_v44 = vld [vmem:[%s12174_s28 + $0x12f0] sm:$0xff] }
 0x35a   : > { %9709 = vmatpush1.bf16.msra.mxu0 %v14443_v3  ;;  %v10164_v3 = vpack.c.bf16 %v4102_v46, %v4100_v48  ;;  %v4132_v48 = vld [vmem:[%s12174_s28 + $0x13d0] sm:$0xff] }
 0x35b   : > { %10157 = vmatpush1.bf16.msra.mxu1 %v10156_v16  ;;  %9711 = vmatprep.subr.bf16.mxu0 %v14446_v63  ;;  %v10166_v63 = vpack.c.bf16 %v4107_v12, %v4105_v58  ;;  %v4124_v16 = vld [vmem:[%s12174_s28 + $0x1050] sm:$0xff]  ;;  %v4137_v58 = vld [vmem:[%s12174_s28 + $0x1598] sm:$0xff] }
 0x35c   : > { %10159 = vmatprep.subr.bf16.mxu1 %v10158_v6  ;;  %v4126_v6 = vld [vmem:[%s12174_s28 + $0x1130] sm:$0xff]  ;;  %v4139_v12 = vld [vmem:[%s12174_s28 + $0x1678] sm:$0xff] }
 0x35d   : > { %v4134_v46 = vld [vmem:[%s12174_s28 + $0x14b0] sm:$0xff] }
 0x35e   : > { %9713 = vmatpush1.bf16.msra.mxu0 %v14455_v0  ;;  %v10168_v0 = vpack.c.bf16 %v4106_v13, %v4104_v53  ;;  %v4141_v53 = vld [vmem:[%s12174_s28 + $0x1758] sm:$0xff] }
 0x35f   : > { %10161 = vmatpush1.bf16.msra.mxu1 %v10160_v59  ;;  %9715 = vmatprep.subr.bf16.mxu0 %v14458_v10  ;;  %v10170_v10 = vpack.c.bf16 %v4111_v30, %v4109_v55  ;;  %v4133_v59 = vld [vmem:[%s12174_s28 + $0x13d8] sm:$0xff]  ;;  %v4140_v55 = vld [vmem:[%s12174_s28 + $0x1750] sm:$0xff] }
 0x360   : > { %10163 = vmatprep.subr.bf16.mxu1 %v10162_v4  ;;  %v4135_v4 = vld [vmem:[%s12174_s28 + $0x14b8] sm:$0xff]  ;;  %v4142_v30 = vld [vmem:[%s12174_s28 + $0x1830] sm:$0xff] }
 0x361   : > { %v4143_v13 = vld [vmem:[%s12174_s28 + $0x1838] sm:$0xff] }
 0x362   : > { %9717 = vmatpush1.bf16.msra.mxu0 %v14467_v26  ;;  %v10172_v26 = vpack.c.bf16 %v4110_v54, %v4108_v56  ;;  %v4144_v56 = vld [vmem:[%s12174_s28 + $0x1910] sm:$0xff] }
 0x363   : > { %10165 = vmatpush1.bf16.msra.mxu1 %v10164_v3  ;;  %9719 = vmatprep.subr.bf16.mxu0 %v14470_v23  ;;  %v10174_v23 = vpack.c.bf16 %v4115_v32, %v4113_v31  ;;  %v4136_v3 = vld [vmem:[%s12174_s28 + $0x1590] sm:$0xff]  ;;  %v4149_v31 = vld [vmem:[%s12174_s28 + $0x1ad8] sm:$0xff] }
 0x364   : > { %10167 = vmatprep.subr.bf16.mxu1 %v10166_v63  ;;  %v4138_v63 = vld [vmem:[%s12174_s28 + $0x1670] sm:$0xff]  ;;  %v4151_v32 = vld [vmem:[%s12174_s28 + $0x1bb8] sm:$0xff] }
 0x365   : > { %v4146_v54 = vld [vmem:[%s12174_s28 + $0x19f0] sm:$0xff] }
 0x366   : > { %9721 = vmatpush1.bf16.msra.mxu0 %v14479_v2  ;;  %v10176_v2 = vpack.c.bf16 %v4114_v52, %v4112_v28  ;;  %v4312_v28 = vld [vmem:[%s12174_s28 + $0x58] sm:$0xff] }
 0x367   : > { %10169 = vmatpush1.bf16.msra.mxu1 %v10168_v0  ;;  %9723 = vmatprep.subr.bf16.mxu0 %v14482_v29  ;;  %v10178_v29 = vpack.c.bf16 %v4119_v25, %v4117_v15  ;;  %v4145_v0 = vld [vmem:[%s12174_s28 + $0x1918] sm:$0xff]  ;;  %v5299_v15 = vld [vmem:[%s12174_s28 + $0x68] sm:$0xff] }
 0x368   : > { %10171 = vmatprep.subr.bf16.mxu1 %v10170_v10  ;;  %v4147_v10 = vld [vmem:[%s12174_s28 + $0x19f8] sm:$0xff] }
 0x369   : > { %v4314_v52 = vld [vmem:[%s12174_s28 + $0x138] sm:$0xff] }
 0x36a   : > { %9725 = vmatpush1.bf16.msra.mxu0 %v14491_v60  ;;  %v10180_v60 = vpack.c.bf16 %v4118_v1, %v4116_v61  ;;  %v14719_v25 = vpack.c.bf16 %v4314_v52, %v4312_v28  ;;  %v5298_v61 = vld [vmem:[%s12174_s28 + $0x60] sm:$0xff]  ;;  %v4332_v28 = vld [vmem:[%s12174_s28 + $0x918] sm:$0xff] }
 0x36b   : > { %10173 = vmatpush1.bf16.msra.mxu1 %v10172_v26  ;;  %9727 = vmatprep.subr.bf16.mxu0 %v14494_v27  ;;  %v10182_v27 = vpack.c.bf16 %v4123_v9, %v4121_v42  ;;  %v10210_v26 = vpack.c.bf16 %v4151_v32, %v4149_v31  ;;  %v5300_v42 = vld [vmem:[%s12174_s28 + $0x140] sm:$0xff]  ;;  %v4316_v9 = vld [vmem:[%s12174_s28 + $0x218] sm:$0xff]  ;;  %v4327_v32 = vld [vmem:[%s12174_s28 + $0x750] sm:$0xff] }
 0x36c   : > { %10175 = vmatprep.subr.bf16.mxu1 %v10174_v23  ;;  %v4150_v23 = vld [vmem:[%s12174_s28 + $0x1bb0] sm:$0xff]  ;;  %v4334_v52 = vld [vmem:[%s12174_s28 + $0x9f8] sm:$0xff] }
 0x36e   : > { %9729 = vmatpush1.bf16.msra.mxu0 %v14503_v49  ;;  %v10184_v49 = vpack.c.bf16 %v4122_v40, %v4120_v41  ;;  %v10664_v40 = vpack.c.bf16 %v5300_v42, %v5298_v61  ;;  %v4331_v61 = vld [vmem:[%s12174_s28 + $0x910] sm:$0xff]  ;;  %v5318_v42 = vld [vmem:[%s12174_s28 + $0x920] sm:$0xff] }
 0x36f   : > { %10177 = vmatpush1.bf16.msra.mxu1 %v10176_v2  ;;  %9731 = vmatprep.subr.bf16.mxu0 %v14506_v18  ;;  %v10186_v18 = vpack.c.bf16 %v4127_v14, %v4125_v17  ;;  %v4311_v2 = vld [vmem:[%s12174_s28 + $0x50] sm:$0xff] }
 0x370   : > { %10179 = vmatprep.subr.bf16.mxu1 %v10178_v29  ;;  %v4313_v29 = vld [vmem:[%s12174_s28 + $0x130] sm:$0xff] }
 0x371   : > { %v14733_v41 = vpack.c.bf16 %v4313_v29, %v4311_v2  ;;  %v4315_v14 = vld [vmem:[%s12174_s28 + $0x210] sm:$0xff]  ;;  %v14795_v29 = vpack.c.bf16 %v4334_v52, %v4332_v28 }
 0x372   : > { %9733 = vmatpush1.bf16.msra.mxu0 %v14515_v37  ;;  %v10188_v37 = vpack.c.bf16 %v4126_v6, %v4124_v16  ;;  %v5304_v16 = vld [vmem:[%s12174_s28 + $0x300] sm:$0xff]  ;;  %v4320_v6 = vld [vmem:[%s12174_s28 + $0x3d8] sm:$0xff] }
 0x373   : > { %10181 = vmatpush1.bf16.msra.mxu1 %v10180_v60  ;;  %9735 = vmatprep.subr.bf16.mxu0 %v14518_v8  ;;  %v10190_v8 = vpack.c.bf16 %v4131_v35, %v4129_v34  ;;  %v4318_v60 = vld [vmem:[%s12174_s28 + $0x2f8] sm:$0xff]  ;;  %v5307_v35 = vld [vmem:[%s12174_s28 + $0x3e8] sm:$0xff] }
 0x374   : > { %10183 = vmatprep.subr.bf16.mxu1 %v10182_v27  ;;  %v5305_v27 = vld [vmem:[%s12174_s28 + $0x308] sm:$0xff]  ;;  %v14736_v17 = vpack.c.bf16 %v4318_v60, %v4316_v9  ;;  %v4322_v34 = vld [vmem:[%s12174_s28 + $0x4b8] sm:$0xff]  ;;  %v5320_v60 = vld [vmem:[%s12174_s28 + $0xa00] sm:$0xff] }
 0x376   : > { %9737 = vmatpush1.bf16.msra.mxu0 %v14527_v19  ;;  %v10192_v19 = vpack.c.bf16 %v4130_v44, %v4128_v21 }
 0x377   : > { %10185 = vmatpush1.bf16.msra.mxu1 %v10184_v49  ;;  %9739 = vmatprep.subr.bf16.mxu0 %v14530_v5  ;;  %v10194_v5 = vpack.c.bf16 %v4135_v4, %v4133_v59  ;;  %v4317_v49 = vld [vmem:[%s12174_s28 + $0x2f0] sm:$0xff]  ;;  %v14753_v59 = vpack.c.bf16 %v4322_v34, %v4320_v6  ;;  %v5322_v6 = vld [vmem:[%s12174_s28 + $0xae0] sm:$0xff] }
 0x378   : > { %10187 = vmatprep.subr.bf16.mxu1 %v10186_v18  ;;  %v5302_v18 = vld [vmem:[%s12174_s28 + $0x220] sm:$0xff]  ;;  %v14750_v21 = vpack.c.bf16 %v4317_v49, %v4315_v14  ;;  %v4319_v4 = vld [vmem:[%s12174_s28 + $0x3d0] sm:$0xff]  ;;  %v10684_v49 = vpack.c.bf16 %v5320_v60, %v5318_v42  ;;  %v4354_v60 = vld [vmem:[%s12174_s28 + $0x12b8] sm:$0xff] }
 0x379   : > { %v10668_v44 = vpack.c.bf16 %v5304_v16, %v5302_v18  ;;  %v4337_v16 = vld [vmem:[%s12174_s28 + $0xbb0] sm:$0xff]  ;;  %v5336_v42 = vld [vmem:[%s12174_s28 + $0x1100] sm:$0xff] }
 0x37a   : > { %9741 = vmatpush1.bf16.msra.mxu0 %v14539_v57  ;;  %v10196_v57 = vpack.c.bf16 %v4134_v46, %v4132_v48  ;;  %v5308_v46 = vld [vmem:[%s12174_s28 + $0x4c0] sm:$0xff] }
 0x37b   : > { %10189 = vmatpush1.bf16.msra.mxu1 %v10188_v37  ;;  %9743 = vmatprep.subr.bf16.mxu0 %v14542_v11  ;;  %v10198_v11 = vpack.c.bf16 %v4139_v12, %v4137_v58  ;;  %v5309_v37 = vld [vmem:[%s12174_s28 + $0x4c8] sm:$0xff]  ;;  %v4324_v58 = vld [vmem:[%s12174_s28 + $0x598] sm:$0xff] }
 0x37c   : > { %10191 = vmatprep.subr.bf16.mxu1 %v10190_v8  ;;  %v8372_v8 = vld [vmem:[%s17282_s1 + $0x18] sm:$0xff]  ;;  %v10670_v48 = vpack.c.bf16 %v5309_v37, %v5307_v35  ;;  %v5324_v35 = vld [vmem:[%s12174_s28 + $0xbc0] sm:$0xff] }
 0x37d   : > { %v4326_v12 = vld [vmem:[%s12174_s28 + $0x678] sm:$0xff] }
 0x37e   : > { %9745 = vmatpush1.bf16.msra.mxu0 %v14551_v20  ;;  %v10200_v20 = vpack.c.bf16 %v4138_v63, %v4136_v3  ;;  %v4340_v37 = vld [vmem:[%s12174_s28 + $0xc98] sm:$0xff] }
 0x37f   : > { %10193 = vmatpush1.bf16.msra.mxu1 %v10192_v19  ;;  %9747 = vmatprep.subr.bf16.mxu0 %v14554_v36  ;;  %v10202_v36 = vpack.c.bf16 %v4143_v13, %v4141_v53  ;;  %v4321_v19 = vld [vmem:[%s12174_s28 + $0x4b0] sm:$0xff]  ;;  %v14767_v53 = vpack.c.bf16 %v4326_v12, %v4324_v58  ;;  %v5326_v12 = vld [vmem:[%s12174_s28 + $0xca0] sm:$0xff] }
 0x380   : > { %10195 = vmatprep.subr.bf16.mxu1 %v10194_v5  ;;  %v5306_v5 = vld [vmem:[%s12174_s28 + $0x3e0] sm:$0xff]  ;;  %v14764_v3 = vpack.c.bf16 %v4321_v19, %v4319_v4  ;;  %v4323_v13 = vld [vmem:[%s12174_s28 + $0x590] sm:$0xff]  ;;  %v5329_v4 = vld [vmem:[%s12174_s28 + $0xd88] sm:$0xff] }
 0x381   : > { %v10672_v63 = vpack.c.bf16 %v5308_v46, %v5306_v5  ;;  %v10688_v5 = vpack.c.bf16 %v5324_v35, %v5322_v6  ;;  %v4339_v46 = vld [vmem:[%s12174_s28 + $0xc90] sm:$0xff]  ;;  %v5338_v6 = vld [vmem:[%s12174_s28 + $0x11e0] sm:$0xff] }
 0x382   : > { %9749 = vmatpush1.bf16.msra.mxu0 %v14563_v43  ;;  %v10204_v43 = vpack.c.bf16 %v4142_v30, %v4140_v55  ;;  %v5312_v30 = vld [vmem:[%s12174_s28 + $0x680] sm:$0xff]  ;;  %v4341_v58 = vld [vmem:[%s12174_s28 + $0xd70] sm:$0xff] }
 0x383   : > { %10197 = vmatpush1.bf16.msra.mxu1 %v10196_v57  ;;  %9751 = vmatprep.subr.bf16.mxu0 %v14566_v62  ;;  %v10206_v62 = vpack.c.bf16 %v4147_v10, %v4145_v0  ;;  %v5311_v57 = vld [vmem:[%s12174_s28 + $0x5a8] sm:$0xff]  ;;  %v4328_v0 = vld [vmem:[%s12174_s28 + $0x758] sm:$0xff]  ;;  %v5340_v35 = vld [vmem:[%s12174_s28 + $0x12c0] sm:$0xff] }
 0x384   : > { %10199 = vmatprep.subr.bf16.mxu1 %v10198_v11  ;;  %v5313_v11 = vld [vmem:[%s12174_s28 + $0x688] sm:$0xff]  ;;  %v4330_v10 = vld [vmem:[%s12174_s28 + $0x838] sm:$0xff] }
 0x385   : > { %v10674_v55 = vpack.c.bf16 %v5313_v11, %v5311_v57  ;;  %v14781_v31 = vpack.c.bf16 %v4330_v10, %v4328_v0  ;;  %v5328_v11 = vld [vmem:[%s12174_s28 + $0xd80] sm:$0xff]  ;;  %v4343_v10 = vld [vmem:[%s12174_s28 + $0xe50] sm:$0xff] }
 0x386   : > { %9753 = vmatpush1.bf16.msra.mxu0 %v14575_v24  ;;  %v10208_v24 = vpack.c.bf16 %v4146_v54, %v4144_v56 }
 0x387   : > { %10201 = vmatpush1.bf16.msra.mxu1 %v10200_v20  ;;  %9755 = vmatprep.subr.bf16.mxu0 %v14578_v33  ;;  %v4148_v33 = vld [vmem:[%s12174_s28 + $0x1ad0] sm:$0xff] }
 0x388   : > { %10203 = vmatprep.subr.bf16.mxu1 %v10202_v36  ;;  %v4325_v20 = vld [vmem:[%s12174_s28 + $0x670] sm:$0xff]  ;;  %v5310_v36 = vld [vmem:[%s12174_s28 + $0x5a0] sm:$0xff] }
 0x389   : > { %v14778_v56 = vpack.c.bf16 %v4325_v20, %v4323_v13  ;;  %v10676_v54 = vpack.c.bf16 %v5312_v30, %v5310_v36  ;;  %v4346_v13 = vld [vmem:[%s12174_s28 + $0xf38] sm:$0xff]  ;;  %v5331_v20 = vld [vmem:[%s12174_s28 + $0xe68] sm:$0xff]  ;;  %v10692_v30 = vpack.c.bf16 %v5328_v11, %v5326_v12  ;;  %v4355_v12 = vld [vmem:[%s12174_s28 + $0x1390] sm:$0xff] }
 0x38a   : > { %9757 = vmatpush1.bf16.msra.mxu0 %v14587_v7  ;;  %v5301_v7 = vld [vmem:[%s12174_s28 + $0x148] sm:$0xff]  ;;  %v5342_v11 = vld [vmem:[%s12174_s28 + $0x13a0] sm:$0xff] }
 0x38b   : > { %10205 = vmatpush1.bf16.msra.mxu1 %v10204_v43  ;;  %9759 = vmatprep.subr.bf16.mxu0 %v14590_v22  ;;  %v10212_v22 = vpack.c.bf16 %v4150_v23, %v4148_v33  ;;  %v10662_v1 = vpack.c.bf16 %v5301_v7, %v5299_v15  ;;  %v5315_v43 = vld [vmem:[%s12174_s28 + $0x768] sm:$0xff]  ;;  %v5314_v33 = vld [vmem:[%s12174_s28 + $0x760] sm:$0xff] }
 0x38c   : > { %10207 = vmatprep.subr.bf16.mxu1 %v10206_v62  ;;  %v5317_v62 = vld [vmem:[%s12174_s28 + $0x848] sm:$0xff]  ;;  %v5316_v23 = vld [vmem:[%s12174_s28 + $0x840] sm:$0xff] }
 0x38d   : > { %v5319_v15 = vld [vmem:[%s12174_s28 + $0x928] sm:$0xff]  ;;  %v10680_v2 = vpack.c.bf16 %v5316_v23, %v5314_v33  ;;  %v4350_v33 = vld [vmem:[%s12174_s28 + $0x10f8] sm:$0xff] }
 0x38e   : > { %9761 = vmatpush1.bf16.msra.mxu0 %v14599_v51  ;;  %v5303_v51 = vld [vmem:[%s12174_s28 + $0x228] sm:$0xff] }
 0x38f   : > { %10209 = vmatpush1.bf16.msra.mxu1 %v10208_v24  ;;  %9763 = vmatprep.subr.bf16.mxu0 %v14602_v45  ;;  %v8357_v45 = vld [vmem:[%s17282_s1 + $0x60] sm:$0xff]  ;;  %v4329_v24 = vld [vmem:[%s12174_s28 + $0x830] sm:$0xff]  ;;  %v5321_v7 = vld [vmem:[%s12174_s28 + $0xa08] sm:$0xff] }
 0x390   : > { %10211 = vmatprep.subr.bf16.mxu1 %v10210_v26  ;;  %v10678_v26 = vpack.c.bf16 %v5317_v62, %v5315_v43  ;;  %v10682_v9 = vpack.c.bf16 %v5321_v7, %v5319_v15  ;;  %v5333_v36 = vld [vmem:[%s12174_s28 + $0xf48] sm:$0xff]  ;;  %v4345_v43 = vld [vmem:[%s12174_s28 + $0xf30] sm:$0xff]  ;;  %v5330_v62 = vld [vmem:[%s12174_s28 + $0xe60] sm:$0xff] }
 0x391   : > { %v5337_v23 = vld [vmem:[%s12174_s28 + $0x1108] sm:$0xff]  ;;  %v14848_v28 = vpack.c.bf16 %v4345_v43, %v4343_v10  ;;  %v4347_v7 = vld [vmem:[%s12174_s28 + $0x1010] sm:$0xff] }
 0x392   : > { %9765 = vmatpush1.bf16.msra.mxu0 %v14611_v39  ;;  %v10666_v39 = vpack.c.bf16 %v5305_v27, %v5303_v51  ;;  %v4336_v51 = vld [vmem:[%s12174_s28 + $0xad8] sm:$0xff]  ;;  %v5349_v10 = vld [vmem:[%s12174_s28 + $0x1648] sm:$0xff] }
 0x393   : > { %10213 = vmatpush1.bf16.msra.mxu1 %v10212_v22  ;;  %10215 = vmatprep.subr.bf16.mxu0 %v14719_v25  ;;  %v14792_v22 = vpack.c.bf16 %v4329_v24, %v4327_v32  ;;  %v4338_v27 = vld [vmem:[%s12174_s28 + $0xbb8] sm:$0xff]  ;;  %v5332_v32 = vld [vmem:[%s12174_s28 + $0xf40] sm:$0xff] }
 0x394   : > { %10663 = vmatprep.subr.bf16.mxu1 %v10662_v1  ;;  %v4333_v1 = vld [vmem:[%s12174_s28 + $0x9f0] sm:$0xff]  ;;  %v14809_v18 = vpack.c.bf16 %v4338_v27, %v4336_v51  ;;  %v4348_v24 = vld [vmem:[%s12174_s28 + $0x1018] sm:$0xff]  ;;  %v10696_v52 = vpack.c.bf16 %v5332_v32, %v5330_v62  ;;  %v5339_v51 = vld [vmem:[%s12174_s28 + $0x11e8] sm:$0xff] }
 0x395   : > { %3232 = vmatmul.mubr.f32.vlgmr.msra.gmra.mrb[2].mxu0 %v8357_v45  ;;  %v14806_v14 = vpack.c.bf16 %v4333_v1, %v4331_v61  ;;  %v14851_v15 = vpack.c.bf16 %v4350_v33, %v4348_v24  ;;  %v5334_v61 = vld [vmem:[%s12174_s28 + $0x1020] sm:$0xff]  ;;  %v5341_v27 = vld [vmem:[%s12174_s28 + $0x12c8] sm:$0xff]  ;;  %v4359_v32 = vld [vmem:[%s12174_s28 + $0x1550] sm:$0xff] }
 0x396   : > { %4219 = vmatmul.mubr.f32.vlgmr.msra.gmra.mrb[2].mxu1 %v8357_v45  ;;  %10217 = vmatpush1.bf16.msra.mxu0 %v14733_v41  ;;  %v5323_v45 = vld [vmem:[%s12174_s28 + $0xae8] sm:$0xff]  ;;  %v4361_v24 = vld [vmem:[%s12174_s28 + $0x1630] sm:$0xff]  ;;  %v5346_v33 = vld [vmem:[%s12174_s28 + $0x1560] sm:$0xff] }
 0x397   : > { %10665 = vmatpush1.bf16.msra.mxu1 %v10664_v40  ;;  %10219 = vmatprep.subr.bf16.mxu0 %v14736_v17  ;;  %v5325_v40 = vld [vmem:[%s12174_s28 + $0xbc8] sm:$0xff] }
 0x398   : > { %10667 = vmatprep.subr.bf16.mxu1 %v10666_v39  ;;  %4441 = vmatprep.mubr.f32.mxu0 %v8372_v8  ;;  %v4335_v39 = vld [vmem:[%s12174_s28 + $0xad0] sm:$0xff]  ;;  %v10686_v34 = vpack.c.bf16 %v5325_v40, %v5323_v45  ;;  %v10700_v40 = vpack.c.bf16 %v5336_v42, %v5334_v61  ;;  %v5353_v61 = vld [vmem:[%s12174_s28 + $0x1808] sm:$0xff] }
 0x399   : > { %5428 = vmatprep.mubr.f32.mxu1 %v8372_v8  ;;  %v4342_v8 = vld [vmem:[%s12174_s28 + $0xd78] sm:$0xff]  ;;  %v14820_v19 = vpack.c.bf16 %v4337_v16, %v4335_v39  ;;  %v4351_v39 = vld [vmem:[%s12174_s28 + $0x11d0] sm:$0xff] }
 0x39a   : > { %10221 = vmatpush1.bf16.msra.mxu0 %v14750_v21  ;;  %v4353_v16 = vld [vmem:[%s12174_s28 + $0x12b0] sm:$0xff] }
 0x39b   : > { %10669 = vmatpush1.bf16.msra.mxu1 %v10668_v44  ;;  %10223 = vmatprep.subr.bf16.mxu0 %v14753_v59  ;;  %v5327_v44 = vld [vmem:[%s12174_s28 + $0xca8] sm:$0xff] }
 0x39c   : > { %10671 = vmatprep.subr.bf16.mxu1 %v10670_v48  ;;  %v14823_v48 = vpack.c.bf16 %v4342_v8, %v4340_v37  ;;  %v10690_v57 = vpack.c.bf16 %v5329_v4, %v5327_v44  ;;  %v4356_v37 = vld [vmem:[%s12174_s28 + $0x1398] sm:$0xff]  ;;  %v5343_v44 = vld [vmem:[%s12174_s28 + $0x13a8] sm:$0xff] }
 0x39d   : > { %v4358_v8 = vld [vmem:[%s12174_s28 + $0x1478] sm:$0xff]  ;;  %v5345_v4 = vld [vmem:[%s12174_s28 + $0x1488] sm:$0xff] }
 0x39e   : > { %10225 = vmatpush1.bf16.msra.mxu0 %v14764_v3 }
 0x39f   : > { %10673 = vmatpush1.bf16.msra.mxu1 %v10672_v63  ;;  %10227 = vmatprep.subr.bf16.mxu0 %v14767_v53  ;;  %v4344_v63 = vld [vmem:[%s12174_s28 + $0xe58] sm:$0xff] }
 0x3a0   : > { %10675 = vmatprep.subr.bf16.mxu1 %v10674_v55  ;;  %v14834_v55 = vpack.c.bf16 %v4341_v58, %v4339_v46  ;;  %v14837_v0 = vpack.c.bf16 %v4346_v13, %v4344_v63  ;;  %v10704_v46 = vpack.c.bf16 %v5340_v35, %v5338_v6  ;;  %v14879_v58 = vpack.c.bf16 %v4358_v8, %v4356_v37  ;;  %v5344_v13 = vld [vmem:[%s12174_s28 + $0x1480] sm:$0xff]  ;;  %v4370_v6 = vld [vmem:[%s12174_s28 + $0x19b8] sm:$0xff]  ;;  %v5357_v35 = vld [vmem:[%s12174_s28 + $0x19c8] sm:$0xff] }
 0x3a1   : > { %v10706_v63 = vpack.c.bf16 %v5345_v4, %v5343_v44  ;;  %v10708_v62 = vpack.c.bf16 %v5344_v13, %v5342_v11  ;;  %v4367_v4 = vld [vmem:[%s12174_s28 + $0x18d0] sm:$0xff]  ;;  %v5356_v11 = vld [vmem:[%s12174_s28 + $0x19c0] sm:$0xff]  ;;  %v4374_v13 = vld [vmem:[%s12174_s28 + $0x1b78] sm:$0xff] }
 0x3a2   : > { %10229 = vmatpush1.bf16.msra.mxu0 %v14778_v56 }
 0x3a3   : > { %10677 = vmatpush1.bf16.msra.mxu1 %v10676_v54  ;;  %10231 = vmatprep.subr.bf16.mxu0 %v14781_v31  ;;  %v10694_v54 = vpack.c.bf16 %v5333_v36, %v5331_v20  ;;  %v4360_v20 = vld [vmem:[%s12174_s28 + $0x1558] sm:$0xff] }
 0x3a4   : > { %10679 = vmatprep.subr.bf16.mxu1 %v10678_v26  ;;  %v5335_v26 = vld [vmem:[%s12174_s28 + $0x1028] sm:$0xff]  ;;  %v4362_v36 = vld [vmem:[%s12174_s28 + $0x1638] sm:$0xff] }
 0x3a5   : > { %v10698_v1 = vpack.c.bf16 %v5337_v23, %v5335_v26  ;;  %v5348_v23 = vld [vmem:[%s12174_s28 + $0x1640] sm:$0xff] }
 0x3a6   : > { %10233 = vmatpush1.bf16.msra.mxu0 %v14792_v22  ;;  %v10712_v42 = vpack.c.bf16 %v5348_v23, %v5346_v33  ;;  %v5358_v33 = vld [vmem:[%s12174_s28 + $0x1aa0] sm:$0xff] }
 0x3a7   : > { %10681 = vmatpush1.bf16.msra.mxu1 %v10680_v2  ;;  %10235 = vmatprep.subr.bf16.mxu0 %v14795_v29  ;;  %v4349_v2 = vld [vmem:[%s12174_s28 + $0x10f0] sm:$0xff]  ;;  %v5360_v23 = vld [vmem:[%s12174_s28 + $0x1b80] sm:$0xff] }
 0x3a8   : > { %10683 = vmatprep.subr.bf16.mxu1 %v10682_v9  ;;  %v4352_v9 = vld [vmem:[%s12174_s28 + $0x11d8] sm:$0xff]  ;;  %v14862_v45 = vpack.c.bf16 %v4349_v2, %v4347_v7  ;;  %v5351_v2 = vld [vmem:[%s12174_s28 + $0x1728] sm:$0xff] }
 0x3a9   : > { %v4366_v7 = vld [vmem:[%s12174_s28 + $0x17f8] sm:$0xff] }
 0x3aa   : > { %10237 = vmatpush1.bf16.msra.mxu0 %v14806_v14 }
 0x3ab   : > { %10685 = vmatpush1.bf16.msra.mxu1 %v10684_v49  ;;  %10239 = vmatprep.subr.bf16.mxu0 %v14809_v18  ;;  %v14865_v49 = vpack.c.bf16 %v4354_v60, %v4352_v9  ;;  %v4363_v60 = vld [vmem:[%s12174_s28 + $0x1710] sm:$0xff] }
 0x3ac   : > { %10687 = vmatprep.subr.bf16.mxu1 %v10686_v34  ;;  %v10702_v34 = vpack.c.bf16 %v5341_v27, %v5339_v51  ;;  %v4365_v51 = vld [vmem:[%s12174_s28 + $0x17f0] sm:$0xff]  ;;  %v5350_v27 = vld [vmem:[%s12174_s28 + $0x1720] sm:$0xff] }
 0x3ad   : > { %v14918_v37 = vpack.c.bf16 %v4365_v51, %v4363_v60  ;;  %v4245_v60 = vld [vmem:[%s12174_s28 + $0x40] sm:$0xff] }
 0x3ae   : > { %10241 = vmatpush1.bf16.msra.mxu0 %v14820_v19  ;;  %v4247_v51 = vld [vmem:[%s12174_s28 + $0x120] sm:$0xff] }
 0x3af   : > { %10689 = vmatpush1.bf16.msra.mxu1 %v10688_v5  ;;  %10243 = vmatprep.subr.bf16.mxu0 %v14823_v48  ;;  %v14876_v5 = vpack.c.bf16 %v4353_v16, %v4351_v39  ;;  %v5352_v39 = vld [vmem:[%s12174_s28 + $0x1800] sm:$0xff]  ;;  %v4368_v16 = vld [vmem:[%s12174_s28 + $0x18d8] sm:$0xff] }
 0x3b0   : > { %10691 = vmatprep.subr.bf16.mxu1 %v10690_v57  ;;  %v4357_v57 = vld [vmem:[%s12174_s28 + $0x1470] sm:$0xff]  ;;  %v10716_v8 = vpack.c.bf16 %v5352_v39, %v5350_v27  ;;  %v14921_v44 = vpack.c.bf16 %v4370_v6, %v4368_v16  ;;  %v4250_v27 = vld [vmem:[%s12174_s28 + $0x208] sm:$0xff]  ;;  %v10280_v16 = vpack.c.bf16 %v4247_v51, %v4245_v60  ;;  %v4269_v51 = vld [vmem:[%s12174_s28 + $0xac0] sm:$0xff] }
 0x3b1   : > { %v14890_v43 = vpack.c.bf16 %v4357_v57, %v4355_v12  ;;  %v5354_v12 = vld [vmem:[%s12174_s28 + $0x18e0] sm:$0xff]  ;;  %v8371_v39 = vld [vmem:[%s17282_s1 + $0x10] sm:$0xff]  ;;  %v4272_v60 = vld [vmem:[%s12174_s28 + $0xba8] sm:$0xff] }
 0x3b2   : > { %10245 = vmatpush1.bf16.msra.mxu0 %v14834_v55 }
 0x3b3   : > { %10693 = vmatpush1.bf16.msra.mxu1 %v10692_v30  ;;  %10247 = vmatprep.subr.bf16.mxu0 %v14837_v0  ;;  %v5347_v30 = vld [vmem:[%s12174_s28 + $0x1568] sm:$0xff] }
 0x3b4   : > { %10695 = vmatprep.subr.bf16.mxu1 %v10694_v54  ;;  %v14893_v54 = vpack.c.bf16 %v4362_v36, %v4360_v20  ;;  %v10710_v26 = vpack.c.bf16 %v5349_v10, %v5347_v30  ;;  %v5359_v20 = vld [vmem:[%s12174_s28 + $0x1aa8] sm:$0xff]  ;;  %v10720_v10 = vpack.c.bf16 %v5356_v11, %v5354_v12  ;;  %v4253_v11 = vld [vmem:[%s12174_s28 + $0x3c0] sm:$0xff] }
 0x3b5   : > { %v5361_v36 = vld [vmem:[%s12174_s28 + $0x1b88] sm:$0xff] }
 0x3b6   : > { %10249 = vmatpush1.bf16.msra.mxu0 %v14848_v28 }
 0x3b7   : > { %10697 = vmatpush1.bf16.msra.mxu1 %v10696_v52  ;;  %10251 = vmatprep.subr.bf16.mxu0 %v14851_v15  ;;  %v4364_v52 = vld [vmem:[%s12174_s28 + $0x1718] sm:$0xff] }
 0x3b8   : > { %10699 = vmatprep.subr.bf16.mxu1 %v10698_v1  ;;  %v14904_v1 = vpack.c.bf16 %v4361_v24, %v4359_v32  ;;  %v14907_v9 = vpack.c.bf16 %v4366_v7, %v4364_v52  ;;  %v4371_v32 = vld [vmem:[%s12174_s28 + $0x1a90] sm:$0xff]  ;;  %v4246_v52 = vld [vmem:[%s12174_s28 + $0x48] sm:$0xff] }
 0x3b9   : > { %v4373_v24 = vld [vmem:[%s12174_s28 + $0x1b70] sm:$0xff]  ;;  %v4248_v7 = vld [vmem:[%s12174_s28 + $0x128] sm:$0xff] }
 0x3ba   : > { %10253 = vmatpush1.bf16.msra.mxu0 %v14862_v45 }
 0x3bb   : > { %10701 = vmatpush1.bf16.msra.mxu1 %v10700_v40  ;;  %10255 = vmatprep.subr.bf16.mxu0 %v14865_v49  ;;  %v10714_v40 = vpack.c.bf16 %v5353_v61, %v5351_v2  ;;  %v14944_v2 = vpack.c.bf16 %v4373_v24, %v4371_v32  ;;  %v10724_v61 = vpack.c.bf16 %v5360_v23, %v5358_v33  ;;  %v4262_v32 = vld [vmem:[%s12174_s28 + $0x748] sm:$0xff]  ;;  %v4261_v33 = vld [vmem:[%s12174_s28 + $0x740] sm:$0xff] }
 0x3bc   : > { %10703 = vmatprep.subr.bf16.mxu1 %v10702_v34  ;;  %v5355_v34 = vld [vmem:[%s12174_s28 + $0x18e8] sm:$0xff] }
 0x3bd   : > { %v10718_v57 = vpack.c.bf16 %v5357_v35, %v5355_v34  ;;  %v4249_v34 = vld [vmem:[%s12174_s28 + $0x200] sm:$0xff]  ;;  %v4266_v23 = vld [vmem:[%s12174_s28 + $0x908] sm:$0xff] }
 0x3be   : > { %10257 = vmatpush1.bf16.msra.mxu0 %v14876_v5  ;;  %v4251_v35 = vld [vmem:[%s12174_s28 + $0x2e0] sm:$0xff] }
 0x3bf   : > { %10705 = vmatpush1.bf16.msra.mxu1 %v10704_v46  ;;  %10259 = vmatprep.subr.bf16.mxu0 %v14879_v58  ;;  %v4369_v46 = vld [vmem:[%s12174_s28 + $0x19b0] sm:$0xff]  ;;  %v10284_v12 = vpack.c.bf16 %v4251_v35, %v4249_v34  ;;  %v4278_v34 = vld [vmem:[%s12174_s28 + $0xe48] sm:$0xff] }
 0x3c0   : > { %10707 = vmatprep.subr.bf16.mxu1 %v10706_v63  ;;  %v4372_v63 = vld [vmem:[%s12174_s28 + $0x1a98] sm:$0xff]  ;;  %v14932_v30 = vpack.c.bf16 %v4369_v46, %v4367_v4  ;;  %v4256_v4 = vld [vmem:[%s12174_s28 + $0x4a8] sm:$0xff] }
 0x3c1   : > { %v4310_v46 = vld [vmem:[%s17282_s1 + $0x8] sm:$0xff] }
 0x3c2   : > { %10261 = vmatpush1.bf16.msra.mxu0 %v14890_v43  ;;  %v4280_v35 = vld [vmem:[%s12174_s28 + $0xf28] sm:$0xff] }
 0x3c3   : > { %10709 = vmatpush1.bf16.msra.mxu1 %v10708_v62  ;;  %10263 = vmatprep.subr.bf16.mxu0 %v14893_v54  ;;  %v14935_v62 = vpack.c.bf16 %v4374_v13, %v4372_v63  ;;  %v4258_v63 = vld [vmem:[%s12174_s28 + $0x588] sm:$0xff] }
 0x3c4   : > { %10711 = vmatprep.subr.bf16.mxu1 %v10710_v26  ;;  %v10722_v26 = vpack.c.bf16 %v5361_v36, %v5359_v20  ;;  %v4260_v13 = vld [vmem:[%s12174_s28 + $0x668] sm:$0xff]  ;;  %v4257_v36 = vld [vmem:[%s12174_s28 + $0x580] sm:$0xff] }
 0x3c6   : > { %10265 = vmatpush1.bf16.msra.mxu0 %v14904_v1 }
 0x3c7   : > { %10713 = vmatpush1.bf16.msra.mxu1 %v10712_v42  ;;  %10267 = vmatprep.subr.bf16.mxu0 %v14907_v9  ;;  %v10278_v42 = vpack.c.bf16 %v4248_v7, %v4246_v52  ;;  %v4268_v52 = vld [vmem:[%s12174_s28 + $0x9e8] sm:$0xff]  ;;  %v4265_v7 = vld [vmem:[%s12174_s28 + $0x900] sm:$0xff] }
 0x3c8   : > { %10715 = vmatprep.subr.bf16.mxu1 %v10714_v40  ;;  %v4252_v40 = vld [vmem:[%s12174_s28 + $0x2e8] sm:$0xff] }
 0x3c9   : > { %v10282_v6 = vpack.c.bf16 %v4252_v40, %v4250_v27  ;;  %v4271_v27 = vld [vmem:[%s12174_s28 + $0xba0] sm:$0xff]  ;;  %v4274_v40 = vld [vmem:[%s12174_s28 + $0xc88] sm:$0xff] }
 0x3ca   : > { %10269 = vmatpush1.bf16.msra.mxu0 %v14918_v37 }
 0x3cb   : > { %10717 = vmatpush1.bf16.msra.mxu1 %v10716_v8  ;;  %10271 = vmatprep.subr.bf16.mxu0 %v14921_v44  ;;  %v4254_v8 = vld [vmem:[%s12174_s28 + $0x3c8] sm:$0xff] }
 0x3cc   : > { %10719 = vmatprep.subr.bf16.mxu1 %v10718_v57  ;;  %v10286_v57 = vpack.c.bf16 %v4256_v4, %v4254_v8  ;;  %v4277_v8 = vld [vmem:[%s12174_s28 + $0xe40] sm:$0xff] }
 0x3cd   : > { %v4279_v4 = vld [vmem:[%s12174_s28 + $0xf20] sm:$0xff] }
 0x3ce   : > { %10273 = vmatpush1.bf16.msra.mxu0 %v14932_v30 }
 0x3cf   : > { %10721 = vmatpush1.bf16.msra.mxu1 %v10720_v10  ;;  %10275 = vmatprep.subr.bf16.mxu0 %v14935_v62  ;;  %v4259_v10 = vld [vmem:[%s12174_s28 + $0x660] sm:$0xff] }
 0x3d0   : > { %10723 = vmatprep.subr.bf16.mxu1 %v10722_v26  ;;  %v10292_v24 = vpack.c.bf16 %v4259_v10, %v4257_v36  ;;  %v4263_v26 = vld [vmem:[%s12174_s28 + $0x820] sm:$0xff]  ;;  %v4292_v36 = vld [vmem:[%s12174_s28 + $0x1468] sm:$0xff] }
 0x3d1   : > { %v4289_v10 = vld [vmem:[%s12174_s28 + $0x1380] sm:$0xff] }
 0x3d2   : > { %10277 = vmatpush1.bf16.msra.mxu0 %v14944_v2 }
 0x3d3   : > { %10725 = vmatpush1.bf16.msra.mxu1 %v10724_v61  ;;  %10279 = vmatprep.subr.bf16.mxu0 %v10278_v42  ;;  %v4267_v61 = vld [vmem:[%s12174_s28 + $0x9e0] sm:$0xff]  ;;  %v4270_v42 = vld [vmem:[%s12174_s28 + $0xac8] sm:$0xff] }
 0x3d4   : > { %10727 = vmatprep.subr.bf16.mxu1 %v14719_v25  ;;  %v4255_v25 = vld [vmem:[%s12174_s28 + $0x4a0] sm:$0xff] }
 0x3d5   : > { %4442 = vmatmul.mubr.f32.vlgmr.msra.gmra.mrb[4].mxu0 %v8371_v39  ;;  %v10288_v20 = vpack.c.bf16 %v4255_v25, %v4253_v11  ;;  %v4283_v11 = vld [vmem:[%s12174_s28 + $0x10e0] sm:$0xff]  ;;  %v4286_v25 = vld [vmem:[%s12174_s28 + $0x11c8] sm:$0xff] }
 0x3d6   : > { %10281 = vmatpush1.bf16.msra.mxu0 %v10280_v16  ;;  %5429 = vmatmul.mubr.f32.vlgmr.msra.gmra.mrb[4].mxu1 %v8371_v39  ;;  %v4276_v39 = vld [vmem:[%s12174_s28 + $0xd68] sm:$0xff]  ;;  %v4273_v16 = vld [vmem:[%s12174_s28 + $0xc80] sm:$0xff] }
 0x3d7   : > { %10729 = vmatpush1.bf16.msra.mxu1 %v14733_v41  ;;  %10283 = vmatprep.subr.bf16.mxu0 %v10282_v6  ;;  %v10290_v41 = vpack.c.bf16 %v4260_v13, %v4258_v63  ;;  %v4275_v6 = vld [vmem:[%s12174_s28 + $0xd60] sm:$0xff]  ;;  %v4288_v63 = vld [vmem:[%s12174_s28 + $0x12a8] sm:$0xff] }
 0x3d8   : > { %10731 = vmatprep.subr.bf16.mxu1 %v14736_v17  ;;  %4512 = vmatprep.mubr.f32.mxu0 %v4310_v46  ;;  %v4264_v17 = vld [vmem:[%s12174_s28 + $0x828] sm:$0xff]  ;;  %v4285_v13 = vld [vmem:[%s12174_s28 + $0x11c0] sm:$0xff] }
 0x3d9   : > { %5499 = vmatprep.mubr.f32.mxu1 %v4310_v46  ;;  %v4282_v46 = vld [vmem:[%s12174_s28 + $0x1008] sm:$0xff] }
 0x3da   : > { %10285 = vmatpush1.bf16.msra.mxu0 %v10284_v12  ;;  %v4284_v12 = vld [vmem:[%s12174_s28 + $0x10e8] sm:$0xff] }
 0x3db   : > { %10733 = vmatpush1.bf16.msra.mxu1 %v14750_v21  ;;  %10287 = vmatprep.subr.bf16.mxu0 %v10286_v57  ;;  %v10294_v21 = vpack.c.bf16 %v4264_v17, %v4262_v32  ;;  %v4281_v57 = vld [vmem:[%s12174_s28 + $0x1000] sm:$0xff]  ;;  %v4294_v17 = vld [vmem:[%s12174_s28 + $0x1548] sm:$0xff] }
 0x3dc   : > { %10735 = vmatprep.subr.bf16.mxu1 %v14753_v59  ;;  %v10296_v59 = vpack.c.bf16 %v4263_v26, %v4261_v33  ;;  %v4291_v32 = vld [vmem:[%s12174_s28 + $0x1460] sm:$0xff]  ;;  %v4298_v26 = vld [vmem:[%s12174_s28 + $0x1708] sm:$0xff] }
 0x3dd   : > { %v4295_v33 = vld [vmem:[%s12174_s28 + $0x1620] sm:$0xff] }
 0x3de   : > { %10289 = vmatpush1.bf16.msra.mxu0 %v10288_v20  ;;  %v4287_v20 = vld [vmem:[%s12174_s28 + $0x12a0] sm:$0xff] }
 0x3df   : > { %10737 = vmatpush1.bf16.msra.mxu1 %v14764_v3  ;;  %10291 = vmatprep.subr.bf16.mxu0 %v10290_v41  ;;  %v10298_v3 = vpack.c.bf16 %v4268_v52, %v4266_v23  ;;  %v4290_v41 = vld [vmem:[%s12174_s28 + $0x1388] sm:$0xff]  ;;  %v4297_v52 = vld [vmem:[%s12174_s28 + $0x1700] sm:$0xff] }
 0x3e0   : > { %10739 = vmatprep.subr.bf16.mxu1 %v14767_v53  ;;  %v10300_v53 = vpack.c.bf16 %v4267_v61, %v4265_v7  ;;  %v4300_v23 = vld [vmem:[%s12174_s28 + $0x17e8] sm:$0xff]  ;;  %v4301_v61 = vld [vmem:[%s12174_s28 + $0x18c0] sm:$0xff] }
 0x3e1   : > { %v4304_v7 = vld [vmem:[%s12174_s28 + $0x19a8] sm:$0xff] }
 0x3e2   : > { %10293 = vmatpush1.bf16.msra.mxu0 %v10292_v24  ;;  %v4296_v24 = vld [vmem:[%s12174_s28 + $0x1628] sm:$0xff] }
 0x3e3   : > { %10741 = vmatpush1.bf16.msra.mxu1 %v14778_v56  ;;  %10295 = vmatprep.subr.bf16.mxu0 %v10294_v21  ;;  %v10302_v56 = vpack.c.bf16 %v4272_v60, %v4270_v42  ;;  %v4293_v21 = vld [vmem:[%s12174_s28 + $0x1540] sm:$0xff]  ;;  %v4306_v60 = vld [vmem:[%s12174_s28 + $0x1a88] sm:$0xff] }
 0x3e4   : > { %10743 = vmatprep.subr.bf16.mxu1 %v14781_v31  ;;  %v10304_v31 = vpack.c.bf16 %v4271_v27, %v4269_v51  ;;  %v4303_v42 = vld [vmem:[%s12174_s28 + $0x19a0] sm:$0xff]  ;;  %v4520_v27 = vld [vmem:[%s12174_s28 + $0x68] sm:$0xff] }
 0x3e5   : > { %v4307_v51 = vld [vmem:[%s12174_s28 + $0x1b60] sm:$0xff] }
 0x3e6   : > { %10297 = vmatpush1.bf16.msra.mxu0 %v10296_v59  ;;  %v4299_v59 = vld [vmem:[%s12174_s28 + $0x17e0] sm:$0xff] }
 0x3e7   : > { %10745 = vmatpush1.bf16.msra.mxu1 %v14792_v22  ;;  %10299 = vmatprep.subr.bf16.mxu0 %v10298_v3  ;;  %v10306_v22 = vpack.c.bf16 %v4276_v39, %v4274_v40  ;;  %v4302_v3 = vld [vmem:[%s12174_s28 + $0x18c8] sm:$0xff]  ;;  %v5507_v40 = vld [vmem:[%s12174_s28 + $0x78] sm:$0xff] }
 0x3e8   : > { %10747 = vmatprep.subr.bf16.mxu1 %v14795_v29  ;;  %v10308_v29 = vpack.c.bf16 %v4275_v6, %v4273_v16  ;;  %v5509_v39 = vld [vmem:[%s12174_s28 + $0x158] sm:$0xff]  ;;  %v4521_v16 = vld [vmem:[%s12174_s28 + $0x140] sm:$0xff]  ;;  %v5506_v6 = vld [vmem:[%s12174_s28 + $0x70] sm:$0xff] }
 0x3ea   : > { %10301 = vmatpush1.bf16.msra.mxu0 %v10300_v53  ;;  %v10336_v53 = vpack.c.bf16 %v4303_v42, %v4301_v61 }
 0x3eb   : > { %10749 = vmatpush1.bf16.msra.mxu1 %v14806_v14  ;;  %10303 = vmatprep.subr.bf16.mxu0 %v10302_v56  ;;  %v10310_v14 = vpack.c.bf16 %v4280_v35, %v4278_v34  ;;  %v4305_v56 = vld [vmem:[%s12174_s28 + $0x1a80] sm:$0xff]  ;;  %v5508_v34 = vld [vmem:[%s12174_s28 + $0x150] sm:$0xff]  ;;  %v4524_v35 = vld [vmem:[%s12174_s28 + $0x228] sm:$0xff] }
 0x3ec   : > { %10751 = vmatprep.subr.bf16.mxu1 %v14809_v18  ;;  %v10312_v18 = vpack.c.bf16 %v4279_v4, %v4277_v8  ;;  %v4309_v8 = vld [vmem:[%s17282_s1] sm:$0xff] }
 0x3ee   : > { %10305 = vmatpush1.bf16.msra.mxu0 %v10304_v31  ;;  %v10340_v31 = vpack.c.bf16 %v4307_v51, %v4305_v56  ;;  %v5524_v51 = vld [vmem:[%s12174_s28 + $0x850] sm:$0xff] }
 0x3ef   : > { %10753 = vmatpush1.bf16.msra.mxu1 %v14820_v19  ;;  %10307 = vmatprep.subr.bf16.mxu0 %v10306_v22  ;;  %v10314_v19 = vpack.c.bf16 %v4284_v12, %v4282_v46  ;;  %v4519_v22 = vld [vmem:[%s12174_s28 + $0x60] sm:$0xff] }
 0x3f0   : > { %10755 = vmatprep.subr.bf16.mxu1 %v14823_v48  ;;  %v10316_v48 = vpack.c.bf16 %v4283_v11, %v4281_v57  ;;  %v10344_v4 = vpack.c.bf16 %v4521_v16, %v4519_v22  ;;  %v4523_v12 = vld [vmem:[%s12174_s28 + $0x220] sm:$0xff]  ;;  %v5512_v11 = vld [vmem:[%s12174_s28 + $0x310] sm:$0xff] }
 0x3f1   : > { %v4539_v16 = vld [vmem:[%s12174_s28 + $0x920] sm:$0xff] }
 0x3f2   : > { %10309 = vmatpush1.bf16.msra.mxu0 %v10308_v29  ;;  %v4526_v29 = vld [vmem:[%s12174_s28 + $0x308] sm:$0xff] }
 0x3f3   : > { %10757 = vmatpush1.bf16.msra.mxu1 %v14834_v55  ;;  %10311 = vmatprep.subr.bf16.mxu0 %v10310_v14  ;;  %v10318_v55 = vpack.c.bf16 %v4288_v63, %v4286_v25  ;;  %v5511_v14 = vld [vmem:[%s12174_s28 + $0x238] sm:$0xff]  ;;  %v10346_v46 = vpack.c.bf16 %v4526_v29, %v4524_v35  ;;  %v4528_v25 = vld [vmem:[%s12174_s28 + $0x3e8] sm:$0xff]  ;;  %v5528_v29 = vld [vmem:[%s12174_s28 + $0xa10] sm:$0xff] }
 0x3f4   : > { %10759 = vmatprep.subr.bf16.mxu1 %v14837_v0  ;;  %v10320_v0 = vpack.c.bf16 %v4287_v20, %v4285_v13  ;;  %v4530_v63 = vld [vmem:[%s12174_s28 + $0x4c8] sm:$0xff] }
 0x3f6   : > { %10313 = vmatpush1.bf16.msra.mxu0 %v10312_v18  ;;  %v4525_v18 = vld [vmem:[%s12174_s28 + $0x300] sm:$0xff] }
 0x3f7   : > { %10761 = vmatpush1.bf16.msra.mxu1 %v14848_v28  ;;  %10315 = vmatprep.subr.bf16.mxu0 %v10314_v19  ;;  %v10322_v28 = vpack.c.bf16 %v4292_v36, %v4290_v41  ;;  %v5510_v19 = vld [vmem:[%s12174_s28 + $0x230] sm:$0xff]  ;;  %v10348_v13 = vpack.c.bf16 %v4525_v18, %v4523_v12  ;;  %v10350_v41 = vpack.c.bf16 %v4530_v63, %v4528_v25  ;;  %v4527_v36 = vld [vmem:[%s12174_s28 + $0x3e0] sm:$0xff] }
 0x3f8   : > { %10763 = vmatprep.subr.bf16.mxu1 %v14851_v15  ;;  %v10324_v15 = vpack.c.bf16 %v4291_v32, %v4289_v10  ;;  %v15082_v20 = vpack.c.bf16 %v5512_v11, %v5510_v19  ;;  %v5516_v32 = vld [vmem:[%s12174_s28 + $0x4d0] sm:$0xff]  ;;  %v4543_v19 = vld [vmem:[%s12174_s28 + $0xae0] sm:$0xff] }
 0x3f9   : > { %v4545_v11 = vld [vmem:[%s12174_s28 + $0xbc0] sm:$0xff]  ;;  %v5530_v25 = vld [vmem:[%s12174_s28 + $0xaf0] sm:$0xff] }
 0x3fa   : > { %10317 = vmatpush1.bf16.msra.mxu0 %v10316_v48  ;;  %v5517_v48 = vld [vmem:[%s12174_s28 + $0x4d8] sm:$0xff] }
 0x3fb   : > { %10765 = vmatpush1.bf16.msra.mxu1 %v14862_v45  ;;  %10319 = vmatprep.subr.bf16.mxu0 %v10318_v55  ;;  %v10326_v45 = vpack.c.bf16 %v4296_v24, %v4294_v17  ;;  %v8374_v55 = vld [vmem:[%s17282_s1 + $0x28] sm:$0xff] }
 0x3fc   : > { %10767 = vmatprep.subr.bf16.mxu1 %v14865_v49  ;;  %v10328_v49 = vpack.c.bf16 %v4295_v33, %v4293_v21  ;;  %v4532_v17 = vld [vmem:[%s12174_s28 + $0x5a8] sm:$0xff] }
 0x3fd   : > { %v4534_v24 = vld [vmem:[%s12174_s28 + $0x688] sm:$0xff] }
 0x3fe   : > { %10321 = vmatpush1.bf16.msra.mxu0 %v10320_v0  ;;  %v4529_v0 = vld [vmem:[%s12174_s28 + $0x4c0] sm:$0xff] }
 0x3ff   : > { %10769 = vmatpush1.bf16.msra.mxu1 %v14876_v5  ;;  %10323 = vmatprep.subr.bf16.mxu0 %v10322_v28  ;;  %v10330_v5 = vpack.c.bf16 %v4300_v23, %v4298_v26  ;;  %v5514_v28 = vld [vmem:[%s12174_s28 + $0x3f0] sm:$0xff]  ;;  %v10352_v21 = vpack.c.bf16 %v4529_v0, %v4527_v36  ;;  %v10354_v26 = vpack.c.bf16 %v4534_v24, %v4532_v17  ;;  %v4531_v23 = vld [vmem:[%s12174_s28 + $0x5a0] sm:$0xff] }
 0x400   : > { %10771 = vmatprep.subr.bf16.mxu1 %v14879_v58  ;;  %v10332_v58 = vpack.c.bf16 %v4299_v59, %v4297_v52  ;;  %v15096_v33 = vpack.c.bf16 %v5516_v32, %v5514_v28  ;;  %v5520_v59 = vld [vmem:[%s12174_s28 + $0x690] sm:$0xff]  ;;  %v10368_v36 = vpack.c.bf16 %v4545_v11, %v4543_v19  ;;  %v4547_v32 = vld [vmem:[%s12174_s28 + $0xca0] sm:$0xff] }
 0x401   : > { %v4549_v17 = vld [vmem:[%s12174_s28 + $0xd80] sm:$0xff]  ;;  %v5534_v24 = vld [vmem:[%s12174_s28 + $0xcb0] sm:$0xff] }
 0x402   : > { %10325 = vmatpush1.bf16.msra.mxu0 %v10324_v15  ;;  %v5519_v15 = vld [vmem:[%s12174_s28 + $0x5b8] sm:$0xff]  ;;  %v4561_v19 = vld [vmem:[%s12174_s28 + $0x12c0] sm:$0xff]  ;;  %v5546_v11 = vld [vmem:[%s12174_s28 + $0x11f0] sm:$0xff] }
 0x403   : > { %10773 = vmatpush1.bf16.msra.mxu1 %v14890_v43  ;;  %10327 = vmatprep.subr.bf16.mxu0 %v10326_v45  ;;  %v10334_v43 = vpack.c.bf16 %v4304_v7, %v4302_v3  ;;  %v5521_v45 = vld [vmem:[%s12174_s28 + $0x698] sm:$0xff]  ;;  %v4536_v3 = vld [vmem:[%s12174_s28 + $0x768] sm:$0xff] }
 0x404   : > { %10775 = vmatprep.subr.bf16.mxu1 %v14893_v54  ;;  %v4308_v54 = vld [vmem:[%s12174_s28 + $0x1b68] sm:$0xff]  ;;  %v15102_v52 = vpack.c.bf16 %v5521_v45, %v5519_v15  ;;  %v5536_v45 = vld [vmem:[%s12174_s28 + $0xd90] sm:$0xff] }
 0x405   : > { %v4538_v7 = vld [vmem:[%s12174_s28 + $0x848] sm:$0xff] }
 0x406   : > { %10329 = vmatpush1.bf16.msra.mxu0 %v10328_v49  ;;  %v4533_v49 = vld [vmem:[%s12174_s28 + $0x680] sm:$0xff] }
 0x407   : > { %10777 = vmatpush1.bf16.msra.mxu1 %v14904_v1  ;;  %10331 = vmatprep.subr.bf16.mxu0 %v10330_v5  ;;  %v10338_v1 = vpack.c.bf16 %v4308_v54, %v4306_v60  ;;  %v5518_v5 = vld [vmem:[%s12174_s28 + $0x5b0] sm:$0xff]  ;;  %v10356_v61 = vpack.c.bf16 %v4533_v49, %v4531_v23  ;;  %v10358_v60 = vpack.c.bf16 %v4538_v7, %v4536_v3  ;;  %v4535_v54 = vld [vmem:[%s12174_s28 + $0x760] sm:$0xff]  ;;  %v5539_v23 = vld [vmem:[%s12174_s28 + $0xe78] sm:$0xff] }
 0x408   : > { %10779 = vmatprep.subr.bf16.mxu1 %v14907_v9  ;;  %v4522_v9 = vld [vmem:[%s12174_s28 + $0x148] sm:$0xff]  ;;  %v15110_v42 = vpack.c.bf16 %v5520_v59, %v5518_v5  ;;  %v5541_v49 = vld [vmem:[%s12174_s28 + $0xf58] sm:$0xff]  ;;  %v10372_v5 = vpack.c.bf16 %v4549_v17, %v4547_v32  ;;  %v15166_v59 = vpack.c.bf16 %v5536_v45, %v5534_v24  ;;  %v4551_v7 = vld [vmem:[%s12174_s28 + $0xe60] sm:$0xff] }
 0x409   : > { %v4563_v17 = vld [vmem:[%s12174_s28 + $0x13a0] sm:$0xff]  ;;  %v5550_v45 = vld [vmem:[%s12174_s28 + $0x13b0] sm:$0xff] }
 0x40a   : > { %10333 = vmatpush1.bf16.msra.mxu0 %v10332_v58  ;;  %v5523_v58 = vld [vmem:[%s12174_s28 + $0x778] sm:$0xff]  ;;  %v4565_v24 = vld [vmem:[%s12174_s28 + $0x1480] sm:$0xff] }
 0x40b   : > { %10781 = vmatpush1.bf16.msra.mxu1 %v14918_v37  ;;  %10335 = vmatprep.subr.bf16.mxu0 %v10334_v43  ;;  %v10342_v37 = vpack.c.bf16 %v4522_v9, %v4520_v27  ;;  %v5525_v43 = vld [vmem:[%s12174_s28 + $0x858] sm:$0xff]  ;;  %v4540_v27 = vld [vmem:[%s12174_s28 + $0x928] sm:$0xff] }
 0x40c   : > { %10783 = vmatprep.subr.bf16.mxu1 %v14921_v44  ;;  %v15054_v44 = vpack.c.bf16 %v5509_v39, %v5507_v40  ;;  %v15116_v56 = vpack.c.bf16 %v5525_v43, %v5523_v58  ;;  %v4542_v9 = vld [vmem:[%s12174_s28 + $0xa08] sm:$0xff]  ;;  %v5527_v40 = vld [vmem:[%s12174_s28 + $0x938] sm:$0xff]  ;;  %v4553_v58 = vld [vmem:[%s12174_s28 + $0xf40] sm:$0xff] }
 0x40d   : > { %v5529_v39 = vld [vmem:[%s12174_s28 + $0xa18] sm:$0xff]  ;;  %v10362_v22 = vpack.c.bf16 %v4542_v9, %v4540_v27  ;;  %v5538_v43 = vld [vmem:[%s12174_s28 + $0xe70] sm:$0xff]  ;;  %v10376_v27 = vpack.c.bf16 %v4553_v58, %v4551_v7  ;;  %v10388_v7 = vpack.c.bf16 %v4565_v24, %v4563_v17 }
 0x40e   : > { %10337 = vmatpush1.bf16.msra.mxu0 %v10336_v53  ;;  %v4537_v53 = vld [vmem:[%s12174_s28 + $0x840] sm:$0xff]  ;;  %v15130_v35 = vpack.c.bf16 %v5529_v39, %v5527_v40  ;;  %v5564_v24 = vld [vmem:[%s12174_s28 + $0x19d0] sm:$0xff] }
 0x40f   : > { %10785 = vmatpush1.bf16.msra.mxu1 %v14932_v30  ;;  %10339 = vmatprep.subr.bf16.mxu0 %v10338_v1  ;;  %v5513_v30 = vld [vmem:[%s12174_s28 + $0x318] sm:$0xff]  ;;  %v5522_v1 = vld [vmem:[%s12174_s28 + $0x770] sm:$0xff]  ;;  %v4555_v39 = vld [vmem:[%s12174_s28 + $0x1020] sm:$0xff] }
 0x410   : > { %10787 = vmatprep.subr.bf16.mxu1 %v14935_v62  ;;  %v15065_v62 = vpack.c.bf16 %v5508_v34, %v5506_v6  ;;  %v15071_v57 = vpack.c.bf16 %v5513_v30, %v5511_v14  ;;  %v4541_v6 = vld [vmem:[%s12174_s28 + $0xa00] sm:$0xff]  ;;  %v5526_v34 = vld [vmem:[%s12174_s28 + $0x930] sm:$0xff]  ;;  %v4544_v14 = vld [vmem:[%s12174_s28 + $0xae8] sm:$0xff] }
 0x411   : > { %v4546_v30 = vld [vmem:[%s12174_s28 + $0xbc8] sm:$0xff]  ;;  %v15138_v12 = vpack.c.bf16 %v5528_v29, %v5526_v34 }
 0x412   : > { %10341 = vmatpush1.bf16.msra.mxu0 %v10340_v31  ;;  %v10360_v31 = vpack.c.bf16 %v4537_v53, %v4535_v54  ;;  %v10366_v18 = vpack.c.bf16 %v4546_v30, %v4544_v14  ;;  %v4556_v54 = vld [vmem:[%s12174_s28 + $0x1028] sm:$0xff]  ;;  %v5547_v14 = vld [vmem:[%s12174_s28 + $0x11f8] sm:$0xff] }
 0x413   : > { %10789 = vmatpush1.bf16.msra.mxu1 %v14944_v2  ;;  %10343 = vmatprep.subr.bf16.mxu0 %v10342_v37  ;;  %v5515_v2 = vld [vmem:[%s12174_s28 + $0x3f8] sm:$0xff]  ;;  %v15124_v37 = vpack.c.bf16 %v5524_v51, %v5522_v1  ;;  %v4558_v53 = vld [vmem:[%s12174_s28 + $0x1108] sm:$0xff] }
 0x414   : > { %10791 = vmatprep.subr.bf16.mxu1 %v15054_v44  ;;  %v15088_v10 = vpack.c.bf16 %v5517_v48, %v5515_v2  ;;  %v5532_v2 = vld [vmem:[%s12174_s28 + $0xbd0] sm:$0xff]  ;;  %v4548_v48 = vld [vmem:[%s12174_s28 + $0xca8] sm:$0xff]  ;;  %v5543_v1 = vld [vmem:[%s12174_s28 + $0x1038] sm:$0xff]  ;;  %v10378_v40 = vpack.c.bf16 %v4558_v53, %v4556_v54 }
 0x415   : > { %4513 = vmatmul.mubr.f32.vlgmr.msra.gmra.mrb[4].mxu0 %v4309_v8  ;;  %v15152_v0 = vpack.c.bf16 %v5532_v2, %v5530_v25  ;;  %v5545_v51 = vld [vmem:[%s12174_s28 + $0x1118] sm:$0xff]  ;;  %v4560_v34 = vld [vmem:[%s12174_s28 + $0x11e8] sm:$0xff]  ;;  %v5548_v2 = vld [vmem:[%s12174_s28 + $0x12d0] sm:$0xff] }
 0x416   : > { %10345 = vmatpush1.bf16.msra.mxu0 %v10344_v4  ;;  %5500 = vmatmul.mubr.f32.vlgmr.msra.gmra.mrb[4].mxu1 %v4309_v8  ;;  %v5531_v8 = vld [vmem:[%s12174_s28 + $0xaf8] sm:$0xff]  ;;  %v4562_v29 = vld [vmem:[%s12174_s28 + $0x12c8] sm:$0xff]  ;;  %v4569_v54 = vld [vmem:[%s12174_s28 + $0x1640] sm:$0xff] }
 0x417   : > { %10793 = vmatpush1.bf16.msra.mxu1 %v15065_v62  ;;  %10347 = vmatprep.subr.bf16.mxu0 %v10346_v46  ;;  %v5533_v4 = vld [vmem:[%s12174_s28 + $0xbd8] sm:$0xff]  ;;  %v10364_v46 = vpack.c.bf16 %v4541_v6, %v4539_v16  ;;  %v15186_v16 = vpack.c.bf16 %v5545_v51, %v5543_v1  ;;  %v5544_v6 = vld [vmem:[%s12174_s28 + $0x1110] sm:$0xff] }
 0x418   : > { %10795 = vmatprep.subr.bf16.mxu1 %v15071_v57  ;;  %4649 = vmatprep.mubr.f32.mxu0 %v8374_v55  ;;  %v15144_v63 = vpack.c.bf16 %v5533_v4, %v5531_v8  ;;  %v5549_v30 = vld [vmem:[%s12174_s28 + $0x12d8] sm:$0xff]  ;;  %v5554_v53 = vld [vmem:[%s12174_s28 + $0x1570] sm:$0xff] }
 0x419   : > { %5636 = vmatprep.mubr.f32.mxu1 %v8374_v55  ;;  %v4550_v55 = vld [vmem:[%s12174_s28 + $0xd88] sm:$0xff]  ;;  %v15200_v25 = vpack.c.bf16 %v5549_v30, %v5547_v14  ;;  %v5556_v51 = vld [vmem:[%s12174_s28 + $0x1650] sm:$0xff]  ;;  %v4573_v14 = vld [vmem:[%s12174_s28 + $0x1800] sm:$0xff] }
 0x41a   : > { %10349 = vmatpush1.bf16.msra.mxu0 %v10348_v13  ;;  %v5535_v13 = vld [vmem:[%s12174_s28 + $0xcb8] sm:$0xff]  ;;  %v10370_v28 = vpack.c.bf16 %v4550_v55, %v4548_v48  ;;  %v4564_v48 = vld [vmem:[%s12174_s28 + $0x13a8] sm:$0xff]  ;;  %v5558_v30 = vld [vmem:[%s12174_s28 + $0x1730] sm:$0xff] }
 0x41b   : > { %10797 = vmatpush1.bf16.msra.mxu1 %v15082_v20  ;;  %10351 = vmatprep.subr.bf16.mxu0 %v10350_v41  ;;  %v5537_v41 = vld [vmem:[%s12174_s28 + $0xd98] sm:$0xff]  ;;  %v4566_v55 = vld [vmem:[%s12174_s28 + $0x1488] sm:$0xff] }
 0x41c   : > { %10799 = vmatprep.subr.bf16.mxu1 %v15088_v10  ;;  %v15158_v15 = vpack.c.bf16 %v5537_v41, %v5535_v13  ;;  %v5551_v13 = vld [vmem:[%s12174_s28 + $0x13b8] sm:$0xff]  ;;  %v10386_v32 = vpack.c.bf16 %v4566_v55, %v4564_v48 }
 0x41d   : > { %v5553_v41 = vld [vmem:[%s12174_s28 + $0x1498] sm:$0xff] }
 0x41e   : > { %10353 = vmatpush1.bf16.msra.mxu0 %v10352_v21  ;;  %v4552_v21 = vld [vmem:[%s12174_s28 + $0xe68] sm:$0xff] }
 0x41f   : > { %10801 = vmatpush1.bf16.msra.mxu1 %v15096_v33  ;;  %10355 = vmatprep.subr.bf16.mxu0 %v10354_v26  ;;  %v4554_v26 = vld [vmem:[%s12174_s28 + $0xf48] sm:$0xff] }
 0x420   : > { %10803 = vmatprep.subr.bf16.mxu1 %v15102_v52  ;;  %v10374_v3 = vpack.c.bf16 %v4554_v26, %v4552_v21  ;;  %v15214_v21 = vpack.c.bf16 %v5553_v41, %v5551_v13  ;;  %v5552_v26 = vld [vmem:[%s12174_s28 + $0x1490] sm:$0xff]  ;;  %v4575_v41 = vld [vmem:[%s12174_s28 + $0x18e0] sm:$0xff] }
 0x421   : > { %v15222_v58 = vpack.c.bf16 %v5552_v26, %v5550_v45  ;;  %v4580_v45 = vld [vmem:[%s12174_s28 + $0x1aa8] sm:$0xff] }
 0x422   : > { %10357 = vmatpush1.bf16.msra.mxu0 %v10356_v61  ;;  %v15172_v61 = vpack.c.bf16 %v5541_v49, %v5539_v23  ;;  %v4568_v23 = vld [vmem:[%s12174_s28 + $0x1568] sm:$0xff] }
 0x423   : > { %10805 = vmatpush1.bf16.msra.mxu1 %v15110_v42  ;;  %10359 = vmatprep.subr.bf16.mxu0 %v10358_v60  ;;  %v5540_v60 = vld [vmem:[%s12174_s28 + $0xf50] sm:$0xff]  ;;  %v4570_v49 = vld [vmem:[%s12174_s28 + $0x1648] sm:$0xff] }
 0x424   : > { %10807 = vmatprep.subr.bf16.mxu1 %v15116_v56  ;;  %v15180_v9 = vpack.c.bf16 %v5540_v60, %v5538_v43  ;;  %v10390_v43 = vpack.c.bf16 %v4570_v49, %v4568_v23  ;;  %v4567_v60 = vld [vmem:[%s12174_s28 + $0x1560] sm:$0xff]  ;;  %v4582_v26 = vld [vmem:[%s12174_s28 + $0x1b88] sm:$0xff]  ;;  %v5567_v23 = vld [vmem:[%s12174_s28 + $0x1ab8] sm:$0xff] }
 0x425   : > { %v5569_v49 = vld [vmem:[%s12174_s28 + $0x1b98] sm:$0xff] }
 0x426   : > { %10361 = vmatpush1.bf16.msra.mxu0 %v10360_v31  ;;  %v4557_v31 = vld [vmem:[%s12174_s28 + $0x1100] sm:$0xff] }
 0x427   : > { %10809 = vmatpush1.bf16.msra.mxu1 %v15124_v37  ;;  %10363 = vmatprep.subr.bf16.mxu0 %v10362_v22  ;;  %v5542_v22 = vld [vmem:[%s12174_s28 + $0x1030] sm:$0xff]  ;;  %v10380_v8 = vpack.c.bf16 %v4557_v31, %v4555_v39  ;;  %v5559_v39 = vld [vmem:[%s12174_s28 + $0x1738] sm:$0xff] }
 0x428   : > { %10811 = vmatprep.subr.bf16.mxu1 %v15130_v35  ;;  %v15194_v4 = vpack.c.bf16 %v5544_v6, %v5542_v22  ;;  %v5561_v31 = vld [vmem:[%s12174_s28 + $0x1818] sm:$0xff]  ;;  %v10392_v22 = vpack.c.bf16 %v4569_v54, %v4567_v60  ;;  %v15236_v6 = vpack.c.bf16 %v5556_v51, %v5554_v53  ;;  %v4581_v60 = vld [vmem:[%s12174_s28 + $0x1b80] sm:$0xff]  ;;  %v15269_v54 = vpack.c.bf16 %v5569_v49, %v5567_v23  ;;  %v5566_v53 = vld [vmem:[%s12174_s28 + $0x1ab0] sm:$0xff] }
 0x429   : > { %v5568_v51 = vld [vmem:[%s12174_s28 + $0x1b90] sm:$0xff]  ;;  %v5657_v23 = vld [vmem:[%s12174_s28 + $0x5c0] sm:$0xff] }
 0x42a   : > { %10365 = vmatpush1.bf16.msra.mxu0 %v10364_v46  ;;  %v10382_v46 = vpack.c.bf16 %v4562_v29, %v4560_v34  ;;  %v4571_v29 = vld [vmem:[%s12174_s28 + $0x1720] sm:$0xff] }
 0x42b   : > { %10813 = vmatpush1.bf16.msra.mxu1 %v15138_v12  ;;  %10367 = vmatprep.subr.bf16.mxu0 %v10366_v18  ;;  %v4559_v18 = vld [vmem:[%s12174_s28 + $0x11e0] sm:$0xff]  ;;  %v10396_v48 = vpack.c.bf16 %v4573_v14, %v4571_v29  ;;  %v5650_v14 = vld [vmem:[%s12174_s28 + $0x248] sm:$0xff] }
 0x42c   : > { %10815 = vmatprep.subr.bf16.mxu1 %v15144_v63  ;;  %v5647_v29 = vld [vmem:[%s12174_s28 + $0x160] sm:$0xff] }
 0x42d   : > { %v5659_v49 = vld [vmem:[%s12174_s28 + $0x6a0] sm:$0xff] }
 0x42e   : > { %10369 = vmatpush1.bf16.msra.mxu0 %v10368_v36  ;;  %v10384_v36 = vpack.c.bf16 %v4561_v19, %v4559_v18  ;;  %v4576_v18 = vld [vmem:[%s12174_s28 + $0x18e8] sm:$0xff] }
 0x42f   : > { %10817 = vmatpush1.bf16.msra.mxu1 %v15152_v0  ;;  %10371 = vmatprep.subr.bf16.mxu0 %v10370_v28  ;;  %v15208_v28 = vpack.c.bf16 %v5548_v2, %v5546_v11  ;;  %v4578_v19 = vld [vmem:[%s12174_s28 + $0x19c8] sm:$0xff]  ;;  %v5563_v11 = vld [vmem:[%s12174_s28 + $0x18f8] sm:$0xff] }
 0x430   : > { %10819 = vmatprep.subr.bf16.mxu1 %v15158_v15  ;;  %v5565_v2 = vld [vmem:[%s12174_s28 + $0x19d8] sm:$0xff]  ;;  %v10398_v13 = vpack.c.bf16 %v4578_v19, %v4576_v18 }
 0x431   : > { %v15256_v17 = vpack.c.bf16 %v5565_v2, %v5563_v11  ;;  %v5649_v11 = vld [vmem:[%s12174_s28 + $0x240] sm:$0xff] }
 0x432   : > { %10373 = vmatpush1.bf16.msra.mxu0 %v10372_v5  ;;  %v5555_v5 = vld [vmem:[%s12174_s28 + $0x1578] sm:$0xff]  ;;  %v5651_v2 = vld [vmem:[%s12174_s28 + $0x320] sm:$0xff] }
 0x433   : > { %10821 = vmatpush1.bf16.msra.mxu1 %v15166_v59  ;;  %10375 = vmatprep.subr.bf16.mxu0 %v10374_v3  ;;  %v5557_v3 = vld [vmem:[%s12174_s28 + $0x1658] sm:$0xff] }
 0x434   : > { %10823 = vmatprep.subr.bf16.mxu1 %v15172_v61  ;;  %v15228_v1 = vpack.c.bf16 %v5557_v3, %v5555_v5 }
 0x436   : > { %10377 = vmatpush1.bf16.msra.mxu0 %v10376_v27  ;;  %v4572_v27 = vld [vmem:[%s12174_s28 + $0x1728] sm:$0xff] }
 0x437   : > { %10825 = vmatpush1.bf16.msra.mxu1 %v15180_v9  ;;  %10379 = vmatprep.subr.bf16.mxu0 %v10378_v40  ;;  %v4574_v40 = vld [vmem:[%s12174_s28 + $0x1808] sm:$0xff] }
 0x438   : > { %10827 = vmatprep.subr.bf16.mxu1 %v15186_v16  ;;  %v10394_v34 = vpack.c.bf16 %v4574_v40, %v4572_v27  ;;  %v5646_v27 = vld [vmem:[%s12174_s28 + $0x88] sm:$0xff] }
 0x439   : > { %v5648_v40 = vld [vmem:[%s12174_s28 + $0x168] sm:$0xff] }
 0x43a   : > { %10381 = vmatpush1.bf16.msra.mxu0 %v10380_v8  ;;  %v15242_v8 = vpack.c.bf16 %v5561_v31, %v5559_v39  ;;  %v15276_v31 = vpack.c.bf16 %v5568_v51, %v5566_v53  ;;  %v5666_v53 = vld [vmem:[%s12174_s28 + $0x948] sm:$0xff] }
 0x43b   : > { %10829 = vmatpush1.bf16.msra.mxu1 %v15194_v4  ;;  %10383 = vmatprep.subr.bf16.mxu0 %v10382_v46  ;;  %v5560_v46 = vld [vmem:[%s12174_s28 + $0x1810] sm:$0xff]  ;;  %v5668_v51 = vld [vmem:[%s12174_s28 + $0xa28] sm:$0xff] }
 0x43c   : > { %10831 = vmatprep.subr.bf16.mxu1 %v15200_v25  ;;  %v15250_v55 = vpack.c.bf16 %v5560_v46, %v5558_v30  ;;  %v5652_v30 = vld [vmem:[%s12174_s28 + $0x328] sm:$0xff]  ;;  %v8373_v46 = vld [vmem:[%s17282_s1 + $0x20] sm:$0xff] }
 0x43d   : > { %v15293_v19 = vpack.c.bf16 %v5652_v30, %v5650_v14  ;;  %v5669_v14 = vld [vmem:[%s12174_s28 + $0xb00] sm:$0xff] }
 0x43e   : > { %10385 = vmatpush1.bf16.msra.mxu0 %v10384_v36  ;;  %v4577_v36 = vld [vmem:[%s12174_s28 + $0x19c0] sm:$0xff] }
 0x43f   : > { %10833 = vmatpush1.bf16.msra.mxu1 %v15208_v28  ;;  %10387 = vmatprep.subr.bf16.mxu0 %v10386_v32  ;;  %v5562_v32 = vld [vmem:[%s12174_s28 + $0x18f0] sm:$0xff]  ;;  %v10400_v5 = vpack.c.bf16 %v4577_v36, %v4575_v41  ;;  %v8376_v41 = vld [vmem:[%s17282_s1 + $0x38] sm:$0xff]  ;;  %v5671_v30 = vld [vmem:[%s12174_s28 + $0xbe0] sm:$0xff] }
 0x440   : > { %10835 = vmatprep.subr.bf16.mxu1 %v15214_v21  ;;  %v15264_v3 = vpack.c.bf16 %v5564_v24, %v5562_v32  ;;  %v5653_v32 = vld [vmem:[%s12174_s28 + $0x400] sm:$0xff] }
 0x441   : > { %v5655_v24 = vld [vmem:[%s12174_s28 + $0x4e0] sm:$0xff] }
 0x442   : > { %10389 = vmatpush1.bf16.msra.mxu0 %v10388_v7  ;;  %v10402_v7 = vpack.c.bf16 %v4582_v26, %v4580_v45  ;;  %v5658_v45 = vld [vmem:[%s12174_s28 + $0x5c8] sm:$0xff] }
 0x443   : > { %10837 = vmatpush1.bf16.msra.mxu1 %v15222_v58  ;;  %10391 = vmatprep.subr.bf16.mxu0 %v10390_v43  ;;  %v4579_v43 = vld [vmem:[%s12174_s28 + $0x1aa0] sm:$0xff] }
 0x444   : > { %10839 = vmatprep.subr.bf16.mxu1 %v15228_v1  ;;  %v10404_v39 = vpack.c.bf16 %v4581_v60, %v4579_v43  ;;  %v5661_v43 = vld [vmem:[%s12174_s28 + $0x780] sm:$0xff] }
 0x445   : > { %v5663_v60 = vld [vmem:[%s12174_s28 + $0x860] sm:$0xff] }
 0x446   : > { %10393 = vmatpush1.bf16.msra.mxu0 %v10392_v22  ;;  %v15279_v22 = vpack.c.bf16 %v5648_v40, %v5646_v27  ;;  %v5665_v27 = vld [vmem:[%s12174_s28 + $0x940] sm:$0xff] }
 0x447   : > { %10841 = vmatpush1.bf16.msra.mxu1 %v15236_v6  ;;  %10395 = vmatprep.subr.bf16.mxu0 %v10394_v34  ;;  %v5645_v34 = vld [vmem:[%s12174_s28 + $0x80] sm:$0xff] }
 0x448   : > { %10843 = vmatprep.subr.bf16.mxu1 %v15242_v8  ;;  %v15290_v18 = vpack.c.bf16 %v5647_v29, %v5645_v34  ;;  %v5667_v40 = vld [vmem:[%s12174_s28 + $0xa20] sm:$0xff]  ;;  %v5672_v34 = vld [vmem:[%s12174_s28 + $0xbe8] sm:$0xff] }
 0x44a   : > { %10397 = vmatpush1.bf16.msra.mxu0 %v10396_v48  ;;  %v5654_v48 = vld [vmem:[%s12174_s28 + $0x408] sm:$0xff] }
 0x44b   : > { %10845 = vmatpush1.bf16.msra.mxu1 %v15250_v55  ;;  %10399 = vmatprep.subr.bf16.mxu0 %v10398_v13  ;;  %v5656_v13 = vld [vmem:[%s12174_s28 + $0x4e8] sm:$0xff] }
 0x44c   : > { %10847 = vmatprep.subr.bf16.mxu1 %v15256_v17  ;;  %v15308_v36 = vpack.c.bf16 %v5656_v13, %v5654_v48  ;;  %v5674_v48 = vld [vmem:[%s12174_s28 + $0xcc8] sm:$0xff] }
 0x44e   : > { %10401 = vmatpush1.bf16.msra.mxu0 %v10400_v5  ;;  %v5662_v5 = vld [vmem:[%s12174_s28 + $0x788] sm:$0xff] }
 0x44f   : > { %10849 = vmatpush1.bf16.msra.mxu1 %v15264_v3  ;;  %10403 = vmatprep.subr.bf16.mxu0 %v10402_v7  ;;  %v5664_v7 = vld [vmem:[%s12174_s28 + $0x868] sm:$0xff] }
 0x450   : > { %10851 = vmatprep.subr.bf16.mxu1 %v15269_v54 }
 0x452   : > { %10405 = vmatpush1.bf16.msra.mxu0 %v10404_v39  ;;  %v5670_v39 = vld [vmem:[%s12174_s28 + $0xb08] sm:$0xff] }
 0x453   : > { %10853 = vmatpush1.bf16.msra.mxu1 %v15276_v31  ;;  %10407 = vmatprep.subr.bf16.mxu0 %v15054_v44  ;;  %v15305_v44 = vpack.c.bf16 %v5651_v2, %v5649_v11  ;;  %v15356_v29 = vpack.c.bf16 %v5672_v34, %v5670_v39 }
 0x454   : > { %10855 = vmatprep.subr.bf16.mxu1 %v15279_v22 }
 0x455   : > { %4650 = vmatmul.mubr.f32.vlgmr.msra.gmra.mrb[4].mxu0 %v8373_v46 }
 0x456   : > { %10409 = vmatpush1.bf16.msra.mxu0 %v15065_v62  ;;  %5637 = vmatmul.mubr.f32.vlgmr.msra.gmra.mrb[4].mxu1 %v8373_v46  ;;  %v5660_v62 = vld [vmem:[%s12174_s28 + $0x6a8] sm:$0xff] }
 0x457   : > { %10857 = vmatpush1.bf16.msra.mxu1 %v15290_v18  ;;  %10411 = vmatprep.subr.bf16.mxu0 %v15071_v57  ;;  %v15317_v57 = vpack.c.bf16 %v5655_v24, %v5653_v32  ;;  %v15320_v26 = vpack.c.bf16 %v5660_v62, %v5658_v45  ;;  %v15369_v45 = vpack.c.bf16 %v5671_v30, %v5669_v14  ;;  %v5679_v14 = vld [vmem:[%s12174_s28 + $0xf60] sm:$0xff] }
 0x458   : > { %10859 = vmatprep.subr.bf16.mxu1 %v15293_v19  ;;  %4788 = vmatprep.mubr.f32.mxu0 %v8376_v41 }
 0x459   : > { %5775 = vmatprep.mubr.f32.mxu1 %v8376_v41 }
 0x45a   : > { %10413 = vmatpush1.bf16.msra.mxu0 %v15082_v20  ;;  %v15329_v20 = vpack.c.bf16 %v5659_v49, %v5657_v23 }
 0x45b   : > { %10861 = vmatpush1.bf16.msra.mxu1 %v15305_v44  ;;  %10415 = vmatprep.subr.bf16.mxu0 %v15088_v10  ;;  %v15332_v10 = vpack.c.bf16 %v5664_v7, %v5662_v5  ;;  %v5675_v5 = vld [vmem:[%s12174_s28 + $0xda0] sm:$0xff] }
 0x45c   : > { %10863 = vmatprep.subr.bf16.mxu1 %v15308_v36 }
 0x45e   : > { %10417 = vmatpush1.bf16.msra.mxu0 %v15096_v33  ;;  %v15341_v33 = vpack.c.bf16 %v5663_v60, %v5661_v43  ;;  %v5678_v60 = vld [vmem:[%s12174_s28 + $0xe88] sm:$0xff] }
 0x45f   : > { %10865 = vmatpush1.bf16.msra.mxu1 %v15317_v57  ;;  %10419 = vmatprep.subr.bf16.mxu0 %v15102_v52  ;;  %v15344_v52 = vpack.c.bf16 %v5668_v51, %v5666_v53  ;;  %v5680_v53 = vld [vmem:[%s12174_s28 + $0xf68] sm:$0xff] }
 0x460   : > { %10867 = vmatprep.subr.bf16.mxu1 %v15320_v26 }
 0x462   : > { %10421 = vmatpush1.bf16.msra.mxu0 %v15110_v42  ;;  %v15353_v42 = vpack.c.bf16 %v5667_v40, %v5665_v27 }
 0x463   : > { %10869 = vmatpush1.bf16.msra.mxu1 %v15329_v20  ;;  %10423 = vmatprep.subr.bf16.mxu0 %v15116_v56 }
 0x464   : > { %10871 = vmatprep.subr.bf16.mxu1 %v15332_v10 }
 0x466   : > { %10425 = vmatpush1.bf16.msra.mxu0 %v15124_v37  ;;  %v5676_v37 = vld [vmem:[%s12174_s28 + $0xda8] sm:$0xff] }
 0x467   : > { %10873 = vmatpush1.bf16.msra.mxu1 %v15341_v33  ;;  %10427 = vmatprep.subr.bf16.mxu0 %v15130_v35  ;;  %v15372_v49 = vpack.c.bf16 %v5676_v37, %v5674_v48 }
 0x468   : > { %v3233_v56 = vpop.f32.mrb[2].mxu0  ;;  %10875 = vmatprep.subr.bf16.mxu1 %v15344_v52 }
 0x469   : > { %v3240_v46 = vadd.f32 %v3233_v56, %v14066_v38  ;;  %v4220_v11 = vpop.f32.mrb[2].mxu1  ;;  %v3235_v2 = vpop.f32.mrb[3].mxu0  ;;  %v5677_v56 = vld [vmem:[%s12174_s28 + $0xe80] sm:$0xff] }
 0x46a   : > { %v4227_v35 = vadd.f32 %v4220_v11, %v14066_v38  ;;  %v3241_v13 = vadd.f32 %v3235_v2, %v14066_v38  ;;  %v4222_v41 = vpop.f32.mrb[3].mxu1  ;;  %10429 = vmatpush1.bf16.msra.mxu0 %v15138_v12  ;;  %v5673_v12 = vld [vmem:[%s12174_s28 + $0xcc0] sm:$0xff]  ;;  %v5684_v2 = vld [vmem:[%s12174_s28 + $0x1128] sm:$0xff] }
 0x46b   : > { %v3242_v32 = vmax.f32 %v3240_v46, 0.0  ;;  %v4228_v24 = vadd.f32 %v4222_v41, %v14066_v38  ;;  %10877 = vmatpush1.bf16.msra.mxu1 %v15353_v42  ;;  %10431 = vmatprep.subr.bf16.mxu0 %v15144_v63  ;;  %v15388_v27 = vpack.c.bf16 %v5675_v5, %v5673_v12  ;;  %v5685_v12 = vld [vmem:[%s12174_s28 + $0x1200] sm:$0xff] }
 0x46c   : > { %v4229_v62 = vmax.f32 %v4227_v35, 0.0  ;;  %v3243_v23 = vmax.f32 %v3241_v13, 0.0  ;;  %10879 = vmatprep.subr.bf16.mxu1 %v15356_v29  ;;  %v15401_v35 = vpack.c.bf16 %v5679_v14, %v5677_v56  ;;  %v5687_v5 = vld [vmem:[%s12174_s28 + $0x12e0] sm:$0xff]  ;;  %v5700_v56 = vld [vmem:[%s12174_s28 + $0x1828] sm:$0xff] }
 0x46d   : > { %3244 = vst [vmem:[%s14089_s10 + $0x20] sm:$0xff] %v3242_v32  ;;  %v4230_v7 = vmax.f32 %v4228_v24, 0.0  ;;  %v3246_v43 = vmul.f32 %v3242_v32, %v14084_v47  ;;  %v5683_v24 = vld [vmem:[%s12174_s28 + $0x1120] sm:$0xff] }
 0x46e   : > { %4231 = vst [vmem:[%s14089_s10 + $0x30] sm:$0xff] %v4229_v62  ;;  %3245 = vst [vmem:[%s14089_s10 + $0x28] sm:$0xff] %v3243_v23  ;;  %10433 = vmatpush1.bf16.msra.mxu0 %v15152_v0  ;;  %v3247_v63 = vmul.f32 %v3243_v23, %v14094_v50  ;;  %v4233_v51 = vmul.f32 %v4229_v62, %v14084_v47  ;;  %v15392_v0 = vpack.c.bf16 %v5680_v53, %v5678_v60  ;;  %v5689_v60 = vld [vmem:[%s12174_s28 + $0x13c0] sm:$0xff] }
 0x46f   : > { %4232 = vst [vmem:[%s14089_s10 + $0x38] sm:$0xff] %v4230_v7  ;;  %10881 = vmatpush1.bf16.msra.mxu1 %v15369_v45  ;;  %10435 = vmatprep.subr.bf16.mxu0 %v15158_v15  ;;  %v4234_v40 = vmul.f32 %v4230_v7, %v14094_v50  ;;  %v3252_v39 = vmul.f32 %v3246_v43, %v3242_v32  ;;  %v5682_v15 = vld [vmem:[%s12174_s28 + $0x1048] sm:$0xff]  ;;  %v5681_v32 = vld [vmem:[%s12174_s28 + $0x1040] sm:$0xff] }
 0x470   : > { %10883 = vmatprep.subr.bf16.mxu1 %v15372_v49  ;;  %v3248_v34 = vadd.f32 %v3247_v63, %v3246_v43  ;;  %v3253_v30 = vmul.f32 %v3247_v63, %v3243_v23  ;;  %v4239_v46 = vmul.f32 %v4233_v51, %v4229_v62  ;;  %v15404_v41 = vpack.c.bf16 %v5684_v2, %v5682_v15  ;;  %v5688_v62 = vld [vmem:[%s12174_s28 + $0x12e8] sm:$0xff]  ;;  %v5691_v53 = vld [vmem:[%s12174_s28 + $0x14a0] sm:$0xff] }
 0x471   : > { %v4235_v11 = vadd.f32 %v4234_v40, %v4233_v51  ;;  %v4240_v48 = vmul.f32 %v4234_v40, %v4230_v7  ;;  %v5690_v7 = vld [vmem:[%s12174_s28 + $0x13c8] sm:$0xff]  ;;  %v5693_v40 = vld [vmem:[%s12174_s28 + $0x1580] sm:$0xff] }
 0x472   : > { %10437 = vmatpush1.bf16.msra.mxu0 %v15166_v59  ;;  %3249 = vadd.xlane.f32.xlu1 %v3248_v34  ;;  %v3254_v37 = vadd.f32 %v3253_v30, %v3252_v39  ;;  %v5686_v59 = vld [vmem:[%s12174_s28 + $0x1208] sm:$0xff]  ;;  %v5695_v39 = vld [vmem:[%s12174_s28 + $0x1660] sm:$0xff] }
 0x473   : > { %10885 = vmatpush1.bf16.msra.mxu1 %v15388_v27  ;;  %10439 = vmatprep.subr.bf16.mxu0 %v15172_v61  ;;  %v4241_v13 = vadd.f32 %v4240_v48, %v4239_v46  ;;  %v15413_v61 = vpack.c.bf16 %v5683_v24, %v5681_v32  ;;  %v15416_v23 = vpack.c.bf16 %v5688_v62, %v5686_v59  ;;  %v5692_v43 = vld [vmem:[%s12174_s28 + $0x14a8] sm:$0xff]  ;;  %v5697_v14 = vld [vmem:[%s12174_s28 + $0x1740] sm:$0xff]  ;;  %v5785_v24 = vld [vmem:[%s12174_s28 + $0x98] sm:$0xff] }
 0x474   : > { %10887 = vmatprep.subr.bf16.mxu1 %v15392_v0  ;;  %v5694_v63 = vld [vmem:[%s12174_s28 + $0x1588] sm:$0xff]  ;;  %v5699_v30 = vld [vmem:[%s12174_s28 + $0x1820] sm:$0xff]  ;;  %v5787_v59 = vld [vmem:[%s12174_s28 + $0x178] sm:$0xff] }
 0x475   : > { %v5696_v51 = vld [vmem:[%s12174_s28 + $0x1668] sm:$0xff]  ;;  %v5701_v15 = vld [vmem:[%s12174_s28 + $0x1900] sm:$0xff]  ;;  %v5784_v62 = vld [vmem:[%s12174_s28 + $0x90] sm:$0xff] }
 0x476   : > { %10441 = vmatpush1.bf16.msra.mxu0 %v15180_v9  ;;  %4236 = vadd.xlane.f32.xlu1 %v4235_v11  ;;  %v15425_v9 = vpack.c.bf16 %v5687_v5, %v5685_v12  ;;  %v5698_v34 = vld [vmem:[%s12174_s28 + $0x1748] sm:$0xff]  ;;  %v5703_v2 = vld [vmem:[%s12174_s28 + $0x19e0] sm:$0xff]  ;;  %v5786_v12 = vld [vmem:[%s12174_s28 + $0x170] sm:$0xff] }
 0x477   : > { %10889 = vmatpush1.bf16.msra.mxu1 %v15401_v35  ;;  %10443 = vmatprep.subr.bf16.mxu0 %v15186_v16  ;;  %v15428_v16 = vpack.c.bf16 %v5692_v43, %v5690_v7  ;;  %v5702_v46 = vld [vmem:[%s12174_s28 + $0x1908] sm:$0xff]  ;;  %v5707_v32 = vld [vmem:[%s12174_s28 + $0x1ba0] sm:$0xff]  ;;  %v5789_v5 = vld [vmem:[%s12174_s28 + $0x258] sm:$0xff] }
 0x478   : > { %10891 = vmatprep.subr.bf16.mxu1 %v15404_v41  ;;  %v5704_v11 = vld [vmem:[%s12174_s28 + $0x19e8] sm:$0xff]  ;;  %v5791_v7 = vld [vmem:[%s12174_s28 + $0x338] sm:$0xff] }
 0x479   : > { %v5706_v48 = vld [vmem:[%s12174_s28 + $0x1ac8] sm:$0xff]  ;;  %v15503_v43 = vpack.c.bf16 %v5791_v7, %v5789_v5  ;;  %v5810_v5 = vld [vmem:[%s12174_s28 + $0xbf0] sm:$0xff]  ;;  %v5813_v7 = vld [vmem:[%s12174_s28 + $0xcd8] sm:$0xff] }
 0x47a   : > { %10445 = vmatpush1.bf16.msra.mxu0 %v15194_v4  ;;  %3255 = vadd.xlane.f32.xlu1 %v3254_v37  ;;  %v15437_v4 = vpack.c.bf16 %v5691_v53, %v5689_v60  ;;  %v5708_v37 = vld [vmem:[%s12174_s28 + $0x1ba8] sm:$0xff]  ;;  %v5788_v60 = vld [vmem:[%s12174_s28 + $0x250] sm:$0xff] }
 0x47b   : > { %10893 = vmatpush1.bf16.msra.mxu1 %v15413_v61  ;;  %10447 = vmatprep.subr.bf16.mxu0 %v15200_v25  ;;  %v15440_v25 = vpack.c.bf16 %v5696_v51, %v5694_v63  ;;  %v5790_v53 = vld [vmem:[%s12174_s28 + $0x330] sm:$0xff]  ;;  %v5795_v63 = vld [vmem:[%s12174_s28 + $0x4f8] sm:$0xff]  ;;  %v8378_v51 = vld [vmem:[%s17282_s1 + $0x48] sm:$0xff] }
 0x47c   : > { %10895 = vmatprep.subr.bf16.mxu1 %v15416_v23 }
 0x47e   : > { %10449 = vmatpush1.bf16.msra.mxu0 %v15208_v28  ;;  %4242 = vadd.xlane.f32.xlu1 %v4241_v13  ;;  %v15449_v28 = vpack.c.bf16 %v5695_v39, %v5693_v40  ;;  %v5705_v13 = vld [vmem:[%s12174_s28 + $0x1ac0] sm:$0xff]  ;;  %v5792_v39 = vld [vmem:[%s12174_s28 + $0x410] sm:$0xff] }
 0x47f   : > { %10897 = vmatpush1.bf16.msra.mxu1 %v15425_v9  ;;  %10451 = vmatprep.subr.bf16.mxu0 %v15214_v21  ;;  %v15452_v21 = vpack.c.bf16 %v5700_v56, %v5698_v34  ;;  %v5794_v34 = vld [vmem:[%s12174_s28 + $0x4f0] sm:$0xff]  ;;  %v5797_v56 = vld [vmem:[%s12174_s28 + $0x5d8] sm:$0xff] }
 0x480   : > { %10899 = vmatprep.subr.bf16.mxu1 %v15428_v16 }
 0x482   : > { %10453 = vmatpush1.bf16.msra.mxu0 %v15222_v58  ;;  %v15461_v58 = vpack.c.bf16 %v5699_v30, %v5697_v14  ;;  %v5796_v30 = vld [vmem:[%s12174_s28 + $0x5d0] sm:$0xff] }
 0x483   : > { %10901 = vmatpush1.bf16.msra.mxu1 %v15437_v4  ;;  %10455 = vmatprep.subr.bf16.mxu0 %v15228_v1  ;;  %v15464_v1 = vpack.c.bf16 %v5704_v11, %v5702_v46  ;;  %v5798_v46 = vld [vmem:[%s12174_s28 + $0x6b0] sm:$0xff]  ;;  %v5801_v11 = vld [vmem:[%s12174_s28 + $0x798] sm:$0xff] }
 0x484   : > { %10903 = vmatprep.subr.bf16.mxu1 %v15440_v25 }
 0x486   : > { %10457 = vmatpush1.bf16.msra.mxu0 %v15236_v6  ;;  %v15473_v6 = vpack.c.bf16 %v5703_v2, %v5701_v15  ;;  %v5803_v15 = vld [vmem:[%s12174_s28 + $0x878] sm:$0xff]  ;;  %v5800_v2 = vld [vmem:[%s12174_s28 + $0x790] sm:$0xff] }
 0x487   : > { %10905 = vmatpush1.bf16.msra.mxu1 %v15449_v28  ;;  %10459 = vmatprep.subr.bf16.mxu0 %v15242_v8  ;;  %v15476_v8 = vpack.c.bf16 %v5708_v37, %v5706_v48  ;;  %v5802_v48 = vld [vmem:[%s12174_s28 + $0x870] sm:$0xff]  ;;  %v5805_v37 = vld [vmem:[%s12174_s28 + $0x958] sm:$0xff] }
 0x488   : > { %10907 = vmatprep.subr.bf16.mxu1 %v15452_v21 }
 0x48a   : > { %10461 = vmatpush1.bf16.msra.mxu0 %v15250_v55  ;;  %v15485_v55 = vpack.c.bf16 %v5707_v32, %v5705_v13  ;;  %v5807_v13 = vld [vmem:[%s12174_s28 + $0xa38] sm:$0xff]  ;;  %v5804_v32 = vld [vmem:[%s12174_s28 + $0x950] sm:$0xff] }
 0x48b   : > { %10909 = vmatpush1.bf16.msra.mxu1 %v15461_v58  ;;  %10463 = vmatprep.subr.bf16.mxu0 %v15256_v17  ;;  %v15488_v17 = vpack.c.bf16 %v5787_v59, %v5785_v24  ;;  %v5806_v24 = vld [vmem:[%s12174_s28 + $0xa30] sm:$0xff]  ;;  %v5809_v59 = vld [vmem:[%s12174_s28 + $0xb18] sm:$0xff] }
 0x48c   : > { %10911 = vmatprep.subr.bf16.mxu1 %v15464_v1 }
 0x48e   : > { %10465 = vmatpush1.bf16.msra.mxu0 %v15264_v3  ;;  %v8375_v3 = vld [vmem:[%s17282_s1 + $0x30] sm:$0xff] }
 0x48f   : > { %10913 = vmatpush1.bf16.msra.mxu1 %v15473_v6  ;;  %10467 = vmatprep.subr.bf16.mxu0 %v15269_v54  ;;  %v15500_v54 = vpack.c.bf16 %v5786_v12, %v5784_v62  ;;  %v5811_v62 = vld [vmem:[%s12174_s28 + $0xbf8] sm:$0xff]  ;;  %v5808_v12 = vld [vmem:[%s12174_s28 + $0xb10] sm:$0xff] }
 0x490   : > { %10915 = vmatprep.subr.bf16.mxu1 %v15476_v8 }
 0x492   : > { %10469 = vmatpush1.bf16.msra.mxu0 %v15276_v31  ;;  %v5793_v31 = vld [vmem:[%s12174_s28 + $0x418] sm:$0xff] }
 0x493   : > { %10917 = vmatpush1.bf16.msra.mxu1 %v15485_v55  ;;  %10471 = vmatprep.subr.bf16.mxu0 %v15279_v22  ;;  %v15515_v22 = vpack.c.bf16 %v5790_v53, %v5788_v60  ;;  %v15518_v40 = vpack.c.bf16 %v5795_v63, %v5793_v31  ;;  %v5812_v60 = vld [vmem:[%s12174_s28 + $0xcd0] sm:$0xff]  ;;  %v5817_v31 = vld [vmem:[%s12174_s28 + $0xe98] sm:$0xff] }
 0x494   : > { %10919 = vmatprep.subr.bf16.mxu1 %v15488_v17  ;;  %v5814_v53 = vld [vmem:[%s12174_s28 + $0xdb0] sm:$0xff]  ;;  %v5819_v63 = vld [vmem:[%s12174_s28 + $0xf78] sm:$0xff] }
 0x495   : > { %4789 = vmatmul.mubr.f32.vlgmr.msra.gmra.mrb[4].mxu0 %v8375_v3 }
 0x496   : > { %10473 = vmatpush1.bf16.msra.mxu0 %v15290_v18  ;;  %5776 = vmatmul.mubr.f32.vlgmr.msra.gmra.mrb[4].mxu1 %v8375_v3  ;;  %v5799_v18 = vld [vmem:[%s12174_s28 + $0x6b8] sm:$0xff] }
 0x497   : > { %10921 = vmatpush1.bf16.msra.mxu1 %v15500_v54  ;;  %10475 = vmatprep.subr.bf16.mxu0 %v15293_v19  ;;  %v15527_v19 = vpack.c.bf16 %v5794_v34, %v5792_v39  ;;  %v15530_v14 = vpack.c.bf16 %v5799_v18, %v5797_v56  ;;  %v5815_v3 = vld [vmem:[%s12174_s28 + $0xdb8] sm:$0xff]  ;;  %v5818_v39 = vld [vmem:[%s12174_s28 + $0xf70] sm:$0xff] }
 0x498   : > { %10923 = vmatprep.subr.bf16.mxu1 %v15503_v43  ;;  %4927 = vmatprep.mubr.f32.mxu0 %v8378_v51  ;;  %v5821_v34 = vld [vmem:[%s12174_s28 + $0x1058] sm:$0xff]  ;;  %v5820_v18 = vld [vmem:[%s12174_s28 + $0x1050] sm:$0xff] }
 0x499   : > { %5914 = vmatprep.mubr.f32.mxu1 %v8378_v51  ;;  %v5816_v51 = vld [vmem:[%s12174_s28 + $0xe90] sm:$0xff]  ;;  %v5823_v56 = vld [vmem:[%s12174_s28 + $0x1138] sm:$0xff] }
 0x49a   : > { %10477 = vmatpush1.bf16.msra.mxu0 %v15305_v44  ;;  %v15539_v44 = vpack.c.bf16 %v5798_v46, %v5796_v30  ;;  %v5822_v30 = vld [vmem:[%s12174_s28 + $0x1130] sm:$0xff]  ;;  %v5825_v46 = vld [vmem:[%s12174_s28 + $0x1218] sm:$0xff] }
 0x49b   : > { %10925 = vmatpush1.bf16.msra.mxu1 %v15515_v22  ;;  %10479 = vmatprep.subr.bf16.mxu0 %v15308_v36  ;;  %v15542_v36 = vpack.c.bf16 %v5803_v15, %v5801_v11  ;;  %v5827_v11 = vld [vmem:[%s12174_s28 + $0x12f8] sm:$0xff]  ;;  %v5824_v15 = vld [vmem:[%s12174_s28 + $0x1210] sm:$0xff] }
 0x49c   : > { %10927 = vmatprep.subr.bf16.mxu1 %v15518_v40 }
 0x49e   : > { %10481 = vmatpush1.bf16.msra.mxu0 %v15317_v57  ;;  %v15551_v57 = vpack.c.bf16 %v5802_v48, %v5800_v2  ;;  %v5826_v2 = vld [vmem:[%s12174_s28 + $0x12f0] sm:$0xff]  ;;  %v5829_v48 = vld [vmem:[%s12174_s28 + $0x13d8] sm:$0xff] }
 0x49f   : > { %10929 = vmatpush1.bf16.msra.mxu1 %v15527_v19  ;;  %10483 = vmatprep.subr.bf16.mxu0 %v15320_v26  ;;  %v15554_v26 = vpack.c.bf16 %v5807_v13, %v5805_v37  ;;  %v5831_v37 = vld [vmem:[%s12174_s28 + $0x14b8] sm:$0xff]  ;;  %v5828_v13 = vld [vmem:[%s12174_s28 + $0x13d0] sm:$0xff] }
 0x4a0   : > { %10931 = vmatprep.subr.bf16.mxu1 %v15530_v14 }
 0x4a2   : > { %10485 = vmatpush1.bf16.msra.mxu0 %v15329_v20  ;;  %v15563_v20 = vpack.c.bf16 %v5806_v24, %v5804_v32  ;;  %v5830_v32 = vld [vmem:[%s12174_s28 + $0x14b0] sm:$0xff]  ;;  %v5833_v24 = vld [vmem:[%s12174_s28 + $0x1598] sm:$0xff] }
 0x4a3   : > { %10933 = vmatpush1.bf16.msra.mxu1 %v15539_v44  ;;  %10487 = vmatprep.subr.bf16.mxu0 %v15332_v10  ;;  %v15566_v10 = vpack.c.bf16 %v5811_v62, %v5809_v59  ;;  %v5835_v59 = vld [vmem:[%s12174_s28 + $0x1678] sm:$0xff]  ;;  %v5832_v62 = vld [vmem:[%s12174_s28 + $0x1590] sm:$0xff] }
 0x4a4   : > { %10935 = vmatprep.subr.bf16.mxu1 %v15542_v36 }
 0x4a6   : > { %10489 = vmatpush1.bf16.msra.mxu0 %v15341_v33  ;;  %v15575_v33 = vpack.c.bf16 %v5810_v5, %v5808_v12  ;;  %v5834_v12 = vld [vmem:[%s12174_s28 + $0x1670] sm:$0xff]  ;;  %v5837_v5 = vld [vmem:[%s12174_s28 + $0x1758] sm:$0xff] }
 0x4a7   : > { %10937 = vmatpush1.bf16.msra.mxu1 %v15551_v57  ;;  %10491 = vmatprep.subr.bf16.mxu0 %v15344_v52  ;;  %v15578_v52 = vpack.c.bf16 %v5815_v3, %v5813_v7  ;;  %v5839_v7 = vld [vmem:[%s12174_s28 + $0x1838] sm:$0xff]  ;;  %v5836_v3 = vld [vmem:[%s12174_s28 + $0x1750] sm:$0xff] }
 0x4a8   : > { %10939 = vmatprep.subr.bf16.mxu1 %v15554_v26 }
 0x4aa   : > { %10493 = vmatpush1.bf16.msra.mxu0 %v15353_v42  ;;  %v15587_v42 = vpack.c.bf16 %v5814_v53, %v5812_v60  ;;  %v5838_v60 = vld [vmem:[%s12174_s28 + $0x1830] sm:$0xff]  ;;  %v5841_v53 = vld [vmem:[%s12174_s28 + $0x1918] sm:$0xff] }
 0x4ab   : > { %10941 = vmatpush1.bf16.msra.mxu1 %v15563_v20  ;;  %10495 = vmatprep.subr.bf16.mxu0 %v15356_v29  ;;  %v15590_v29 = vpack.c.bf16 %v5819_v63, %v5817_v31  ;;  %v5843_v31 = vld [vmem:[%s12174_s28 + $0x19f8] sm:$0xff]  ;;  %v5840_v63 = vld [vmem:[%s12174_s28 + $0x1910] sm:$0xff] }
 0x4ac   : > { %10943 = vmatprep.subr.bf16.mxu1 %v15566_v10 }
 0x4ae   : > { %10497 = vmatpush1.bf16.msra.mxu0 %v15369_v45  ;;  %v15599_v45 = vpack.c.bf16 %v5818_v39, %v5816_v51  ;;  %v5842_v51 = vld [vmem:[%s12174_s28 + $0x19f0] sm:$0xff]  ;;  %v5845_v39 = vld [vmem:[%s12174_s28 + $0x1ad8] sm:$0xff] }
 0x4af   : > { %10945 = vmatpush1.bf16.msra.mxu1 %v15575_v33  ;;  %10499 = vmatprep.subr.bf16.mxu0 %v15372_v49  ;;  %v15602_v49 = vpack.c.bf16 %v5823_v56, %v5821_v34  ;;  %v5847_v34 = vld [vmem:[%s12174_s28 + $0x1bb8] sm:$0xff]  ;;  %v5844_v56 = vld [vmem:[%s12174_s28 + $0x1ad0] sm:$0xff] }
 0x4b0   : > { %10947 = vmatprep.subr.bf16.mxu1 %v15578_v52 }
 0x4b2   : > { %10501 = vmatpush1.bf16.msra.mxu0 %v15388_v27  ;;  %v15611_v27 = vpack.c.bf16 %v5822_v30, %v5820_v18  ;;  %v5846_v18 = vld [vmem:[%s12174_s28 + $0x1bb0] sm:$0xff]  ;;  %v5924_v30 = vld [vmem:[%s12174_s28 + $0xa8] sm:$0xff] }
 0x4b3   : > { %10949 = vmatpush1.bf16.msra.mxu1 %v15587_v42  ;;  %10503 = vmatprep.subr.bf16.mxu0 %v15392_v0  ;;  %v15614_v0 = vpack.c.bf16 %v5827_v11, %v5825_v46  ;;  %v5926_v46 = vld [vmem:[%s12174_s28 + $0x188] sm:$0xff]  ;;  %v5923_v11 = vld [vmem:[%s12174_s28 + $0xa0] sm:$0xff] }
 0x4b4   : > { %10951 = vmatprep.subr.bf16.mxu1 %v15590_v29 }
 0x4b6   : > { %10505 = vmatpush1.bf16.msra.mxu0 %v15401_v35  ;;  %v15623_v35 = vpack.c.bf16 %v5826_v2, %v5824_v15  ;;  %v5925_v15 = vld [vmem:[%s12174_s28 + $0x180] sm:$0xff]  ;;  %v5928_v2 = vld [vmem:[%s12174_s28 + $0x268] sm:$0xff] }
 0x4b7   : > { %10953 = vmatpush1.bf16.msra.mxu1 %v15599_v45  ;;  %10507 = vmatprep.subr.bf16.mxu0 %v15404_v41  ;;  %v15626_v41 = vpack.c.bf16 %v5831_v37, %v5829_v48  ;;  %v5930_v48 = vld [vmem:[%s12174_s28 + $0x348] sm:$0xff] }
 0x4b8   : > { %10955 = vmatprep.subr.bf16.mxu1 %v15602_v49  ;;  %v15701_v37 = vpack.c.bf16 %v5930_v48, %v5928_v2  ;;  %v5949_v2 = vld [vmem:[%s12174_s28 + $0xc00] sm:$0xff]  ;;  %v5952_v48 = vld [vmem:[%s12174_s28 + $0xce8] sm:$0xff] }
 0x4ba   : > { %10509 = vmatpush1.bf16.msra.mxu0 %v15413_v61  ;;  %v15635_v61 = vpack.c.bf16 %v5830_v32, %v5828_v13  ;;  %v5927_v13 = vld [vmem:[%s12174_s28 + $0x260] sm:$0xff] }
 0x4bb   : > { %10957 = vmatpush1.bf16.msra.mxu1 %v15611_v27  ;;  %10511 = vmatprep.subr.bf16.mxu0 %v15416_v23  ;;  %v15638_v23 = vpack.c.bf16 %v5835_v59, %v5833_v24  ;;  %v5929_v32 = vld [vmem:[%s12174_s28 + $0x340] sm:$0xff]  ;;  %v5934_v24 = vld [vmem:[%s12174_s28 + $0x508] sm:$0xff]  ;;  %v8380_v59 = vld [vmem:[%s17282_s1 + $0x58] sm:$0xff] }
 0x4bc   : > { %10959 = vmatprep.subr.bf16.mxu1 %v15614_v0 }
 0x4be   : > { %10513 = vmatpush1.bf16.msra.mxu0 %v15425_v9  ;;  %v15647_v9 = vpack.c.bf16 %v5834_v12, %v5832_v62  ;;  %v5931_v12 = vld [vmem:[%s12174_s28 + $0x420] sm:$0xff] }
 0x4bf   : > { %10961 = vmatpush1.bf16.msra.mxu1 %v15623_v35  ;;  %10515 = vmatprep.subr.bf16.mxu0 %v15428_v16  ;;  %v15650_v16 = vpack.c.bf16 %v5839_v7, %v5837_v5  ;;  %v5933_v5 = vld [vmem:[%s12174_s28 + $0x500] sm:$0xff]  ;;  %v5936_v7 = vld [vmem:[%s12174_s28 + $0x5e8] sm:$0xff] }
 0x4c0   : > { %10963 = vmatprep.subr.bf16.mxu1 %v15626_v41 }
 0x4c2   : > { %10517 = vmatpush1.bf16.msra.mxu0 %v15437_v4  ;;  %v15659_v4 = vpack.c.bf16 %v5838_v60, %v5836_v3  ;;  %v5935_v60 = vld [vmem:[%s12174_s28 + $0x5e0] sm:$0xff] }
 0x4c3   : > { %10965 = vmatpush1.bf16.msra.mxu1 %v15635_v61  ;;  %10519 = vmatprep.subr.bf16.mxu0 %v15440_v25  ;;  %v15662_v25 = vpack.c.bf16 %v5843_v31, %v5841_v53  ;;  %v5937_v53 = vld [vmem:[%s12174_s28 + $0x6c0] sm:$0xff]  ;;  %v5940_v31 = vld [vmem:[%s12174_s28 + $0x7a8] sm:$0xff] }
 0x4c4   : > { %10967 = vmatprep.subr.bf16.mxu1 %v15638_v23 }
 0x4c6   : > { %10521 = vmatpush1.bf16.msra.mxu0 %v15449_v28  ;;  %v15671_v28 = vpack.c.bf16 %v5842_v51, %v5840_v63  ;;  %v5942_v63 = vld [vmem:[%s12174_s28 + $0x888] sm:$0xff]  ;;  %v5939_v51 = vld [vmem:[%s12174_s28 + $0x7a0] sm:$0xff] }
 0x4c7   : > { %10969 = vmatpush1.bf16.msra.mxu1 %v15647_v9  ;;  %10523 = vmatprep.subr.bf16.mxu0 %v15452_v21  ;;  %v15674_v21 = vpack.c.bf16 %v5847_v34, %v5845_v39  ;;  %v5941_v39 = vld [vmem:[%s12174_s28 + $0x880] sm:$0xff]  ;;  %v5944_v34 = vld [vmem:[%s12174_s28 + $0x968] sm:$0xff] }
 0x4c8   : > { %10971 = vmatprep.subr.bf16.mxu1 %v15650_v16 }
 0x4ca   : > { %10525 = vmatpush1.bf16.msra.mxu0 %v15461_v58  ;;  %v15683_v58 = vpack.c.bf16 %v5846_v18, %v5844_v56  ;;  %v5946_v56 = vld [vmem:[%s12174_s28 + $0xa48] sm:$0xff]  ;;  %v5943_v18 = vld [vmem:[%s12174_s28 + $0x960] sm:$0xff] }
 0x4cb   : > { %10973 = vmatpush1.bf16.msra.mxu1 %v15659_v4  ;;  %10527 = vmatprep.subr.bf16.mxu0 %v15464_v1  ;;  %v15686_v1 = vpack.c.bf16 %v5926_v46, %v5924_v30  ;;  %v5945_v30 = vld [vmem:[%s12174_s28 + $0xa40] sm:$0xff]  ;;  %v5948_v46 = vld [vmem:[%s12174_s28 + $0xb28] sm:$0xff] }
 0x4cc   : > { %10975 = vmatprep.subr.bf16.mxu1 %v15662_v25 }
 0x4ce   : > { %10529 = vmatpush1.bf16.msra.mxu0 %v15473_v6  ;;  %v8377_v6 = vld [vmem:[%s17282_s1 + $0x40] sm:$0xff] }
 0x4cf   : > { %10977 = vmatpush1.bf16.msra.mxu1 %v15671_v28  ;;  %10531 = vmatprep.subr.bf16.mxu0 %v15476_v8  ;;  %v15698_v8 = vpack.c.bf16 %v5925_v15, %v5923_v11  ;;  %v5950_v11 = vld [vmem:[%s12174_s28 + $0xc08] sm:$0xff]  ;;  %v5947_v15 = vld [vmem:[%s12174_s28 + $0xb20] sm:$0xff] }
 0x4d0   : > { %10979 = vmatprep.subr.bf16.mxu1 %v15674_v21 }
 0x4d2   : > { %10533 = vmatpush1.bf16.msra.mxu0 %v15485_v55  ;;  %v5932_v55 = vld [vmem:[%s12174_s28 + $0x428] sm:$0xff] }
 0x4d3   : > { %10981 = vmatpush1.bf16.msra.mxu1 %v15683_v58  ;;  %10535 = vmatprep.subr.bf16.mxu0 %v15488_v17  ;;  %v15713_v17 = vpack.c.bf16 %v5929_v32, %v5927_v13  ;;  %v15716_v62 = vpack.c.bf16 %v5934_v24, %v5932_v55  ;;  %v5951_v13 = vld [vmem:[%s12174_s28 + $0xce0] sm:$0xff]  ;;  %v5956_v55 = vld [vmem:[%s12174_s28 + $0xea8] sm:$0xff] }
 0x4d4   : > { %10983 = vmatprep.subr.bf16.mxu1 %v15686_v1  ;;  %v5953_v32 = vld [vmem:[%s12174_s28 + $0xdc0] sm:$0xff]  ;;  %v5958_v24 = vld [vmem:[%s12174_s28 + $0xf88] sm:$0xff] }
 0x4d5   : > { %4928 = vmatmul.mubr.f32.vlgmr.msra.gmra.mrb[4].mxu0 %v8377_v6 }
 0x4d6   : > { %10537 = vmatpush1.bf16.msra.mxu0 %v15500_v54  ;;  %5915 = vmatmul.mubr.f32.vlgmr.msra.gmra.mrb[4].mxu1 %v8377_v6  ;;  %v5938_v54 = vld [vmem:[%s12174_s28 + $0x6c8] sm:$0xff] }
 0x4d7   : > { %10985 = vmatpush1.bf16.msra.mxu1 %v15698_v8  ;;  %10539 = vmatprep.subr.bf16.mxu0 %v15503_v43  ;;  %v15725_v43 = vpack.c.bf16 %v5933_v5, %v5931_v12  ;;  %v15728_v3 = vpack.c.bf16 %v5938_v54, %v5936_v7  ;;  %v5954_v6 = vld [vmem:[%s12174_s28 + $0xdc8] sm:$0xff]  ;;  %v5957_v12 = vld [vmem:[%s12174_s28 + $0xf80] sm:$0xff] }
 0x4d8   : > { %10987 = vmatprep.subr.bf16.mxu1 %v15701_v37  ;;  %5066 = vmatprep.mubr.f32.mxu0 %v8380_v59  ;;  %v5960_v5 = vld [vmem:[%s12174_s28 + $0x1068] sm:$0xff]  ;;  %v5959_v54 = vld [vmem:[%s12174_s28 + $0x1060] sm:$0xff] }
 0x4d9   : > { %6053 = vmatprep.mubr.f32.mxu1 %v8380_v59  ;;  %v5955_v59 = vld [vmem:[%s12174_s28 + $0xea0] sm:$0xff]  ;;  %v5962_v7 = vld [vmem:[%s12174_s28 + $0x1148] sm:$0xff] }
 0x4da   : > { %10541 = vmatpush1.bf16.msra.mxu0 %v15515_v22  ;;  %v15737_v22 = vpack.c.bf16 %v5937_v53, %v5935_v60  ;;  %v5961_v60 = vld [vmem:[%s12174_s28 + $0x1140] sm:$0xff]  ;;  %v5964_v53 = vld [vmem:[%s12174_s28 + $0x1228] sm:$0xff] }
 0x4db   : > { %10989 = vmatpush1.bf16.msra.mxu1 %v15713_v17  ;;  %10543 = vmatprep.subr.bf16.mxu0 %v15518_v40  ;;  %v15740_v40 = vpack.c.bf16 %v5942_v63, %v5940_v31  ;;  %v5966_v31 = vld [vmem:[%s12174_s28 + $0x1308] sm:$0xff]  ;;  %v5963_v63 = vld [vmem:[%s12174_s28 + $0x1220] sm:$0xff] }
 0x4dc   : > { %10991 = vmatprep.subr.bf16.mxu1 %v15716_v62 }
 0x4de   : > { %10545 = vmatpush1.bf16.msra.mxu0 %v15527_v19  ;;  %v15749_v19 = vpack.c.bf16 %v5941_v39, %v5939_v51  ;;  %v5965_v51 = vld [vmem:[%s12174_s28 + $0x1300] sm:$0xff]  ;;  %v5968_v39 = vld [vmem:[%s12174_s28 + $0x13e8] sm:$0xff] }
 0x4df   : > { %10993 = vmatpush1.bf16.msra.mxu1 %v15725_v43  ;;  %10547 = vmatprep.subr.bf16.mxu0 %v15530_v14  ;;  %v15752_v14 = vpack.c.bf16 %v5946_v56, %v5944_v34  ;;  %v5970_v34 = vld [vmem:[%s12174_s28 + $0x14c8] sm:$0xff]  ;;  %v5967_v56 = vld [vmem:[%s12174_s28 + $0x13e0] sm:$0xff] }
 0x4e0   : > { %10995 = vmatprep.subr.bf16.mxu1 %v15728_v3 }
 0x4e2   : > { %10549 = vmatpush1.bf16.msra.mxu0 %v15539_v44  ;;  %v15761_v44 = vpack.c.bf16 %v5945_v30, %v5943_v18  ;;  %v5969_v18 = vld [vmem:[%s12174_s28 + $0x14c0] sm:$0xff]  ;;  %v5972_v30 = vld [vmem:[%s12174_s28 + $0x15a8] sm:$0xff] }
 0x4e3   : > { %10997 = vmatpush1.bf16.msra.mxu1 %v15737_v22  ;;  %10551 = vmatprep.subr.bf16.mxu0 %v15542_v36  ;;  %v15764_v36 = vpack.c.bf16 %v5950_v11, %v5948_v46  ;;  %v5974_v46 = vld [vmem:[%s12174_s28 + $0x1688] sm:$0xff]  ;;  %v5971_v11 = vld [vmem:[%s12174_s28 + $0x15a0] sm:$0xff] }
 0x4e4   : > { %10999 = vmatprep.subr.bf16.mxu1 %v15740_v40 }
 0x4e6   : > { %10553 = vmatpush1.bf16.msra.mxu0 %v15551_v57  ;;  %v15773_v57 = vpack.c.bf16 %v5949_v2, %v5947_v15  ;;  %v5973_v15 = vld [vmem:[%s12174_s28 + $0x1680] sm:$0xff]  ;;  %v5976_v2 = vld [vmem:[%s12174_s28 + $0x1768] sm:$0xff] }
 0x4e7   : > { %11001 = vmatpush1.bf16.msra.mxu1 %v15749_v19  ;;  %10555 = vmatprep.subr.bf16.mxu0 %v15554_v26  ;;  %v15776_v26 = vpack.c.bf16 %v5954_v6, %v5952_v48  ;;  %v5978_v48 = vld [vmem:[%s12174_s28 + $0x1848] sm:$0xff]  ;;  %v5975_v6 = vld [vmem:[%s12174_s28 + $0x1760] sm:$0xff] }
 0x4e8   : > { %11003 = vmatprep.subr.bf16.mxu1 %v15752_v14 }
 0x4ea   : > { %10557 = vmatpush1.bf16.msra.mxu0 %v15563_v20  ;;  %v15785_v20 = vpack.c.bf16 %v5953_v32, %v5951_v13  ;;  %v5977_v13 = vld [vmem:[%s12174_s28 + $0x1840] sm:$0xff]  ;;  %v5980_v32 = vld [vmem:[%s12174_s28 + $0x1928] sm:$0xff] }
 0x4eb   : > { %11005 = vmatpush1.bf16.msra.mxu1 %v15761_v44  ;;  %10559 = vmatprep.subr.bf16.mxu0 %v15566_v10  ;;  %v15788_v10 = vpack.c.bf16 %v5958_v24, %v5956_v55  ;;  %v5982_v55 = vld [vmem:[%s12174_s28 + $0x1a08] sm:$0xff]  ;;  %v5979_v24 = vld [vmem:[%s12174_s28 + $0x1920] sm:$0xff] }
 0x4ec   : > { %11007 = vmatprep.subr.bf16.mxu1 %v15764_v36 }
 0x4ee   : > { %10561 = vmatpush1.bf16.msra.mxu0 %v15575_v33  ;;  %v15797_v33 = vpack.c.bf16 %v5957_v12, %v5955_v59  ;;  %v5981_v59 = vld [vmem:[%s12174_s28 + $0x1a00] sm:$0xff]  ;;  %v5984_v12 = vld [vmem:[%s12174_s28 + $0x1ae8] sm:$0xff] }
 0x4ef   : > { %11009 = vmatpush1.bf16.msra.mxu1 %v15773_v57  ;;  %10563 = vmatprep.subr.bf16.mxu0 %v15578_v52  ;;  %v15800_v52 = vpack.c.bf16 %v5962_v7, %v5960_v5  ;;  %v5986_v5 = vld [vmem:[%s12174_s28 + $0x1bc8] sm:$0xff]  ;;  %v5983_v7 = vld [vmem:[%s12174_s28 + $0x1ae0] sm:$0xff] }
 0x4f0   : > { %11011 = vmatprep.subr.bf16.mxu1 %v15776_v26 }
 0x4f2   : > { %10565 = vmatpush1.bf16.msra.mxu0 %v15587_v42  ;;  %v15809_v42 = vpack.c.bf16 %v5961_v60, %v5959_v54  ;;  %v5985_v54 = vld [vmem:[%s12174_s28 + $0x1bc0] sm:$0xff]  ;;  %v6063_v60 = vld [vmem:[%s12174_s28 + $0xb8] sm:$0xff] }
 0x4f3   : > { %11013 = vmatpush1.bf16.msra.mxu1 %v15785_v20  ;;  %10567 = vmatprep.subr.bf16.mxu0 %v15590_v29  ;;  %v15812_v29 = vpack.c.bf16 %v5966_v31, %v5964_v53  ;;  %v6065_v53 = vld [vmem:[%s12174_s28 + $0x198] sm:$0xff]  ;;  %v6062_v31 = vld [vmem:[%s12174_s28 + $0xb0] sm:$0xff] }
 0x4f4   : > { %11015 = vmatprep.subr.bf16.mxu1 %v15788_v10 }
 0x4f6   : > { %10569 = vmatpush1.bf16.msra.mxu0 %v15599_v45  ;;  %v15821_v45 = vpack.c.bf16 %v5965_v51, %v5963_v63  ;;  %v6064_v63 = vld [vmem:[%s12174_s28 + $0x190] sm:$0xff]  ;;  %v6067_v51 = vld [vmem:[%s12174_s28 + $0x278] sm:$0xff] }
 0x4f7   : > { %11017 = vmatpush1.bf16.msra.mxu1 %v15797_v33  ;;  %10571 = vmatprep.subr.bf16.mxu0 %v15602_v49  ;;  %v15824_v49 = vpack.c.bf16 %v5970_v34, %v5968_v39  ;;  %v6069_v39 = vld [vmem:[%s12174_s28 + $0x358] sm:$0xff] }
 0x4f8   : > { %11019 = vmatprep.subr.bf16.mxu1 %v15800_v52  ;;  %v11050_v34 = vpack.c.bf16 %v6069_v39, %v6067_v51  ;;  %v6091_v51 = vld [vmem:[%s12174_s28 + $0xcf8] sm:$0xff] }
 0x4f9   : > { %v6093_v39 = vld [vmem:[%s12174_s28 + $0xdd8] sm:$0xff] }
 0x4fa   : > { %10573 = vmatpush1.bf16.msra.mxu0 %v15611_v27  ;;  %v15833_v27 = vpack.c.bf16 %v5969_v18, %v5967_v56  ;;  %v6066_v56 = vld [vmem:[%s12174_s28 + $0x270] sm:$0xff] }
 0x4fb   : > { %11021 = vmatpush1.bf16.msra.mxu1 %v15809_v42  ;;  %10575 = vmatprep.subr.bf16.mxu0 %v15614_v0  ;;  %v15836_v0 = vpack.c.bf16 %v5974_v46, %v5972_v30  ;;  %v6068_v18 = vld [vmem:[%s12174_s28 + $0x350] sm:$0xff]  ;;  %v6071_v30 = vld [vmem:[%s12174_s28 + $0x438] sm:$0xff]  ;;  %v8382_v46 = vld [vmem:[%s17282_s1 + $0x68] sm:$0xff] }
 0x4fc   : > { %11023 = vmatprep.subr.bf16.mxu1 %v15812_v29 }
 0x4fe   : > { %10577 = vmatpush1.bf16.msra.mxu0 %v15623_v35  ;;  %v15845_v35 = vpack.c.bf16 %v5973_v15, %v5971_v11  ;;  %v6070_v15 = vld [vmem:[%s12174_s28 + $0x430] sm:$0xff] }
 0x4ff   : > { %11025 = vmatpush1.bf16.msra.mxu1 %v15821_v45  ;;  %10579 = vmatprep.subr.bf16.mxu0 %v15626_v41  ;;  %v15848_v41 = vpack.c.bf16 %v5978_v48, %v5976_v2  ;;  %v6072_v2 = vld [vmem:[%s12174_s28 + $0x510] sm:$0xff]  ;;  %v6075_v48 = vld [vmem:[%s12174_s28 + $0x5f8] sm:$0xff] }
 0x500   : > { %11027 = vmatprep.subr.bf16.mxu1 %v15824_v49 }
 0x502   : > { %10581 = vmatpush1.bf16.msra.mxu0 %v15635_v61  ;;  %v15857_v61 = vpack.c.bf16 %v5977_v13, %v5975_v6  ;;  %v6077_v6 = vld [vmem:[%s12174_s28 + $0x6d8] sm:$0xff]  ;;  %v6074_v13 = vld [vmem:[%s12174_s28 + $0x5f0] sm:$0xff] }
 0x503   : > { %11029 = vmatpush1.bf16.msra.mxu1 %v15833_v27  ;;  %10583 = vmatprep.subr.bf16.mxu0 %v15638_v23  ;;  %v15860_v23 = vpack.c.bf16 %v5982_v55, %v5980_v32  ;;  %v6076_v32 = vld [vmem:[%s12174_s28 + $0x6d0] sm:$0xff]  ;;  %v6079_v55 = vld [vmem:[%s12174_s28 + $0x7b8] sm:$0xff] }
 0x504   : > { %11031 = vmatprep.subr.bf16.mxu1 %v15836_v0 }
 0x506   : > { %10585 = vmatpush1.bf16.msra.mxu0 %v15647_v9  ;;  %v15869_v9 = vpack.c.bf16 %v5981_v59, %v5979_v24  ;;  %v6081_v24 = vld [vmem:[%s12174_s28 + $0x898] sm:$0xff]  ;;  %v6078_v59 = vld [vmem:[%s12174_s28 + $0x7b0] sm:$0xff] }
 0x507   : > { %11033 = vmatpush1.bf16.msra.mxu1 %v15845_v35  ;;  %10587 = vmatprep.subr.bf16.mxu0 %v15650_v16  ;;  %v15872_v16 = vpack.c.bf16 %v5986_v5, %v5984_v12  ;;  %v6080_v12 = vld [vmem:[%s12174_s28 + $0x890] sm:$0xff]  ;;  %v6083_v5 = vld [vmem:[%s12174_s28 + $0x978] sm:$0xff] }
 0x508   : > { %11035 = vmatprep.subr.bf16.mxu1 %v15848_v41 }
 0x50a   : > { %10589 = vmatpush1.bf16.msra.mxu0 %v15659_v4  ;;  %v15881_v4 = vpack.c.bf16 %v5985_v54, %v5983_v7  ;;  %v6085_v7 = vld [vmem:[%s12174_s28 + $0xa58] sm:$0xff]  ;;  %v6082_v54 = vld [vmem:[%s12174_s28 + $0x970] sm:$0xff] }
 0x50b   : > { %11037 = vmatpush1.bf16.msra.mxu1 %v15857_v61  ;;  %10591 = vmatprep.subr.bf16.mxu0 %v15662_v25  ;;  %v11046_v25 = vpack.c.bf16 %v6065_v53, %v6063_v60  ;;  %v6084_v60 = vld [vmem:[%s12174_s28 + $0xa50] sm:$0xff]  ;;  %v6087_v53 = vld [vmem:[%s12174_s28 + $0xb38] sm:$0xff] }
 0x50c   : > { %11039 = vmatprep.subr.bf16.mxu1 %v15860_v23 }
 0x50e   : > { %10593 = vmatpush1.bf16.msra.mxu0 %v15671_v28  ;;  %v8379_v28 = vld [vmem:[%s17282_s1 + $0x50] sm:$0xff] }
 0x50f   : > { %11041 = vmatpush1.bf16.msra.mxu1 %v15869_v9  ;;  %10595 = vmatprep.subr.bf16.mxu0 %v15674_v21  ;;  %v11048_v21 = vpack.c.bf16 %v6064_v63, %v6062_v31  ;;  %v6086_v31 = vld [vmem:[%s12174_s28 + $0xb30] sm:$0xff] }
 0x510   : > { %11043 = vmatprep.subr.bf16.mxu1 %v15872_v16  ;;  %v6088_v63 = vld [vmem:[%s12174_s28 + $0xc10] sm:$0xff] }
 0x512   : > { %10597 = vmatpush1.bf16.msra.mxu0 %v15683_v58  ;;  %v6073_v58 = vld [vmem:[%s12174_s28 + $0x518] sm:$0xff] }
 0x513   : > { %11045 = vmatpush1.bf16.msra.mxu1 %v15881_v4  ;;  %10599 = vmatprep.subr.bf16.mxu0 %v15686_v1  ;;  %v11052_v1 = vpack.c.bf16 %v6068_v18, %v6066_v56  ;;  %v11054_v11 = vpack.c.bf16 %v6073_v58, %v6071_v30  ;;  %v6097_v56 = vld [vmem:[%s12174_s28 + $0xf98] sm:$0xff]  ;;  %v6094_v18 = vld [vmem:[%s12174_s28 + $0xeb0] sm:$0xff] }
 0x514   : > { %11047 = vmatprep.subr.bf16.mxu1 %v11046_v25  ;;  %v6089_v25 = vld [vmem:[%s12174_s28 + $0xc18] sm:$0xff]  ;;  %v6096_v30 = vld [vmem:[%s12174_s28 + $0xf90] sm:$0xff] }
 0x515   : > { %5067 = vmatmul.mubr.f32.vlgmr.msra.gmra.mrb[4].mxu0 %v8379_v28  ;;  %v6099_v58 = vld [vmem:[%s12174_s28 + $0x1078] sm:$0xff] }
 0x516   : > { %10601 = vmatpush1.bf16.msra.mxu0 %v15698_v8  ;;  %6054 = vmatmul.mubr.f32.vlgmr.msra.gmra.mrb[4].mxu1 %v8379_v28  ;;  %v11056_v8 = vpack.c.bf16 %v6072_v2, %v6070_v15  ;;  %v6090_v28 = vld [vmem:[%s12174_s28 + $0xcf0] sm:$0xff]  ;;  %v6103_v15 = vld [vmem:[%s12174_s28 + $0x1238] sm:$0xff] }
 0x517   : > { %11049 = vmatpush1.bf16.msra.mxu1 %v11048_v21  ;;  %10603 = vmatprep.subr.bf16.mxu0 %v15701_v37  ;;  %v11058_v37 = vpack.c.bf16 %v6077_v6, %v6075_v48  ;;  %v6092_v21 = vld [vmem:[%s12174_s28 + $0xdd0] sm:$0xff]  ;;  %v6105_v2 = vld [vmem:[%s12174_s28 + $0x1318] sm:$0xff] }
 0x518   : > { %11051 = vmatprep.subr.bf16.mxu1 %v11050_v34  ;;  %5205 = vmatprep.mubr.f32.mxu0 %v8382_v46  ;;  %v6095_v34 = vld [vmem:[%s12174_s28 + $0xeb8] sm:$0xff]  ;;  %v6102_v48 = vld [vmem:[%s12174_s28 + $0x1230] sm:$0xff] }
 0x519   : > { %6192 = vmatprep.mubr.f32.mxu1 %v8382_v46  ;;  %v6101_v46 = vld [vmem:[%s12174_s28 + $0x1158] sm:$0xff]  ;;  %v6104_v6 = vld [vmem:[%s12174_s28 + $0x1310] sm:$0xff] }
 0x51a   : > { %10605 = vmatpush1.bf16.msra.mxu0 %v15713_v17  ;;  %v11060_v17 = vpack.c.bf16 %v6076_v32, %v6074_v13  ;;  %v6106_v13 = vld [vmem:[%s12174_s28 + $0x13f0] sm:$0xff] }
 0x51b   : > { %11053 = vmatpush1.bf16.msra.mxu1 %v11052_v1  ;;  %10607 = vmatprep.subr.bf16.mxu0 %v15716_v62  ;;  %v11062_v62 = vpack.c.bf16 %v6081_v24, %v6079_v55  ;;  %v6098_v1 = vld [vmem:[%s12174_s28 + $0x1070] sm:$0xff]  ;;  %v6111_v55 = vld [vmem:[%s12174_s28 + $0x15b8] sm:$0xff] }
 0x51c   : > { %11055 = vmatprep.subr.bf16.mxu1 %v11054_v11  ;;  %v6100_v11 = vld [vmem:[%s12174_s28 + $0x1150] sm:$0xff]  ;;  %v6113_v24 = vld [vmem:[%s12174_s28 + $0x1698] sm:$0xff] }
 0x51d   : > { %v6108_v32 = vld [vmem:[%s12174_s28 + $0x14d0] sm:$0xff] }
 0x51e   : > { %10609 = vmatpush1.bf16.msra.mxu0 %v15725_v43  ;;  %v11064_v43 = vpack.c.bf16 %v6080_v12, %v6078_v59  ;;  %v6115_v59 = vld [vmem:[%s12174_s28 + $0x1778] sm:$0xff] }
 0x51f   : > { %11057 = vmatpush1.bf16.msra.mxu1 %v11056_v8  ;;  %10611 = vmatprep.subr.bf16.mxu0 %v15728_v3  ;;  %v11066_v3 = vpack.c.bf16 %v6085_v7, %v6083_v5  ;;  %v6107_v8 = vld [vmem:[%s12174_s28 + $0x13f8] sm:$0xff]  ;;  %v6114_v5 = vld [vmem:[%s12174_s28 + $0x1770] sm:$0xff] }
 0x520   : > { %11059 = vmatprep.subr.bf16.mxu1 %v11058_v37  ;;  %v6109_v37 = vld [vmem:[%s12174_s28 + $0x14d8] sm:$0xff]  ;;  %v6116_v7 = vld [vmem:[%s12174_s28 + $0x1850] sm:$0xff] }
 0x521   : > { %v6117_v12 = vld [vmem:[%s12174_s28 + $0x1858] sm:$0xff] }
 0x522   : > { %10613 = vmatpush1.bf16.msra.mxu0 %v15737_v22  ;;  %v11068_v22 = vpack.c.bf16 %v6084_v60, %v6082_v54  ;;  %v6118_v54 = vld [vmem:[%s12174_s28 + $0x1930] sm:$0xff] }
 0x523   : > { %11061 = vmatpush1.bf16.msra.mxu1 %v11060_v17  ;;  %10615 = vmatprep.subr.bf16.mxu0 %v15740_v40  ;;  %v11070_v40 = vpack.c.bf16 %v6089_v25, %v6087_v53  ;;  %v6110_v17 = vld [vmem:[%s12174_s28 + $0x15b0] sm:$0xff]  ;;  %v6123_v53 = vld [vmem:[%s12174_s28 + $0x1af8] sm:$0xff] }
 0x524   : > { %11063 = vmatprep.subr.bf16.mxu1 %v11062_v62  ;;  %v6112_v62 = vld [vmem:[%s12174_s28 + $0x1690] sm:$0xff]  ;;  %v6125_v25 = vld [vmem:[%s12174_s28 + $0x1bd8] sm:$0xff] }
 0x525   : > { %v6120_v60 = vld [vmem:[%s12174_s28 + $0x1a10] sm:$0xff] }
 0x526   : > { %10617 = vmatpush1.bf16.msra.mxu0 %v15749_v19  ;;  %v11072_v19 = vpack.c.bf16 %v6088_v63, %v6086_v31  ;;  %v6286_v31 = vld [vmem:[%s12174_s28 + $0x78] sm:$0xff] }
 0x527   : > { %11065 = vmatpush1.bf16.msra.mxu1 %v11064_v43  ;;  %10619 = vmatprep.subr.bf16.mxu0 %v15752_v14  ;;  %v11074_v14 = vpack.c.bf16 %v6093_v39, %v6091_v51  ;;  %v6119_v43 = vld [vmem:[%s12174_s28 + $0x1938] sm:$0xff]  ;;  %v7273_v51 = vld [vmem:[%s12174_s28 + $0x88] sm:$0xff] }
 0x528   : > { %11067 = vmatprep.subr.bf16.mxu1 %v11066_v3  ;;  %v6121_v3 = vld [vmem:[%s12174_s28 + $0x1a18] sm:$0xff] }
 0x529   : > { %v6288_v63 = vld [vmem:[%s12174_s28 + $0x158] sm:$0xff] }
 0x52a   : > { %10621 = vmatpush1.bf16.msra.mxu0 %v15761_v44  ;;  %v11076_v44 = vpack.c.bf16 %v6092_v21, %v6090_v28  ;;  %v15989_v39 = vpack.c.bf16 %v6288_v63, %v6286_v31  ;;  %v7272_v28 = vld [vmem:[%s12174_s28 + $0x80] sm:$0xff]  ;;  %v6306_v31 = vld [vmem:[%s12174_s28 + $0x938] sm:$0xff] }
 0x52b   : > { %11069 = vmatpush1.bf16.msra.mxu1 %v11068_v22  ;;  %10623 = vmatprep.subr.bf16.mxu0 %v15764_v36  ;;  %v11078_v36 = vpack.c.bf16 %v6097_v56, %v6095_v34  ;;  %v11106_v22 = vpack.c.bf16 %v6125_v25, %v6123_v53  ;;  %v7274_v34 = vld [vmem:[%s12174_s28 + $0x160] sm:$0xff]  ;;  %v6290_v56 = vld [vmem:[%s12174_s28 + $0x238] sm:$0xff]  ;;  %v6301_v25 = vld [vmem:[%s12174_s28 + $0x770] sm:$0xff] }
 0x52c   : > { %11071 = vmatprep.subr.bf16.mxu1 %v11070_v40  ;;  %v6124_v40 = vld [vmem:[%s12174_s28 + $0x1bd0] sm:$0xff]  ;;  %v6308_v63 = vld [vmem:[%s12174_s28 + $0xa18] sm:$0xff] }
 0x52e   : > { %10625 = vmatpush1.bf16.msra.mxu0 %v15773_v57  ;;  %v11080_v57 = vpack.c.bf16 %v6096_v30, %v6094_v18  ;;  %v11560_v30 = vpack.c.bf16 %v7274_v34, %v7272_v28  ;;  %v6305_v28 = vld [vmem:[%s12174_s28 + $0x930] sm:$0xff]  ;;  %v7292_v34 = vld [vmem:[%s12174_s28 + $0x940] sm:$0xff] }
 0x52f   : > { %11073 = vmatpush1.bf16.msra.mxu1 %v11072_v19  ;;  %10627 = vmatprep.subr.bf16.mxu0 %v15776_v26  ;;  %v11082_v26 = vpack.c.bf16 %v6101_v46, %v6099_v58  ;;  %v6285_v19 = vld [vmem:[%s12174_s28 + $0x70] sm:$0xff] }
 0x530   : > { %11075 = vmatprep.subr.bf16.mxu1 %v11074_v14  ;;  %v6287_v14 = vld [vmem:[%s12174_s28 + $0x150] sm:$0xff] }
 0x531   : > { %v16003_v18 = vpack.c.bf16 %v6287_v14, %v6285_v19  ;;  %v6289_v46 = vld [vmem:[%s12174_s28 + $0x230] sm:$0xff]  ;;  %v16065_v14 = vpack.c.bf16 %v6308_v63, %v6306_v31 }
 0x532   : > { %10629 = vmatpush1.bf16.msra.mxu0 %v15785_v20  ;;  %v11084_v20 = vpack.c.bf16 %v6100_v11, %v6098_v1  ;;  %v7278_v1 = vld [vmem:[%s12174_s28 + $0x320] sm:$0xff]  ;;  %v6294_v11 = vld [vmem:[%s12174_s28 + $0x3f8] sm:$0xff] }
 0x533   : > { %11077 = vmatpush1.bf16.msra.mxu1 %v11076_v44  ;;  %10631 = vmatprep.subr.bf16.mxu0 %v15788_v10  ;;  %v11086_v10 = vpack.c.bf16 %v6105_v2, %v6103_v15  ;;  %v6292_v44 = vld [vmem:[%s12174_s28 + $0x318] sm:$0xff]  ;;  %v7281_v2 = vld [vmem:[%s12174_s28 + $0x408] sm:$0xff] }
 0x534   : > { %11079 = vmatprep.subr.bf16.mxu1 %v11078_v36  ;;  %v7279_v36 = vld [vmem:[%s12174_s28 + $0x328] sm:$0xff]  ;;  %v16006_v58 = vpack.c.bf16 %v6292_v44, %v6290_v56  ;;  %v6296_v15 = vld [vmem:[%s12174_s28 + $0x4d8] sm:$0xff]  ;;  %v7294_v44 = vld [vmem:[%s12174_s28 + $0xa20] sm:$0xff] }
 0x536   : > { %10633 = vmatpush1.bf16.msra.mxu0 %v15797_v33  ;;  %v11088_v33 = vpack.c.bf16 %v6104_v6, %v6102_v48 }
 0x537   : > { %11081 = vmatpush1.bf16.msra.mxu1 %v11080_v57  ;;  %10635 = vmatprep.subr.bf16.mxu0 %v15800_v52  ;;  %v11090_v52 = vpack.c.bf16 %v6109_v37, %v6107_v8  ;;  %v6291_v57 = vld [vmem:[%s12174_s28 + $0x310] sm:$0xff]  ;;  %v16023_v8 = vpack.c.bf16 %v6296_v15, %v6294_v11  ;;  %v7296_v11 = vld [vmem:[%s12174_s28 + $0xb00] sm:$0xff] }
 0x538   : > { %11083 = vmatprep.subr.bf16.mxu1 %v11082_v26  ;;  %v7276_v26 = vld [vmem:[%s12174_s28 + $0x240] sm:$0xff]  ;;  %v16020_v48 = vpack.c.bf16 %v6291_v57, %v6289_v46  ;;  %v6293_v37 = vld [vmem:[%s12174_s28 + $0x3f0] sm:$0xff]  ;;  %v11580_v57 = vpack.c.bf16 %v7294_v44, %v7292_v34  ;;  %v6328_v44 = vld [vmem:[%s12174_s28 + $0x12d8] sm:$0xff] }
 0x539   : > { %v11564_v6 = vpack.c.bf16 %v7278_v1, %v7276_v26  ;;  %v6311_v1 = vld [vmem:[%s12174_s28 + $0xbd0] sm:$0xff]  ;;  %v7310_v34 = vld [vmem:[%s12174_s28 + $0x1120] sm:$0xff] }
 0x53a   : > { %10637 = vmatpush1.bf16.msra.mxu0 %v15809_v42  ;;  %v11092_v42 = vpack.c.bf16 %v6108_v32, %v6106_v13  ;;  %v7282_v32 = vld [vmem:[%s12174_s28 + $0x4e0] sm:$0xff] }
 0x53b   : > { %11085 = vmatpush1.bf16.msra.mxu1 %v11084_v20  ;;  %10639 = vmatprep.subr.bf16.mxu0 %v15812_v29  ;;  %v11094_v29 = vpack.c.bf16 %v6113_v24, %v6111_v55  ;;  %v7283_v20 = vld [vmem:[%s12174_s28 + $0x4e8] sm:$0xff]  ;;  %v6298_v55 = vld [vmem:[%s12174_s28 + $0x5b8] sm:$0xff] }
 0x53c   : > { %11087 = vmatprep.subr.bf16.mxu1 %v11086_v10  ;;  %v8396_v10 = vld [vmem:[%s17282_s1 + $0x18] sm:$0xff]  ;;  %v11566_v13 = vpack.c.bf16 %v7283_v20, %v7281_v2  ;;  %v7298_v2 = vld [vmem:[%s12174_s28 + $0xbe0] sm:$0xff] }
 0x53d   : > { %v6300_v24 = vld [vmem:[%s12174_s28 + $0x698] sm:$0xff] }
 0x53e   : > { %10641 = vmatpush1.bf16.msra.mxu0 %v15821_v45  ;;  %v11096_v45 = vpack.c.bf16 %v6112_v62, %v6110_v17  ;;  %v6314_v20 = vld [vmem:[%s12174_s28 + $0xcb8] sm:$0xff] }
 0x53f   : > { %11089 = vmatpush1.bf16.msra.mxu1 %v11088_v33  ;;  %10643 = vmatprep.subr.bf16.mxu0 %v15824_v49  ;;  %v11098_v49 = vpack.c.bf16 %v6117_v12, %v6115_v59  ;;  %v6295_v33 = vld [vmem:[%s12174_s28 + $0x4d0] sm:$0xff]  ;;  %v16037_v59 = vpack.c.bf16 %v6300_v24, %v6298_v55  ;;  %v7300_v24 = vld [vmem:[%s12174_s28 + $0xcc0] sm:$0xff] }
 0x540   : > { %11091 = vmatprep.subr.bf16.mxu1 %v11090_v52  ;;  %v7280_v52 = vld [vmem:[%s12174_s28 + $0x400] sm:$0xff]  ;;  %v16034_v17 = vpack.c.bf16 %v6295_v33, %v6293_v37  ;;  %v6297_v12 = vld [vmem:[%s12174_s28 + $0x5b0] sm:$0xff]  ;;  %v7303_v37 = vld [vmem:[%s12174_s28 + $0xda8] sm:$0xff] }
 0x541   : > { %v11568_v62 = vpack.c.bf16 %v7282_v32, %v7280_v52  ;;  %v11584_v52 = vpack.c.bf16 %v7298_v2, %v7296_v11  ;;  %v6313_v32 = vld [vmem:[%s12174_s28 + $0xcb0] sm:$0xff]  ;;  %v7312_v11 = vld [vmem:[%s12174_s28 + $0x1200] sm:$0xff] }
 0x542   : > { %10645 = vmatpush1.bf16.msra.mxu0 %v15833_v27  ;;  %v11100_v27 = vpack.c.bf16 %v6116_v7, %v6114_v5  ;;  %v7286_v7 = vld [vmem:[%s12174_s28 + $0x6a0] sm:$0xff]  ;;  %v6315_v55 = vld [vmem:[%s12174_s28 + $0xd90] sm:$0xff] }
 0x543   : > { %11093 = vmatpush1.bf16.msra.mxu1 %v11092_v42  ;;  %10647 = vmatprep.subr.bf16.mxu0 %v15836_v0  ;;  %v11102_v0 = vpack.c.bf16 %v6121_v3, %v6119_v43  ;;  %v7285_v42 = vld [vmem:[%s12174_s28 + $0x5c8] sm:$0xff]  ;;  %v6302_v43 = vld [vmem:[%s12174_s28 + $0x778] sm:$0xff]  ;;  %v7314_v2 = vld [vmem:[%s12174_s28 + $0x12e0] sm:$0xff] }
 0x544   : > { %11095 = vmatprep.subr.bf16.mxu1 %v11094_v29  ;;  %v7287_v29 = vld [vmem:[%s12174_s28 + $0x6a8] sm:$0xff]  ;;  %v6304_v3 = vld [vmem:[%s12174_s28 + $0x858] sm:$0xff] }
 0x545   : > { %v11570_v5 = vpack.c.bf16 %v7287_v29, %v7285_v42  ;;  %v16051_v53 = vpack.c.bf16 %v6304_v3, %v6302_v43  ;;  %v7302_v29 = vld [vmem:[%s12174_s28 + $0xda0] sm:$0xff]  ;;  %v6317_v3 = vld [vmem:[%s12174_s28 + $0xe70] sm:$0xff] }
 0x546   : > { %10649 = vmatpush1.bf16.msra.mxu0 %v15845_v35  ;;  %v11104_v35 = vpack.c.bf16 %v6120_v60, %v6118_v54 }
 0x547   : > { %11097 = vmatpush1.bf16.msra.mxu1 %v11096_v45  ;;  %10651 = vmatprep.subr.bf16.mxu0 %v15848_v41  ;;  %v6122_v41 = vld [vmem:[%s12174_s28 + $0x1af0] sm:$0xff] }
 0x548   : > { %11099 = vmatprep.subr.bf16.mxu1 %v11098_v49  ;;  %v6299_v45 = vld [vmem:[%s12174_s28 + $0x690] sm:$0xff]  ;;  %v7284_v49 = vld [vmem:[%s12174_s28 + $0x5c0] sm:$0xff] }
 0x549   : > { %v16048_v54 = vpack.c.bf16 %v6299_v45, %v6297_v12  ;;  %v11572_v60 = vpack.c.bf16 %v7286_v7, %v7284_v49  ;;  %v6320_v12 = vld [vmem:[%s12174_s28 + $0xf58] sm:$0xff]  ;;  %v7305_v45 = vld [vmem:[%s12174_s28 + $0xe88] sm:$0xff]  ;;  %v11588_v7 = vpack.c.bf16 %v7302_v29, %v7300_v24  ;;  %v6329_v24 = vld [vmem:[%s12174_s28 + $0x13b0] sm:$0xff] }
 0x54a   : > { %10653 = vmatpush1.bf16.msra.mxu0 %v15857_v61  ;;  %v7275_v61 = vld [vmem:[%s12174_s28 + $0x168] sm:$0xff]  ;;  %v7316_v29 = vld [vmem:[%s12174_s28 + $0x13c0] sm:$0xff] }
 0x54b   : > { %11101 = vmatpush1.bf16.msra.mxu1 %v11100_v27  ;;  %10655 = vmatprep.subr.bf16.mxu0 %v15860_v23  ;;  %v11108_v23 = vpack.c.bf16 %v6124_v40, %v6122_v41  ;;  %v11558_v21 = vpack.c.bf16 %v7275_v61, %v7273_v51  ;;  %v7289_v27 = vld [vmem:[%s12174_s28 + $0x788] sm:$0xff]  ;;  %v7288_v41 = vld [vmem:[%s12174_s28 + $0x780] sm:$0xff] }
 0x54c   : > { %11103 = vmatprep.subr.bf16.mxu1 %v11102_v0  ;;  %v7291_v0 = vld [vmem:[%s12174_s28 + $0x868] sm:$0xff]  ;;  %v7290_v40 = vld [vmem:[%s12174_s28 + $0x860] sm:$0xff] }
 0x54d   : > { %v7293_v51 = vld [vmem:[%s12174_s28 + $0x948] sm:$0xff]  ;;  %v11576_v19 = vpack.c.bf16 %v7290_v40, %v7288_v41  ;;  %v6324_v41 = vld [vmem:[%s12174_s28 + $0x1118] sm:$0xff] }
 0x54e   : > { %10657 = vmatpush1.bf16.msra.mxu0 %v15869_v9  ;;  %v7277_v9 = vld [vmem:[%s12174_s28 + $0x248] sm:$0xff] }
 0x54f   : > { %11105 = vmatpush1.bf16.msra.mxu1 %v11104_v35  ;;  %10659 = vmatprep.subr.bf16.mxu0 %v15872_v16  ;;  %v8381_v16 = vld [vmem:[%s17282_s1 + $0x60] sm:$0xff]  ;;  %v6303_v35 = vld [vmem:[%s12174_s28 + $0x850] sm:$0xff]  ;;  %v7295_v61 = vld [vmem:[%s12174_s28 + $0xa28] sm:$0xff] }
 0x550   : > { %11107 = vmatprep.subr.bf16.mxu1 %v11106_v22  ;;  %v11574_v22 = vpack.c.bf16 %v7291_v0, %v7289_v27  ;;  %v11578_v56 = vpack.c.bf16 %v7295_v61, %v7293_v51  ;;  %v7307_v49 = vld [vmem:[%s12174_s28 + $0xf68] sm:$0xff]  ;;  %v6319_v27 = vld [vmem:[%s12174_s28 + $0xf50] sm:$0xff]  ;;  %v7304_v0 = vld [vmem:[%s12174_s28 + $0xe80] sm:$0xff] }
 0x551   : > { %v7311_v40 = vld [vmem:[%s12174_s28 + $0x1128] sm:$0xff]  ;;  %v16118_v31 = vpack.c.bf16 %v6319_v27, %v6317_v3  ;;  %v6321_v61 = vld [vmem:[%s12174_s28 + $0x1030] sm:$0xff] }
 0x552   : > { %10661 = vmatpush1.bf16.msra.mxu0 %v15881_v4  ;;  %v11562_v4 = vpack.c.bf16 %v7279_v36, %v7277_v9  ;;  %v6310_v9 = vld [vmem:[%s12174_s28 + $0xaf8] sm:$0xff]  ;;  %v7323_v3 = vld [vmem:[%s12174_s28 + $0x1668] sm:$0xff] }
 0x553   : > { %11109 = vmatpush1.bf16.msra.mxu1 %v11108_v23  ;;  %11111 = vmatprep.subr.bf16.mxu0 %v15989_v39  ;;  %v16062_v23 = vpack.c.bf16 %v6303_v35, %v6301_v25  ;;  %v6312_v36 = vld [vmem:[%s12174_s28 + $0xbd8] sm:$0xff]  ;;  %v7306_v25 = vld [vmem:[%s12174_s28 + $0xf60] sm:$0xff] }
 0x554   : > { %11559 = vmatprep.subr.bf16.mxu1 %v11558_v21  ;;  %v6307_v21 = vld [vmem:[%s12174_s28 + $0xa10] sm:$0xff]  ;;  %v16079_v26 = vpack.c.bf16 %v6312_v36, %v6310_v9  ;;  %v6322_v35 = vld [vmem:[%s12174_s28 + $0x1038] sm:$0xff]  ;;  %v11592_v63 = vpack.c.bf16 %v7306_v25, %v7304_v0  ;;  %v7313_v9 = vld [vmem:[%s12174_s28 + $0x1208] sm:$0xff] }
 0x555   : > { %5206 = vmatmul.mubr.f32.vlgmr.msra.gmra.mrb[4].mxu0 %v8381_v16  ;;  %v16076_v46 = vpack.c.bf16 %v6307_v21, %v6305_v28  ;;  %v16121_v51 = vpack.c.bf16 %v6324_v41, %v6322_v35  ;;  %v7308_v28 = vld [vmem:[%s12174_s28 + $0x1040] sm:$0xff]  ;;  %v7315_v36 = vld [vmem:[%s12174_s28 + $0x12e8] sm:$0xff]  ;;  %v6333_v25 = vld [vmem:[%s12174_s28 + $0x1570] sm:$0xff] }
 0x556   : > { %6193 = vmatmul.mubr.f32.vlgmr.msra.gmra.mrb[4].mxu1 %v8381_v16  ;;  %11113 = vmatpush1.bf16.msra.mxu0 %v16003_v18  ;;  %v7297_v16 = vld [vmem:[%s12174_s28 + $0xb08] sm:$0xff]  ;;  %v6335_v35 = vld [vmem:[%s12174_s28 + $0x1650] sm:$0xff]  ;;  %v7320_v41 = vld [vmem:[%s12174_s28 + $0x1580] sm:$0xff] }
 0x557   : > { %11561 = vmatpush1.bf16.msra.mxu1 %v11560_v30  ;;  %11115 = vmatprep.subr.bf16.mxu0 %v16006_v58  ;;  %v7299_v30 = vld [vmem:[%s12174_s28 + $0xbe8] sm:$0xff] }
 0x558   : > { %11563 = vmatprep.subr.bf16.mxu1 %v11562_v4  ;;  %6415 = vmatprep.mubr.f32.mxu0 %v8396_v10  ;;  %v6309_v4 = vld [vmem:[%s12174_s28 + $0xaf0] sm:$0xff]  ;;  %v11582_v15 = vpack.c.bf16 %v7299_v30, %v7297_v16  ;;  %v11596_v30 = vpack.c.bf16 %v7310_v34, %v7308_v28  ;;  %v7327_v28 = vld [vmem:[%s12174_s28 + $0x1828] sm:$0xff] }
 0x559   : > { %7402 = vmatprep.mubr.f32.mxu1 %v8396_v10  ;;  %v6316_v10 = vld [vmem:[%s12174_s28 + $0xd98] sm:$0xff]  ;;  %v16090_v33 = vpack.c.bf16 %v6311_v1, %v6309_v4  ;;  %v6325_v4 = vld [vmem:[%s12174_s28 + $0x11f0] sm:$0xff] }
 0x55a   : > { %11117 = vmatpush1.bf16.msra.mxu0 %v16020_v48  ;;  %v6327_v1 = vld [vmem:[%s12174_s28 + $0x12d0] sm:$0xff] }
 0x55b   : > { %11565 = vmatpush1.bf16.msra.mxu1 %v11564_v6  ;;  %11119 = vmatprep.subr.bf16.mxu0 %v16023_v8  ;;  %v7301_v6 = vld [vmem:[%s12174_s28 + $0xcc8] sm:$0xff] }
 0x55c   : > { %11567 = vmatprep.subr.bf16.mxu1 %v11566_v13  ;;  %v16093_v13 = vpack.c.bf16 %v6316_v10, %v6314_v20  ;;  %v11586_v42 = vpack.c.bf16 %v7303_v37, %v7301_v6  ;;  %v6330_v20 = vld [vmem:[%s12174_s28 + $0x13b8] sm:$0xff]  ;;  %v7317_v6 = vld [vmem:[%s12174_s28 + $0x13c8] sm:$0xff] }
 0x55d   : > { %v6332_v10 = vld [vmem:[%s12174_s28 + $0x1498] sm:$0xff]  ;;  %v7319_v37 = vld [vmem:[%s12174_s28 + $0x14a8] sm:$0xff] }
 0x55e   : > { %11121 = vmatpush1.bf16.msra.mxu0 %v16034_v17 }
 0x55f   : > { %11569 = vmatpush1.bf16.msra.mxu1 %v11568_v62  ;;  %11123 = vmatprep.subr.bf16.mxu0 %v16037_v59  ;;  %v6318_v62 = vld [vmem:[%s12174_s28 + $0xe78] sm:$0xff] }
 0x560   : > { %11571 = vmatprep.subr.bf16.mxu1 %v11570_v5  ;;  %v16104_v5 = vpack.c.bf16 %v6315_v55, %v6313_v32  ;;  %v16107_v43 = vpack.c.bf16 %v6320_v12, %v6318_v62  ;;  %v11600_v32 = vpack.c.bf16 %v7314_v2, %v7312_v11  ;;  %v16149_v55 = vpack.c.bf16 %v6332_v10, %v6330_v20  ;;  %v7318_v12 = vld [vmem:[%s12174_s28 + $0x14a0] sm:$0xff]  ;;  %v6344_v11 = vld [vmem:[%s12174_s28 + $0x19d8] sm:$0xff]  ;;  %v7331_v2 = vld [vmem:[%s12174_s28 + $0x19e8] sm:$0xff] }
 0x561   : > { %v11602_v62 = vpack.c.bf16 %v7319_v37, %v7317_v6  ;;  %v11604_v0 = vpack.c.bf16 %v7318_v12, %v7316_v29  ;;  %v6341_v37 = vld [vmem:[%s12174_s28 + $0x18f0] sm:$0xff]  ;;  %v7330_v29 = vld [vmem:[%s12174_s28 + $0x19e0] sm:$0xff]  ;;  %v6348_v12 = vld [vmem:[%s12174_s28 + $0x1b98] sm:$0xff] }
 0x562   : > { %11125 = vmatpush1.bf16.msra.mxu0 %v16048_v54 }
 0x563   : > { %11573 = vmatpush1.bf16.msra.mxu1 %v11572_v60  ;;  %11127 = vmatprep.subr.bf16.mxu0 %v16051_v53  ;;  %v11590_v60 = vpack.c.bf16 %v7307_v49, %v7305_v45  ;;  %v6334_v45 = vld [vmem:[%s12174_s28 + $0x1578] sm:$0xff] }
 0x564   : > { %11575 = vmatprep.subr.bf16.mxu1 %v11574_v22  ;;  %v7309_v22 = vld [vmem:[%s12174_s28 + $0x1048] sm:$0xff]  ;;  %v6336_v49 = vld [vmem:[%s12174_s28 + $0x1658] sm:$0xff] }
 0x565   : > { %v11594_v21 = vpack.c.bf16 %v7311_v40, %v7309_v22  ;;  %v7322_v40 = vld [vmem:[%s12174_s28 + $0x1660] sm:$0xff] }
 0x566   : > { %11129 = vmatpush1.bf16.msra.mxu0 %v16062_v23  ;;  %v11608_v34 = vpack.c.bf16 %v7322_v40, %v7320_v41  ;;  %v7332_v41 = vld [vmem:[%s12174_s28 + $0x1ac0] sm:$0xff] }
 0x567   : > { %11577 = vmatpush1.bf16.msra.mxu1 %v11576_v19  ;;  %11131 = vmatprep.subr.bf16.mxu0 %v16065_v14  ;;  %v6323_v19 = vld [vmem:[%s12174_s28 + $0x1110] sm:$0xff]  ;;  %v7334_v40 = vld [vmem:[%s12174_s28 + $0x1ba0] sm:$0xff] }
 0x568   : > { %11579 = vmatprep.subr.bf16.mxu1 %v11578_v56  ;;  %v6326_v56 = vld [vmem:[%s12174_s28 + $0x11f8] sm:$0xff]  ;;  %v16132_v16 = vpack.c.bf16 %v6323_v19, %v6321_v61  ;;  %v7325_v19 = vld [vmem:[%s12174_s28 + $0x1748] sm:$0xff] }
 0x569   : > { %v6340_v61 = vld [vmem:[%s12174_s28 + $0x1818] sm:$0xff] }
 0x56a   : > { %11133 = vmatpush1.bf16.msra.mxu0 %v16076_v46 }
 0x56b   : > { %11581 = vmatpush1.bf16.msra.mxu1 %v11580_v57  ;;  %11135 = vmatprep.subr.bf16.mxu0 %v16079_v26  ;;  %v16135_v57 = vpack.c.bf16 %v6328_v44, %v6326_v56  ;;  %v6337_v44 = vld [vmem:[%s12174_s28 + $0x1730] sm:$0xff] }
 0x56c   : > { %11583 = vmatprep.subr.bf16.mxu1 %v11582_v15  ;;  %v11598_v15 = vpack.c.bf16 %v7315_v36, %v7313_v9  ;;  %v6339_v9 = vld [vmem:[%s12174_s28 + $0x1810] sm:$0xff]  ;;  %v7324_v36 = vld [vmem:[%s12174_s28 + $0x1740] sm:$0xff] }
 0x56d   : > { %v16188_v20 = vpack.c.bf16 %v6339_v9, %v6337_v44  ;;  %v6219_v44 = vld [vmem:[%s12174_s28 + $0x60] sm:$0xff] }
 0x56e   : > { %11137 = vmatpush1.bf16.msra.mxu0 %v16090_v33  ;;  %v6221_v9 = vld [vmem:[%s12174_s28 + $0x140] sm:$0xff] }
 0x56f   : > { %11585 = vmatpush1.bf16.msra.mxu1 %v11584_v52  ;;  %11139 = vmatprep.subr.bf16.mxu0 %v16093_v13  ;;  %v16146_v52 = vpack.c.bf16 %v6327_v1, %v6325_v4  ;;  %v7326_v4 = vld [vmem:[%s12174_s28 + $0x1820] sm:$0xff]  ;;  %v6342_v1 = vld [vmem:[%s12174_s28 + $0x18f8] sm:$0xff] }
 0x570   : > { %11587 = vmatprep.subr.bf16.mxu1 %v11586_v42  ;;  %v6331_v42 = vld [vmem:[%s12174_s28 + $0x1490] sm:$0xff]  ;;  %v11612_v10 = vpack.c.bf16 %v7326_v4, %v7324_v36  ;;  %v16191_v6 = vpack.c.bf16 %v6344_v11, %v6342_v1  ;;  %v6224_v36 = vld [vmem:[%s12174_s28 + $0x228] sm:$0xff]  ;;  %v11176_v1 = vpack.c.bf16 %v6221_v9, %v6219_v44  ;;  %v6243_v9 = vld [vmem:[%s12174_s28 + $0xae0] sm:$0xff] }
 0x571   : > { %v16160_v27 = vpack.c.bf16 %v6331_v42, %v6329_v24  ;;  %v7328_v24 = vld [vmem:[%s12174_s28 + $0x1900] sm:$0xff]  ;;  %v8395_v4 = vld [vmem:[%s17282_s1 + $0x10] sm:$0xff]  ;;  %v6246_v44 = vld [vmem:[%s12174_s28 + $0xbc8] sm:$0xff] }
 0x572   : > { %11141 = vmatpush1.bf16.msra.mxu0 %v16104_v5 }
 0x573   : > { %11589 = vmatpush1.bf16.msra.mxu1 %v11588_v7  ;;  %11143 = vmatprep.subr.bf16.mxu0 %v16107_v43  ;;  %v7321_v7 = vld [vmem:[%s12174_s28 + $0x1588] sm:$0xff] }
 0x574   : > { %11591 = vmatprep.subr.bf16.mxu1 %v11590_v60  ;;  %v16163_v60 = vpack.c.bf16 %v6336_v49, %v6334_v45  ;;  %v11606_v22 = vpack.c.bf16 %v7323_v3, %v7321_v7  ;;  %v7333_v45 = vld [vmem:[%s12174_s28 + $0x1ac8] sm:$0xff]  ;;  %v11616_v3 = vpack.c.bf16 %v7330_v29, %v7328_v24  ;;  %v6227_v29 = vld [vmem:[%s12174_s28 + $0x3e0] sm:$0xff] }
 0x575   : > { %v7335_v49 = vld [vmem:[%s12174_s28 + $0x1ba8] sm:$0xff] }
 0x576   : > { %11145 = vmatpush1.bf16.msra.mxu0 %v16118_v31 }
 0x577   : > { %11593 = vmatpush1.bf16.msra.mxu1 %v11592_v63  ;;  %11147 = vmatprep.subr.bf16.mxu0 %v16121_v51  ;;  %v6338_v63 = vld [vmem:[%s12174_s28 + $0x1738] sm:$0xff] }
 0x578   : > { %11595 = vmatprep.subr.bf16.mxu1 %v11594_v21  ;;  %v16174_v21 = vpack.c.bf16 %v6335_v35, %v6333_v25  ;;  %v16177_v56 = vpack.c.bf16 %v6340_v61, %v6338_v63  ;;  %v6345_v25 = vld [vmem:[%s12174_s28 + $0x1ab0] sm:$0xff]  ;;  %v6220_v63 = vld [vmem:[%s12174_s28 + $0x68] sm:$0xff] }
 0x579   : > { %v6347_v35 = vld [vmem:[%s12174_s28 + $0x1b90] sm:$0xff]  ;;  %v6222_v61 = vld [vmem:[%s12174_s28 + $0x148] sm:$0xff] }
 0x57a   : > { %11149 = vmatpush1.bf16.msra.mxu0 %v16132_v16 }
 0x57b   : > { %11597 = vmatpush1.bf16.msra.mxu1 %v11596_v30  ;;  %11151 = vmatprep.subr.bf16.mxu0 %v16135_v57  ;;  %v11610_v30 = vpack.c.bf16 %v7327_v28, %v7325_v19  ;;  %v16214_v19 = vpack.c.bf16 %v6347_v35, %v6345_v25  ;;  %v11620_v28 = vpack.c.bf16 %v7334_v40, %v7332_v41  ;;  %v6236_v25 = vld [vmem:[%s12174_s28 + $0x768] sm:$0xff]  ;;  %v6235_v41 = vld [vmem:[%s12174_s28 + $0x760] sm:$0xff] }
 0x57c   : > { %11599 = vmatprep.subr.bf16.mxu1 %v11598_v15  ;;  %v7329_v15 = vld [vmem:[%s12174_s28 + $0x1908] sm:$0xff] }
 0x57d   : > { %v11614_v42 = vpack.c.bf16 %v7331_v2, %v7329_v15  ;;  %v6223_v15 = vld [vmem:[%s12174_s28 + $0x220] sm:$0xff]  ;;  %v6240_v40 = vld [vmem:[%s12174_s28 + $0x928] sm:$0xff] }
 0x57e   : > { %11153 = vmatpush1.bf16.msra.mxu0 %v16146_v52  ;;  %v6225_v2 = vld [vmem:[%s12174_s28 + $0x300] sm:$0xff] }
 0x57f   : > { %11601 = vmatpush1.bf16.msra.mxu1 %v11600_v32  ;;  %11155 = vmatprep.subr.bf16.mxu0 %v16149_v55  ;;  %v6343_v32 = vld [vmem:[%s12174_s28 + $0x19d0] sm:$0xff]  ;;  %v11180_v24 = vpack.c.bf16 %v6225_v2, %v6223_v15  ;;  %v6252_v15 = vld [vmem:[%s12174_s28 + $0xe68] sm:$0xff] }
 0x580   : > { %11603 = vmatprep.subr.bf16.mxu1 %v11602_v62  ;;  %v6346_v62 = vld [vmem:[%s12174_s28 + $0x1ab8] sm:$0xff]  ;;  %v16202_v7 = vpack.c.bf16 %v6343_v32, %v6341_v37  ;;  %v6230_v37 = vld [vmem:[%s12174_s28 + $0x4c8] sm:$0xff] }
 0x581   : > { %v6284_v32 = vld [vmem:[%s17282_s1 + $0x8] sm:$0xff] }
 0x582   : > { %11157 = vmatpush1.bf16.msra.mxu0 %v16160_v27  ;;  %v6254_v2 = vld [vmem:[%s12174_s28 + $0xf48] sm:$0xff] }
 0x583   : > { %11605 = vmatpush1.bf16.msra.mxu1 %v11604_v0  ;;  %11159 = vmatprep.subr.bf16.mxu0 %v16163_v60  ;;  %v16205_v0 = vpack.c.bf16 %v6348_v12, %v6346_v62  ;;  %v6232_v62 = vld [vmem:[%s12174_s28 + $0x5a8] sm:$0xff] }
 0x584   : > { %11607 = vmatprep.subr.bf16.mxu1 %v11606_v22  ;;  %v11618_v22 = vpack.c.bf16 %v7335_v49, %v7333_v45  ;;  %v6234_v12 = vld [vmem:[%s12174_s28 + $0x688] sm:$0xff]  ;;  %v6231_v49 = vld [vmem:[%s12174_s28 + $0x5a0] sm:$0xff] }
 0x586   : > { %11161 = vmatpush1.bf16.msra.mxu0 %v16174_v21 }
 0x587   : > { %11609 = vmatpush1.bf16.msra.mxu1 %v11608_v34  ;;  %11163 = vmatprep.subr.bf16.mxu0 %v16177_v56  ;;  %v11174_v34 = vpack.c.bf16 %v6222_v61, %v6220_v63  ;;  %v6242_v63 = vld [vmem:[%s12174_s28 + $0xa08] sm:$0xff]  ;;  %v6239_v61 = vld [vmem:[%s12174_s28 + $0x920] sm:$0xff] }
 0x588   : > { %11611 = vmatprep.subr.bf16.mxu1 %v11610_v30  ;;  %v6226_v30 = vld [vmem:[%s12174_s28 + $0x308] sm:$0xff] }
 0x589   : > { %v11178_v11 = vpack.c.bf16 %v6226_v30, %v6224_v36  ;;  %v6245_v36 = vld [vmem:[%s12174_s28 + $0xbc0] sm:$0xff]  ;;  %v6248_v30 = vld [vmem:[%s12174_s28 + $0xca8] sm:$0xff] }
 0x58a   : > { %11165 = vmatpush1.bf16.msra.mxu0 %v16188_v20 }
 0x58b   : > { %11613 = vmatpush1.bf16.msra.mxu1 %v11612_v10  ;;  %11167 = vmatprep.subr.bf16.mxu0 %v16191_v6  ;;  %v6228_v10 = vld [vmem:[%s12174_s28 + $0x3e8] sm:$0xff] }
 0x58c   : > { %11615 = vmatprep.subr.bf16.mxu1 %v11614_v42  ;;  %v11182_v42 = vpack.c.bf16 %v6230_v37, %v6228_v10  ;;  %v6251_v10 = vld [vmem:[%s12174_s28 + $0xe60] sm:$0xff] }
 0x58d   : > { %v6253_v37 = vld [vmem:[%s12174_s28 + $0xf40] sm:$0xff] }
 0x58e   : > { %11169 = vmatpush1.bf16.msra.mxu0 %v16202_v7 }
 0x58f   : > { %11617 = vmatpush1.bf16.msra.mxu1 %v11616_v3  ;;  %11171 = vmatprep.subr.bf16.mxu0 %v16205_v0  ;;  %v6233_v3 = vld [vmem:[%s12174_s28 + $0x680] sm:$0xff] }
 0x590   : > { %11619 = vmatprep.subr.bf16.mxu1 %v11618_v22  ;;  %v11188_v35 = vpack.c.bf16 %v6233_v3, %v6231_v49  ;;  %v6237_v22 = vld [vmem:[%s12174_s28 + $0x840] sm:$0xff]  ;;  %v6266_v49 = vld [vmem:[%s12174_s28 + $0x1488] sm:$0xff] }
 0x591   : > { %v6263_v3 = vld [vmem:[%s12174_s28 + $0x13a0] sm:$0xff] }
 0x592   : > { %11173 = vmatpush1.bf16.msra.mxu0 %v16214_v19 }
 0x593   : > { %11621 = vmatpush1.bf16.msra.mxu1 %v11620_v28  ;;  %11175 = vmatprep.subr.bf16.mxu0 %v11174_v34  ;;  %v6241_v28 = vld [vmem:[%s12174_s28 + $0xa00] sm:$0xff]  ;;  %v6244_v34 = vld [vmem:[%s12174_s28 + $0xae8] sm:$0xff] }
 0x594   : > { %11623 = vmatprep.subr.bf16.mxu1 %v15989_v39  ;;  %v6229_v39 = vld [vmem:[%s12174_s28 + $0x4c0] sm:$0xff] }
 0x595   : > { %6416 = vmatmul.mubr.f32.vlgmr.msra.gmra.mrb[6].mxu0 %v8395_v4  ;;  %v11184_v45 = vpack.c.bf16 %v6229_v39, %v6227_v29  ;;  %v6257_v29 = vld [vmem:[%s12174_s28 + $0x1100] sm:$0xff]  ;;  %v6260_v39 = vld [vmem:[%s12174_s28 + $0x11e8] sm:$0xff] }
 0x596   : > { %11177 = vmatpush1.bf16.msra.mxu0 %v11176_v1  ;;  %7403 = vmatmul.mubr.f32.vlgmr.msra.gmra.mrb[6].mxu1 %v8395_v4  ;;  %v6250_v4 = vld [vmem:[%s12174_s28 + $0xd88] sm:$0xff]  ;;  %v6247_v1 = vld [vmem:[%s12174_s28 + $0xca0] sm:$0xff] }
 0x597   : > { %11625 = vmatpush1.bf16.msra.mxu1 %v16003_v18  ;;  %11179 = vmatprep.subr.bf16.mxu0 %v11178_v11  ;;  %v11186_v18 = vpack.c.bf16 %v6234_v12, %v6232_v62  ;;  %v6249_v11 = vld [vmem:[%s12174_s28 + $0xd80] sm:$0xff]  ;;  %v6262_v62 = vld [vmem:[%s12174_s28 + $0x12c8] sm:$0xff] }
 0x598   : > { %11627 = vmatprep.subr.bf16.mxu1 %v16006_v58  ;;  %6486 = vmatprep.mubr.f32.mxu0 %v6284_v32  ;;  %v6238_v58 = vld [vmem:[%s12174_s28 + $0x848] sm:$0xff]  ;;  %v6259_v12 = vld [vmem:[%s12174_s28 + $0x11e0] sm:$0xff] }
 0x599   : > { %7473 = vmatprep.mubr.f32.mxu1 %v6284_v32  ;;  %v6256_v32 = vld [vmem:[%s12174_s28 + $0x1028] sm:$0xff] }
 0x59a   : > { %11181 = vmatpush1.bf16.msra.mxu0 %v11180_v24  ;;  %v6258_v24 = vld [vmem:[%s12174_s28 + $0x1108] sm:$0xff] }
 0x59b   : > { %11629 = vmatpush1.bf16.msra.mxu1 %v16020_v48  ;;  %11183 = vmatprep.subr.bf16.mxu0 %v11182_v42  ;;  %v11190_v48 = vpack.c.bf16 %v6238_v58, %v6236_v25  ;;  %v6255_v42 = vld [vmem:[%s12174_s28 + $0x1020] sm:$0xff]  ;;  %v6268_v58 = vld [vmem:[%s12174_s28 + $0x1568] sm:$0xff] }
 0x59c   : > { %11631 = vmatprep.subr.bf16.mxu1 %v16023_v8  ;;  %v11192_v8 = vpack.c.bf16 %v6237_v22, %v6235_v41  ;;  %v6265_v25 = vld [vmem:[%s12174_s28 + $0x1480] sm:$0xff]  ;;  %v6272_v22 = vld [vmem:[%s12174_s28 + $0x1728] sm:$0xff] }
 0x59d   : > { %v6269_v41 = vld [vmem:[%s12174_s28 + $0x1640] sm:$0xff] }
 0x59e   : > { %11185 = vmatpush1.bf16.msra.mxu0 %v11184_v45  ;;  %v6261_v45 = vld [vmem:[%s12174_s28 + $0x12c0] sm:$0xff] }
 0x59f   : > { %11633 = vmatpush1.bf16.msra.mxu1 %v16034_v17  ;;  %11187 = vmatprep.subr.bf16.mxu0 %v11186_v18  ;;  %v11194_v17 = vpack.c.bf16 %v6242_v63, %v6240_v40  ;;  %v6264_v18 = vld [vmem:[%s12174_s28 + $0x13a8] sm:$0xff]  ;;  %v6271_v63 = vld [vmem:[%s12174_s28 + $0x1720] sm:$0xff] }
 0x5a0   : > { %11635 = vmatprep.subr.bf16.mxu1 %v16037_v59  ;;  %v11196_v59 = vpack.c.bf16 %v6241_v28, %v6239_v61  ;;  %v6274_v40 = vld [vmem:[%s12174_s28 + $0x1808] sm:$0xff]  ;;  %v6275_v28 = vld [vmem:[%s12174_s28 + $0x18e0] sm:$0xff] }
 0x5a1   : > { %v6278_v61 = vld [vmem:[%s12174_s28 + $0x19c8] sm:$0xff] }
 0x5a2   : > { %11189 = vmatpush1.bf16.msra.mxu0 %v11188_v35  ;;  %v6270_v35 = vld [vmem:[%s12174_s28 + $0x1648] sm:$0xff] }
 0x5a3   : > { %11637 = vmatpush1.bf16.msra.mxu1 %v16048_v54  ;;  %11191 = vmatprep.subr.bf16.mxu0 %v11190_v48  ;;  %v11198_v54 = vpack.c.bf16 %v6246_v44, %v6244_v34  ;;  %v6267_v48 = vld [vmem:[%s12174_s28 + $0x1560] sm:$0xff]  ;;  %v6280_v44 = vld [vmem:[%s12174_s28 + $0x1aa8] sm:$0xff] }
 0x5a4   : > { %11639 = vmatprep.subr.bf16.mxu1 %v16051_v53  ;;  %v11200_v53 = vpack.c.bf16 %v6245_v36, %v6243_v9  ;;  %v6277_v34 = vld [vmem:[%s12174_s28 + $0x19c0] sm:$0xff]  ;;  %v6494_v36 = vld [vmem:[%s12174_s28 + $0x88] sm:$0xff] }
 0x5a5   : > { %v6281_v9 = vld [vmem:[%s12174_s28 + $0x1b80] sm:$0xff] }
 0x5a6   : > { %11193 = vmatpush1.bf16.msra.mxu0 %v11192_v8  ;;  %v6273_v8 = vld [vmem:[%s12174_s28 + $0x1800] sm:$0xff] }
 0x5a7   : > { %11641 = vmatpush1.bf16.msra.mxu1 %v16062_v23  ;;  %11195 = vmatprep.subr.bf16.mxu0 %v11194_v17  ;;  %v11202_v23 = vpack.c.bf16 %v6250_v4, %v6248_v30  ;;  %v6276_v17 = vld [vmem:[%s12174_s28 + $0x18e8] sm:$0xff]  ;;  %v7481_v30 = vld [vmem:[%s12174_s28 + $0x98] sm:$0xff] }
 0x5a8   : > { %11643 = vmatprep.subr.bf16.mxu1 %v16065_v14  ;;  %v11204_v14 = vpack.c.bf16 %v6249_v11, %v6247_v1  ;;  %v7483_v4 = vld [vmem:[%s12174_s28 + $0x178] sm:$0xff]  ;;  %v6495_v1 = vld [vmem:[%s12174_s28 + $0x160] sm:$0xff]  ;;  %v7480_v11 = vld [vmem:[%s12174_s28 + $0x90] sm:$0xff] }
 0x5aa   : > { %11197 = vmatpush1.bf16.msra.mxu0 %v11196_v59  ;;  %v11232_v59 = vpack.c.bf16 %v6277_v34, %v6275_v28 }
 0x5ab   : > { %11645 = vmatpush1.bf16.msra.mxu1 %v16076_v46  ;;  %11199 = vmatprep.subr.bf16.mxu0 %v11198_v54  ;;  %v11206_v46 = vpack.c.bf16 %v6254_v2, %v6252_v15  ;;  %v6279_v54 = vld [vmem:[%s12174_s28 + $0x1aa0] sm:$0xff]  ;;  %v7482_v15 = vld [vmem:[%s12174_s28 + $0x170] sm:$0xff]  ;;  %v6498_v2 = vld [vmem:[%s12174_s28 + $0x248] sm:$0xff] }
 0x5ac   : > { %11647 = vmatprep.subr.bf16.mxu1 %v16079_v26  ;;  %v11208_v26 = vpack.c.bf16 %v6253_v37, %v6251_v10  ;;  %v6283_v10 = vld [vmem:[%s17282_s1] sm:$0xff] }
 0x5ae   : > { %11201 = vmatpush1.bf16.msra.mxu0 %v11200_v53  ;;  %v11236_v53 = vpack.c.bf16 %v6281_v9, %v6279_v54  ;;  %v7498_v9 = vld [vmem:[%s12174_s28 + $0x870] sm:$0xff] }
 0x5af   : > { %11649 = vmatpush1.bf16.msra.mxu1 %v16090_v33  ;;  %11203 = vmatprep.subr.bf16.mxu0 %v11202_v23  ;;  %v11210_v33 = vpack.c.bf16 %v6258_v24, %v6256_v32  ;;  %v6493_v23 = vld [vmem:[%s12174_s28 + $0x80] sm:$0xff] }
 0x5b0   : > { %11651 = vmatprep.subr.bf16.mxu1 %v16093_v13  ;;  %v11212_v13 = vpack.c.bf16 %v6257_v29, %v6255_v42  ;;  %v11240_v37 = vpack.c.bf16 %v6495_v1, %v6493_v23  ;;  %v6497_v24 = vld [vmem:[%s12174_s28 + $0x240] sm:$0xff]  ;;  %v7486_v29 = vld [vmem:[%s12174_s28 + $0x330] sm:$0xff] }
 0x5b1   : > { %v6513_v1 = vld [vmem:[%s12174_s28 + $0x940] sm:$0xff] }
 0x5b2   : > { %11205 = vmatpush1.bf16.msra.mxu0 %v11204_v14  ;;  %v6500_v14 = vld [vmem:[%s12174_s28 + $0x328] sm:$0xff] }
 0x5b3   : > { %11653 = vmatpush1.bf16.msra.mxu1 %v16104_v5  ;;  %11207 = vmatprep.subr.bf16.mxu0 %v11206_v46  ;;  %v11214_v5 = vpack.c.bf16 %v6262_v62, %v6260_v39  ;;  %v7485_v46 = vld [vmem:[%s12174_s28 + $0x258] sm:$0xff]  ;;  %v11242_v32 = vpack.c.bf16 %v6500_v14, %v6498_v2  ;;  %v6502_v39 = vld [vmem:[%s12174_s28 + $0x408] sm:$0xff]  ;;  %v7502_v14 = vld [vmem:[%s12174_s28 + $0xa30] sm:$0xff] }
 0x5b4   : > { %11655 = vmatprep.subr.bf16.mxu1 %v16107_v43  ;;  %v11216_v43 = vpack.c.bf16 %v6261_v45, %v6259_v12  ;;  %v6504_v62 = vld [vmem:[%s12174_s28 + $0x4e8] sm:$0xff] }
 0x5b6   : > { %11209 = vmatpush1.bf16.msra.mxu0 %v11208_v26  ;;  %v6499_v26 = vld [vmem:[%s12174_s28 + $0x320] sm:$0xff] }
 0x5b7   : > { %11657 = vmatpush1.bf16.msra.mxu1 %v16118_v31  ;;  %11211 = vmatprep.subr.bf16.mxu0 %v11210_v33  ;;  %v11218_v31 = vpack.c.bf16 %v6266_v49, %v6264_v18  ;;  %v7484_v33 = vld [vmem:[%s12174_s28 + $0x250] sm:$0xff]  ;;  %v11244_v12 = vpack.c.bf16 %v6499_v26, %v6497_v24  ;;  %v11246_v18 = vpack.c.bf16 %v6504_v62, %v6502_v39  ;;  %v6501_v49 = vld [vmem:[%s12174_s28 + $0x400] sm:$0xff] }
 0x5b8   : > { %11659 = vmatprep.subr.bf16.mxu1 %v16121_v51  ;;  %v11220_v51 = vpack.c.bf16 %v6265_v25, %v6263_v3  ;;  %v16352_v45 = vpack.c.bf16 %v7486_v29, %v7484_v33  ;;  %v7490_v25 = vld [vmem:[%s12174_s28 + $0x4f0] sm:$0xff]  ;;  %v6517_v33 = vld [vmem:[%s12174_s28 + $0xb00] sm:$0xff] }
 0x5b9   : > { %v6519_v29 = vld [vmem:[%s12174_s28 + $0xbe0] sm:$0xff]  ;;  %v7504_v39 = vld [vmem:[%s12174_s28 + $0xb10] sm:$0xff] }
 0x5ba   : > { %11213 = vmatpush1.bf16.msra.mxu0 %v11212_v13  ;;  %v7491_v13 = vld [vmem:[%s12174_s28 + $0x4f8] sm:$0xff] }
 0x5bb   : > { %11661 = vmatpush1.bf16.msra.mxu1 %v16132_v16  ;;  %11215 = vmatprep.subr.bf16.mxu0 %v11214_v5  ;;  %v11222_v16 = vpack.c.bf16 %v6270_v35, %v6268_v58  ;;  %v8398_v5 = vld [vmem:[%s17282_s1 + $0x28] sm:$0xff] }
 0x5bc   : > { %11663 = vmatprep.subr.bf16.mxu1 %v16135_v57  ;;  %v11224_v57 = vpack.c.bf16 %v6269_v41, %v6267_v48  ;;  %v6506_v58 = vld [vmem:[%s12174_s28 + $0x5c8] sm:$0xff] }
 0x5bd   : > { %v6508_v35 = vld [vmem:[%s12174_s28 + $0x6a8] sm:$0xff] }
 0x5be   : > { %11217 = vmatpush1.bf16.msra.mxu0 %v11216_v43  ;;  %v6503_v43 = vld [vmem:[%s12174_s28 + $0x4e0] sm:$0xff] }
 0x5bf   : > { %11665 = vmatpush1.bf16.msra.mxu1 %v16146_v52  ;;  %11219 = vmatprep.subr.bf16.mxu0 %v11218_v31  ;;  %v11226_v52 = vpack.c.bf16 %v6274_v40, %v6272_v22  ;;  %v7488_v31 = vld [vmem:[%s12174_s28 + $0x410] sm:$0xff]  ;;  %v11248_v48 = vpack.c.bf16 %v6503_v43, %v6501_v49  ;;  %v11250_v22 = vpack.c.bf16 %v6508_v35, %v6506_v58  ;;  %v6505_v40 = vld [vmem:[%s12174_s28 + $0x5c0] sm:$0xff] }
 0x5c0   : > { %11667 = vmatprep.subr.bf16.mxu1 %v16149_v55  ;;  %v11228_v55 = vpack.c.bf16 %v6273_v8, %v6271_v63  ;;  %v16366_v41 = vpack.c.bf16 %v7490_v25, %v7488_v31  ;;  %v7494_v8 = vld [vmem:[%s12174_s28 + $0x6b0] sm:$0xff]  ;;  %v11264_v49 = vpack.c.bf16 %v6519_v29, %v6517_v33  ;;  %v6521_v25 = vld [vmem:[%s12174_s28 + $0xcc0] sm:$0xff] }
 0x5c1   : > { %v6523_v58 = vld [vmem:[%s12174_s28 + $0xda0] sm:$0xff]  ;;  %v7508_v35 = vld [vmem:[%s12174_s28 + $0xcd0] sm:$0xff] }
 0x5c2   : > { %11221 = vmatpush1.bf16.msra.mxu0 %v11220_v51  ;;  %v7493_v51 = vld [vmem:[%s12174_s28 + $0x5d8] sm:$0xff]  ;;  %v6535_v33 = vld [vmem:[%s12174_s28 + $0x12e0] sm:$0xff]  ;;  %v7520_v29 = vld [vmem:[%s12174_s28 + $0x1210] sm:$0xff] }
 0x5c3   : > { %11669 = vmatpush1.bf16.msra.mxu1 %v16160_v27  ;;  %11223 = vmatprep.subr.bf16.mxu0 %v11222_v16  ;;  %v11230_v27 = vpack.c.bf16 %v6278_v61, %v6276_v17  ;;  %v7495_v16 = vld [vmem:[%s12174_s28 + $0x6b8] sm:$0xff]  ;;  %v6510_v17 = vld [vmem:[%s12174_s28 + $0x788] sm:$0xff] }
 0x5c4   : > { %11671 = vmatprep.subr.bf16.mxu1 %v16163_v60  ;;  %v6282_v60 = vld [vmem:[%s12174_s28 + $0x1b88] sm:$0xff]  ;;  %v16372_v63 = vpack.c.bf16 %v7495_v16, %v7493_v51  ;;  %v7510_v16 = vld [vmem:[%s12174_s28 + $0xdb0] sm:$0xff] }
 0x5c5   : > { %v6512_v61 = vld [vmem:[%s12174_s28 + $0x868] sm:$0xff] }
 0x5c6   : > { %11225 = vmatpush1.bf16.msra.mxu0 %v11224_v57  ;;  %v6507_v57 = vld [vmem:[%s12174_s28 + $0x6a0] sm:$0xff] }
 0x5c7   : > { %11673 = vmatpush1.bf16.msra.mxu1 %v16174_v21  ;;  %11227 = vmatprep.subr.bf16.mxu0 %v11226_v52  ;;  %v11234_v21 = vpack.c.bf16 %v6282_v60, %v6280_v44  ;;  %v7492_v52 = vld [vmem:[%s12174_s28 + $0x5d0] sm:$0xff]  ;;  %v11252_v28 = vpack.c.bf16 %v6507_v57, %v6505_v40  ;;  %v11254_v44 = vpack.c.bf16 %v6512_v61, %v6510_v17  ;;  %v6509_v60 = vld [vmem:[%s12174_s28 + $0x780] sm:$0xff]  ;;  %v7513_v40 = vld [vmem:[%s12174_s28 + $0xe98] sm:$0xff] }
 0x5c8   : > { %11675 = vmatprep.subr.bf16.mxu1 %v16177_v56  ;;  %v6496_v56 = vld [vmem:[%s12174_s28 + $0x168] sm:$0xff]  ;;  %v16380_v34 = vpack.c.bf16 %v7494_v8, %v7492_v52  ;;  %v7515_v57 = vld [vmem:[%s12174_s28 + $0xf78] sm:$0xff]  ;;  %v11268_v52 = vpack.c.bf16 %v6523_v58, %v6521_v25  ;;  %v16436_v8 = vpack.c.bf16 %v7510_v16, %v7508_v35  ;;  %v6525_v61 = vld [vmem:[%s12174_s28 + $0xe80] sm:$0xff] }
 0x5c9   : > { %v6537_v58 = vld [vmem:[%s12174_s28 + $0x13c0] sm:$0xff]  ;;  %v7524_v16 = vld [vmem:[%s12174_s28 + $0x13d0] sm:$0xff] }
 0x5ca   : > { %11229 = vmatpush1.bf16.msra.mxu0 %v11228_v55  ;;  %v7497_v55 = vld [vmem:[%s12174_s28 + $0x798] sm:$0xff]  ;;  %v6539_v35 = vld [vmem:[%s12174_s28 + $0x14a0] sm:$0xff] }
 0x5cb   : > { %11677 = vmatpush1.bf16.msra.mxu1 %v16188_v20  ;;  %11231 = vmatprep.subr.bf16.mxu0 %v11230_v27  ;;  %v11238_v20 = vpack.c.bf16 %v6496_v56, %v6494_v36  ;;  %v7499_v27 = vld [vmem:[%s12174_s28 + $0x878] sm:$0xff]  ;;  %v6514_v36 = vld [vmem:[%s12174_s28 + $0x948] sm:$0xff] }
 0x5cc   : > { %11679 = vmatprep.subr.bf16.mxu1 %v16191_v6  ;;  %v16324_v6 = vpack.c.bf16 %v7483_v4, %v7481_v30  ;;  %v16386_v54 = vpack.c.bf16 %v7499_v27, %v7497_v55  ;;  %v6516_v56 = vld [vmem:[%s12174_s28 + $0xa28] sm:$0xff]  ;;  %v7501_v30 = vld [vmem:[%s12174_s28 + $0x958] sm:$0xff]  ;;  %v6527_v55 = vld [vmem:[%s12174_s28 + $0xf60] sm:$0xff] }
 0x5cd   : > { %v7503_v4 = vld [vmem:[%s12174_s28 + $0xa38] sm:$0xff]  ;;  %v11258_v23 = vpack.c.bf16 %v6516_v56, %v6514_v36  ;;  %v7512_v27 = vld [vmem:[%s12174_s28 + $0xe90] sm:$0xff]  ;;  %v11272_v36 = vpack.c.bf16 %v6527_v55, %v6525_v61  ;;  %v11284_v61 = vpack.c.bf16 %v6539_v35, %v6537_v58 }
 0x5ce   : > { %11233 = vmatpush1.bf16.msra.mxu0 %v11232_v59  ;;  %v6511_v59 = vld [vmem:[%s12174_s28 + $0x860] sm:$0xff]  ;;  %v16400_v2 = vpack.c.bf16 %v7503_v4, %v7501_v30  ;;  %v7538_v35 = vld [vmem:[%s12174_s28 + $0x19f0] sm:$0xff] }
 0x5cf   : > { %11681 = vmatpush1.bf16.msra.mxu1 %v16202_v7  ;;  %11235 = vmatprep.subr.bf16.mxu0 %v11234_v21  ;;  %v7487_v7 = vld [vmem:[%s12174_s28 + $0x338] sm:$0xff]  ;;  %v7496_v21 = vld [vmem:[%s12174_s28 + $0x790] sm:$0xff]  ;;  %v6529_v4 = vld [vmem:[%s12174_s28 + $0x1040] sm:$0xff] }
 0x5d0   : > { %11683 = vmatprep.subr.bf16.mxu1 %v16205_v0  ;;  %v16335_v0 = vpack.c.bf16 %v7482_v15, %v7480_v11  ;;  %v16341_v42 = vpack.c.bf16 %v7487_v7, %v7485_v46  ;;  %v6515_v11 = vld [vmem:[%s12174_s28 + $0xa20] sm:$0xff]  ;;  %v7500_v15 = vld [vmem:[%s12174_s28 + $0x950] sm:$0xff]  ;;  %v6518_v46 = vld [vmem:[%s12174_s28 + $0xb08] sm:$0xff] }
 0x5d1   : > { %v6520_v7 = vld [vmem:[%s12174_s28 + $0xbe8] sm:$0xff]  ;;  %v16408_v24 = vpack.c.bf16 %v7502_v14, %v7500_v15 }
 0x5d2   : > { %11237 = vmatpush1.bf16.msra.mxu0 %v11236_v53  ;;  %v11256_v53 = vpack.c.bf16 %v6511_v59, %v6509_v60  ;;  %v11262_v26 = vpack.c.bf16 %v6520_v7, %v6518_v46  ;;  %v6530_v60 = vld [vmem:[%s12174_s28 + $0x1048] sm:$0xff]  ;;  %v7521_v46 = vld [vmem:[%s12174_s28 + $0x1218] sm:$0xff] }
 0x5d3   : > { %11685 = vmatpush1.bf16.msra.mxu1 %v16214_v19  ;;  %11239 = vmatprep.subr.bf16.mxu0 %v11238_v20  ;;  %v7489_v19 = vld [vmem:[%s12174_s28 + $0x418] sm:$0xff]  ;;  %v16394_v20 = vpack.c.bf16 %v7498_v9, %v7496_v21  ;;  %v6532_v59 = vld [vmem:[%s12174_s28 + $0x1128] sm:$0xff] }
 0x5d4   : > { %11687 = vmatprep.subr.bf16.mxu1 %v16324_v6  ;;  %v16358_v3 = vpack.c.bf16 %v7491_v13, %v7489_v19  ;;  %v7506_v19 = vld [vmem:[%s12174_s28 + $0xbf0] sm:$0xff]  ;;  %v6522_v13 = vld [vmem:[%s12174_s28 + $0xcc8] sm:$0xff]  ;;  %v7517_v21 = vld [vmem:[%s12174_s28 + $0x1058] sm:$0xff]  ;;  %v11274_v30 = vpack.c.bf16 %v6532_v59, %v6530_v60 }
 0x5d5   : > { %6487 = vmatmul.mubr.f32.vlgmr.msra.gmra.mrb[6].mxu0 %v6283_v10  ;;  %v16422_v43 = vpack.c.bf16 %v7506_v19, %v7504_v39  ;;  %v7519_v9 = vld [vmem:[%s12174_s28 + $0x1138] sm:$0xff]  ;;  %v6534_v15 = vld [vmem:[%s12174_s28 + $0x1208] sm:$0xff]  ;;  %v7522_v19 = vld [vmem:[%s12174_s28 + $0x12f0] sm:$0xff] }
 0x5d6   : > { %11241 = vmatpush1.bf16.msra.mxu0 %v11240_v37  ;;  %7474 = vmatmul.mubr.f32.vlgmr.msra.gmra.mrb[6].mxu1 %v6283_v10  ;;  %v7505_v10 = vld [vmem:[%s12174_s28 + $0xb18] sm:$0xff]  ;;  %v6536_v14 = vld [vmem:[%s12174_s28 + $0x12e8] sm:$0xff]  ;;  %v6543_v60 = vld [vmem:[%s12174_s28 + $0x1660] sm:$0xff] }
 0x5d7   : > { %11689 = vmatpush1.bf16.msra.mxu1 %v16335_v0  ;;  %11243 = vmatprep.subr.bf16.mxu0 %v11242_v32  ;;  %v7507_v37 = vld [vmem:[%s12174_s28 + $0xbf8] sm:$0xff]  ;;  %v11260_v32 = vpack.c.bf16 %v6515_v11, %v6513_v1  ;;  %v16456_v1 = vpack.c.bf16 %v7519_v9, %v7517_v21  ;;  %v7518_v11 = vld [vmem:[%s12174_s28 + $0x1130] sm:$0xff] }
 0x5d8   : > { %11691 = vmatprep.subr.bf16.mxu1 %v16341_v42  ;;  %6623 = vmatprep.mubr.f32.mxu0 %v8398_v5  ;;  %v16414_v62 = vpack.c.bf16 %v7507_v37, %v7505_v10  ;;  %v7523_v7 = vld [vmem:[%s12174_s28 + $0x12f8] sm:$0xff]  ;;  %v7528_v59 = vld [vmem:[%s12174_s28 + $0x1590] sm:$0xff] }
 0x5d9   : > { %7610 = vmatprep.mubr.f32.mxu1 %v8398_v5  ;;  %v6524_v5 = vld [vmem:[%s12174_s28 + $0xda8] sm:$0xff]  ;;  %v16470_v39 = vpack.c.bf16 %v7523_v7, %v7521_v46  ;;  %v7530_v9 = vld [vmem:[%s12174_s28 + $0x1670] sm:$0xff]  ;;  %v6547_v46 = vld [vmem:[%s12174_s28 + $0x1820] sm:$0xff] }
 0x5da   : > { %11245 = vmatpush1.bf16.msra.mxu0 %v11244_v12  ;;  %v7509_v12 = vld [vmem:[%s12174_s28 + $0xcd8] sm:$0xff]  ;;  %v11266_v31 = vpack.c.bf16 %v6524_v5, %v6522_v13  ;;  %v6538_v13 = vld [vmem:[%s12174_s28 + $0x13c8] sm:$0xff]  ;;  %v7532_v7 = vld [vmem:[%s12174_s28 + $0x1750] sm:$0xff] }
 0x5db   : > { %11693 = vmatpush1.bf16.msra.mxu1 %v16352_v45  ;;  %11247 = vmatprep.subr.bf16.mxu0 %v11246_v18  ;;  %v7511_v18 = vld [vmem:[%s12174_s28 + $0xdb8] sm:$0xff]  ;;  %v6540_v5 = vld [vmem:[%s12174_s28 + $0x14a8] sm:$0xff] }
 0x5dc   : > { %11695 = vmatprep.subr.bf16.mxu1 %v16358_v3  ;;  %v16428_v51 = vpack.c.bf16 %v7511_v18, %v7509_v12  ;;  %v7525_v12 = vld [vmem:[%s12174_s28 + $0x13d8] sm:$0xff]  ;;  %v11282_v25 = vpack.c.bf16 %v6540_v5, %v6538_v13 }
 0x5dd   : > { %v7527_v18 = vld [vmem:[%s12174_s28 + $0x14b8] sm:$0xff] }
 0x5de   : > { %11249 = vmatpush1.bf16.msra.mxu0 %v11248_v48  ;;  %v6526_v48 = vld [vmem:[%s12174_s28 + $0xe88] sm:$0xff] }
 0x5df   : > { %11697 = vmatpush1.bf16.msra.mxu1 %v16366_v41  ;;  %11251 = vmatprep.subr.bf16.mxu0 %v11250_v22  ;;  %v6528_v22 = vld [vmem:[%s12174_s28 + $0xf68] sm:$0xff] }
 0x5e0   : > { %11699 = vmatprep.subr.bf16.mxu1 %v16372_v63  ;;  %v11270_v17 = vpack.c.bf16 %v6528_v22, %v6526_v48  ;;  %v16484_v48 = vpack.c.bf16 %v7527_v18, %v7525_v12  ;;  %v7526_v22 = vld [vmem:[%s12174_s28 + $0x14b0] sm:$0xff]  ;;  %v6549_v18 = vld [vmem:[%s12174_s28 + $0x1900] sm:$0xff] }
 0x5e1   : > { %v16492_v55 = vpack.c.bf16 %v7526_v22, %v7524_v16  ;;  %v6554_v16 = vld [vmem:[%s12174_s28 + $0x1ac8] sm:$0xff] }
 0x5e2   : > { %11253 = vmatpush1.bf16.msra.mxu0 %v11252_v28  ;;  %v16442_v28 = vpack.c.bf16 %v7515_v57, %v7513_v40  ;;  %v6542_v40 = vld [vmem:[%s12174_s28 + $0x1588] sm:$0xff] }
 0x5e3   : > { %11701 = vmatpush1.bf16.msra.mxu1 %v16380_v34  ;;  %11255 = vmatprep.subr.bf16.mxu0 %v11254_v44  ;;  %v7514_v44 = vld [vmem:[%s12174_s28 + $0xf70] sm:$0xff]  ;;  %v6544_v57 = vld [vmem:[%s12174_s28 + $0x1668] sm:$0xff] }
 0x5e4   : > { %11703 = vmatprep.subr.bf16.mxu1 %v16386_v54  ;;  %v16450_v56 = vpack.c.bf16 %v7514_v44, %v7512_v27  ;;  %v11286_v27 = vpack.c.bf16 %v6544_v57, %v6542_v40  ;;  %v6541_v44 = vld [vmem:[%s12174_s28 + $0x1580] sm:$0xff]  ;;  %v6556_v22 = vld [vmem:[%s12174_s28 + $0x1ba8] sm:$0xff]  ;;  %v7541_v40 = vld [vmem:[%s12174_s28 + $0x1ad8] sm:$0xff] }
 0x5e5   : > { %v7543_v57 = vld [vmem:[%s12174_s28 + $0x1bb8] sm:$0xff] }
 0x5e6   : > { %11257 = vmatpush1.bf16.msra.mxu0 %v11256_v53  ;;  %v6531_v53 = vld [vmem:[%s12174_s28 + $0x1120] sm:$0xff] }
 0x5e7   : > { %11705 = vmatpush1.bf16.msra.mxu1 %v16394_v20  ;;  %11259 = vmatprep.subr.bf16.mxu0 %v11258_v23  ;;  %v7516_v23 = vld [vmem:[%s12174_s28 + $0x1050] sm:$0xff]  ;;  %v11276_v10 = vpack.c.bf16 %v6531_v53, %v6529_v4  ;;  %v7533_v4 = vld [vmem:[%s12174_s28 + $0x1758] sm:$0xff] }
 0x5e8   : > { %11707 = vmatprep.subr.bf16.mxu1 %v16400_v2  ;;  %v16464_v37 = vpack.c.bf16 %v7518_v11, %v7516_v23  ;;  %v7535_v53 = vld [vmem:[%s12174_s28 + $0x1838] sm:$0xff]  ;;  %v11288_v23 = vpack.c.bf16 %v6543_v60, %v6541_v44  ;;  %v16506_v11 = vpack.c.bf16 %v7530_v9, %v7528_v59  ;;  %v6555_v44 = vld [vmem:[%s12174_s28 + $0x1ba0] sm:$0xff]  ;;  %v16539_v60 = vpack.c.bf16 %v7543_v57, %v7541_v40  ;;  %v7540_v59 = vld [vmem:[%s12174_s28 + $0x1ad0] sm:$0xff] }
 0x5e9   : > { %v7542_v9 = vld [vmem:[%s12174_s28 + $0x1bb0] sm:$0xff]  ;;  %v7631_v40 = vld [vmem:[%s12174_s28 + $0x5e0] sm:$0xff] }
 0x5ea   : > { %11261 = vmatpush1.bf16.msra.mxu0 %v11260_v32  ;;  %v11278_v32 = vpack.c.bf16 %v6536_v14, %v6534_v15  ;;  %v6545_v14 = vld [vmem:[%s12174_s28 + $0x1740] sm:$0xff] }
 0x5eb   : > { %11709 = vmatpush1.bf16.msra.mxu1 %v16408_v24  ;;  %11263 = vmatprep.subr.bf16.mxu0 %v11262_v26  ;;  %v6533_v26 = vld [vmem:[%s12174_s28 + $0x1200] sm:$0xff]  ;;  %v11292_v13 = vpack.c.bf16 %v6547_v46, %v6545_v14  ;;  %v7624_v46 = vld [vmem:[%s12174_s28 + $0x268] sm:$0xff] }
 0x5ec   : > { %11711 = vmatprep.subr.bf16.mxu1 %v16414_v62  ;;  %v7621_v14 = vld [vmem:[%s12174_s28 + $0x180] sm:$0xff] }
 0x5ed   : > { %v7633_v57 = vld [vmem:[%s12174_s28 + $0x6c0] sm:$0xff] }
 0x5ee   : > { %11265 = vmatpush1.bf16.msra.mxu0 %v11264_v49  ;;  %v11280_v49 = vpack.c.bf16 %v6535_v33, %v6533_v26  ;;  %v6550_v26 = vld [vmem:[%s12174_s28 + $0x1908] sm:$0xff] }
 0x5ef   : > { %11713 = vmatpush1.bf16.msra.mxu1 %v16422_v43  ;;  %11267 = vmatprep.subr.bf16.mxu0 %v11266_v31  ;;  %v16478_v31 = vpack.c.bf16 %v7522_v19, %v7520_v29  ;;  %v6552_v33 = vld [vmem:[%s12174_s28 + $0x19e8] sm:$0xff]  ;;  %v7537_v29 = vld [vmem:[%s12174_s28 + $0x1918] sm:$0xff] }
 0x5f0   : > { %11715 = vmatprep.subr.bf16.mxu1 %v16428_v51  ;;  %v7539_v19 = vld [vmem:[%s12174_s28 + $0x19f8] sm:$0xff]  ;;  %v11294_v12 = vpack.c.bf16 %v6552_v33, %v6550_v26 }
 0x5f1   : > { %v16526_v58 = vpack.c.bf16 %v7539_v19, %v7537_v29  ;;  %v7623_v29 = vld [vmem:[%s12174_s28 + $0x260] sm:$0xff] }
 0x5f2   : > { %11269 = vmatpush1.bf16.msra.mxu0 %v11268_v52  ;;  %v7529_v52 = vld [vmem:[%s12174_s28 + $0x1598] sm:$0xff]  ;;  %v7625_v19 = vld [vmem:[%s12174_s28 + $0x340] sm:$0xff] }
 0x5f3   : > { %11717 = vmatpush1.bf16.msra.mxu1 %v16436_v8  ;;  %11271 = vmatprep.subr.bf16.mxu0 %v11270_v17  ;;  %v7531_v17 = vld [vmem:[%s12174_s28 + $0x1678] sm:$0xff] }
 0x5f4   : > { %11719 = vmatprep.subr.bf16.mxu1 %v16442_v28  ;;  %v16498_v21 = vpack.c.bf16 %v7531_v17, %v7529_v52 }
 0x5f6   : > { %11273 = vmatpush1.bf16.msra.mxu0 %v11272_v36  ;;  %v6546_v36 = vld [vmem:[%s12174_s28 + $0x1748] sm:$0xff] }
 0x5f7   : > { %11721 = vmatpush1.bf16.msra.mxu1 %v16450_v56  ;;  %11275 = vmatprep.subr.bf16.mxu0 %v11274_v30  ;;  %v6548_v30 = vld [vmem:[%s12174_s28 + $0x1828] sm:$0xff] }
 0x5f8   : > { %11723 = vmatprep.subr.bf16.mxu1 %v16456_v1  ;;  %v11290_v15 = vpack.c.bf16 %v6548_v30, %v6546_v36  ;;  %v7620_v36 = vld [vmem:[%s12174_s28 + $0xa8] sm:$0xff] }
 0x5f9   : > { %v7622_v30 = vld [vmem:[%s12174_s28 + $0x188] sm:$0xff] }
 0x5fa   : > { %11277 = vmatpush1.bf16.msra.mxu0 %v11276_v10  ;;  %v16512_v10 = vpack.c.bf16 %v7535_v53, %v7533_v4  ;;  %v16546_v53 = vpack.c.bf16 %v7542_v9, %v7540_v59  ;;  %v7640_v59 = vld [vmem:[%s12174_s28 + $0x968] sm:$0xff] }
 0x5fb   : > { %11725 = vmatpush1.bf16.msra.mxu1 %v16464_v37  ;;  %11279 = vmatprep.subr.bf16.mxu0 %v11278_v32  ;;  %v7534_v32 = vld [vmem:[%s12174_s28 + $0x1830] sm:$0xff]  ;;  %v7642_v9 = vld [vmem:[%s12174_s28 + $0xa48] sm:$0xff] }
 0x5fc   : > { %11727 = vmatprep.subr.bf16.mxu1 %v16470_v39  ;;  %v16520_v5 = vpack.c.bf16 %v7534_v32, %v7532_v7  ;;  %v7626_v7 = vld [vmem:[%s12174_s28 + $0x348] sm:$0xff]  ;;  %v8397_v32 = vld [vmem:[%s17282_s1 + $0x20] sm:$0xff] }
 0x5fd   : > { %v16563_v33 = vpack.c.bf16 %v7626_v7, %v7624_v46  ;;  %v7643_v46 = vld [vmem:[%s12174_s28 + $0xb20] sm:$0xff] }
 0x5fe   : > { %11281 = vmatpush1.bf16.msra.mxu0 %v11280_v49  ;;  %v6551_v49 = vld [vmem:[%s12174_s28 + $0x19e0] sm:$0xff] }
 0x5ff   : > { %11729 = vmatpush1.bf16.msra.mxu1 %v16478_v31  ;;  %11283 = vmatprep.subr.bf16.mxu0 %v11282_v25  ;;  %v7536_v25 = vld [vmem:[%s12174_s28 + $0x1910] sm:$0xff]  ;;  %v11296_v52 = vpack.c.bf16 %v6551_v49, %v6549_v18  ;;  %v8400_v18 = vld [vmem:[%s17282_s1 + $0x38] sm:$0xff]  ;;  %v7645_v7 = vld [vmem:[%s12174_s28 + $0xc00] sm:$0xff] }
 0x600   : > { %11731 = vmatprep.subr.bf16.mxu1 %v16484_v48  ;;  %v16534_v17 = vpack.c.bf16 %v7538_v35, %v7536_v25  ;;  %v7627_v25 = vld [vmem:[%s12174_s28 + $0x420] sm:$0xff] }
 0x601   : > { %v7629_v35 = vld [vmem:[%s12174_s28 + $0x500] sm:$0xff] }
 0x602   : > { %11285 = vmatpush1.bf16.msra.mxu0 %v11284_v61  ;;  %v11298_v61 = vpack.c.bf16 %v6556_v22, %v6554_v16  ;;  %v7632_v16 = vld [vmem:[%s12174_s28 + $0x5e8] sm:$0xff] }
 0x603   : > { %11733 = vmatpush1.bf16.msra.mxu1 %v16492_v55  ;;  %11287 = vmatprep.subr.bf16.mxu0 %v11286_v27  ;;  %v6553_v27 = vld [vmem:[%s12174_s28 + $0x1ac0] sm:$0xff] }
 0x604   : > { %11735 = vmatprep.subr.bf16.mxu1 %v16498_v21  ;;  %v11300_v4 = vpack.c.bf16 %v6555_v44, %v6553_v27  ;;  %v7635_v27 = vld [vmem:[%s12174_s28 + $0x7a0] sm:$0xff] }
 0x605   : > { %v7637_v44 = vld [vmem:[%s12174_s28 + $0x880] sm:$0xff] }
 0x606   : > { %11289 = vmatpush1.bf16.msra.mxu0 %v11288_v23  ;;  %v16549_v23 = vpack.c.bf16 %v7622_v30, %v7620_v36  ;;  %v7639_v36 = vld [vmem:[%s12174_s28 + $0x960] sm:$0xff] }
 0x607   : > { %11737 = vmatpush1.bf16.msra.mxu1 %v16506_v11  ;;  %11291 = vmatprep.subr.bf16.mxu0 %v11290_v15  ;;  %v7619_v15 = vld [vmem:[%s12174_s28 + $0xa0] sm:$0xff] }
 0x608   : > { %11739 = vmatprep.subr.bf16.mxu1 %v16512_v10  ;;  %v16560_v26 = vpack.c.bf16 %v7621_v14, %v7619_v15  ;;  %v7641_v30 = vld [vmem:[%s12174_s28 + $0xa40] sm:$0xff]  ;;  %v7646_v15 = vld [vmem:[%s12174_s28 + $0xc08] sm:$0xff] }
 0x60a   : > { %11293 = vmatpush1.bf16.msra.mxu0 %v11292_v13  ;;  %v7628_v13 = vld [vmem:[%s12174_s28 + $0x428] sm:$0xff] }
 0x60b   : > { %11741 = vmatpush1.bf16.msra.mxu1 %v16520_v5  ;;  %11295 = vmatprep.subr.bf16.mxu0 %v11294_v12  ;;  %v7630_v12 = vld [vmem:[%s12174_s28 + $0x508] sm:$0xff] }
 0x60c   : > { %11743 = vmatprep.subr.bf16.mxu1 %v16526_v58  ;;  %v16578_v49 = vpack.c.bf16 %v7630_v12, %v7628_v13  ;;  %v7648_v13 = vld [vmem:[%s12174_s28 + $0xce8] sm:$0xff] }
 0x60e   : > { %11297 = vmatpush1.bf16.msra.mxu0 %v11296_v52  ;;  %v7636_v52 = vld [vmem:[%s12174_s28 + $0x7a8] sm:$0xff] }
 0x60f   : > { %11745 = vmatpush1.bf16.msra.mxu1 %v16534_v17  ;;  %11299 = vmatprep.subr.bf16.mxu0 %v11298_v61  ;;  %v7638_v61 = vld [vmem:[%s12174_s28 + $0x888] sm:$0xff] }
 0x610   : > { %11747 = vmatprep.subr.bf16.mxu1 %v16539_v60 }
 0x612   : > { %11301 = vmatpush1.bf16.msra.mxu0 %v11300_v4  ;;  %v7644_v4 = vld [vmem:[%s12174_s28 + $0xb28] sm:$0xff] }
 0x613   : > { %11749 = vmatpush1.bf16.msra.mxu1 %v16546_v53  ;;  %11303 = vmatprep.subr.bf16.mxu0 %v16324_v6  ;;  %v16575_v6 = vpack.c.bf16 %v7625_v19, %v7623_v29  ;;  %v16626_v14 = vpack.c.bf16 %v7646_v15, %v7644_v4 }
 0x614   : > { %11751 = vmatprep.subr.bf16.mxu1 %v16549_v23 }
 0x615   : > { %6624 = vmatmul.mubr.f32.vlgmr.msra.gmra.mrb[6].mxu0 %v8397_v32 }
 0x616   : > { %11305 = vmatpush1.bf16.msra.mxu0 %v16335_v0  ;;  %7611 = vmatmul.mubr.f32.vlgmr.msra.gmra.mrb[6].mxu1 %v8397_v32  ;;  %v7634_v0 = vld [vmem:[%s12174_s28 + $0x6c8] sm:$0xff] }
 0x617   : > { %11753 = vmatpush1.bf16.msra.mxu1 %v16560_v26  ;;  %11307 = vmatprep.subr.bf16.mxu0 %v16341_v42  ;;  %v16587_v42 = vpack.c.bf16 %v7629_v35, %v7627_v25  ;;  %v16590_v22 = vpack.c.bf16 %v7634_v0, %v7632_v16  ;;  %v16639_v16 = vpack.c.bf16 %v7645_v7, %v7643_v46  ;;  %v7653_v46 = vld [vmem:[%s12174_s28 + $0xf80] sm:$0xff] }
 0x618   : > { %11755 = vmatprep.subr.bf16.mxu1 %v16563_v33  ;;  %6762 = vmatprep.mubr.f32.mxu0 %v8400_v18 }
 0x619   : > { %7749 = vmatprep.mubr.f32.mxu1 %v8400_v18 }
 0x61a   : > { %11309 = vmatpush1.bf16.msra.mxu0 %v16352_v45  ;;  %v16599_v45 = vpack.c.bf16 %v7633_v57, %v7631_v40 }
 0x61b   : > { %11757 = vmatpush1.bf16.msra.mxu1 %v16575_v6  ;;  %11311 = vmatprep.subr.bf16.mxu0 %v16358_v3  ;;  %v16602_v3 = vpack.c.bf16 %v7638_v61, %v7636_v52  ;;  %v7649_v52 = vld [vmem:[%s12174_s28 + $0xdc0] sm:$0xff] }
 0x61c   : > { %11759 = vmatprep.subr.bf16.mxu1 %v16578_v49 }
 0x61e   : > { %11313 = vmatpush1.bf16.msra.mxu0 %v16366_v41  ;;  %v16611_v41 = vpack.c.bf16 %v7637_v44, %v7635_v27  ;;  %v7652_v44 = vld [vmem:[%s12174_s28 + $0xea8] sm:$0xff] }
 0x61f   : > { %11761 = vmatpush1.bf16.msra.mxu1 %v16587_v42  ;;  %11315 = vmatprep.subr.bf16.mxu0 %v16372_v63  ;;  %v16614_v63 = vpack.c.bf16 %v7642_v9, %v7640_v59  ;;  %v7654_v59 = vld [vmem:[%s12174_s28 + $0xf88] sm:$0xff] }
 0x620   : > { %11763 = vmatprep.subr.bf16.mxu1 %v16590_v22 }
 0x622   : > { %11317 = vmatpush1.bf16.msra.mxu0 %v16380_v34  ;;  %v16623_v34 = vpack.c.bf16 %v7641_v30, %v7639_v36 }
 0x623   : > { %11765 = vmatpush1.bf16.msra.mxu1 %v16599_v45  ;;  %11319 = vmatprep.subr.bf16.mxu0 %v16386_v54 }
 0x624   : > { %11767 = vmatprep.subr.bf16.mxu1 %v16602_v3 }
 0x626   : > { %11321 = vmatpush1.bf16.msra.mxu0 %v16394_v20  ;;  %v7650_v20 = vld [vmem:[%s12174_s28 + $0xdc8] sm:$0xff] }
 0x627   : > { %11769 = vmatpush1.bf16.msra.mxu1 %v16611_v41  ;;  %11323 = vmatprep.subr.bf16.mxu0 %v16400_v2  ;;  %v16642_v57 = vpack.c.bf16 %v7650_v20, %v7648_v13 }
 0x628   : > { %v5207_v54 = vpop.f32.mrb[4].mxu0  ;;  %11771 = vmatprep.subr.bf16.mxu1 %v16614_v63 }
 0x629   : > { %v5214_v32 = vadd.f32 %v5207_v54, %v14066_v38  ;;  %v6194_v29 = vpop.f32.mrb[4].mxu1  ;;  %v5209_v19 = vpop.f32.mrb[5].mxu0  ;;  %v7651_v54 = vld [vmem:[%s12174_s28 + $0xea0] sm:$0xff] }
 0x62a   : > { %v6201_v2 = vadd.f32 %v6194_v29, %v14066_v38  ;;  %v5215_v12 = vadd.f32 %v5209_v19, %v14066_v38  ;;  %v6196_v18 = vpop.f32.mrb[5].mxu1  ;;  %11325 = vmatpush1.bf16.msra.mxu0 %v16408_v24  ;;  %v7647_v24 = vld [vmem:[%s12174_s28 + $0xce0] sm:$0xff]  ;;  %v7656_v19 = vld [vmem:[%s12174_s28 + $0x1068] sm:$0xff] }
 0x62b   : > { %v5216_v25 = vmax.f32 %v5214_v32, 0.0  ;;  %v6202_v35 = vadd.f32 %v6196_v18, %v14066_v38  ;;  %11773 = vmatpush1.bf16.msra.mxu1 %v16623_v34  ;;  %11327 = vmatprep.subr.bf16.mxu0 %v16414_v62  ;;  %v16658_v36 = vpack.c.bf16 %v7649_v52, %v7647_v24  ;;  %v7659_v24 = vld [vmem:[%s12174_s28 + $0x1220] sm:$0xff] }
 0x62c   : > { %v6203_v0 = vmax.f32 %v6201_v2, 0.0  ;;  %v5217_v40 = vmax.f32 %v5215_v12, 0.0  ;;  %11775 = vmatprep.subr.bf16.mxu1 %v16626_v14  ;;  %v16670_v2 = vpack.c.bf16 %v7653_v46, %v7651_v54  ;;  %v7661_v52 = vld [vmem:[%s12174_s28 + $0x1300] sm:$0xff]  ;;  %v7674_v54 = vld [vmem:[%s12174_s28 + $0x1848] sm:$0xff] }
 0x62d   : > { %5218 = vst [vmem:[%s14089_s10 + $0x40] sm:$0xff] %v5216_v25  ;;  %v6204_v61 = vmax.f32 %v6202_v35, 0.0  ;;  %v5220_v27 = vmul.f32 %v5216_v25, %v14084_v47  ;;  %v7660_v35 = vld [vmem:[%s12174_s28 + $0x1228] sm:$0xff]  ;;  %v7671_v46 = vld [vmem:[%s12174_s28 + $0x1760] sm:$0xff] }
 0x62e   : > { %6205 = vst [vmem:[%s14089_s10 + $0x50] sm:$0xff] %v6203_v0  ;;  %5219 = vst [vmem:[%s14089_s10 + $0x48] sm:$0xff] %v5217_v40  ;;  %11329 = vmatpush1.bf16.msra.mxu0 %v16422_v43  ;;  %v5221_v62 = vmul.f32 %v5217_v40, %v14094_v50  ;;  %v6207_v9 = vmul.f32 %v6203_v0, %v14084_v47  ;;  %v16662_v43 = vpack.c.bf16 %v7654_v59, %v7652_v44  ;;  %v7663_v44 = vld [vmem:[%s12174_s28 + $0x13e0] sm:$0xff] }
 0x62f   : > { %6206 = vst [vmem:[%s14089_s10 + $0x58] sm:$0xff] %v6204_v61  ;;  %11777 = vmatpush1.bf16.msra.mxu1 %v16639_v16  ;;  %11331 = vmatprep.subr.bf16.mxu0 %v16428_v51  ;;  %v6208_v30 = vmul.f32 %v6204_v61, %v14094_v50  ;;  %v5226_v4 = vmul.f32 %v5220_v27, %v5216_v25  ;;  %v7658_v51 = vld [vmem:[%s12174_s28 + $0x1148] sm:$0xff]  ;;  %v7655_v25 = vld [vmem:[%s12174_s28 + $0x1060] sm:$0xff] }
 0x630   : > { %11779 = vmatprep.subr.bf16.mxu1 %v16642_v57  ;;  %v5222_v15 = vadd.f32 %v5221_v62, %v5220_v27  ;;  %v5227_v7 = vmul.f32 %v5221_v62, %v5217_v40  ;;  %v6213_v32 = vmul.f32 %v6207_v9, %v6203_v0  ;;  %v16674_v18 = vpack.c.bf16 %v7658_v51, %v7656_v19  ;;  %v7662_v0 = vld [vmem:[%s12174_s28 + $0x1308] sm:$0xff]  ;;  %v7665_v59 = vld [vmem:[%s12174_s28 + $0x14c0] sm:$0xff] }
 0x631   : > { %v6209_v29 = vadd.f32 %v6208_v30, %v6207_v9  ;;  %v6214_v13 = vmul.f32 %v6208_v30, %v6204_v61  ;;  %v16686_v40 = vpack.c.bf16 %v7662_v0, %v7660_v35  ;;  %v7664_v61 = vld [vmem:[%s12174_s28 + $0x13e8] sm:$0xff]  ;;  %v7667_v30 = vld [vmem:[%s12174_s28 + $0x15a0] sm:$0xff]  ;;  %v7761_v35 = vld [vmem:[%s12174_s28 + $0x198] sm:$0xff] }
 0x632   : > { %11333 = vmatpush1.bf16.msra.mxu0 %v16436_v8  ;;  %5223 = vadd.xlane.f32.xlu1 %v5222_v15  ;;  %v5228_v20 = vadd.f32 %v5227_v7, %v5226_v4  ;;  %v7657_v8 = vld [vmem:[%s12174_s28 + $0x1140] sm:$0xff]  ;;  %v7666_v27 = vld [vmem:[%s12174_s28 + $0x14c8] sm:$0xff]  ;;  %v7758_v0 = vld [vmem:[%s12174_s28 + $0xb0] sm:$0xff] }
 0x633   : > { %11781 = vmatpush1.bf16.msra.mxu1 %v16658_v36  ;;  %6210 = vadd.xlane.f32.xlu0 %v6209_v29  ;;  %v6215_v12 = vadd.f32 %v6214_v13, %v6213_v32  ;;  %v7668_v62 = vld [vmem:[%s12174_s28 + $0x15a8] sm:$0xff]  ;;  %v7669_v4 = vld [vmem:[%s12174_s28 + $0x1680] sm:$0xff] }
 0x634   : > { %11335 = vmatprep.subr.bf16.mxu0 %v16442_v28  ;;  %11783 = vmatprep.subr.bf16.mxu1 %v16662_v43  ;;  %v16683_v28 = vpack.c.bf16 %v7657_v8, %v7655_v25  ;;  %v7670_v9 = vld [vmem:[%s12174_s28 + $0x1688] sm:$0xff]  ;;  %v7673_v7 = vld [vmem:[%s12174_s28 + $0x1840] sm:$0xff]  ;;  %v7759_v8 = vld [vmem:[%s12174_s28 + $0xb8] sm:$0xff] }
 0x635   : > { %v7672_v15 = vld [vmem:[%s12174_s28 + $0x1768] sm:$0xff]  ;;  %v7675_v19 = vld [vmem:[%s12174_s28 + $0x1920] sm:$0xff] }
 0x636   : > { %11337 = vmatpush1.bf16.msra.mxu0 %v16450_v56  ;;  %5229 = vadd.xlane.f32.xlu1 %v5228_v20  ;;  %v16695_v56 = vpack.c.bf16 %v7661_v52, %v7659_v24  ;;  %v7676_v32 = vld [vmem:[%s12174_s28 + $0x1928] sm:$0xff]  ;;  %v7677_v51 = vld [vmem:[%s12174_s28 + $0x1a00] sm:$0xff]  ;;  %v7760_v24 = vld [vmem:[%s12174_s28 + $0x190] sm:$0xff] }
 0x637   : > { %11785 = vmatpush1.bf16.msra.mxu1 %v16670_v2  ;;  %11339 = vmatprep.subr.bf16.mxu0 %v16456_v1  ;;  %v16698_v1 = vpack.c.bf16 %v7666_v27, %v7664_v61  ;;  %v7678_v29 = vld [vmem:[%s12174_s28 + $0x1a08] sm:$0xff]  ;;  %v7681_v25 = vld [vmem:[%s12174_s28 + $0x1bc0] sm:$0xff]  ;;  %v7763_v52 = vld [vmem:[%s12174_s28 + $0x278] sm:$0xff] }
 0x638   : > { %11787 = vmatprep.subr.bf16.mxu1 %v16674_v18  ;;  %v7680_v13 = vld [vmem:[%s12174_s28 + $0x1ae8] sm:$0xff]  ;;  %v7765_v61 = vld [vmem:[%s12174_s28 + $0x358] sm:$0xff] }
 0x639   : > { %v7682_v20 = vld [vmem:[%s12174_s28 + $0x1bc8] sm:$0xff]  ;;  %v16773_v27 = vpack.c.bf16 %v7765_v61, %v7763_v52  ;;  %v7784_v52 = vld [vmem:[%s12174_s28 + $0xc10] sm:$0xff]  ;;  %v7787_v61 = vld [vmem:[%s12174_s28 + $0xcf8] sm:$0xff] }
 0x63a   : > { %11341 = vmatpush1.bf16.msra.mxu0 %v16464_v37  ;;  %6216 = vadd.xlane.f32.xlu1 %v6215_v12  ;;  %v16707_v37 = vpack.c.bf16 %v7665_v59, %v7663_v44  ;;  %v7679_v12 = vld [vmem:[%s12174_s28 + $0x1ae0] sm:$0xff]  ;;  %v7762_v44 = vld [vmem:[%s12174_s28 + $0x270] sm:$0xff] }
 0x63b   : > { %11789 = vmatpush1.bf16.msra.mxu1 %v16683_v28  ;;  %11343 = vmatprep.subr.bf16.mxu0 %v16470_v39  ;;  %v16710_v39 = vpack.c.bf16 %v7670_v9, %v7668_v62  ;;  %v7764_v59 = vld [vmem:[%s12174_s28 + $0x350] sm:$0xff]  ;;  %v7769_v62 = vld [vmem:[%s12174_s28 + $0x518] sm:$0xff]  ;;  %v8402_v9 = vld [vmem:[%s17282_s1 + $0x48] sm:$0xff] }
 0x63c   : > { %11791 = vmatprep.subr.bf16.mxu1 %v16686_v40 }
 0x63e   : > { %11345 = vmatpush1.bf16.msra.mxu0 %v16478_v31  ;;  %v16719_v31 = vpack.c.bf16 %v7669_v4, %v7667_v30  ;;  %v7766_v4 = vld [vmem:[%s12174_s28 + $0x430] sm:$0xff] }
 0x63f   : > { %11793 = vmatpush1.bf16.msra.mxu1 %v16695_v56  ;;  %11347 = vmatprep.subr.bf16.mxu0 %v16484_v48  ;;  %v16722_v48 = vpack.c.bf16 %v7674_v54, %v7672_v15  ;;  %v7768_v15 = vld [vmem:[%s12174_s28 + $0x510] sm:$0xff]  ;;  %v7771_v54 = vld [vmem:[%s12174_s28 + $0x5f8] sm:$0xff] }
 0x640   : > { %11795 = vmatprep.subr.bf16.mxu1 %v16698_v1 }
 0x642   : > { %11349 = vmatpush1.bf16.msra.mxu0 %v16492_v55  ;;  %v16731_v55 = vpack.c.bf16 %v7673_v7, %v7671_v46  ;;  %v7770_v7 = vld [vmem:[%s12174_s28 + $0x5f0] sm:$0xff] }
 0x643   : > { %11797 = vmatpush1.bf16.msra.mxu1 %v16707_v37  ;;  %11351 = vmatprep.subr.bf16.mxu0 %v16498_v21  ;;  %v16734_v21 = vpack.c.bf16 %v7678_v29, %v7676_v32  ;;  %v7772_v32 = vld [vmem:[%s12174_s28 + $0x6d0] sm:$0xff]  ;;  %v7775_v29 = vld [vmem:[%s12174_s28 + $0x7b8] sm:$0xff] }
 0x644   : > { %11799 = vmatprep.subr.bf16.mxu1 %v16710_v39 }
 0x646   : > { %11353 = vmatpush1.bf16.msra.mxu0 %v16506_v11  ;;  %v16743_v11 = vpack.c.bf16 %v7677_v51, %v7675_v19  ;;  %v7777_v19 = vld [vmem:[%s12174_s28 + $0x898] sm:$0xff]  ;;  %v7774_v51 = vld [vmem:[%s12174_s28 + $0x7b0] sm:$0xff] }
 0x647   : > { %11801 = vmatpush1.bf16.msra.mxu1 %v16719_v31  ;;  %11355 = vmatprep.subr.bf16.mxu0 %v16512_v10  ;;  %v16746_v10 = vpack.c.bf16 %v7682_v20, %v7680_v13  ;;  %v7776_v13 = vld [vmem:[%s12174_s28 + $0x890] sm:$0xff]  ;;  %v7779_v20 = vld [vmem:[%s12174_s28 + $0x978] sm:$0xff] }
 0x648   : > { %11803 = vmatprep.subr.bf16.mxu1 %v16722_v48 }
 0x64a   : > { %11357 = vmatpush1.bf16.msra.mxu0 %v16520_v5  ;;  %v16755_v5 = vpack.c.bf16 %v7681_v25, %v7679_v12  ;;  %v7781_v12 = vld [vmem:[%s12174_s28 + $0xa58] sm:$0xff]  ;;  %v7778_v25 = vld [vmem:[%s12174_s28 + $0x970] sm:$0xff] }
 0x64b   : > { %11805 = vmatpush1.bf16.msra.mxu1 %v16731_v55  ;;  %11359 = vmatprep.subr.bf16.mxu0 %v16526_v58  ;;  %v16758_v58 = vpack.c.bf16 %v7761_v35, %v7759_v8  ;;  %v7780_v8 = vld [vmem:[%s12174_s28 + $0xa50] sm:$0xff]  ;;  %v7783_v35 = vld [vmem:[%s12174_s28 + $0xb38] sm:$0xff] }
 0x64c   : > { %11807 = vmatprep.subr.bf16.mxu1 %v16734_v21 }
 0x64e   : > { %11361 = vmatpush1.bf16.msra.mxu0 %v16534_v17  ;;  %v8399_v17 = vld [vmem:[%s17282_s1 + $0x30] sm:$0xff] }
 0x64f   : > { %11809 = vmatpush1.bf16.msra.mxu1 %v16743_v11  ;;  %11363 = vmatprep.subr.bf16.mxu0 %v16539_v60  ;;  %v16770_v60 = vpack.c.bf16 %v7760_v24, %v7758_v0  ;;  %v7785_v0 = vld [vmem:[%s12174_s28 + $0xc18] sm:$0xff]  ;;  %v7782_v24 = vld [vmem:[%s12174_s28 + $0xb30] sm:$0xff] }
 0x650   : > { %11811 = vmatprep.subr.bf16.mxu1 %v16746_v10 }
 0x652   : > { %11365 = vmatpush1.bf16.msra.mxu0 %v16546_v53  ;;  %v7767_v53 = vld [vmem:[%s12174_s28 + $0x438] sm:$0xff] }
 0x653   : > { %11813 = vmatpush1.bf16.msra.mxu1 %v16755_v5  ;;  %11367 = vmatprep.subr.bf16.mxu0 %v16549_v23  ;;  %v16785_v23 = vpack.c.bf16 %v7764_v59, %v7762_v44  ;;  %v16788_v30 = vpack.c.bf16 %v7769_v62, %v7767_v53  ;;  %v7786_v44 = vld [vmem:[%s12174_s28 + $0xcf0] sm:$0xff]  ;;  %v7791_v53 = vld [vmem:[%s12174_s28 + $0xeb8] sm:$0xff] }
 0x654   : > { %11815 = vmatprep.subr.bf16.mxu1 %v16758_v58  ;;  %v7788_v59 = vld [vmem:[%s12174_s28 + $0xdd0] sm:$0xff]  ;;  %v7793_v62 = vld [vmem:[%s12174_s28 + $0xf98] sm:$0xff] }
 0x655   : > { %6763 = vmatmul.mubr.f32.vlgmr.msra.gmra.mrb[6].mxu0 %v8399_v17 }
 0x656   : > { %11369 = vmatpush1.bf16.msra.mxu0 %v16560_v26  ;;  %7750 = vmatmul.mubr.f32.vlgmr.msra.gmra.mrb[6].mxu1 %v8399_v17  ;;  %v7773_v26 = vld [vmem:[%s12174_s28 + $0x6d8] sm:$0xff] }
 0x657   : > { %11817 = vmatpush1.bf16.msra.mxu1 %v16770_v60  ;;  %11371 = vmatprep.subr.bf16.mxu0 %v16563_v33  ;;  %v16797_v33 = vpack.c.bf16 %v7768_v15, %v7766_v4  ;;  %v16800_v46 = vpack.c.bf16 %v7773_v26, %v7771_v54  ;;  %v7789_v17 = vld [vmem:[%s12174_s28 + $0xdd8] sm:$0xff]  ;;  %v7792_v4 = vld [vmem:[%s12174_s28 + $0xf90] sm:$0xff] }
 0x658   : > { %11819 = vmatprep.subr.bf16.mxu1 %v16773_v27  ;;  %6901 = vmatprep.mubr.f32.mxu0 %v8402_v9  ;;  %v7795_v15 = vld [vmem:[%s12174_s28 + $0x1078] sm:$0xff]  ;;  %v7794_v26 = vld [vmem:[%s12174_s28 + $0x1070] sm:$0xff] }
 0x659   : > { %7888 = vmatprep.mubr.f32.mxu1 %v8402_v9  ;;  %v7790_v9 = vld [vmem:[%s12174_s28 + $0xeb0] sm:$0xff]  ;;  %v7797_v54 = vld [vmem:[%s12174_s28 + $0x1158] sm:$0xff] }
 0x65a   : > { %11373 = vmatpush1.bf16.msra.mxu0 %v16575_v6  ;;  %v16809_v6 = vpack.c.bf16 %v7772_v32, %v7770_v7  ;;  %v7796_v7 = vld [vmem:[%s12174_s28 + $0x1150] sm:$0xff]  ;;  %v7799_v32 = vld [vmem:[%s12174_s28 + $0x1238] sm:$0xff] }
 0x65b   : > { %11821 = vmatpush1.bf16.msra.mxu1 %v16785_v23  ;;  %11375 = vmatprep.subr.bf16.mxu0 %v16578_v49  ;;  %v16812_v49 = vpack.c.bf16 %v7777_v19, %v7775_v29  ;;  %v7801_v29 = vld [vmem:[%s12174_s28 + $0x1318] sm:$0xff]  ;;  %v7798_v19 = vld [vmem:[%s12174_s28 + $0x1230] sm:$0xff] }
 0x65c   : > { %11823 = vmatprep.subr.bf16.mxu1 %v16788_v30 }
 0x65e   : > { %11377 = vmatpush1.bf16.msra.mxu0 %v16587_v42  ;;  %v16821_v42 = vpack.c.bf16 %v7776_v13, %v7774_v51  ;;  %v7800_v51 = vld [vmem:[%s12174_s28 + $0x1310] sm:$0xff]  ;;  %v7803_v13 = vld [vmem:[%s12174_s28 + $0x13f8] sm:$0xff] }
 0x65f   : > { %11825 = vmatpush1.bf16.msra.mxu1 %v16797_v33  ;;  %11379 = vmatprep.subr.bf16.mxu0 %v16590_v22  ;;  %v16824_v22 = vpack.c.bf16 %v7781_v12, %v7779_v20  ;;  %v7805_v20 = vld [vmem:[%s12174_s28 + $0x14d8] sm:$0xff]  ;;  %v7802_v12 = vld [vmem:[%s12174_s28 + $0x13f0] sm:$0xff] }
 0x660   : > { %11827 = vmatprep.subr.bf16.mxu1 %v16800_v46 }
 0x662   : > { %11381 = vmatpush1.bf16.msra.mxu0 %v16599_v45  ;;  %v16833_v45 = vpack.c.bf16 %v7780_v8, %v7778_v25  ;;  %v7804_v25 = vld [vmem:[%s12174_s28 + $0x14d0] sm:$0xff]  ;;  %v7807_v8 = vld [vmem:[%s12174_s28 + $0x15b8] sm:$0xff] }
 0x663   : > { %11829 = vmatpush1.bf16.msra.mxu1 %v16809_v6  ;;  %11383 = vmatprep.subr.bf16.mxu0 %v16602_v3  ;;  %v16836_v3 = vpack.c.bf16 %v7785_v0, %v7783_v35  ;;  %v7809_v35 = vld [vmem:[%s12174_s28 + $0x1698] sm:$0xff]  ;;  %v7806_v0 = vld [vmem:[%s12174_s28 + $0x15b0] sm:$0xff] }
 0x664   : > { %11831 = vmatprep.subr.bf16.mxu1 %v16812_v49 }
 0x666   : > { %11385 = vmatpush1.bf16.msra.mxu0 %v16611_v41  ;;  %v16845_v41 = vpack.c.bf16 %v7784_v52, %v7782_v24  ;;  %v7808_v24 = vld [vmem:[%s12174_s28 + $0x1690] sm:$0xff]  ;;  %v7811_v52 = vld [vmem:[%s12174_s28 + $0x1778] sm:$0xff] }
 0x667   : > { %11833 = vmatpush1.bf16.msra.mxu1 %v16821_v42  ;;  %11387 = vmatprep.subr.bf16.mxu0 %v16614_v63  ;;  %v16848_v63 = vpack.c.bf16 %v7789_v17, %v7787_v61  ;;  %v7813_v61 = vld [vmem:[%s12174_s28 + $0x1858] sm:$0xff]  ;;  %v7810_v17 = vld [vmem:[%s12174_s28 + $0x1770] sm:$0xff] }
 0x668   : > { %11835 = vmatprep.subr.bf16.mxu1 %v16824_v22 }
 0x66a   : > { %11389 = vmatpush1.bf16.msra.mxu0 %v16623_v34  ;;  %v16857_v34 = vpack.c.bf16 %v7788_v59, %v7786_v44  ;;  %v7812_v44 = vld [vmem:[%s12174_s28 + $0x1850] sm:$0xff]  ;;  %v7815_v59 = vld [vmem:[%s12174_s28 + $0x1938] sm:$0xff] }
 0x66b   : > { %11837 = vmatpush1.bf16.msra.mxu1 %v16833_v45  ;;  %11391 = vmatprep.subr.bf16.mxu0 %v16626_v14  ;;  %v16860_v14 = vpack.c.bf16 %v7793_v62, %v7791_v53  ;;  %v7817_v53 = vld [vmem:[%s12174_s28 + $0x1a18] sm:$0xff]  ;;  %v7814_v62 = vld [vmem:[%s12174_s28 + $0x1930] sm:$0xff] }
 0x66c   : > { %11839 = vmatprep.subr.bf16.mxu1 %v16836_v3 }
 0x66e   : > { %11393 = vmatpush1.bf16.msra.mxu0 %v16639_v16  ;;  %v16869_v16 = vpack.c.bf16 %v7792_v4, %v7790_v9  ;;  %v7816_v9 = vld [vmem:[%s12174_s28 + $0x1a10] sm:$0xff]  ;;  %v7819_v4 = vld [vmem:[%s12174_s28 + $0x1af8] sm:$0xff] }
 0x66f   : > { %11841 = vmatpush1.bf16.msra.mxu1 %v16845_v41  ;;  %11395 = vmatprep.subr.bf16.mxu0 %v16642_v57  ;;  %v16872_v57 = vpack.c.bf16 %v7797_v54, %v7795_v15  ;;  %v7821_v15 = vld [vmem:[%s12174_s28 + $0x1bd8] sm:$0xff]  ;;  %v7818_v54 = vld [vmem:[%s12174_s28 + $0x1af0] sm:$0xff] }
 0x670   : > { %11843 = vmatprep.subr.bf16.mxu1 %v16848_v63 }
 0x672   : > { %11397 = vmatpush1.bf16.msra.mxu0 %v16658_v36  ;;  %v16881_v36 = vpack.c.bf16 %v7796_v7, %v7794_v26  ;;  %v7820_v26 = vld [vmem:[%s12174_s28 + $0x1bd0] sm:$0xff]  ;;  %v7898_v7 = vld [vmem:[%s12174_s28 + $0xc8] sm:$0xff] }
 0x673   : > { %11845 = vmatpush1.bf16.msra.mxu1 %v16857_v34  ;;  %11399 = vmatprep.subr.bf16.mxu0 %v16662_v43  ;;  %v16884_v43 = vpack.c.bf16 %v7801_v29, %v7799_v32  ;;  %v7900_v32 = vld [vmem:[%s12174_s28 + $0x1a8] sm:$0xff]  ;;  %v7897_v29 = vld [vmem:[%s12174_s28 + $0xc0] sm:$0xff] }
 0x674   : > { %11847 = vmatprep.subr.bf16.mxu1 %v16860_v14 }
 0x676   : > { %11401 = vmatpush1.bf16.msra.mxu0 %v16670_v2  ;;  %v16893_v2 = vpack.c.bf16 %v7800_v51, %v7798_v19  ;;  %v7899_v19 = vld [vmem:[%s12174_s28 + $0x1a0] sm:$0xff]  ;;  %v7902_v51 = vld [vmem:[%s12174_s28 + $0x288] sm:$0xff] }
 0x677   : > { %11849 = vmatpush1.bf16.msra.mxu1 %v16869_v16  ;;  %11403 = vmatprep.subr.bf16.mxu0 %v16674_v18  ;;  %v16896_v18 = vpack.c.bf16 %v7805_v20, %v7803_v13  ;;  %v7904_v13 = vld [vmem:[%s12174_s28 + $0x368] sm:$0xff] }
 0x678   : > { %11851 = vmatprep.subr.bf16.mxu1 %v16872_v57  ;;  %v16971_v20 = vpack.c.bf16 %v7904_v13, %v7902_v51  ;;  %v7923_v51 = vld [vmem:[%s12174_s28 + $0xc20] sm:$0xff]  ;;  %v7926_v13 = vld [vmem:[%s12174_s28 + $0xd08] sm:$0xff] }
 0x67a   : > { %11405 = vmatpush1.bf16.msra.mxu0 %v16683_v28  ;;  %v16905_v28 = vpack.c.bf16 %v7804_v25, %v7802_v12  ;;  %v7901_v12 = vld [vmem:[%s12174_s28 + $0x280] sm:$0xff] }
 0x67b   : > { %11853 = vmatpush1.bf16.msra.mxu1 %v16881_v36  ;;  %11407 = vmatprep.subr.bf16.mxu0 %v16686_v40  ;;  %v16908_v40 = vpack.c.bf16 %v7809_v35, %v7807_v8  ;;  %v7903_v25 = vld [vmem:[%s12174_s28 + $0x360] sm:$0xff]  ;;  %v7908_v8 = vld [vmem:[%s12174_s28 + $0x528] sm:$0xff]  ;;  %v8404_v35 = vld [vmem:[%s17282_s1 + $0x58] sm:$0xff] }
 0x67c   : > { %11855 = vmatprep.subr.bf16.mxu1 %v16884_v43 }
 0x67e   : > { %11409 = vmatpush1.bf16.msra.mxu0 %v16695_v56  ;;  %v16917_v56 = vpack.c.bf16 %v7808_v24, %v7806_v0  ;;  %v7905_v24 = vld [vmem:[%s12174_s28 + $0x440] sm:$0xff] }
 0x67f   : > { %11857 = vmatpush1.bf16.msra.mxu1 %v16893_v2  ;;  %11411 = vmatprep.subr.bf16.mxu0 %v16698_v1  ;;  %v16920_v1 = vpack.c.bf16 %v7813_v61, %v7811_v52  ;;  %v7907_v52 = vld [vmem:[%s12174_s28 + $0x520] sm:$0xff]  ;;  %v7910_v61 = vld [vmem:[%s12174_s28 + $0x608] sm:$0xff] }
 0x680   : > { %11859 = vmatprep.subr.bf16.mxu1 %v16896_v18 }
 0x682   : > { %11413 = vmatpush1.bf16.msra.mxu0 %v16707_v37  ;;  %v16929_v37 = vpack.c.bf16 %v7812_v44, %v7810_v17  ;;  %v7909_v44 = vld [vmem:[%s12174_s28 + $0x600] sm:$0xff] }
 0x683   : > { %11861 = vmatpush1.bf16.msra.mxu1 %v16905_v28  ;;  %11415 = vmatprep.subr.bf16.mxu0 %v16710_v39  ;;  %v16932_v39 = vpack.c.bf16 %v7817_v53, %v7815_v59  ;;  %v7911_v59 = vld [vmem:[%s12174_s28 + $0x6e0] sm:$0xff]  ;;  %v7914_v53 = vld [vmem:[%s12174_s28 + $0x7c8] sm:$0xff] }
 0x684   : > { %11863 = vmatprep.subr.bf16.mxu1 %v16908_v40 }
 0x686   : > { %11417 = vmatpush1.bf16.msra.mxu0 %v16719_v31  ;;  %v16941_v31 = vpack.c.bf16 %v7816_v9, %v7814_v62  ;;  %v7916_v62 = vld [vmem:[%s12174_s28 + $0x8a8] sm:$0xff]  ;;  %v7913_v9 = vld [vmem:[%s12174_s28 + $0x7c0] sm:$0xff] }
 0x687   : > { %11865 = vmatpush1.bf16.msra.mxu1 %v16917_v56  ;;  %11419 = vmatprep.subr.bf16.mxu0 %v16722_v48  ;;  %v16944_v48 = vpack.c.bf16 %v7821_v15, %v7819_v4  ;;  %v7915_v4 = vld [vmem:[%s12174_s28 + $0x8a0] sm:$0xff]  ;;  %v7918_v15 = vld [vmem:[%s12174_s28 + $0x988] sm:$0xff] }
 0x688   : > { %11867 = vmatprep.subr.bf16.mxu1 %v16920_v1 }
 0x68a   : > { %11421 = vmatpush1.bf16.msra.mxu0 %v16731_v55  ;;  %v16953_v55 = vpack.c.bf16 %v7820_v26, %v7818_v54  ;;  %v7920_v54 = vld [vmem:[%s12174_s28 + $0xa68] sm:$0xff]  ;;  %v7917_v26 = vld [vmem:[%s12174_s28 + $0x980] sm:$0xff] }
 0x68b   : > { %11869 = vmatpush1.bf16.msra.mxu1 %v16929_v37  ;;  %11423 = vmatprep.subr.bf16.mxu0 %v16734_v21  ;;  %v16956_v21 = vpack.c.bf16 %v7900_v32, %v7898_v7  ;;  %v7919_v7 = vld [vmem:[%s12174_s28 + $0xa60] sm:$0xff]  ;;  %v7922_v32 = vld [vmem:[%s12174_s28 + $0xb48] sm:$0xff] }
 0x68c   : > { %11871 = vmatprep.subr.bf16.mxu1 %v16932_v39 }
 0x68e   : > { %11425 = vmatpush1.bf16.msra.mxu0 %v16743_v11  ;;  %v8401_v11 = vld [vmem:[%s17282_s1 + $0x40] sm:$0xff] }
 0x68f   : > { %11873 = vmatpush1.bf16.msra.mxu1 %v16941_v31  ;;  %11427 = vmatprep.subr.bf16.mxu0 %v16746_v10  ;;  %v16968_v10 = vpack.c.bf16 %v7899_v19, %v7897_v29  ;;  %v7924_v29 = vld [vmem:[%s12174_s28 + $0xc28] sm:$0xff]  ;;  %v7921_v19 = vld [vmem:[%s12174_s28 + $0xb40] sm:$0xff] }
 0x690   : > { %11875 = vmatprep.subr.bf16.mxu1 %v16944_v48 }
 0x692   : > { %11429 = vmatpush1.bf16.msra.mxu0 %v16755_v5  ;;  %v7906_v5 = vld [vmem:[%s12174_s28 + $0x448] sm:$0xff] }
 0x693   : > { %11877 = vmatpush1.bf16.msra.mxu1 %v16953_v55  ;;  %11431 = vmatprep.subr.bf16.mxu0 %v16758_v58  ;;  %v16983_v58 = vpack.c.bf16 %v7903_v25, %v7901_v12  ;;  %v16986_v0 = vpack.c.bf16 %v7908_v8, %v7906_v5  ;;  %v7925_v12 = vld [vmem:[%s12174_s28 + $0xd00] sm:$0xff]  ;;  %v7930_v5 = vld [vmem:[%s12174_s28 + $0xec8] sm:$0xff] }
 0x694   : > { %11879 = vmatprep.subr.bf16.mxu1 %v16956_v21  ;;  %v7927_v25 = vld [vmem:[%s12174_s28 + $0xde0] sm:$0xff]  ;;  %v7932_v8 = vld [vmem:[%s12174_s28 + $0xfa8] sm:$0xff] }
 0x695   : > { %6902 = vmatmul.mubr.f32.vlgmr.msra.gmra.mrb[6].mxu0 %v8401_v11 }
 0x696   : > { %11433 = vmatpush1.bf16.msra.mxu0 %v16770_v60  ;;  %7889 = vmatmul.mubr.f32.vlgmr.msra.gmra.mrb[6].mxu1 %v8401_v11  ;;  %v7912_v60 = vld [vmem:[%s12174_s28 + $0x6e8] sm:$0xff] }
 0x697   : > { %11881 = vmatpush1.bf16.msra.mxu1 %v16968_v10  ;;  %11435 = vmatprep.subr.bf16.mxu0 %v16773_v27  ;;  %v16995_v27 = vpack.c.bf16 %v7907_v52, %v7905_v24  ;;  %v16998_v17 = vpack.c.bf16 %v7912_v60, %v7910_v61  ;;  %v7928_v11 = vld [vmem:[%s12174_s28 + $0xde8] sm:$0xff]  ;;  %v7931_v24 = vld [vmem:[%s12174_s28 + $0xfa0] sm:$0xff] }
 0x698   : > { %11883 = vmatprep.subr.bf16.mxu1 %v16971_v20  ;;  %7040 = vmatprep.mubr.f32.mxu0 %v8404_v35  ;;  %v7934_v52 = vld [vmem:[%s12174_s28 + $0x1088] sm:$0xff]  ;;  %v7933_v60 = vld [vmem:[%s12174_s28 + $0x1080] sm:$0xff] }
 0x699   : > { %8027 = vmatprep.mubr.f32.mxu1 %v8404_v35  ;;  %v7929_v35 = vld [vmem:[%s12174_s28 + $0xec0] sm:$0xff]  ;;  %v7936_v61 = vld [vmem:[%s12174_s28 + $0x1168] sm:$0xff] }
 0x69a   : > { %11437 = vmatpush1.bf16.msra.mxu0 %v16785_v23  ;;  %v17007_v23 = vpack.c.bf16 %v7911_v59, %v7909_v44  ;;  %v7935_v44 = vld [vmem:[%s12174_s28 + $0x1160] sm:$0xff]  ;;  %v7938_v59 = vld [vmem:[%s12174_s28 + $0x1248] sm:$0xff] }
 0x69b   : > { %11885 = vmatpush1.bf16.msra.mxu1 %v16983_v58  ;;  %11439 = vmatprep.subr.bf16.mxu0 %v16788_v30  ;;  %v17010_v30 = vpack.c.bf16 %v7916_v62, %v7914_v53  ;;  %v7940_v53 = vld [vmem:[%s12174_s28 + $0x1328] sm:$0xff]  ;;  %v7937_v62 = vld [vmem:[%s12174_s28 + $0x1240] sm:$0xff] }
 0x69c   : > { %11887 = vmatprep.subr.bf16.mxu1 %v16986_v0 }
 0x69e   : > { %11441 = vmatpush1.bf16.msra.mxu0 %v16797_v33  ;;  %v17019_v33 = vpack.c.bf16 %v7915_v4, %v7913_v9  ;;  %v7939_v9 = vld [vmem:[%s12174_s28 + $0x1320] sm:$0xff]  ;;  %v7942_v4 = vld [vmem:[%s12174_s28 + $0x1408] sm:$0xff] }
 0x69f   : > { %11889 = vmatpush1.bf16.msra.mxu1 %v16995_v27  ;;  %11443 = vmatprep.subr.bf16.mxu0 %v16800_v46  ;;  %v17022_v46 = vpack.c.bf16 %v7920_v54, %v7918_v15  ;;  %v7944_v15 = vld [vmem:[%s12174_s28 + $0x14e8] sm:$0xff]  ;;  %v7941_v54 = vld [vmem:[%s12174_s28 + $0x1400] sm:$0xff] }
 0x6a0   : > { %11891 = vmatprep.subr.bf16.mxu1 %v16998_v17 }
 0x6a2   : > { %11445 = vmatpush1.bf16.msra.mxu0 %v16809_v6  ;;  %v17031_v6 = vpack.c.bf16 %v7919_v7, %v7917_v26  ;;  %v7943_v26 = vld [vmem:[%s12174_s28 + $0x14e0] sm:$0xff]  ;;  %v7946_v7 = vld [vmem:[%s12174_s28 + $0x15c8] sm:$0xff] }
 0x6a3   : > { %11893 = vmatpush1.bf16.msra.mxu1 %v17007_v23  ;;  %11447 = vmatprep.subr.bf16.mxu0 %v16812_v49  ;;  %v17034_v49 = vpack.c.bf16 %v7924_v29, %v7922_v32  ;;  %v7948_v32 = vld [vmem:[%s12174_s28 + $0x16a8] sm:$0xff]  ;;  %v7945_v29 = vld [vmem:[%s12174_s28 + $0x15c0] sm:$0xff] }
 0x6a4   : > { %11895 = vmatprep.subr.bf16.mxu1 %v17010_v30 }
 0x6a6   : > { %11449 = vmatpush1.bf16.msra.mxu0 %v16821_v42  ;;  %v17043_v42 = vpack.c.bf16 %v7923_v51, %v7921_v19  ;;  %v7947_v19 = vld [vmem:[%s12174_s28 + $0x16a0] sm:$0xff]  ;;  %v7950_v51 = vld [vmem:[%s12174_s28 + $0x1788] sm:$0xff] }
 0x6a7   : > { %11897 = vmatpush1.bf16.msra.mxu1 %v17019_v33  ;;  %11451 = vmatprep.subr.bf16.mxu0 %v16824_v22  ;;  %v17046_v22 = vpack.c.bf16 %v7928_v11, %v7926_v13  ;;  %v7952_v13 = vld [vmem:[%s12174_s28 + $0x1868] sm:$0xff]  ;;  %v7949_v11 = vld [vmem:[%s12174_s28 + $0x1780] sm:$0xff] }
 0x6a8   : > { %11899 = vmatprep.subr.bf16.mxu1 %v17022_v46 }
 0x6aa   : > { %11453 = vmatpush1.bf16.msra.mxu0 %v16833_v45  ;;  %v17055_v45 = vpack.c.bf16 %v7927_v25, %v7925_v12  ;;  %v7951_v12 = vld [vmem:[%s12174_s28 + $0x1860] sm:$0xff]  ;;  %v7954_v25 = vld [vmem:[%s12174_s28 + $0x1948] sm:$0xff] }
 0x6ab   : > { %11901 = vmatpush1.bf16.msra.mxu1 %v17031_v6  ;;  %11455 = vmatprep.subr.bf16.mxu0 %v16836_v3  ;;  %v17058_v3 = vpack.c.bf16 %v7932_v8, %v7930_v5  ;;  %v7956_v5 = vld [vmem:[%s12174_s28 + $0x1a28] sm:$0xff]  ;;  %v7953_v8 = vld [vmem:[%s12174_s28 + $0x1940] sm:$0xff] }
 0x6ac   : > { %11903 = vmatprep.subr.bf16.mxu1 %v17034_v49 }
 0x6ae   : > { %11457 = vmatpush1.bf16.msra.mxu0 %v16845_v41  ;;  %v17067_v41 = vpack.c.bf16 %v7931_v24, %v7929_v35  ;;  %v7955_v35 = vld [vmem:[%s12174_s28 + $0x1a20] sm:$0xff]  ;;  %v7958_v24 = vld [vmem:[%s12174_s28 + $0x1b08] sm:$0xff] }
 0x6af   : > { %11905 = vmatpush1.bf16.msra.mxu1 %v17043_v42  ;;  %11459 = vmatprep.subr.bf16.mxu0 %v16848_v63  ;;  %v17070_v63 = vpack.c.bf16 %v7936_v61, %v7934_v52  ;;  %v7960_v52 = vld [vmem:[%s12174_s28 + $0x1be8] sm:$0xff]  ;;  %v7957_v61 = vld [vmem:[%s12174_s28 + $0x1b00] sm:$0xff] }
 0x6b0   : > { %11907 = vmatprep.subr.bf16.mxu1 %v17046_v22 }
 0x6b2   : > { %11461 = vmatpush1.bf16.msra.mxu0 %v16857_v34  ;;  %v17079_v34 = vpack.c.bf16 %v7935_v44, %v7933_v60  ;;  %v7959_v60 = vld [vmem:[%s12174_s28 + $0x1be0] sm:$0xff]  ;;  %v8037_v44 = vld [vmem:[%s12174_s28 + $0xd8] sm:$0xff] }
 0x6b3   : > { %11909 = vmatpush1.bf16.msra.mxu1 %v17055_v45  ;;  %11463 = vmatprep.subr.bf16.mxu0 %v16860_v14  ;;  %v17082_v14 = vpack.c.bf16 %v7940_v53, %v7938_v59  ;;  %v8039_v59 = vld [vmem:[%s12174_s28 + $0x1b8] sm:$0xff]  ;;  %v8036_v53 = vld [vmem:[%s12174_s28 + $0xd0] sm:$0xff] }
 0x6b4   : > { %11911 = vmatprep.subr.bf16.mxu1 %v17058_v3 }
 0x6b6   : > { %11465 = vmatpush1.bf16.msra.mxu0 %v16869_v16  ;;  %v17091_v16 = vpack.c.bf16 %v7939_v9, %v7937_v62  ;;  %v8038_v62 = vld [vmem:[%s12174_s28 + $0x1b0] sm:$0xff]  ;;  %v8041_v9 = vld [vmem:[%s12174_s28 + $0x298] sm:$0xff] }
 0x6b7   : > { %11913 = vmatpush1.bf16.msra.mxu1 %v17067_v41  ;;  %11467 = vmatprep.subr.bf16.mxu0 %v16872_v57  ;;  %v17094_v57 = vpack.c.bf16 %v7944_v15, %v7942_v4  ;;  %v8043_v4 = vld [vmem:[%s12174_s28 + $0x378] sm:$0xff] }
 0x6b8   : > { %11915 = vmatprep.subr.bf16.mxu1 %v17070_v63  ;;  %v11946_v15 = vpack.c.bf16 %v8043_v4, %v8041_v9  ;;  %v8065_v9 = vld [vmem:[%s12174_s28 + $0xd18] sm:$0xff] }
 0x6b9   : > { %v8067_v4 = vld [vmem:[%s12174_s28 + $0xdf8] sm:$0xff] }
 0x6ba   : > { %11469 = vmatpush1.bf16.msra.mxu0 %v16881_v36  ;;  %v17103_v36 = vpack.c.bf16 %v7943_v26, %v7941_v54  ;;  %v8040_v54 = vld [vmem:[%s12174_s28 + $0x290] sm:$0xff] }
 0x6bb   : > { %11917 = vmatpush1.bf16.msra.mxu1 %v17079_v34  ;;  %11471 = vmatprep.subr.bf16.mxu0 %v16884_v43  ;;  %v17106_v43 = vpack.c.bf16 %v7948_v32, %v7946_v7  ;;  %v8042_v26 = vld [vmem:[%s12174_s28 + $0x370] sm:$0xff]  ;;  %v8045_v7 = vld [vmem:[%s12174_s28 + $0x458] sm:$0xff]  ;;  %v8406_v32 = vld [vmem:[%s17282_s1 + $0x68] sm:$0xff] }
 0x6bc   : > { %11919 = vmatprep.subr.bf16.mxu1 %v17082_v14 }
 0x6be   : > { %11473 = vmatpush1.bf16.msra.mxu0 %v16893_v2  ;;  %v17115_v2 = vpack.c.bf16 %v7947_v19, %v7945_v29  ;;  %v8044_v19 = vld [vmem:[%s12174_s28 + $0x450] sm:$0xff] }
 0x6bf   : > { %11921 = vmatpush1.bf16.msra.mxu1 %v17091_v16  ;;  %11475 = vmatprep.subr.bf16.mxu0 %v16896_v18  ;;  %v17118_v18 = vpack.c.bf16 %v7952_v13, %v7950_v51  ;;  %v8046_v51 = vld [vmem:[%s12174_s28 + $0x530] sm:$0xff]  ;;  %v8049_v13 = vld [vmem:[%s12174_s28 + $0x618] sm:$0xff] }
 0x6c0   : > { %11923 = vmatprep.subr.bf16.mxu1 %v17094_v57 }
 0x6c2   : > { %11477 = vmatpush1.bf16.msra.mxu0 %v16905_v28  ;;  %v17127_v28 = vpack.c.bf16 %v7951_v12, %v7949_v11  ;;  %v8051_v11 = vld [vmem:[%s12174_s28 + $0x6f8] sm:$0xff]  ;;  %v8048_v12 = vld [vmem:[%s12174_s28 + $0x610] sm:$0xff] }
 0x6c3   : > { %11925 = vmatpush1.bf16.msra.mxu1 %v17103_v36  ;;  %11479 = vmatprep.subr.bf16.mxu0 %v16908_v40  ;;  %v17130_v40 = vpack.c.bf16 %v7956_v5, %v7954_v25  ;;  %v8050_v25 = vld [vmem:[%s12174_s28 + $0x6f0] sm:$0xff]  ;;  %v8053_v5 = vld [vmem:[%s12174_s28 + $0x7d8] sm:$0xff] }
 0x6c4   : > { %11927 = vmatprep.subr.bf16.mxu1 %v17106_v43 }
 0x6c6   : > { %11481 = vmatpush1.bf16.msra.mxu0 %v16917_v56  ;;  %v17139_v56 = vpack.c.bf16 %v7955_v35, %v7953_v8  ;;  %v8055_v8 = vld [vmem:[%s12174_s28 + $0x8b8] sm:$0xff]  ;;  %v8052_v35 = vld [vmem:[%s12174_s28 + $0x7d0] sm:$0xff] }
 0x6c7   : > { %11929 = vmatpush1.bf16.msra.mxu1 %v17115_v2  ;;  %11483 = vmatprep.subr.bf16.mxu0 %v16920_v1  ;;  %v17142_v1 = vpack.c.bf16 %v7960_v52, %v7958_v24  ;;  %v8054_v24 = vld [vmem:[%s12174_s28 + $0x8b0] sm:$0xff]  ;;  %v8057_v52 = vld [vmem:[%s12174_s28 + $0x998] sm:$0xff] }
 0x6c8   : > { %11931 = vmatprep.subr.bf16.mxu1 %v17118_v18 }
 0x6ca   : > { %11485 = vmatpush1.bf16.msra.mxu0 %v16929_v37  ;;  %v17151_v37 = vpack.c.bf16 %v7959_v60, %v7957_v61  ;;  %v8059_v61 = vld [vmem:[%s12174_s28 + $0xa78] sm:$0xff]  ;;  %v8056_v60 = vld [vmem:[%s12174_s28 + $0x990] sm:$0xff] }
 0x6cb   : > { %11933 = vmatpush1.bf16.msra.mxu1 %v17127_v28  ;;  %11487 = vmatprep.subr.bf16.mxu0 %v16932_v39  ;;  %v11942_v39 = vpack.c.bf16 %v8039_v59, %v8037_v44  ;;  %v8058_v44 = vld [vmem:[%s12174_s28 + $0xa70] sm:$0xff]  ;;  %v8061_v59 = vld [vmem:[%s12174_s28 + $0xb58] sm:$0xff] }
 0x6cc   : > { %11935 = vmatprep.subr.bf16.mxu1 %v17130_v40 }
 0x6ce   : > { %11489 = vmatpush1.bf16.msra.mxu0 %v16941_v31  ;;  %v8403_v31 = vld [vmem:[%s17282_s1 + $0x50] sm:$0xff] }
 0x6cf   : > { %11937 = vmatpush1.bf16.msra.mxu1 %v17139_v56  ;;  %11491 = vmatprep.subr.bf16.mxu0 %v16944_v48  ;;  %v11944_v48 = vpack.c.bf16 %v8038_v62, %v8036_v53  ;;  %v8060_v53 = vld [vmem:[%s12174_s28 + $0xb50] sm:$0xff] }
 0x6d0   : > { %11939 = vmatprep.subr.bf16.mxu1 %v17142_v1  ;;  %v8062_v62 = vld [vmem:[%s12174_s28 + $0xc30] sm:$0xff] }
 0x6d2   : > { %11493 = vmatpush1.bf16.msra.mxu0 %v16953_v55  ;;  %v8047_v55 = vld [vmem:[%s12174_s28 + $0x538] sm:$0xff] }
 0x6d3   : > { %11941 = vmatpush1.bf16.msra.mxu1 %v17151_v37  ;;  %11495 = vmatprep.subr.bf16.mxu0 %v16956_v21  ;;  %v11948_v21 = vpack.c.bf16 %v8042_v26, %v8040_v54  ;;  %v11950_v29 = vpack.c.bf16 %v8047_v55, %v8045_v7  ;;  %v8071_v54 = vld [vmem:[%s12174_s28 + $0xfb8] sm:$0xff]  ;;  %v8068_v26 = vld [vmem:[%s12174_s28 + $0xed0] sm:$0xff] }
 0x6d4   : > { %11943 = vmatprep.subr.bf16.mxu1 %v11942_v39  ;;  %v8063_v39 = vld [vmem:[%s12174_s28 + $0xc38] sm:$0xff]  ;;  %v8070_v7 = vld [vmem:[%s12174_s28 + $0xfb0] sm:$0xff] }
 0x6d5   : > { %7041 = vmatmul.mubr.f32.vlgmr.msra.gmra.mrb[6].mxu0 %v8403_v31  ;;  %v8073_v55 = vld [vmem:[%s12174_s28 + $0x1098] sm:$0xff] }
 0x6d6   : > { %11497 = vmatpush1.bf16.msra.mxu0 %v16968_v10  ;;  %8028 = vmatmul.mubr.f32.vlgmr.msra.gmra.mrb[6].mxu1 %v8403_v31  ;;  %v11952_v10 = vpack.c.bf16 %v8046_v51, %v8044_v19  ;;  %v8064_v31 = vld [vmem:[%s12174_s28 + $0xd10] sm:$0xff]  ;;  %v8077_v19 = vld [vmem:[%s12174_s28 + $0x1258] sm:$0xff] }
 0x6d7   : > { %11945 = vmatpush1.bf16.msra.mxu1 %v11944_v48  ;;  %11499 = vmatprep.subr.bf16.mxu0 %v16971_v20  ;;  %v11954_v20 = vpack.c.bf16 %v8051_v11, %v8049_v13  ;;  %v8066_v48 = vld [vmem:[%s12174_s28 + $0xdf0] sm:$0xff]  ;;  %v8079_v51 = vld [vmem:[%s12174_s28 + $0x1338] sm:$0xff] }
 0x6d8   : > { %11947 = vmatprep.subr.bf16.mxu1 %v11946_v15  ;;  %7179 = vmatprep.mubr.f32.mxu0 %v8406_v32  ;;  %v8069_v15 = vld [vmem:[%s12174_s28 + $0xed8] sm:$0xff]  ;;  %v8076_v13 = vld [vmem:[%s12174_s28 + $0x1250] sm:$0xff] }
 0x6d9   : > { %8166 = vmatprep.mubr.f32.mxu1 %v8406_v32  ;;  %v8075_v32 = vld [vmem:[%s12174_s28 + $0x1178] sm:$0xff]  ;;  %v8078_v11 = vld [vmem:[%s12174_s28 + $0x1330] sm:$0xff] }
 0x6da   : > { %11501 = vmatpush1.bf16.msra.mxu0 %v16983_v58  ;;  %v11956_v58 = vpack.c.bf16 %v8050_v25, %v8048_v12  ;;  %v8080_v12 = vld [vmem:[%s12174_s28 + $0x1410] sm:$0xff] }
 0x6db   : > { %11949 = vmatpush1.bf16.msra.mxu1 %v11948_v21  ;;  %11503 = vmatprep.subr.bf16.mxu0 %v16986_v0  ;;  %v11958_v0 = vpack.c.bf16 %v8055_v8, %v8053_v5  ;;  %v8072_v21 = vld [vmem:[%s12174_s28 + $0x1090] sm:$0xff]  ;;  %v8085_v5 = vld [vmem:[%s12174_s28 + $0x15d8] sm:$0xff] }
 0x6dc   : > { %11951 = vmatprep.subr.bf16.mxu1 %v11950_v29  ;;  %v8074_v29 = vld [vmem:[%s12174_s28 + $0x1170] sm:$0xff]  ;;  %v8087_v8 = vld [vmem:[%s12174_s28 + $0x16b8] sm:$0xff] }
 0x6dd   : > { %v8082_v25 = vld [vmem:[%s12174_s28 + $0x14f0] sm:$0xff] }
 0x6de   : > { %11505 = vmatpush1.bf16.msra.mxu0 %v16995_v27  ;;  %v11960_v27 = vpack.c.bf16 %v8054_v24, %v8052_v35  ;;  %v8089_v35 = vld [vmem:[%s12174_s28 + $0x1798] sm:$0xff] }
 0x6df   : > { %11953 = vmatpush1.bf16.msra.mxu1 %v11952_v10  ;;  %11507 = vmatprep.subr.bf16.mxu0 %v16998_v17  ;;  %v11962_v17 = vpack.c.bf16 %v8059_v61, %v8057_v52  ;;  %v8081_v10 = vld [vmem:[%s12174_s28 + $0x1418] sm:$0xff]  ;;  %v8088_v52 = vld [vmem:[%s12174_s28 + $0x1790] sm:$0xff] }
 0x6e0   : > { %11955 = vmatprep.subr.bf16.mxu1 %v11954_v20  ;;  %v8083_v20 = vld [vmem:[%s12174_s28 + $0x14f8] sm:$0xff]  ;;  %v8090_v61 = vld [vmem:[%s12174_s28 + $0x1870] sm:$0xff] }
 0x6e1   : > { %v8091_v24 = vld [vmem:[%s12174_s28 + $0x1878] sm:$0xff] }
 0x6e2   : > { %11509 = vmatpush1.bf16.msra.mxu0 %v17007_v23  ;;  %v11964_v23 = vpack.c.bf16 %v8058_v44, %v8056_v60  ;;  %v8094_v44 = vld [vmem:[%s12174_s28 + $0x1a30] sm:$0xff] }
 0x6e3   : > { %11957 = vmatpush1.bf16.msra.mxu1 %v11956_v58  ;;  %11511 = vmatprep.subr.bf16.mxu0 %v17010_v30  ;;  %v11966_v30 = vpack.c.bf16 %v8063_v39, %v8061_v59  ;;  %v8084_v58 = vld [vmem:[%s12174_s28 + $0x15d0] sm:$0xff]  ;;  %v8097_v59 = vld [vmem:[%s12174_s28 + $0x1b18] sm:$0xff] }
 0x6e4   : > { %11959 = vmatprep.subr.bf16.mxu1 %v11958_v0  ;;  %v8086_v0 = vld [vmem:[%s12174_s28 + $0x16b0] sm:$0xff]  ;;  %v8099_v39 = vld [vmem:[%s12174_s28 + $0x1bf8] sm:$0xff] }
 0x6e6   : > { %11513 = vmatpush1.bf16.msra.mxu0 %v17019_v33  ;;  %v11968_v33 = vpack.c.bf16 %v8062_v62, %v8060_v53  ;;  %v8098_v53 = vld [vmem:[%s12174_s28 + $0x1bf0] sm:$0xff] }
 0x6e7   : > { %11961 = vmatpush1.bf16.msra.mxu1 %v11960_v27  ;;  %11515 = vmatprep.subr.bf16.mxu0 %v17022_v46  ;;  %v11970_v46 = vpack.c.bf16 %v8067_v4, %v8065_v9  ;;  %v8093_v27 = vld [vmem:[%s12174_s28 + $0x1958] sm:$0xff] }
 0x6e8   : > { %11963 = vmatprep.subr.bf16.mxu1 %v11962_v17  ;;  %v8095_v17 = vld [vmem:[%s12174_s28 + $0x1a38] sm:$0xff] }
 0x6e9   : > { %v11998_v60 = vpack.c.bf16 %v8095_v17, %v8093_v27 }
 0x6ea   : > { %11517 = vmatpush1.bf16.msra.mxu0 %v17031_v6  ;;  %v11972_v6 = vpack.c.bf16 %v8066_v48, %v8064_v31 }
 0x6eb   : > { %11965 = vmatpush1.bf16.msra.mxu1 %v11964_v23  ;;  %11519 = vmatprep.subr.bf16.mxu0 %v17034_v49  ;;  %v11974_v49 = vpack.c.bf16 %v8071_v54, %v8069_v15 }
 0x6ec   : > { %11967 = vmatprep.subr.bf16.mxu1 %v11966_v30  ;;  %v8096_v30 = vld [vmem:[%s12174_s28 + $0x1b10] sm:$0xff] }
 0x6ee   : > { %11521 = vmatpush1.bf16.msra.mxu0 %v17043_v42  ;;  %v11976_v42 = vpack.c.bf16 %v8070_v7, %v8068_v26 }
 0x6ef   : > { %11969 = vmatpush1.bf16.msra.mxu1 %v11968_v33  ;;  %11523 = vmatprep.subr.bf16.mxu0 %v17046_v22  ;;  %v11978_v22 = vpack.c.bf16 %v8075_v32, %v8073_v55 }
 0x6f0   : > { %11971 = vmatprep.subr.bf16.mxu1 %v11970_v46 }
 0x6f2   : > { %11525 = vmatpush1.bf16.msra.mxu0 %v17055_v45  ;;  %v11980_v45 = vpack.c.bf16 %v8074_v29, %v8072_v21 }
 0x6f3   : > { %11973 = vmatpush1.bf16.msra.mxu1 %v11972_v6  ;;  %11527 = vmatprep.subr.bf16.mxu0 %v17058_v3  ;;  %v11982_v3 = vpack.c.bf16 %v8079_v51, %v8077_v19  ;;  %v2263_v19 = vpop.xlane.xlu1 %2262 }
 0x6f4   : > { %11975 = vmatprep.subr.bf16.mxu1 %v11974_v49 }
 0x6f6   : > { %11529 = vmatpush1.bf16.msra.mxu0 %v17067_v41  ;;  %v11984_v41 = vpack.c.bf16 %v8078_v11, %v8076_v13 }
 0x6f7   : > { %11977 = vmatpush1.bf16.msra.mxu1 %v11976_v42  ;;  %11531 = vmatprep.subr.bf16.mxu0 %v17070_v63  ;;  %v11986_v63 = vpack.c.bf16 %v8083_v20, %v8081_v10  ;;  %v1282_v51 = vpop.xlane.xlu1 %1281  ;;  %v1276_v10 = vpop.xlane.xlu0 %1275 }
 0x6f8   : > { %11979 = vmatprep.subr.bf16.mxu1 %v11978_v22  ;;  %v2264_v20 = vadd.f32 %v2263_v19, %v1276_v10 }
 0x6fa   : > { %11533 = vmatpush1.bf16.msra.mxu0 %v17079_v34  ;;  %v11988_v34 = vpack.c.bf16 %v8082_v25, %v8080_v12 }
 0x6fb   : > { %11981 = vmatpush1.bf16.msra.mxu1 %v11980_v45  ;;  %11535 = vmatprep.subr.bf16.mxu0 %v17082_v14  ;;  %v11990_v14 = vpack.c.bf16 %v8087_v8, %v8085_v5  ;;  %v2269_v45 = vpop.xlane.xlu1 %2268  ;;  %v6211_v5 = vpop.xlane.xlu0 %6210 }
 0x6fc   : > { %11983 = vmatprep.subr.bf16.mxu1 %v11982_v3  ;;  %v2270_v12 = vadd.f32 %v2269_v45, %v1282_v51 }
 0x6fe   : > { %11537 = vmatpush1.bf16.msra.mxu0 %v17091_v16  ;;  %v11992_v16 = vpack.c.bf16 %v8086_v0, %v8084_v58 }
 0x6ff   : > { %11985 = vmatpush1.bf16.msra.mxu1 %v11984_v41  ;;  %11539 = vmatprep.subr.bf16.mxu0 %v17094_v57  ;;  %v11994_v57 = vpack.c.bf16 %v8091_v24, %v8089_v35  ;;  %v3250_v3 = vpop.xlane.xlu1 %3249 }
 0x700   : > { %11987 = vmatprep.subr.bf16.mxu1 %v11986_v63  ;;  %v3251_v63 = vadd.f32 %v3250_v3, %v2264_v20 }
 0x702   : > { %11541 = vmatpush1.bf16.msra.mxu0 %v17103_v36  ;;  %v11996_v36 = vpack.c.bf16 %v8090_v61, %v8088_v52 }
 0x703   : > { %11989 = vmatpush1.bf16.msra.mxu1 %v11988_v34  ;;  %11543 = vmatprep.subr.bf16.mxu0 %v17106_v43  ;;  %v8092_v43 = vld [vmem:[%s12174_s28 + $0x1950] sm:$0xff]  ;;  %s8321_s28 = sshll.u32 %s17289_s22, 3 }
 0x704   : > { %11991 = vmatprep.subr.bf16.mxu1 %v11990_v14  ;;  %v12000_v23 = vpack.c.bf16 %v8094_v44, %v8092_v43  ;;  %s268_s24 = scalar_lea.vmem %s17286_s5, %s8321_s28  ;;  %s272_s27 = scalar_lea.vmem %s17287_s6, %s8321_s28 }
 0x706   : > { %11545 = vmatpush1.bf16.msra.mxu0 %v17115_v2  ;;  %v12002_v2 = vpack.c.bf16 %v8099_v39, %v8097_v59 }
 0x707   : > { %11993 = vmatpush1.bf16.msra.mxu1 %v11992_v16  ;;  %11547 = vmatprep.subr.bf16.mxu0 %v17118_v18  ;;  %v12004_v18 = vpack.c.bf16 %v8098_v53, %v8096_v30 }
 0x708   : > { %11995 = vmatprep.subr.bf16.mxu1 %v11994_v57 }
 0x70a   : > { %11549 = vmatpush1.bf16.msra.mxu0 %v17127_v28  ;;  %v8405_v28 = vld [vmem:[%s17282_s1 + $0x60] sm:$0xff] }
 0x70b   : > { %11997 = vmatpush1.bf16.msra.mxu1 %v11996_v36  ;;  %11551 = vmatprep.subr.bf16.mxu0 %v17130_v40 }
 0x70c   : > { %11999 = vmatprep.subr.bf16.mxu1 %v11998_v60 }
 0x70e   : > { %11553 = vmatpush1.bf16.msra.mxu0 %v17139_v56 }
 0x70f   : > { %12001 = vmatpush1.bf16.msra.mxu1 %v12000_v23  ;;  %11555 = vmatprep.subr.bf16.mxu0 %v17142_v1 }
 0x710   : > { %12003 = vmatprep.subr.bf16.mxu1 %v12002_v2 }
 0x712   : > { %11557 = vmatpush1.bf16.msra.mxu0 %v17151_v37 }
 0x713   : > { %12005 = vmatpush1.bf16.msra.mxu1 %v12004_v18 }
 0x715   : > { %7180 = vmatmul.mubr.f32.vlgmr.msra.gmra.mrb[6].mxu0 %v8405_v28 }
 0x716   : > { %8167 = vmatmul.mubr.f32.vlgmr.msra.gmra.mrb[6].mxu1 %v8405_v28 }
 0x7e8   : > { %v7181_v40 = vpop.f32.mrb[6].mxu0 }
 0x7e9   : > { %v7188_v56 = vadd.f32 %v7181_v40, %v14066_v38  ;;  %v8168_v62 = vpop.f32.mrb[6].mxu1  ;;  %v7183_v1 = vpop.f32.mrb[7].mxu0 }
 0x7ea   : > { %v8175_v9 = vadd.f32 %v8168_v62, %v14066_v38  ;;  %v7189_v37 = vadd.f32 %v7183_v1, %v14066_v38  ;;  %v8170_v4 = vpop.f32.mrb[7].mxu1 }
 0x7eb   : > { %v7190_v33 = vmax.f32 %v7188_v56, 0.0  ;;  %v8176_v46 = vadd.f32 %v8170_v4, %v14066_v38 }
 0x7ec   : > { %v8177_v31 = vmax.f32 %v8175_v9, 0.0  ;;  %v7191_v48 = vmax.f32 %v7189_v37, 0.0 }
 0x7ed   : > { %7192 = vst [vmem:[%s14089_s10 + $0x60] sm:$0xff] %v7190_v33  ;;  %v8178_v15 = vmax.f32 %v8176_v46, 0.0  ;;  %v7194_v54 = vmul.f32 %v7190_v33, %v14084_v47 }
 0x7ee   : > { %8179 = vst [vmem:[%s14089_s10 + $0x70] sm:$0xff] %v8177_v31  ;;  %7193 = vst [vmem:[%s14089_s10 + $0x68] sm:$0xff] %v7191_v48  ;;  %v7195_v6 = vmul.f32 %v7191_v48, %v14094_v50  ;;  %v8181_v49 = vmul.f32 %v8177_v31, %v14084_v47  ;;  %v4237_v47 = vpop.xlane.xlu1 %4236 }
 0x7ef   : > { %8180 = vst [vmem:[%s14089_s10 + $0x78] sm:$0xff] %v8178_v15  ;;  %v7200_v26 = vmul.f32 %v7194_v54, %v7190_v33  ;;  %v8182_v7 = vmul.f32 %v8178_v15, %v14094_v50  ;;  %v4238_v25 = vadd.f32 %v4237_v47, %v3251_v63 }
 0x7f0   : > { %v7196_v55 = vadd.f32 %v7195_v6, %v7194_v54  ;;  %v7201_v32 = vmul.f32 %v7195_v6, %v7191_v48  ;;  %v8187_v42 = vmul.f32 %v8181_v49, %v8177_v31 }
 0x7f1   : > { %v8183_v38 = vadd.f32 %v8182_v7, %v8181_v49  ;;  %v8188_v22 = vmul.f32 %v8182_v7, %v8178_v15 }
 0x7f2   : > { %7197 = vadd.xlane.f32.xlu0 %v7196_v55  ;;  %v7202_v21 = vadd.f32 %v7201_v32, %v7200_v26  ;;  %v3256_v13 = vpop.xlane.xlu1 %3255 }
 0x7f3   : > { %v8189_v29 = vadd.f32 %v8188_v22, %v8187_v42  ;;  %v3257_v8 = vadd.f32 %v3256_v13, %v2270_v12 }
 0x7f4   : > { %7203 = vadd.xlane.f32.xlu1 %v7202_v21 }
 0x7f6   : > { %8184 = vadd.xlane.f32.xlu0 %v8183_v38  ;;  %v4243_v11 = vpop.xlane.xlu1 %4242 }
 0x7f7   : > { %v4244_v58 = vadd.f32 %v4243_v11, %v3257_v8 }
 0x7f8   : > { %8190 = vadd.xlane.f32.xlu1 %v8189_v29 }
 0x7fa   : > { %v5224_v50 = vpop.xlane.xlu1 %5223 }
 0x7fb   : > { %v5225_v34 = vadd.f32 %v5224_v50, %v4238_v25 }
 0x7fd   : > { %v6212_v35 = vadd.f32 %v6211_v5, %v5225_v34 }
 0x7fe   : > { %v5230_v41 = vpop.xlane.xlu1 %5229 }
 0x7ff   : > { %v5231_v24 = vadd.f32 %v5230_v41, %v4244_v58 }
 0x802   : > { %v6217_v14 = vpop.xlane.xlu1 %6216 }
 0x803   : > { %v6218_v57 = vadd.f32 %v6217_v14, %v5231_v24 }
 0x87f   : > { %v7198_v0 = vpop.xlane.xlu0 %7197 }
 0x880   : > { %v7199_v52 = vadd.f32 %v7198_v0, %v6212_v35 }
 0x881   : > { %v7204_v16 = vpop.xlane.xlu1 %7203 }
 0x882   : > { %v7205_v27 = vadd.f32 %v7204_v16, %v6218_v57 }
 0x883   : > { %v8185_v61 = vpop.xlane.xlu0 %8184 }
 0x884   : > { %v8186_v17 = vadd.f32 %v8185_v61, %v7199_v52 }
 0x885   : > { %v8191_v36 = vpop.xlane.xlu1 %8190 }
 0x886   : > { %8194 = vst.msk [vmem:[%s268_s24] sm:$0xff] %vm8193_vm0, %v8186_v17  ;;  %v8192_v60 = vadd.f32 %v8191_v36, %v7205_v27 }
 0x888   : > { %8195 = vst.msk [vmem:[%s272_s27] sm:$0xff] %vm8193_vm0, %v8192_v60 }
 0x889 PF: > { %s17_s21 = sadd.s32 1, %s12119_s21  }
 0x88a   : > { %p14_p4 = scmp.ge.s32.totalorder %s17_s21, 4  }
 0x88c   :  { %16 = sbr.rel (!%p14_p4) target bundleno = 1 (0x1), region = 96 }

</bundles_post_ra>
